<compile_context>
chip_gen: v7x
topology: tpu7x:2x2x1
jax: 0.10.0
libtpu: 0.0.40
codegen_flags: <defaults>
</compile_context>

<pallas_src>
import functools

import jax
import jax.numpy as jnp
from jax.experimental import pallas as pl
from jax.experimental.pallas import tpu as pltpu

EF_DIM = 64
NEG_SLOPE = 0.01
ROW_TILE = 512          # target rows per grid step for matmul-style kernels


def _round_up(x, m):
    return ((x + m - 1) // m) * m


def _pick_tm(m, target=ROW_TILE):
    """Large row tiles amortize per-step overhead; keep >=2 grid steps when
    possible so dimension_semantics=('parallel',) can use both v7x cores."""
    if m >= 2 * target:
        return target
    return max(8, _round_up((m + 1) // 2, 8))


# ---------------------------------------------------------------------------
# Kernel 1: fused matmul + bias + activation (used for conv_0 via im2col).
# ---------------------------------------------------------------------------
def _mm_bias_act_kernel(x_ref, w_ref, b_ref, o_ref, *, activation):
    acc = jnp.dot(x_ref[...], w_ref[...], preferred_element_type=jnp.float32)
    acc = acc + b_ref[...]                                   # f32 elementwise
    if activation == "leaky_relu":
        acc = jnp.where(acc >= 0.0, acc, NEG_SLOPE * acc)
    elif activation == "sigmoid":
        acc = jax.nn.sigmoid(acc)
    o_ref[...] = acc.astype(o_ref.dtype)


def _mm_bias_act(x, w, b, activation, out_dtype):
    """x: (M, K) bf16, w: (K, Cout) bf16, b: (1, Cout) f32 -> (M, Cout)."""
    M, K = x.shape
    Cout = w.shape[1]
    tm = _pick_tm(M)
    Mp = _round_up(M, tm)
    if Mp != M:
        x = jnp.pad(x, ((0, Mp - M), (0, 0)))
    out = pl.pallas_call(
        functools.partial(_mm_bias_act_kernel, activation=activation),
        out_shape=jax.ShapeDtypeStruct((Mp, Cout), out_dtype),
        grid=(Mp // tm,),
        in_specs=[
            pl.BlockSpec((tm, K), lambda i: (i, 0)),      # row tile, K = full dim
            pl.BlockSpec((K, Cout), lambda i: (0, 0)),    # resident weight
            pl.BlockSpec((1, Cout), lambda i: (0, 0)),    # bias row
        ],
        out_specs=pl.BlockSpec((tm, Cout), lambda i: (i, 0)),
        compiler_params=pltpu.CompilerParams(
            dimension_semantics=("parallel",)),
    )(x, w, b)
    return out[:M] if Mp != M else out


# ---------------------------------------------------------------------------
# Kernel 2: valid 3x3x3 conv + leaky_relu with in-kernel im2col.
# ---------------------------------------------------------------------------
def _conv333_kernel(x0_ref, x1_ref, x2_ref, w_ref, b_ref, o_ref, *, W, m_rows):
    """One (batch, out_depth) grid step.

    x{0,1,2}_ref: (1, 1, HWp, Cin) bf16 -- depth slices d, d+1, d+2 of the
                  input with (H, W) flattened into rows (zero-padded to HWp).
    w_ref:        (27, Cin, Cout) bf16, index = kd*9 + kh*3 + kw.
    o_ref:        (1, 1, m_rows, Cout) bf16 with m_rows = Ho * W; output rows
                  whose w >= Wo are junk and get sliced off by the caller.
    """
    cout = w_ref.shape[-1]
    acc = jnp.zeros((m_rows, cout), jnp.float32)
    for kd, xr in enumerate((x0_ref, x1_ref, x2_ref)):
        for kh in range(3):
            for kw in range(3):
                off = kh * W + kw                       # static shift
                xs = xr[0, 0, off:off + m_rows, :]      # (m_rows, Cin) bf16
                acc = acc + jnp.dot(xs, w_ref[kd * 9 + kh * 3 + kw],
                                    preferred_element_type=jnp.float32)
    acc = acc + b_ref[...]
    acc = jnp.where(acc >= 0.0, acc, NEG_SLOPE * acc)   # leaky_relu in f32
    o_ref[0, 0] = acc.astype(o_ref.dtype)


def _conv3x3x3_leaky(h, w27, b):
    """h: (N, D, H, W, Cin) bf16 -> (N, D-2, H-2, W-2, Cout) bf16."""
    N, D, H, W, C = h.shape
    Do, Ho, Wo = D - 2, H - 2, W - 2
    Cout = w27.shape[-1]
    HW = H * W
    HWp = _round_up(HW + 2, 8)          # room for max shift 2*W + 2
    m_rows = Ho * W
    xf = h.reshape(N, D, HW, C)
    xf = jnp.pad(xf, ((0, 0), (0, 0), (0, HWp - HW), (0, 0)))
    out = pl.pallas_call(
        functools.partial(_conv333_kernel, W=W, m_rows=m_rows),
        out_shape=jax.ShapeDtypeStruct((N, Do, m_rows, Cout), jnp.bfloat16),
        grid=(N, Do),
        in_specs=[
            # Same activation passed three times with depth offsets 0/1/2:
            # gives the depth halo without any XLA-side copy.
            pl.BlockSpec((1, 1, HWp, C), lambda n, d: (n, d, 0, 0)),
            pl.BlockSpec((1, 1, HWp, C), lambda n, d: (n, d + 1, 0, 0)),
            pl.BlockSpec((1, 1, HWp, C), lambda n, d: (n, d + 2, 0, 0)),
            pl.BlockSpec((27, C, Cout), lambda n, d: (0, 0, 0)),   # resident
            pl.BlockSpec((1, Cout), lambda n, d: (0, 0)),
        ],
        out_specs=pl.BlockSpec((1, 1, m_rows, Cout), lambda n, d: (n, d, 0, 0)),
        compiler_params=pltpu.CompilerParams(
            dimension_semantics=("parallel", "parallel")),
    )(xf, xf, xf, w27, b)
    out = out.reshape(N, Do, Ho, W, Cout)[:, :, :, :Wo, :]
    return out


# ---------------------------------------------------------------------------
# Kernel 3: fused 1x1x1 tail (conv_3 -> conv_4 -> {conv_out_bool, conv_out_float}).
# ---------------------------------------------------------------------------
def _tail_kernel(x_ref, w3_ref, b3_ref, w4_ref, b4_ref, wh_ref, bh_ref, o_ref,
                 *, n_bool):
    h = jnp.dot(x_ref[...], w3_ref[...], preferred_element_type=jnp.float32)
    h = h + b3_ref[...]
    h = jnp.where(h >= 0.0, h, NEG_SLOPE * h).astype(jnp.bfloat16)   # conv_3
    h = jnp.dot(h, w4_ref[...], preferred_element_type=jnp.float32)
    h = h + b4_ref[...]
    h = jnp.where(h >= 0.0, h, NEG_SLOPE * h).astype(jnp.bfloat16)   # conv_4
    o = jnp.dot(h, wh_ref[...], preferred_element_type=jnp.float32)
    o = o + bh_ref[...]                                              # heads
    if n_bool > 0:
        lane = jax.lax.broadcasted_iota(jnp.int32, o.shape, 1)
        o = jnp.where(lane < n_bool, jax.nn.sigmoid(o), o)
    o_ref[...] = o.astype(o_ref.dtype)


def _fused_tail(x, w3, b3, w4, b4, wh, bh, n_bool):
    """x: (M, 64) bf16 -> (M, n_bool + n_float) f32 head outputs."""
    M, C = x.shape
    Ch = wh.shape[1]
    tm = _pick_tm(M)
    Mp = _round_up(M, tm)
    if Mp != M:
        x = jnp.pad(x, ((0, Mp - M), (0, 0)))
    out = pl.pallas_call(
        functools.partial(_tail_kernel, n_bool=n_bool),
        out_shape=jax.ShapeDtypeStruct((Mp, Ch), jnp.float32),
        grid=(Mp // tm,),
        in_specs=[
            pl.BlockSpec((tm, C), lambda i: (i, 0)),
            pl.BlockSpec((C, C), lambda i: (0, 0)),
            pl.BlockSpec((1, C), lambda i: (0, 0)),
            pl.BlockSpec((C, C), lambda i: (0, 0)),
            pl.BlockSpec((1, C), lambda i: (0, 0)),
            pl.BlockSpec((C, Ch), lambda i: (0, 0)),
            pl.BlockSpec((1, Ch), lambda i: (0, 0)),
        ],
        out_specs=pl.BlockSpec((tm, Ch), lambda i: (i, 0)),
        compiler_params=pltpu.CompilerParams(
            dimension_semantics=("parallel",)),
    )(x, w3, b3, w4, b4, wh, bh)
    return out[:M] if Mp != M else out


# ---------------------------------------------------------------------------
# Plain-JAX glue: im2col for conv_0 only (Cin=1 -> inflation is negligible).
# ---------------------------------------------------------------------------
def _im2col_3d(x, k):
    """x: (N, D, H, W, C) -> ((N*Do*Ho*Wo, k^3*C), (Do, Ho, Wo))."""
    N, D, H, W, C = x.shape
    Do, Ho, Wo = D - k + 1, H - k + 1, W - k + 1
    cols = []
    for kd in range(k):
        for kh in range(k):
            for kw in range(k):
                cols.append(x[:, kd:kd + Do, kh:kh + Ho, kw:kw + Wo, :])
    p = jnp.stack(cols, axis=4)                     # (N, Do, Ho, Wo, k^3, C)
    return p.reshape(N * Do * Ho * Wo, k * k * k * C), (Do, Ho, Wo)


# ---------------------------------------------------------------------------
# Parameter init (PyTorch-layout) + one-time packing to kernel layouts (bf16).
# ---------------------------------------------------------------------------
def init_params(key, out_bool=True, out_float=True, is_undc=False):
    specs = {
        "conv_0": (EF_DIM, 1, 3),
        "conv_1": (EF_DIM, EF_DIM, 3),
        "conv_2": (EF_DIM, EF_DIM, 3),
        "conv_3": (EF_DIM, EF_DIM, 1),
        "conv_4": (EF_DIM, EF_DIM, 1),
    }
    if out_bool:
        specs["conv_out_bool"] = (3 if is_undc else 1, EF_DIM, 1)
    if out_float:
        specs["conv_out_float"] = (3, EF_DIM, 1)
    params = {}
    for name, (cout, cin, k) in specs.items():
        key, kw_, kb_ = jax.random.split(key, 3)
        fan_in = cin * k ** 3
        bound = 1.0 / float(fan_in) ** 0.5
        params[name] = {
            "w": jax.random.uniform(kw_, (cout, cin, k, k, k), jnp.float32,
                                    -bound, bound),
            "b": jax.random.uniform(kb_, (cout,), jnp.float32, -bound, bound),
        }
    return params


def pack_params(params, out_bool=True, out_float=True):
    """Hoisted, one-time weight re-layout + bf16 cast (biases stay f32)."""
    packed = {}

    def conv3_pack(name):
        w = params[name]["w"]                      # (Cout, Cin, 3, 3, 3)
        cout, cin = w.shape[0], w.shape[1]
        wt = jnp.transpose(w, (2, 3, 4, 1, 0)).reshape(27, cin, cout)
        return (wt.astype(jnp.bfloat16),
                params[name]["b"].reshape(1, cout).astype(jnp.float32))

    def conv1_pack(name):
        w = params[name]["w"][:, :, 0, 0, 0]       # (Cout, Cin)
        return (jnp.transpose(w, (1, 0)).astype(jnp.bfloat16),
                params[name]["b"].reshape(1, -1).astype(jnp.float32))

    w0, b0 = conv3_pack("conv_0")
    packed["w0"] = w0.reshape(27 * w0.shape[1], w0.shape[2])   # (27, 64)
    packed["b0"] = b0
    for name in ("conv_1", "conv_2"):
        packed[name + "_w"], packed[name + "_b"] = conv3_pack(name)
    for name in ("conv_3", "conv_4"):
        packed[name + "_w"], packed[name + "_b"] = conv1_pack(name)
    if out_bool:
        packed["wb_head"], packed["bb_head"] = conv1_pack("conv_out_bool")
    if out_float:
        packed["wf_head"], packed["bf_head"] = conv1_pack("conv_out_float")
    return packed


# ---------------------------------------------------------------------------
# Forward pass (matches CNN_3d_rec7.forward).
# ---------------------------------------------------------------------------
def cnn_3d_rec7_forward(x, packed, out_bool=True, out_float=True):
    """x: (N, 1, D, H, W) float32 (PyTorch NCDHW)."""
    assert out_bool or out_float
    N = x.shape[0]
    h = jnp.transpose(x, (0, 2, 3, 4, 1)).astype(jnp.bfloat16)   # (N,D,H,W,1)

    # conv_0 (Cin=1): XLA im2col (K=27) + fused matmul kernel, batch folded in M.
    patches, (Do, Ho, Wo) = _im2col_3d(h, 3)
    o0 = _mm_bias_act(patches, packed["w0"], packed["b0"],
                      "leaky_relu", jnp.bfloat16)
    h = o0.reshape(N, Do, Ho, Wo, EF_DIM)

    # conv_1 / conv_2: in-kernel im2col (depth halo + shifted row matmuls).
    h = _conv3x3x3_leaky(h, packed["conv_1_w"], packed["conv_1_b"])
    h = _conv3x3x3_leaky(h, packed["conv_2_w"], packed["conv_2_b"])

    Nn, Dd, Hh, Ww, C = h.shape
    xt = h.reshape(Nn * Dd * Hh * Ww, C)

    head_w, head_b, n_bool = [], [], 0
    if out_bool:
        head_w.append(packed["wb_head"]); head_b.append(packed["bb_head"])
        n_bool = packed["wb_head"].shape[1]
    if out_float:
        head_w.append(packed["wf_head"]); head_b.append(packed["bf_head"])
    wh = jnp.concatenate(head_w, axis=1) if len(head_w) > 1 else head_w[0]
    bh = jnp.concatenate(head_b, axis=1) if len(head_b) > 1 else head_b[0]

    heads = _fused_tail(xt, packed["conv_3_w"], packed["conv_3_b"],
                        packed["conv_4_w"], packed["conv_4_b"], wh, bh, n_bool)
    heads = heads.reshape(Nn, Dd, Hh, Ww, -1)

    def to_ncdhw(a):
        return jnp.transpose(a, (0, 4, 1, 2, 3))

    if out_bool and out_float:
        return to_ncdhw(heads[..., :n_bool]), to_ncdhw(heads[..., n_bool:])
    return to_ncdhw(heads)


# ---------------------------------------------------------------------------
# Pure-JAX f32 reference (for correctness check only).
# ---------------------------------------------------------------------------
def _ref_conv3d(x, w, b):
    y = jax.lax.conv_general_dilated(
        x, w, window_strides=(1, 1, 1), padding="VALID",
        dimension_numbers=("NCDHW", "OIDHW", "NCDHW"))
    return y + b[None, :, None, None, None]


def ref_forward(x, params):
    h = x
    for name in ("conv_0", "conv_1", "conv_2", "conv_3", "conv_4"):
        h = _ref_conv3d(h, params[name]["w"], params[name]["b"])
        h = jnp.where(h >= 0.0, h, NEG_SLOPE * h)
    ob = jax.nn.sigmoid(_ref_conv3d(h, params["conv_out_bool"]["w"],
                                    params["conv_out_bool"]["b"]))
    of = _ref_conv3d(h, params["conv_out_float"]["w"],
                     params["conv_out_float"]["b"])
    return ob, of


if __name__ == "__main__":
    key = jax.random.PRNGKey(0)
    kp, kx = jax.random.split(key)
    params = init_params(kp, out_bool=True, out_float=True, is_undc=False)
    packed = pack_params(params, out_bool=True, out_float=True)

    # Small input: N=1, Cin=1, 14^3 grid -> three 3x3x3 valid convs give 8^3.
    x = jax.random.normal(kx, (1, 1, 14, 14, 14), jnp.float32)

    fwd = jax.jit(functools.partial(cnn_3d_rec7_forward,
                                    out_bool=True, out_float=True))
    out_b, out_f = fwd(x, packed)
    jax.block_until_ready((out_b, out_f))

    assert out_b.shape == (1, 1, 8, 8, 8), out_b.shape
    assert out_f.shape == (1, 3, 8, 8, 8), out_f.shape

    ref_b, ref_f = ref_forward(x, params)
    assert jnp.allclose(out_b, ref_b, atol=2e-2, rtol=2e-2)
    assert jnp.allclose(out_f, ref_f, atol=2e-2, rtol=2e-2)

    print("KERNEL_OK")
</pallas_src>

<mosaic_0001>
module attributes {stable_mosaic.version = 11 : i64} {
  func.func @_mm_bias_act_kernel(%arg0: i32, %arg1: memref<512x27xbf16, #tpu.memory_space<vmem>>, %arg2: memref<27x64xbf16, #tpu.memory_space<vmem>>, %arg3: memref<1x64xf32, #tpu.memory_space<vmem>>, %arg4: memref<512x64xbf16, #tpu.memory_space<vmem>>) attributes {dimension_semantics = [#tpu.dimension_semantics<parallel>], iteration_bounds = array<i64: 4>, scalar_prefetch = 0 : i64, scratch_operands = 0 : i64, tpu.core_type = #tpu.core_type<tc>, window_params = [{transform_indices = @transform_0, window_bounds = array<i64: 512, 27>}, {pipeline_mode = #tpu.pipeline_mode<synchronous>, transform_indices = @transform_1, window_bounds = array<i64: 27, 64>}, {pipeline_mode = #tpu.pipeline_mode<synchronous>, transform_indices = @transform_2, window_bounds = array<i64: 1, 64>}, {transform_indices = @transform_3, window_bounds = array<i64: 512, 64>}]} {
    %c0 = arith.constant 0 : index
    %c0_0 = arith.constant 0 : index
    %0 = vector.load %arg1[%c0, %c0_0] : memref<512x27xbf16, #tpu.memory_space<vmem>>, vector<512x27xbf16>
    %c0_1 = arith.constant 0 : index
    %c0_2 = arith.constant 0 : index
    %1 = vector.load %arg2[%c0_1, %c0_2] : memref<27x64xbf16, #tpu.memory_space<vmem>>, vector<27x64xbf16>
    %cst = arith.constant dense<0.000000e+00> : vector<512x64xf32>
    %2 = tpu.matmul %0, %1, %cst {dimension_numbers = #tpu.dot_dimension_numbers<[1], [0], [0], [1], [0, 0, 1, 1], [], []>} : vector<512x27xbf16>, vector<27x64xbf16>, vector<512x64xf32> -> vector<512x64xf32>
    %c0_3 = arith.constant 0 : index
    %c0_4 = arith.constant 0 : index
    %3 = vector.load %arg3[%c0_3, %c0_4] : memref<1x64xf32, #tpu.memory_space<vmem>>, vector<1x64xf32>
    %4 = vector.broadcast %3 : vector<1x64xf32> to vector<512x64xf32>
    %5 = arith.addf %2, %4 : vector<512x64xf32>
    %cst_5 = arith.constant 0.000000e+00 : f32
    %6 = vector.broadcast %cst_5 : f32 to vector<512x64xf32>
    %7 = arith.cmpf oge, %5, %6 : vector<512x64xf32>
    %cst_6 = arith.constant 0.00999999977 : f32
    %8 = vector.broadcast %cst_6 : f32 to vector<512x64xf32>
    %9 = arith.mulf %8, %5 : vector<512x64xf32>
    %10 = arith.select %7, %5, %9 : vector<512x64xi1>, vector<512x64xf32>
    %11 = arith.truncf %10 : vector<512x64xf32> to vector<512x64xbf16>
    %c0_7 = arith.constant 0 : index
    %c0_8 = arith.constant 0 : index
    %12 = vector.load %arg4[%c0_7, %c0_8] : memref<512x64xbf16, #tpu.memory_space<vmem>>, vector<512x64xbf16>
    tpu.vector_store %arg4[%c0_7, %c0_8], %11 {strides = array<i32>} : memref<512x64xbf16, #tpu.memory_space<vmem>>, vector<512x64xbf16>,
    return
  }
  func.func @transform_0(%arg0: i32) -> (i32, i32) {
    %c0_i32 = arith.constant 0 : i32
    %c0_i32_0 = arith.constant 0 : i32
    return %arg0, %c0_i32 : i32, i32
  }
  func.func @transform_1(%arg0: i32) -> (i32, i32) {
    %c0_i32 = arith.constant 0 : i32
    %c0_i32_0 = arith.constant 0 : i32
    %c0_i32_1 = arith.constant 0 : i32
    return %c0_i32, %c0_i32_0 : i32, i32
  }
  func.func @transform_2(%arg0: i32) -> (i32, i32) {
    %c0_i32 = arith.constant 0 : i32
    %c0_i32_0 = arith.constant 0 : i32
    %c0_i32_1 = arith.constant 0 : i32
    return %c0_i32, %c0_i32_0 : i32, i32
  }
  func.func @transform_3(%arg0: i32) -> (i32, i32) {
    %c0_i32 = arith.constant 0 : i32
    %c0_i32_0 = arith.constant 0 : i32
    return %arg0, %c0_i32 : i32, i32
  }
}

module attributes {stable_mosaic.version = 11 : i64} {
  func.func @_conv333_kernel(%arg0: i32, %arg1: i32, %arg2: memref<1x1x152x64xbf16, #tpu.memory_space<vmem>>, %arg3: memref<1x1x152x64xbf16, #tpu.memory_space<vmem>>, %arg4: memref<1x1x152x64xbf16, #tpu.memory_space<vmem>>, %arg5: memref<27x64x64xbf16, #tpu.memory_space<vmem>>, %arg6: memref<1x64xf32, #tpu.memory_space<vmem>>, %arg7: memref<1x1x120x64xbf16, #tpu.memory_space<vmem>>) attributes {dimension_semantics = [#tpu.dimension_semantics<parallel>, #tpu.dimension_semantics<parallel>], iteration_bounds = array<i64: 1, 10>, scalar_prefetch = 0 : i64, scratch_operands = 0 : i64, tpu.core_type = #tpu.core_type<tc>, window_params = [{transform_indices = @transform_0, window_bounds = array<i64: 1, 1, 152, 64>}, {transform_indices = @transform_1, window_bounds = array<i64: 1, 1, 152, 64>}, {transform_indices = @transform_2, window_bounds = array<i64: 1, 1, 152, 64>}, {pipeline_mode = #tpu.pipeline_mode<synchronous>, transform_indices = @transform_3, window_bounds = array<i64: 27, 64, 64>}, {pipeline_mode = #tpu.pipeline_mode<synchronous>, transform_indices = @transform_4, window_bounds = array<i64: 1, 64>}, {transform_indices = @transform_5, window_bounds = array<i64: 1, 1, 120, 64>}]} {
    %cst = arith.constant 0.000000e+00 : f32
    %0 = vector.broadcast %cst : f32 to vector<120x64xf32>
    %c0 = arith.constant 0 : index
    %c0_0 = arith.constant 0 : index
    %c0_1 = arith.constant 0 : index
    %c0_2 = arith.constant 0 : index
    %1 = vector.load %arg2[%c0, %c0_0, %c0_1, %c0_2] : memref<1x1x152x64xbf16, #tpu.memory_space<vmem>>, vector<1x1x120x64xbf16>
    %2 = vector.shape_cast %1 : vector<1x1x120x64xbf16> to vector<120x64xbf16>
    %c0_3 = arith.constant 0 : index
    %c0_4 = arith.constant 0 : index
    %c0_5 = arith.constant 0 : index
    %3 = vector.load %arg5[%c0_3, %c0_4, %c0_5] : memref<27x64x64xbf16, #tpu.memory_space<vmem>>, vector<1x64x64xbf16>
    %4 = vector.shape_cast %3 : vector<1x64x64xbf16> to vector<64x64xbf16>
    %cst_6 = arith.constant dense<0.000000e+00> : vector<120x64xf32>
    %5 = tpu.matmul %2, %4, %cst_6 {dimension_numbers = #tpu.dot_dimension_numbers<[1], [0], [0], [1], [0, 0, 1, 1], [], []>} : vector<120x64xbf16>, vector<64x64xbf16>, vector<120x64xf32> -> vector<120x64xf32>
    %6 = arith.addf %0, %5 : vector<120x64xf32>
    %c0_7 = arith.constant 0 : index
    %c0_8 = arith.constant 0 : index
    %c1 = arith.constant 1 : index
    %c0_9 = arith.constant 0 : index
    %7 = vector.load %arg2[%c0_7, %c0_8, %c1, %c0_9] : memref<1x1x152x64xbf16, #tpu.memory_space<vmem>>, vector<1x1x120x64xbf16>
    %8 = vector.shape_cast %7 : vector<1x1x120x64xbf16> to vector<120x64xbf16>
    %c1_10 = arith.constant 1 : index
    %c0_11 = arith.constant 0 : index
    %c0_12 = arith.constant 0 : index
    %9 = vector.load %arg5[%c1_10, %c0_11, %c0_12] : memref<27x64x64xbf16, #tpu.memory_space<vmem>>, vector<1x64x64xbf16>
    %10 = vector.shape_cast %9 : vector<1x64x64xbf16> to vector<64x64xbf16>
    %cst_13 = arith.constant dense<0.000000e+00> : vector<120x64xf32>
    %11 = tpu.matmul %8, %10, %cst_13 {dimension_numbers = #tpu.dot_dimension_numbers<[1], [0], [0], [1], [0, 0, 1, 1], [], []>} : vector<120x64xbf16>, vector<64x64xbf16>, vector<120x64xf32> -> vector<120x64xf32>
    %12 = arith.addf %6, %11 : vector<120x64xf32>
    %c0_14 = arith.constant 0 : index
    %c0_15 = arith.constant 0 : index
    %c2 = arith.constant 2 : index
    %c0_16 = arith.constant 0 : index
    %13 = vector.load %arg2[%c0_14, %c0_15, %c2, %c0_16] : memref<1x1x152x64xbf16, #tpu.memory_space<vmem>>, vector<1x1x120x64xbf16>
    %14 = vector.shape_cast %13 : vector<1x1x120x64xbf16> to vector<120x64xbf16>
    %c2_17 = arith.constant 2 : index
    %c0_18 = arith.constant 0 : index
    %c0_19 = arith.constant 0 : index
    %15 = vector.load %arg5[%c2_17, %c0_18, %c0_19] : memref<27x64x64xbf16, #tpu.memory_space<vmem>>, vector<1x64x64xbf16>
    %16 = vector.shape_cast %15 : vector<1x64x64xbf16> to vector<64x64xbf16>
    %cst_20 = arith.constant dense<0.000000e+00> : vector<120x64xf32>
    %17 = tpu.matmul %14, %16, %cst_20 {dimension_numbers = #tpu.dot_dimension_numbers<[1], [0], [0], [1], [0, 0, 1, 1], [], []>} : vector<120x64xbf16>, vector<64x64xbf16>, vector<120x64xf32> -> vector<120x64xf32>
    %18 = arith.addf %12, %17 : vector<120x64xf32>
    %c0_21 = arith.constant 0 : index
    %c0_22 = arith.constant 0 : index
    %c12 = arith.constant 12 : index
    %c0_23 = arith.constant 0 : index
    %19 = vector.load %arg2[%c0_21, %c0_22, %c12, %c0_23] : memref<1x1x152x64xbf16, #tpu.memory_space<vmem>>, vector<1x1x120x64xbf16>
    %20 = vector.shape_cast %19 : vector<1x1x120x64xbf16> to vector<120x64xbf16>
    %c3 = arith.constant 3 : index
    %c0_24 = arith.constant 0 : index
    %c0_25 = arith.constant 0 : index
    %21 = vector.load %arg5[%c3, %c0_24, %c0_25] : memref<27x64x64xbf16, #tpu.memory_space<vmem>>, vector<1x64x64xbf16>
    %22 = vector.shape_cast %21 : vector<1x64x64xbf16> to vector<64x64xbf16>
    %cst_26 = arith.constant dense<0.000000e+00> : vector<120x64xf32>
    %23 = tpu.matmul %20, %22, %cst_26 {dimension_numbers = #tpu.dot_dimension_numbers<[1], [0], [0], [1], [0, 0, 1, 1], [], []>} : vector<120x64xbf16>, vector<64x64xbf16>, vector<120x64xf32> -> vector<120x64xf32>
    %24 = arith.addf %18, %23 : vector<120x64xf32>
    %c0_27 = arith.constant 0 : index
    %c0_28 = arith.constant 0 : index
    %c13 = arith.constant 13 : index
    %c0_29 = arith.constant 0 : index
    %25 = vector.load %arg2[%c0_27, %c0_28, %c13, %c0_29] : memref<1x1x152x64xbf16, #tpu.memory_space<vmem>>, vector<1x1x120x64xbf16>
    %26 = vector.shape_cast %25 : vector<1x1x120x64xbf16> to vector<120x64xbf16>
    %c4 = arith.constant 4 : index
    %c0_30 = arith.constant 0 : index
    %c0_31 = arith.constant 0 : index
    %27 = vector.load %arg5[%c4, %c0_30, %c0_31] : memref<27x64x64xbf16, #tpu.memory_space<vmem>>, vector<1x64x64xbf16>
    %28 = vector.shape_cast %27 : vector<1x64x64xbf16> to vector<64x64xbf16>
    %cst_32 = arith.constant dense<0.000000e+00> : vector<120x64xf32>
    %29 = tpu.matmul %26, %28, %cst_32 {dimension_numbers = #tpu.dot_dimension_numbers<[1], [0], [0], [1], [0, 0, 1, 1], [], []>} : vector<120x64xbf16>, vector<64x64xbf16>, vector<120x64xf32> -> vector<120x64xf32>
    %30 = arith.addf %24, %29 : vector<120x64xf32>
    %c0_33 = arith.constant 0 : index
    %c0_34 = arith.constant 0 : index
    %c14 = arith.constant 14 : index
    %c0_35 = arith.constant 0 : index
    %31 = vector.load %arg2[%c0_33, %c0_34, %c14, %c0_35] : memref<1x1x152x64xbf16, #tpu.memory_space<vmem>>, vector<1x1x120x64xbf16>
    %32 = vector.shape_cast %31 : vector<1x1x120x64xbf16> to vector<120x64xbf16>
    %c5 = arith.constant 5 : index
    %c0_36 = arith.constant 0 : index
    %c0_37 = arith.constant 0 : index
    %33 = vector.load %arg5[%c5, %c0_36, %c0_37] : memref<27x64x64xbf16, #tpu.memory_space<vmem>>, vector<1x64x64xbf16>
    %34 = vector.shape_cast %33 : vector<1x64x64xbf16> to vector<64x64xbf16>
    %cst_38 = arith.constant dense<0.000000e+00> : vector<120x64xf32>
    %35 = tpu.matmul %32, %34, %cst_38 {dimension_numbers = #tpu.dot_dimension_numbers<[1], [0], [0], [1], [0, 0, 1, 1], [], []>} : vector<120x64xbf16>, vector<64x64xbf16>, vector<120x64xf32> -> vector<120x64xf32>
    %36 = arith.addf %30, %35 : vector<120x64xf32>
    %c0_39 = arith.constant 0 : index
    %c0_40 = arith.constant 0 : index
    %c24 = arith.constant 24 : index
    %c0_41 = arith.constant 0 : index
    %37 = vector.load %arg2[%c0_39, %c0_40, %c24, %c0_41] : memref<1x1x152x64xbf16, #tpu.memory_space<vmem>>, vector<1x1x120x64xbf16>
    %38 = vector.shape_cast %37 : vector<1x1x120x64xbf16> to vector<120x64xbf16>
    %c6 = arith.constant 6 : index
    %c0_42 = arith.constant 0 : index
    %c0_43 = arith.constant 0 : index
    %39 = vector.load %arg5[%c6, %c0_42, %c0_43] : memref<27x64x64xbf16, #tpu.memory_space<vmem>>, vector<1x64x64xbf16>
    %40 = vector.shape_cast %39 : vector<1x64x64xbf16> to vector<64x64xbf16>
    %cst_44 = arith.constant dense<0.000000e+00> : vector<120x64xf32>
    %41 = tpu.matmul %38, %40, %cst_44 {dimension_numbers = #tpu.dot_dimension_numbers<[1], [0], [0], [1], [0, 0, 1, 1], [], []>} : vector<120x64xbf16>, vector<64x64xbf16>, vector<120x64xf32> -> vector<120x64xf32>
    %42 = arith.addf %36, %41 : vector<120x64xf32>
    %c0_45 = arith.constant 0 : index
    %c0_46 = arith.constant 0 : index
    %c25 = arith.constant 25 : index
    %c0_47 = arith.constant 0 : index
    %43 = vector.load %arg2[%c0_45, %c0_46, %c25, %c0_47] : memref<1x1x152x64xbf16, #tpu.memory_space<vmem>>, vector<1x1x120x64xbf16>
    %44 = vector.shape_cast %43 : vector<1x1x120x64xbf16> to vector<120x64xbf16>
    %c7 = arith.constant 7 : index
    %c0_48 = arith.constant 0 : index
    %c0_49 = arith.constant 0 : index
    %45 = vector.load %arg5[%c7, %c0_48, %c0_49] : memref<27x64x64xbf16, #tpu.memory_space<vmem>>, vector<1x64x64xbf16>
    %46 = vector.shape_cast %45 : vector<1x64x64xbf16> to vector<64x64xbf16>
    %cst_50 = arith.constant dense<0.000000e+00> : vector<120x64xf32>
    %47 = tpu.matmul %44, %46, %cst_50 {dimension_numbers = #tpu.dot_dimension_numbers<[1], [0], [0], [1], [0, 0, 1, 1], [], []>} : vector<120x64xbf16>, vector<64x64xbf16>, vector<120x64xf32> -> vector<120x64xf32>
    %48 = arith.addf %42, %47 : vector<120x64xf32>
    %c0_51 = arith.constant 0 : index
    %c0_52 = arith.constant 0 : index
    %c26 = arith.constant 26 : index
    %c0_53 = arith.constant 0 : index
    %49 = vector.load %arg2[%c0_51, %c0_52, %c26, %c0_53] : memref<1x1x152x64xbf16, #tpu.memory_space<vmem>>, vector<1x1x120x64xbf16>
    %50 = vector.shape_cast %49 : vector<1x1x120x64xbf16> to vector<120x64xbf16>
    %c8 = arith.constant 8 : index
    %c0_54 = arith.constant 0 : index
    %c0_55 = arith.constant 0 : index
    %51 = vector.load %arg5[%c8, %c0_54, %c0_55] : memref<27x64x64xbf16, #tpu.memory_space<vmem>>, vector<1x64x64xbf16>
    %52 = vector.shape_cast %51 : vector<1x64x64xbf16> to vector<64x64xbf16>
    %cst_56 = arith.constant dense<0.000000e+00> : vector<120x64xf32>
    %53 = tpu.matmul %50, %52, %cst_56 {dimension_numbers = #tpu.dot_dimension_numbers<[1], [0], [0], [1], [0, 0, 1, 1], [], []>} : vector<120x64xbf16>, vector<64x64xbf16>, vector<120x64xf32> -> vector<120x64xf32>
    %54 = arith.addf %48, %53 : vector<120x64xf32>
    %c0_57 = arith.constant 0 : index
    %c0_58 = arith.constant 0 : index
    %c0_59 = arith.constant 0 : index
    %c0_60 = arith.constant 0 : index
    %55 = vector.load %arg3[%c0_57, %c0_58, %c0_59, %c0_60] : memref<1x1x152x64xbf16, #tpu.memory_space<vmem>>, vector<1x1x120x64xbf16>
    %56 = vector.shape_cast %55 : vector<1x1x120x64xbf16> to vector<120x64xbf16>
    %c9 = arith.constant 9 : index
    %c0_61 = arith.constant 0 : index
    %c0_62 = arith.constant 0 : index
    %57 = vector.load %arg5[%c9, %c0_61, %c0_62] : memref<27x64x64xbf16, #tpu.memory_space<vmem>>, vector<1x64x64xbf16>
    %58 = vector.shape_cast %57 : vector<1x64x64xbf16> to vector<64x64xbf16>
    %cst_63 = arith.constant dense<0.000000e+00> : vector<120x64xf32>
    %59 = tpu.matmul %56, %58, %cst_63 {dimension_numbers = #tpu.dot_dimension_numbers<[1], [0], [0], [1], [0, 0, 1, 1], [], []>} : vector<120x64xbf16>, vector<64x64xbf16>, vector<120x64xf32> -> vector<120x64xf32>
    %60 = arith.addf %54, %59 : vector<120x64xf32>
    %c0_64 = arith.constant 0 : index
    %c0_65 = arith.constant 0 : index
    %c1_66 = arith.constant 1 : index
    %c0_67 = arith.constant 0 : index
    %61 = vector.load %arg3[%c0_64, %c0_65, %c1_66, %c0_67] : memref<1x1x152x64xbf16, #tpu.memory_space<vmem>>, vector<1x1x120x64xbf16>
    %62 = vector.shape_cast %61 : vector<1x1x120x64xbf16> to vector<120x64xbf16>
    %c10 = arith.constant 10 : index
    %c0_68 = arith.constant 0 : index
    %c0_69 = arith.constant 0 : index
    %63 = vector.load %arg5[%c10, %c0_68, %c0_69] : memref<27x64x64xbf16, #tpu.memory_space<vmem>>, vector<1x64x64xbf16>
    %64 = vector.shape_cast %63 : vector<1x64x64xbf16> to vector<64x64xbf16>
    %cst_70 = arith.constant dense<0.000000e+00> : vector<120x64xf32>
    %65 = tpu.matmul %62, %64, %cst_70 {dimension_numbers = #tpu.dot_dimension_numbers<[1], [0], [0], [1], [0, 0, 1, 1], [], []>} : vector<120x64xbf16>, vector<64x64xbf16>, vector<120x64xf32> -> vector<120x64xf32>
    %66 = arith.addf %60, %65 : vector<120x64xf32>
    %c0_71 = arith.constant 0 : index
    %c0_72 = arith.constant 0 : index
    %c2_73 = arith.constant 2 : index
    %c0_74 = arith.constant 0 : index
    %67 = vector.load %arg3[%c0_71, %c0_72, %c2_73, %c0_74] : memref<1x1x152x64xbf16, #tpu.memory_space<vmem>>, vector<1x1x120x64xbf16>
    %68 = vector.shape_cast %67 : vector<1x1x120x64xbf16> to vector<120x64xbf16>
    %c11 = arith.constant 11 : index
    %c0_75 = arith.constant 0 : index
    %c0_76 = arith.constant 0 : index
    %69 = vector.load %arg5[%c11, %c0_75, %c0_76] : memref<27x64x64xbf16, #tpu.memory_space<vmem>>, vector<1x64x64xbf16>
    %70 = vector.shape_cast %69 : vector<1x64x64xbf16> to vector<64x64xbf16>
    %cst_77 = arith.constant dense<0.000000e+00> : vector<120x64xf32>
    %71 = tpu.matmul %68, %70, %cst_77 {dimension_numbers = #tpu.dot_dimension_numbers<[1], [0], [0], [1], [0, 0, 1, 1], [], []>} : vector<120x64xbf16>, vector<64x64xbf16>, vector<120x64xf32> -> vector<120x64xf32>
    %72 = arith.addf %66, %71 : vector<120x64xf32>
    %c0_78 = arith.constant 0 : index
    %c0_79 = arith.constant 0 : index
    %c12_80 = arith.constant 12 : index
    %c0_81 = arith.constant 0 : index
    %73 = vector.load %arg3[%c0_78, %c0_79, %c12_80, %c0_81] : memref<1x1x152x64xbf16, #tpu.memory_space<vmem>>, vector<1x1x120x64xbf16>
    %74 = vector.shape_cast %73 : vector<1x1x120x64xbf16> to vector<120x64xbf16>
    %c12_82 = arith.constant 12 : index
    %c0_83 = arith.constant 0 : index
    %c0_84 = arith.constant 0 : index
    %75 = vector.load %arg5[%c12_82, %c0_83, %c0_84] : memref<27x64x64xbf16, #tpu.memory_space<vmem>>, vector<1x64x64xbf16>
    %76 = vector.shape_cast %75 : vector<1x64x64xbf16> to vector<64x64xbf16>
    %cst_85 = arith.constant dense<0.000000e+00> : vector<120x64xf32>
    %77 = tpu.matmul %74, %76, %cst_85 {dimension_numbers = #tpu.dot_dimension_numbers<[1], [0], [0], [1], [0, 0, 1, 1], [], []>} : vector<120x64xbf16>, vector<64x64xbf16>, vector<120x64xf32> -> vector<120x64xf32>
    %78 = arith.addf %72, %77 : vector<120x64xf32>
    %c0_86 = arith.constant 0 : index
    %c0_87 = arith.constant 0 : index
    %c13_88 = arith.constant 13 : index
    %c0_89 = arith.constant 0 : index
    %79 = vector.load %arg3[%c0_86, %c0_87, %c13_88, %c0_89] : memref<1x1x152x64xbf16, #tpu.memory_space<vmem>>, vector<1x1x120x64xbf16>
    %80 = vector.shape_cast %79 : vector<1x1x120x64xbf16> to vector<120x64xbf16>
    %c13_90 = arith.constant 13 : index
    %c0_91 = arith.constant 0 : index
    %c0_92 = arith.constant 0 : index
    %81 = vector.load %arg5[%c13_90, %c0_91, %c0_92] : memref<27x64x64xbf16, #tpu.memory_space<vmem>>, vector<1x64x64xbf16>
    %82 = vector.shape_cast %81 : vector<1x64x64xbf16> to vector<64x64xbf16>
    %cst_93 = arith.constant dense<0.000000e+00> : vector<120x64xf32>
    %83 = tpu.matmul %80, %82, %cst_93 {dimension_numbers = #tpu.dot_dimension_numbers<[1], [0], [0], [1], [0, 0, 1, 1], [], []>} : vector<120x64xbf16>, vector<64x64xbf16>, vector<120x64xf32> -> vector<120x64xf32>
    %84 = arith.addf %78, %83 : vector<120x64xf32>
    %c0_94 = arith.constant 0 : index
    %c0_95 = arith.constant 0 : index
    %c14_96 = arith.constant 14 : index
    %c0_97 = arith.constant 0 : index
    %85 = vector.load %arg3[%c0_94, %c0_95, %c14_96, %c0_97] : memref<1x1x152x64xbf16, #tpu.memory_space<vmem>>, vector<1x1x120x64xbf16>
    %86 = vector.shape_cast %85 : vector<1x1x120x64xbf16> to vector<120x64xbf16>
    %c14_98 = arith.constant 14 : index
    %c0_99 = arith.constant 0 : index
    %c0_100 = arith.constant 0 : index
    %87 = vector.load %arg5[%c14_98, %c0_99, %c0_100] : memref<27x64x64xbf16, #tpu.memory_space<vmem>>, vector<1x64x64xbf16>
    %88 = vector.shape_cast %87 : vector<1x64x64xbf16> to vector<64x64xbf16>
    %cst_101 = arith.constant dense<0.000000e+00> : vector<120x64xf32>
    %89 = tpu.matmul %86, %88, %cst_101 {dimension_numbers = #tpu.dot_dimension_numbers<[1], [0], [0], [1], [0, 0, 1, 1], [], []>} : vector<120x64xbf16>, vector<64x64xbf16>, vector<120x64xf32> -> vector<120x64xf32>
    %90 = arith.addf %84, %89 : vector<120x64xf32>
    %c0_102 = arith.constant 0 : index
    %c0_103 = arith.constant 0 : index
    %c24_104 = arith.constant 24 : index
    %c0_105 = arith.constant 0 : index
    %91 = vector.load %arg3[%c0_102, %c0_103, %c24_104, %c0_105] : memref<1x1x152x64xbf16, #tpu.memory_space<vmem>>, vector<1x1x120x64xbf16>
    %92 = vector.shape_cast %91 : vector<1x1x120x64xbf16> to vector<120x64xbf16>
    %c15 = arith.constant 15 : index
    %c0_106 = arith.constant 0 : index
    %c0_107 = arith.constant 0 : index
    %93 = vector.load %arg5[%c15, %c0_106, %c0_107] : memref<27x64x64xbf16, #tpu.memory_space<vmem>>, vector<1x64x64xbf16>
    %94 = vector.shape_cast %93 : vector<1x64x64xbf16> to vector<64x64xbf16>
    %cst_108 = arith.constant dense<0.000000e+00> : vector<120x64xf32>
    %95 = tpu.matmul %92, %94, %cst_108 {dimension_numbers = #tpu.dot_dimension_numbers<[1], [0], [0], [1], [0, 0, 1, 1], [], []>} : vector<120x64xbf16>, vector<64x64xbf16>, vector<120x64xf32> -> vector<120x64xf32>
    %96 = arith.addf %90, %95 : vector<120x64xf32>
    %c0_109 = arith.constant 0 : index
    %c0_110 = arith.constant 0 : index
    %c25_111 = arith.constant 25 : index
    %c0_112 = arith.constant 0 : index
    %97 = vector.load %arg3[%c0_109, %c0_110, %c25_111, %c0_112] : memref<1x1x152x64xbf16, #tpu.memory_space<vmem>>, vector<1x1x120x64xbf16>
    %98 = vector.shape_cast %97 : vector<1x1x120x64xbf16> to vector<120x64xbf16>
    %c16 = arith.constant 16 : index
    %c0_113 = arith.constant 0 : index
    %c0_114 = arith.constant 0 : index
    %99 = vector.load %arg5[%c16, %c0_113, %c0_114] : memref<27x64x64xbf16, #tpu.memory_space<vmem>>, vector<1x64x64xbf16>
    %100 = vector.shape_cast %99 : vector<1x64x64xbf16> to vector<64x64xbf16>
    %cst_115 = arith.constant dense<0.000000e+00> : vector<120x64xf32>
    %101 = tpu.matmul %98, %100, %cst_115 {dimension_numbers = #tpu.dot_dimension_numbers<[1], [0], [0], [1], [0, 0, 1, 1], [], []>} : vector<120x64xbf16>, vector<64x64xbf16>, vector<120x64xf32> -> vector<120x64xf32>
    %102 = arith.addf %96, %101 : vector<120x64xf32>
    %c0_116 = arith.constant 0 : index
    %c0_117 = arith.constant 0 : index
    %c26_118 = arith.constant 26 : index
    %c0_119 = arith.constant 0 : index
    %103 = vector.load %arg3[%c0_116, %c0_117, %c26_118, %c0_119] : memref<1x1x152x64xbf16, #tpu.memory_space<vmem>>, vector<1x1x120x64xbf16>
    %104 = vector.shape_cast %103 : vector<1x1x120x64xbf16> to vector<120x64xbf16>
    %c17 = arith.constant 17 : index
    %c0_120 = arith.constant 0 : index
    %c0_121 = arith.constant 0 : index
    %105 = vector.load %arg5[%c17, %c0_120, %c0_121] : memref<27x64x64xbf16, #tpu.memory_space<vmem>>, vector<1x64x64xbf16>
    %106 = vector.shape_cast %105 : vector<1x64x64xbf16> to vector<64x64xbf16>
    %cst_122 = arith.constant dense<0.000000e+00> : vector<120x64xf32>
    %107 = tpu.matmul %104, %106, %cst_122 {dimension_numbers = #tpu.dot_dimension_numbers<[1], [0], [0], [1], [0, 0, 1, 1], [], []>} : vector<120x64xbf16>, vector<64x64xbf16>, vector<120x64xf32> -> vector<120x64xf32>
    %108 = arith.addf %102, %107 : vector<120x64xf32>
    %c0_123 = arith.constant 0 : index
    %c0_124 = arith.constant 0 : index
    %c0_125 = arith.constant 0 : index
    %c0_126 = arith.constant 0 : index
    %109 = vector.load %arg4[%c0_123, %c0_124, %c0_125, %c0_126] : memref<1x1x152x64xbf16, #tpu.memory_space<vmem>>, vector<1x1x120x64xbf16>
    %110 = vector.shape_cast %109 : vector<1x1x120x64xbf16> to vector<120x64xbf16>
    %c18 = arith.constant 18 : index
    %c0_127 = arith.constant 0 : index
    %c0_128 = arith.constant 0 : index
    %111 = vector.load %arg5[%c18, %c0_127, %c0_128] : memref<27x64x64xbf16, #tpu.memory_space<vmem>>, vector<1x64x64xbf16>
    %112 = vector.shape_cast %111 : vector<1x64x64xbf16> to vector<64x64xbf16>
    %cst_129 = arith.constant dense<0.000000e+00> : vector<120x64xf32>
    %113 = tpu.matmul %110, %112, %cst_129 {dimension_numbers = #tpu.dot_dimension_numbers<[1], [0], [0], [1], [0, 0, 1, 1], [], []>} : vector<120x64xbf16>, vector<64x64xbf16>, vector<120x64xf32> -> vector<120x64xf32>
    %114 = arith.addf %108, %113 : vector<120x64xf32>
    %c0_130 = arith.constant 0 : index
    %c0_131 = arith.constant 0 : index
    %c1_132 = arith.constant 1 : index
    %c0_133 = arith.constant 0 : index
    %115 = vector.load %arg4[%c0_130, %c0_131, %c1_132, %c0_133] : memref<1x1x152x64xbf16, #tpu.memory_space<vmem>>, vector<1x1x120x64xbf16>
    %116 = vector.shape_cast %115 : vector<1x1x120x64xbf16> to vector<120x64xbf16>
    %c19 = arith.constant 19 : index
    %c0_134 = arith.constant 0 : index
    %c0_135 = arith.constant 0 : index
    %117 = vector.load %arg5[%c19, %c0_134, %c0_135] : memref<27x64x64xbf16, #tpu.memory_space<vmem>>, vector<1x64x64xbf16>
    %118 = vector.shape_cast %117 : vector<1x64x64xbf16> to vector<64x64xbf16>
    %cst_136 = arith.constant dense<0.000000e+00> : vector<120x64xf32>
    %119 = tpu.matmul %116, %118, %cst_136 {dimension_numbers = #tpu.dot_dimension_numbers<[1], [0], [0], [1], [0, 0, 1, 1], [], []>} : vector<120x64xbf16>, vector<64x64xbf16>, vector<120x64xf32> -> vector<120x64xf32>
    %120 = arith.addf %114, %119 : vector<120x64xf32>
    %c0_137 = arith.constant 0 : index
    %c0_138 = arith.constant 0 : index
    %c2_139 = arith.constant 2 : index
    %c0_140 = arith.constant 0 : index
    %121 = vector.load %arg4[%c0_137, %c0_138, %c2_139, %c0_140] : memref<1x1x152x64xbf16, #tpu.memory_space<vmem>>, vector<1x1x120x64xbf16>
    %122 = vector.shape_cast %121 : vector<1x1x120x64xbf16> to vector<120x64xbf16>
    %c20 = arith.constant 20 : index
    %c0_141 = arith.constant 0 : index
    %c0_142 = arith.constant 0 : index
    %123 = vector.load %arg5[%c20, %c0_141, %c0_142] : memref<27x64x64xbf16, #tpu.memory_space<vmem>>, vector<1x64x64xbf16>
    %124 = vector.shape_cast %123 : vector<1x64x64xbf16> to vector<64x64xbf16>
    %cst_143 = arith.constant dense<0.000000e+00> : vector<120x64xf32>
    %125 = tpu.matmul %122, %124, %cst_143 {dimension_numbers = #tpu.dot_dimension_numbers<[1], [0], [0], [1], [0, 0, 1, 1], [], []>} : vector<120x64xbf16>, vector<64x64xbf16>, vector<120x64xf32> -> vector<120x64xf32>
    %126 = arith.addf %120, %125 : vector<120x64xf32>
    %c0_144 = arith.constant 0 : index
    %c0_145 = arith.constant 0 : index
    %c12_146 = arith.constant 12 : index
    %c0_147 = arith.constant 0 : index
    %127 = vector.load %arg4[%c0_144, %c0_145, %c12_146, %c0_147] : memref<1x1x152x64xbf16, #tpu.memory_space<vmem>>, vector<1x1x120x64xbf16>
    %128 = vector.shape_cast %127 : vector<1x1x120x64xbf16> to vector<120x64xbf16>
    %c21 = arith.constant 21 : index
    %c0_148 = arith.constant 0 : index
    %c0_149 = arith.constant 0 : index
    %129 = vector.load %arg5[%c21, %c0_148, %c0_149] : memref<27x64x64xbf16, #tpu.memory_space<vmem>>, vector<1x64x64xbf16>
    %130 = vector.shape_cast %129 : vector<1x64x64xbf16> to vector<64x64xbf16>
    %cst_150 = arith.constant dense<0.000000e+00> : vector<120x64xf32>
    %131 = tpu.matmul %128, %130, %cst_150 {dimension_numbers = #tpu.dot_dimension_numbers<[1], [0], [0], [1], [0, 0, 1, 1], [], []>} : vector<120x64xbf16>, vector<64x64xbf16>, vector<120x64xf32> -> vector<120x64xf32>
    %132 = arith.addf %126, %131 : vector<120x64xf32>
    %c0_151 = arith.constant 0 : index
    %c0_152 = arith.constant 0 : index
    %c13_153 = arith.constant 13 : index
    %c0_154 = arith.constant 0 : index
    %133 = vector.load %arg4[%c0_151, %c0_152, %c13_153, %c0_154] : memref<1x1x152x64xbf16, #tpu.memory_space<vmem>>, vector<1x1x120x64xbf16>
    %134 = vector.shape_cast %133 : vector<1x1x120x64xbf16> to vector<120x64xbf16>
    %c22 = arith.constant 22 : index
    %c0_155 = arith.constant 0 : index
    %c0_156 = arith.constant 0 : index
    %135 = vector.load %arg5[%c22, %c0_155, %c0_156] : memref<27x64x64xbf16, #tpu.memory_space<vmem>>, vector<1x64x64xbf16>
    %136 = vector.shape_cast %135 : vector<1x64x64xbf16> to vector<64x64xbf16>
    %cst_157 = arith.constant dense<0.000000e+00> : vector<120x64xf32>
    %137 = tpu.matmul %134, %136, %cst_157 {dimension_numbers = #tpu.dot_dimension_numbers<[1], [0], [0], [1], [0, 0, 1, 1], [], []>} : vector<120x64xbf16>, vector<64x64xbf16>, vector<120x64xf32> -> vector<120x64xf32>
    %138 = arith.addf %132, %137 : vector<120x64xf32>
    %c0_158 = arith.constant 0 : index
    %c0_159 = arith.constant 0 : index
    %c14_160 = arith.constant 14 : index
    %c0_161 = arith.constant 0 : index
    %139 = vector.load %arg4[%c0_158, %c0_159, %c14_160, %c0_161] : memref<1x1x152x64xbf16, #tpu.memory_space<vmem>>, vector<1x1x120x64xbf16>
    %140 = vector.shape_cast %139 : vector<1x1x120x64xbf16> to vector<120x64xbf16>
    %c23 = arith.constant 23 : index
    %c0_162 = arith.constant 0 : index
    %c0_163 = arith.constant 0 : index
    %141 = vector.load %arg5[%c23, %c0_162, %c0_163] : memref<27x64x64xbf16, #tpu.memory_space<vmem>>, vector<1x64x64xbf16>
    %142 = vector.shape_cast %141 : vector<1x64x64xbf16> to vector<64x64xbf16>
    %cst_164 = arith.constant dense<0.000000e+00> : vector<120x64xf32>
    %143 = tpu.matmul %140, %142, %cst_164 {dimension_numbers = #tpu.dot_dimension_numbers<[1], [0], [0], [1], [0, 0, 1, 1], [], []>} : vector<120x64xbf16>, vector<64x64xbf16>, vector<120x64xf32> -> vector<120x64xf32>
    %144 = arith.addf %138, %143 : vector<120x64xf32>
    %c0_165 = arith.constant 0 : index
    %c0_166 = arith.constant 0 : index
    %c24_167 = arith.constant 24 : index
    %c0_168 = arith.constant 0 : index
    %145 = vector.load %arg4[%c0_165, %c0_166, %c24_167, %c0_168] : memref<1x1x152x64xbf16, #tpu.memory_space<vmem>>, vector<1x1x120x64xbf16>
    %146 = vector.shape_cast %145 : vector<1x1x120x64xbf16> to vector<120x64xbf16>
    %c24_169 = arith.constant 24 : index
    %c0_170 = arith.constant 0 : index
    %c0_171 = arith.constant 0 : index
    %147 = vector.load %arg5[%c24_169, %c0_170, %c0_171] : memref<27x64x64xbf16, #tpu.memory_space<vmem>>, vector<1x64x64xbf16>
    %148 = vector.shape_cast %147 : vector<1x64x64xbf16> to vector<64x64xbf16>
    %cst_172 = arith.constant dense<0.000000e+00> : vector<120x64xf32>
    %149 = tpu.matmul %146, %148, %cst_172 {dimension_numbers = #tpu.dot_dimension_numbers<[1], [0], [0], [1], [0, 0, 1, 1], [], []>} : vector<120x64xbf16>, vector<64x64xbf16>, vector<120x64xf32> -> vector<120x64xf32>
    %150 = arith.addf %144, %149 : vector<120x64xf32>
    %c0_173 = arith.constant 0 : index
    %c0_174 = arith.constant 0 : index
    %c25_175 = arith.constant 25 : index
    %c0_176 = arith.constant 0 : index
    %151 = vector.load %arg4[%c0_173, %c0_174, %c25_175, %c0_176] : memref<1x1x152x64xbf16, #tpu.memory_space<vmem>>, vector<1x1x120x64xbf16>
    %152 = vector.shape_cast %151 : vector<1x1x120x64xbf16> to vector<120x64xbf16>
    %c25_177 = arith.constant 25 : index
    %c0_178 = arith.constant 0 : index
    %c0_179 = arith.constant 0 : index
    %153 = vector.load %arg5[%c25_177, %c0_178, %c0_179] : memref<27x64x64xbf16, #tpu.memory_space<vmem>>, vector<1x64x64xbf16>
    %154 = vector.shape_cast %153 : vector<1x64x64xbf16> to vector<64x64xbf16>
    %cst_180 = arith.constant dense<0.000000e+00> : vector<120x64xf32>
    %155 = tpu.matmul %152, %154, %cst_180 {dimension_numbers = #tpu.dot_dimension_numbers<[1], [0], [0], [1], [0, 0, 1, 1], [], []>} : vector<120x64xbf16>, vector<64x64xbf16>, vector<120x64xf32> -> vector<120x64xf32>
    %156 = arith.addf %150, %155 : vector<120x64xf32>
    %c0_181 = arith.constant 0 : index
    %c0_182 = arith.constant 0 : index
    %c26_183 = arith.constant 26 : index
    %c0_184 = arith.constant 0 : index
    %157 = vector.load %arg4[%c0_181, %c0_182, %c26_183, %c0_184] : memref<1x1x152x64xbf16, #tpu.memory_space<vmem>>, vector<1x1x120x64xbf16>
    %158 = vector.shape_cast %157 : vector<1x1x120x64xbf16> to vector<120x64xbf16>
    %c26_185 = arith.constant 26 : index
    %c0_186 = arith.constant 0 : index
    %c0_187 = arith.constant 0 : index
    %159 = vector.load %arg5[%c26_185, %c0_186, %c0_187] : memref<27x64x64xbf16, #tpu.memory_space<vmem>>, vector<1x64x64xbf16>
    %160 = vector.shape_cast %159 : vector<1x64x64xbf16> to vector<64x64xbf16>
    %cst_188 = arith.constant dense<0.000000e+00> : vector<120x64xf32>
    %161 = tpu.matmul %158, %160, %cst_188 {dimension_numbers = #tpu.dot_dimension_numbers<[1], [0], [0], [1], [0, 0, 1, 1], [], []>} : vector<120x64xbf16>, vector<64x64xbf16>, vector<120x64xf32> -> vector<120x64xf32>
    %162 = arith.addf %156, %161 : vector<120x64xf32>
    %c0_189 = arith.constant 0 : index
    %c0_190 = arith.constant 0 : index
    %163 = vector.load %arg6[%c0_189, %c0_190] : memref<1x64xf32, #tpu.memory_space<vmem>>, vector<1x64xf32>
    %164 = vector.broadcast %163 : vector<1x64xf32> to vector<120x64xf32>
    %165 = arith.addf %162, %164 : vector<120x64xf32>
    %cst_191 = arith.constant 0.000000e+00 : f32
    %166 = vector.broadcast %cst_191 : f32 to vector<120x64xf32>
    %167 = arith.cmpf oge, %165, %166 : vector<120x64xf32>
    %cst_192 = arith.constant 0.00999999977 : f32
    %168 = vector.broadcast %cst_192 : f32 to vector<120x64xf32>
    %169 = arith.mulf %168, %165 : vector<120x64xf32>
    %170 = arith.select %167, %165, %169 : vector<120x64xi1>, vector<120x64xf32>
    %171 = arith.truncf %170 : vector<120x64xf32> to vector<120x64xbf16>
    %c0_193 = arith.constant 0 : index
    %c0_194 = arith.constant 0 : index
    %c0_195 = arith.constant 0 : index
    %c0_196 = arith.constant 0 : index
    %172 = vector.load %arg7[%c0_193, %c0_194, %c0_195, %c0_196] : memref<1x1x120x64xbf16, #tpu.memory_space<vmem>>, vector<1x1x120x64xbf16>
    %173 = vector.shape_cast %172 : vector<1x1x120x64xbf16> to vector<120x64xbf16>
    %174 = vector.shape_cast %171 : vector<120x64xbf16> to vector<1x1x120x64xbf16>
    tpu.vector_store %arg7[%c0_193, %c0_194, %c0_195, %c0_196], %174 {strides = array<i32>} : memref<1x1x120x64xbf16, #tpu.memory_space<vmem>>, vector<1x1x120x64xbf16>,
    return
  }
  func.func @transform_0(%arg0: i32, %arg1: i32) -> (i32, i32, i32, i32) {
    %c0_i32 = arith.constant 0 : i32
    %c0_i32_0 = arith.constant 0 : i32
    %c0_i32_1 = arith.constant 0 : i32
    return %arg0, %arg1, %c0_i32, %c0_i32_0 : i32, i32, i32, i32
  }
  func.func @transform_1(%arg0: i32, %arg1: i32) -> (i32, i32, i32, i32) {
    %c1_i32 = arith.constant 1 : i32
    %0 = arith.addi %arg1, %c1_i32 : i32
    %c0_i32 = arith.constant 0 : i32
    %c0_i32_0 = arith.constant 0 : i32
    %c0_i32_1 = arith.constant 0 : i32
    return %arg0, %0, %c0_i32, %c0_i32_0 : i32, i32, i32, i32
  }
  func.func @transform_2(%arg0: i32, %arg1: i32) -> (i32, i32, i32, i32) {
    %c2_i32 = arith.constant 2 : i32
    %0 = arith.addi %arg1, %c2_i32 : i32
    %c0_i32 = arith.constant 0 : i32
    %c0_i32_0 = arith.constant 0 : i32
    %c0_i32_1 = arith.constant 0 : i32
    return %arg0, %0, %c0_i32, %c0_i32_0 : i32, i32, i32, i32
  }
  func.func @transform_3(%arg0: i32, %arg1: i32) -> (i32, i32, i32) {
    %c0_i32 = arith.constant 0 : i32
    %c0_i32_0 = arith.constant 0 : i32
    %c0_i32_1 = arith.constant 0 : i32
    %c0_i32_2 = arith.constant 0 : i32
    return %c0_i32, %c0_i32_0, %c0_i32_1 : i32, i32, i32
  }
  func.func @transform_4(%arg0: i32, %arg1: i32) -> (i32, i32) {
    %c0_i32 = arith.constant 0 : i32
    %c0_i32_0 = arith.constant 0 : i32
    %c0_i32_1 = arith.constant 0 : i32
    return %c0_i32, %c0_i32_0 : i32, i32
  }
  func.func @transform_5(%arg0: i32, %arg1: i32) -> (i32, i32, i32, i32) {
    %c0_i32 = arith.constant 0 : i32
    %c0_i32_0 = arith.constant 0 : i32
    %c0_i32_1 = arith.constant 0 : i32
    return %arg0, %arg1, %c0_i32, %c0_i32_0 : i32, i32, i32, i32
  }
}

module attributes {stable_mosaic.version = 11 : i64} {
  func.func @_conv333_kernel(%arg0: i32, %arg1: i32, %arg2: memref<1x1x104x64xbf16, #tpu.memory_space<vmem>>, %arg3: memref<1x1x104x64xbf16, #tpu.memory_space<vmem>>, %arg4: memref<1x1x104x64xbf16, #tpu.memory_space<vmem>>, %arg5: memref<27x64x64xbf16, #tpu.memory_space<vmem>>, %arg6: memref<1x64xf32, #tpu.memory_space<vmem>>, %arg7: memref<1x1x80x64xbf16, #tpu.memory_space<vmem>>) attributes {dimension_semantics = [#tpu.dimension_semantics<parallel>, #tpu.dimension_semantics<parallel>], iteration_bounds = array<i64: 1, 8>, scalar_prefetch = 0 : i64, scratch_operands = 0 : i64, tpu.core_type = #tpu.core_type<tc>, window_params = [{transform_indices = @transform_0, window_bounds = array<i64: 1, 1, 104, 64>}, {transform_indices = @transform_1, window_bounds = array<i64: 1, 1, 104, 64>}, {transform_indices = @transform_2, window_bounds = array<i64: 1, 1, 104, 64>}, {pipeline_mode = #tpu.pipeline_mode<synchronous>, transform_indices = @transform_3, window_bounds = array<i64: 27, 64, 64>}, {pipeline_mode = #tpu.pipeline_mode<synchronous>, transform_indices = @transform_4, window_bounds = array<i64: 1, 64>}, {transform_indices = @transform_5, window_bounds = array<i64: 1, 1, 80, 64>}]} {
    %cst = arith.constant 0.000000e+00 : f32
    %0 = vector.broadcast %cst : f32 to vector<80x64xf32>
    %c0 = arith.constant 0 : index
    %c0_0 = arith.constant 0 : index
    %c0_1 = arith.constant 0 : index
    %c0_2 = arith.constant 0 : index
    %1 = vector.load %arg2[%c0, %c0_0, %c0_1, %c0_2] : memref<1x1x104x64xbf16, #tpu.memory_space<vmem>>, vector<1x1x80x64xbf16>
    %2 = vector.shape_cast %1 : vector<1x1x80x64xbf16> to vector<80x64xbf16>
    %c0_3 = arith.constant 0 : index
    %c0_4 = arith.constant 0 : index
    %c0_5 = arith.constant 0 : index
    %3 = vector.load %arg5[%c0_3, %c0_4, %c0_5] : memref<27x64x64xbf16, #tpu.memory_space<vmem>>, vector<1x64x64xbf16>
    %4 = vector.shape_cast %3 : vector<1x64x64xbf16> to vector<64x64xbf16>
    %cst_6 = arith.constant dense<0.000000e+00> : vector<80x64xf32>
    %5 = tpu.matmul %2, %4, %cst_6 {dimension_numbers = #tpu.dot_dimension_numbers<[1], [0], [0], [1], [0, 0, 1, 1], [], []>} : vector<80x64xbf16>, vector<64x64xbf16>, vector<80x64xf32> -> vector<80x64xf32>
    %6 = arith.addf %0, %5 : vector<80x64xf32>
    %c0_7 = arith.constant 0 : index
    %c0_8 = arith.constant 0 : index
    %c1 = arith.constant 1 : index
    %c0_9 = arith.constant 0 : index
    %7 = vector.load %arg2[%c0_7, %c0_8, %c1, %c0_9] : memref<1x1x104x64xbf16, #tpu.memory_space<vmem>>, vector<1x1x80x64xbf16>
    %8 = vector.shape_cast %7 : vector<1x1x80x64xbf16> to vector<80x64xbf16>
    %c1_10 = arith.constant 1 : index
    %c0_11 = arith.constant 0 : index
    %c0_12 = arith.constant 0 : index
    %9 = vector.load %arg5[%c1_10, %c0_11, %c0_12] : memref<27x64x64xbf16, #tpu.memory_space<vmem>>, vector<1x64x64xbf16>
    %10 = vector.shape_cast %9 : vector<1x64x64xbf16> to vector<64x64xbf16>
    %cst_13 = arith.constant dense<0.000000e+00> : vector<80x64xf32>
    %11 = tpu.matmul %8, %10, %cst_13 {dimension_numbers = #tpu.dot_dimension_numbers<[1], [0], [0], [1], [0, 0, 1, 1], [], []>} : vector<80x64xbf16>, vector<64x64xbf16>, vector<80x64xf32> -> vector<80x64xf32>
    %12 = arith.addf %6, %11 : vector<80x64xf32>
    %c0_14 = arith.constant 0 : index
    %c0_15 = arith.constant 0 : index
    %c2 = arith.constant 2 : index
    %c0_16 = arith.constant 0 : index
    %13 = vector.load %arg2[%c0_14, %c0_15, %c2, %c0_16] : memref<1x1x104x64xbf16, #tpu.memory_space<vmem>>, vector<1x1x80x64xbf16>
    %14 = vector.shape_cast %13 : vector<1x1x80x64xbf16> to vector<80x64xbf16>
    %c2_17 = arith.constant 2 : index
    %c0_18 = arith.constant 0 : index
    %c0_19 = arith.constant 0 : index
    %15 = vector.load %arg5[%c2_17, %c0_18, %c0_19] : memref<27x64x64xbf16, #tpu.memory_space<vmem>>, vector<1x64x64xbf16>
    %16 = vector.shape_cast %15 : vector<1x64x64xbf16> to vector<64x64xbf16>
    %cst_20 = arith.constant dense<0.000000e+00> : vector<80x64xf32>
    %17 = tpu.matmul %14, %16, %cst_20 {dimension_numbers = #tpu.dot_dimension_numbers<[1], [0], [0], [1], [0, 0, 1, 1], [], []>} : vector<80x64xbf16>, vector<64x64xbf16>, vector<80x64xf32> -> vector<80x64xf32>
    %18 = arith.addf %12, %17 : vector<80x64xf32>
    %c0_21 = arith.constant 0 : index
    %c0_22 = arith.constant 0 : index
    %c10 = arith.constant 10 : index
    %c0_23 = arith.constant 0 : index
    %19 = vector.load %arg2[%c0_21, %c0_22, %c10, %c0_23] : memref<1x1x104x64xbf16, #tpu.memory_space<vmem>>, vector<1x1x80x64xbf16>
    %20 = vector.shape_cast %19 : vector<1x1x80x64xbf16> to vector<80x64xbf16>
    %c3 = arith.constant 3 : index
    %c0_24 = arith.constant 0 : index
    %c0_25 = arith.constant 0 : index
    %21 = vector.load %arg5[%c3, %c0_24, %c0_25] : memref<27x64x64xbf16, #tpu.memory_space<vmem>>, vector<1x64x64xbf16>
    %22 = vector.shape_cast %21 : vector<1x64x64xbf16> to vector<64x64xbf16>
    %cst_26 = arith.constant dense<0.000000e+00> : vector<80x64xf32>
    %23 = tpu.matmul %20, %22, %cst_26 {dimension_numbers = #tpu.dot_dimension_numbers<[1], [0], [0], [1], [0, 0, 1, 1], [], []>} : vector<80x64xbf16>, vector<64x64xbf16>, vector<80x64xf32> -> vector<80x64xf32>
    %24 = arith.addf %18, %23 : vector<80x64xf32>
    %c0_27 = arith.constant 0 : index
    %c0_28 = arith.constant 0 : index
    %c11 = arith.constant 11 : index
    %c0_29 = arith.constant 0 : index
    %25 = vector.load %arg2[%c0_27, %c0_28, %c11, %c0_29] : memref<1x1x104x64xbf16, #tpu.memory_space<vmem>>, vector<1x1x80x64xbf16>
    %26 = vector.shape_cast %25 : vector<1x1x80x64xbf16> to vector<80x64xbf16>
    %c4 = arith.constant 4 : index
    %c0_30 = arith.constant 0 : index
    %c0_31 = arith.constant 0 : index
    %27 = vector.load %arg5[%c4, %c0_30, %c0_31] : memref<27x64x64xbf16, #tpu.memory_space<vmem>>, vector<1x64x64xbf16>
    %28 = vector.shape_cast %27 : vector<1x64x64xbf16> to vector<64x64xbf16>
    %cst_32 = arith.constant dense<0.000000e+00> : vector<80x64xf32>
    %29 = tpu.matmul %26, %28, %cst_32 {dimension_numbers = #tpu.dot_dimension_numbers<[1], [0], [0], [1], [0, 0, 1, 1], [], []>} : vector<80x64xbf16>, vector<64x64xbf16>, vector<80x64xf32> -> vector<80x64xf32>
    %30 = arith.addf %24, %29 : vector<80x64xf32>
    %c0_33 = arith.constant 0 : index
    %c0_34 = arith.constant 0 : index
    %c12 = arith.constant 12 : index
    %c0_35 = arith.constant 0 : index
    %31 = vector.load %arg2[%c0_33, %c0_34, %c12, %c0_35] : memref<1x1x104x64xbf16, #tpu.memory_space<vmem>>, vector<1x1x80x64xbf16>
    %32 = vector.shape_cast %31 : vector<1x1x80x64xbf16> to vector<80x64xbf16>
    %c5 = arith.constant 5 : index
    %c0_36 = arith.constant 0 : index
    %c0_37 = arith.constant 0 : index
    %33 = vector.load %arg5[%c5, %c0_36, %c0_37] : memref<27x64x64xbf16, #tpu.memory_space<vmem>>, vector<1x64x64xbf16>
    %34 = vector.shape_cast %33 : vector<1x64x64xbf16> to vector<64x64xbf16>
    %cst_38 = arith.constant dense<0.000000e+00> : vector<80x64xf32>
    %35 = tpu.matmul %32, %34, %cst_38 {dimension_numbers = #tpu.dot_dimension_numbers<[1], [0], [0], [1], [0, 0, 1, 1], [], []>} : vector<80x64xbf16>, vector<64x64xbf16>, vector<80x64xf32> -> vector<80x64xf32>
    %36 = arith.addf %30, %35 : vector<80x64xf32>
    %c0_39 = arith.constant 0 : index
    %c0_40 = arith.constant 0 : index
    %c20 = arith.constant 20 : index
    %c0_41 = arith.constant 0 : index
    %37 = vector.load %arg2[%c0_39, %c0_40, %c20, %c0_41] : memref<1x1x104x64xbf16, #tpu.memory_space<vmem>>, vector<1x1x80x64xbf16>
    %38 = vector.shape_cast %37 : vector<1x1x80x64xbf16> to vector<80x64xbf16>
    %c6 = arith.constant 6 : index
    %c0_42 = arith.constant 0 : index
    %c0_43 = arith.constant 0 : index
    %39 = vector.load %arg5[%c6, %c0_42, %c0_43] : memref<27x64x64xbf16, #tpu.memory_space<vmem>>, vector<1x64x64xbf16>
    %40 = vector.shape_cast %39 : vector<1x64x64xbf16> to vector<64x64xbf16>
    %cst_44 = arith.constant dense<0.000000e+00> : vector<80x64xf32>
    %41 = tpu.matmul %38, %40, %cst_44 {dimension_numbers = #tpu.dot_dimension_numbers<[1], [0], [0], [1], [0, 0, 1, 1], [], []>} : vector<80x64xbf16>, vector<64x64xbf16>, vector<80x64xf32> -> vector<80x64xf32>
    %42 = arith.addf %36, %41 : vector<80x64xf32>
    %c0_45 = arith.constant 0 : index
    %c0_46 = arith.constant 0 : index
    %c21 = arith.constant 21 : index
    %c0_47 = arith.constant 0 : index
    %43 = vector.load %arg2[%c0_45, %c0_46, %c21, %c0_47] : memref<1x1x104x64xbf16, #tpu.memory_space<vmem>>, vector<1x1x80x64xbf16>
    %44 = vector.shape_cast %43 : vector<1x1x80x64xbf16> to vector<80x64xbf16>
    %c7 = arith.constant 7 : index
    %c0_48 = arith.constant 0 : index
    %c0_49 = arith.constant 0 : index
    %45 = vector.load %arg5[%c7, %c0_48, %c0_49] : memref<27x64x64xbf16, #tpu.memory_space<vmem>>, vector<1x64x64xbf16>
    %46 = vector.shape_cast %45 : vector<1x64x64xbf16> to vector<64x64xbf16>
    %cst_50 = arith.constant dense<0.000000e+00> : vector<80x64xf32>
    %47 = tpu.matmul %44, %46, %cst_50 {dimension_numbers = #tpu.dot_dimension_numbers<[1], [0], [0], [1], [0, 0, 1, 1], [], []>} : vector<80x64xbf16>, vector<64x64xbf16>, vector<80x64xf32> -> vector<80x64xf32>
    %48 = arith.addf %42, %47 : vector<80x64xf32>
    %c0_51 = arith.constant 0 : index
    %c0_52 = arith.constant 0 : index
    %c22 = arith.constant 22 : index
    %c0_53 = arith.constant 0 : index
    %49 = vector.load %arg2[%c0_51, %c0_52, %c22, %c0_53] : memref<1x1x104x64xbf16, #tpu.memory_space<vmem>>, vector<1x1x80x64xbf16>
    %50 = vector.shape_cast %49 : vector<1x1x80x64xbf16> to vector<80x64xbf16>
    %c8 = arith.constant 8 : index
    %c0_54 = arith.constant 0 : index
    %c0_55 = arith.constant 0 : index
    %51 = vector.load %arg5[%c8, %c0_54, %c0_55] : memref<27x64x64xbf16, #tpu.memory_space<vmem>>, vector<1x64x64xbf16>
    %52 = vector.shape_cast %51 : vector<1x64x64xbf16> to vector<64x64xbf16>
    %cst_56 = arith.constant dense<0.000000e+00> : vector<80x64xf32>
    %53 = tpu.matmul %50, %52, %cst_56 {dimension_numbers = #tpu.dot_dimension_numbers<[1], [0], [0], [1], [0, 0, 1, 1], [], []>} : vector<80x64xbf16>, vector<64x64xbf16>, vector<80x64xf32> -> vector<80x64xf32>
    %54 = arith.addf %48, %53 : vector<80x64xf32>
    %c0_57 = arith.constant 0 : index
    %c0_58 = arith.constant 0 : index
    %c0_59 = arith.constant 0 : index
    %c0_60 = arith.constant 0 : index
    %55 = vector.load %arg3[%c0_57, %c0_58, %c0_59, %c0_60] : memref<1x1x104x64xbf16, #tpu.memory_space<vmem>>, vector<1x1x80x64xbf16>
    %56 = vector.shape_cast %55 : vector<1x1x80x64xbf16> to vector<80x64xbf16>
    %c9 = arith.constant 9 : index
    %c0_61 = arith.constant 0 : index
    %c0_62 = arith.constant 0 : index
    %57 = vector.load %arg5[%c9, %c0_61, %c0_62] : memref<27x64x64xbf16, #tpu.memory_space<vmem>>, vector<1x64x64xbf16>
    %58 = vector.shape_cast %57 : vector<1x64x64xbf16> to vector<64x64xbf16>
    %cst_63 = arith.constant dense<0.000000e+00> : vector<80x64xf32>
    %59 = tpu.matmul %56, %58, %cst_63 {dimension_numbers = #tpu.dot_dimension_numbers<[1], [0], [0], [1], [0, 0, 1, 1], [], []>} : vector<80x64xbf16>, vector<64x64xbf16>, vector<80x64xf32> -> vector<80x64xf32>
    %60 = arith.addf %54, %59 : vector<80x64xf32>
    %c0_64 = arith.constant 0 : index
    %c0_65 = arith.constant 0 : index
    %c1_66 = arith.constant 1 : index
    %c0_67 = arith.constant 0 : index
    %61 = vector.load %arg3[%c0_64, %c0_65, %c1_66, %c0_67] : memref<1x1x104x64xbf16, #tpu.memory_space<vmem>>, vector<1x1x80x64xbf16>
    %62 = vector.shape_cast %61 : vector<1x1x80x64xbf16> to vector<80x64xbf16>
    %c10_68 = arith.constant 10 : index
    %c0_69 = arith.constant 0 : index
    %c0_70 = arith.constant 0 : index
    %63 = vector.load %arg5[%c10_68, %c0_69, %c0_70] : memref<27x64x64xbf16, #tpu.memory_space<vmem>>, vector<1x64x64xbf16>
    %64 = vector.shape_cast %63 : vector<1x64x64xbf16> to vector<64x64xbf16>
    %cst_71 = arith.constant dense<0.000000e+00> : vector<80x64xf32>
    %65 = tpu.matmul %62, %64, %cst_71 {dimension_numbers = #tpu.dot_dimension_numbers<[1], [0], [0], [1], [0, 0, 1, 1], [], []>} : vector<80x64xbf16>, vector<64x64xbf16>, vector<80x64xf32> -> vector<80x64xf32>
    %66 = arith.addf %60, %65 : vector<80x64xf32>
    %c0_72 = arith.constant 0 : index
    %c0_73 = arith.constant 0 : index
    %c2_74 = arith.constant 2 : index
    %c0_75 = arith.constant 0 : index
    %67 = vector.load %arg3[%c0_72, %c0_73, %c2_74, %c0_75] : memref<1x1x104x64xbf16, #tpu.memory_space<vmem>>, vector<1x1x80x64xbf16>
    %68 = vector.shape_cast %67 : vector<1x1x80x64xbf16> to vector<80x64xbf16>
    %c11_76 = arith.constant 11 : index
    %c0_77 = arith.constant 0 : index
    %c0_78 = arith.constant 0 : index
    %69 = vector.load %arg5[%c11_76, %c0_77, %c0_78] : memref<27x64x64xbf16, #tpu.memory_space<vmem>>, vector<1x64x64xbf16>
    %70 = vector.shape_cast %69 : vector<1x64x64xbf16> to vector<64x64xbf16>
    %cst_79 = arith.constant dense<0.000000e+00> : vector<80x64xf32>
    %71 = tpu.matmul %68, %70, %cst_79 {dimension_numbers = #tpu.dot_dimension_numbers<[1], [0], [0], [1], [0, 0, 1, 1], [], []>} : vector<80x64xbf16>, vector<64x64xbf16>, vector<80x64xf32> -> vector<80x64xf32>
    %72 = arith.addf %66, %71 : vector<80x64xf32>
    %c0_80 = arith.constant 0 : index
    %c0_81 = arith.constant 0 : index
    %c10_82 = arith.constant 10 : index
    %c0_83 = arith.constant 0 : index
    %73 = vector.load %arg3[%c0_80, %c0_81, %c10_82, %c0_83] : memref<1x1x104x64xbf16, #tpu.memory_space<vmem>>, vector<1x1x80x64xbf16>
    %74 = vector.shape_cast %73 : vector<1x1x80x64xbf16> to vector<80x64xbf16>
    %c12_84 = arith.constant 12 : index
    %c0_85 = arith.constant 0 : index
    %c0_86 = arith.constant 0 : index
    %75 = vector.load %arg5[%c12_84, %c0_85, %c0_86] : memref<27x64x64xbf16, #tpu.memory_space<vmem>>, vector<1x64x64xbf16>
    %76 = vector.shape_cast %75 : vector<1x64x64xbf16> to vector<64x64xbf16>
    %cst_87 = arith.constant dense<0.000000e+00> : vector<80x64xf32>
    %77 = tpu.matmul %74, %76, %cst_87 {dimension_numbers = #tpu.dot_dimension_numbers<[1], [0], [0], [1], [0, 0, 1, 1], [], []>} : vector<80x64xbf16>, vector<64x64xbf16>, vector<80x64xf32> -> vector<80x64xf32>
    %78 = arith.addf %72, %77 : vector<80x64xf32>
    %c0_88 = arith.constant 0 : index
    %c0_89 = arith.constant 0 : index
    %c11_90 = arith.constant 11 : index
    %c0_91 = arith.constant 0 : index
    %79 = vector.load %arg3[%c0_88, %c0_89, %c11_90, %c0_91] : memref<1x1x104x64xbf16, #tpu.memory_space<vmem>>, vector<1x1x80x64xbf16>
    %80 = vector.shape_cast %79 : vector<1x1x80x64xbf16> to vector<80x64xbf16>
    %c13 = arith.constant 13 : index
    %c0_92 = arith.constant 0 : index
    %c0_93 = arith.constant 0 : index
    %81 = vector.load %arg5[%c13, %c0_92, %c0_93] : memref<27x64x64xbf16, #tpu.memory_space<vmem>>, vector<1x64x64xbf16>
    %82 = vector.shape_cast %81 : vector<1x64x64xbf16> to vector<64x64xbf16>
    %cst_94 = arith.constant dense<0.000000e+00> : vector<80x64xf32>
    %83 = tpu.matmul %80, %82, %cst_94 {dimension_numbers = #tpu.dot_dimension_numbers<[1], [0], [0], [1], [0, 0, 1, 1], [], []>} : vector<80x64xbf16>, vector<64x64xbf16>, vector<80x64xf32> -> vector<80x64xf32>
    %84 = arith.addf %78, %83 : vector<80x64xf32>
    %c0_95 = arith.constant 0 : index
    %c0_96 = arith.constant 0 : index
    %c12_97 = arith.constant 12 : index
    %c0_98 = arith.constant 0 : index
    %85 = vector.load %arg3[%c0_95, %c0_96, %c12_97, %c0_98] : memref<1x1x104x64xbf16, #tpu.memory_space<vmem>>, vector<1x1x80x64xbf16>
    %86 = vector.shape_cast %85 : vector<1x1x80x64xbf16> to vector<80x64xbf16>
    %c14 = arith.constant 14 : index
    %c0_99 = arith.constant 0 : index
    %c0_100 = arith.constant 0 : index
    %87 = vector.load %arg5[%c14, %c0_99, %c0_100] : memref<27x64x64xbf16, #tpu.memory_space<vmem>>, vector<1x64x64xbf16>
    %88 = vector.shape_cast %87 : vector<1x64x64xbf16> to vector<64x64xbf16>
    %cst_101 = arith.constant dense<0.000000e+00> : vector<80x64xf32>
    %89 = tpu.matmul %86, %88, %cst_101 {dimension_numbers = #tpu.dot_dimension_numbers<[1], [0], [0], [1], [0, 0, 1, 1], [], []>} : vector<80x64xbf16>, vector<64x64xbf16>, vector<80x64xf32> -> vector<80x64xf32>
    %90 = arith.addf %84, %89 : vector<80x64xf32>
    %c0_102 = arith.constant 0 : index
    %c0_103 = arith.constant 0 : index
    %c20_104 = arith.constant 20 : index
    %c0_105 = arith.constant 0 : index
    %91 = vector.load %arg3[%c0_102, %c0_103, %c20_104, %c0_105] : memref<1x1x104x64xbf16, #tpu.memory_space<vmem>>, vector<1x1x80x64xbf16>
    %92 = vector.shape_cast %91 : vector<1x1x80x64xbf16> to vector<80x64xbf16>
    %c15 = arith.constant 15 : index
    %c0_106 = arith.constant 0 : index
    %c0_107 = arith.constant 0 : index
    %93 = vector.load %arg5[%c15, %c0_106, %c0_107] : memref<27x64x64xbf16, #tpu.memory_space<vmem>>, vector<1x64x64xbf16>
    %94 = vector.shape_cast %93 : vector<1x64x64xbf16> to vector<64x64xbf16>
    %cst_108 = arith.constant dense<0.000000e+00> : vector<80x64xf32>
    %95 = tpu.matmul %92, %94, %cst_108 {dimension_numbers = #tpu.dot_dimension_numbers<[1], [0], [0], [1], [0, 0, 1, 1], [], []>} : vector<80x64xbf16>, vector<64x64xbf16>, vector<80x64xf32> -> vector<80x64xf32>
    %96 = arith.addf %90, %95 : vector<80x64xf32>
    %c0_109 = arith.constant 0 : index
    %c0_110 = arith.constant 0 : index
    %c21_111 = arith.constant 21 : index
    %c0_112 = arith.constant 0 : index
    %97 = vector.load %arg3[%c0_109, %c0_110, %c21_111, %c0_112] : memref<1x1x104x64xbf16, #tpu.memory_space<vmem>>, vector<1x1x80x64xbf16>
    %98 = vector.shape_cast %97 : vector<1x1x80x64xbf16> to vector<80x64xbf16>
    %c16 = arith.constant 16 : index
    %c0_113 = arith.constant 0 : index
    %c0_114 = arith.constant 0 : index
    %99 = vector.load %arg5[%c16, %c0_113, %c0_114] : memref<27x64x64xbf16, #tpu.memory_space<vmem>>, vector<1x64x64xbf16>
    %100 = vector.shape_cast %99 : vector<1x64x64xbf16> to vector<64x64xbf16>
    %cst_115 = arith.constant dense<0.000000e+00> : vector<80x64xf32>
    %101 = tpu.matmul %98, %100, %cst_115 {dimension_numbers = #tpu.dot_dimension_numbers<[1], [0], [0], [1], [0, 0, 1, 1], [], []>} : vector<80x64xbf16>, vector<64x64xbf16>, vector<80x64xf32> -> vector<80x64xf32>
    %102 = arith.addf %96, %101 : vector<80x64xf32>
    %c0_116 = arith.constant 0 : index
    %c0_117 = arith.constant 0 : index
    %c22_118 = arith.constant 22 : index
    %c0_119 = arith.constant 0 : index
    %103 = vector.load %arg3[%c0_116, %c0_117, %c22_118, %c0_119] : memref<1x1x104x64xbf16, #tpu.memory_space<vmem>>, vector<1x1x80x64xbf16>
    %104 = vector.shape_cast %103 : vector<1x1x80x64xbf16> to vector<80x64xbf16>
    %c17 = arith.constant 17 : index
    %c0_120 = arith.constant 0 : index
    %c0_121 = arith.constant 0 : index
    %105 = vector.load %arg5[%c17, %c0_120, %c0_121] : memref<27x64x64xbf16, #tpu.memory_space<vmem>>, vector<1x64x64xbf16>
    %106 = vector.shape_cast %105 : vector<1x64x64xbf16> to vector<64x64xbf16>
    %cst_122 = arith.constant dense<0.000000e+00> : vector<80x64xf32>
    %107 = tpu.matmul %104, %106, %cst_122 {dimension_numbers = #tpu.dot_dimension_numbers<[1], [0], [0], [1], [0, 0, 1, 1], [], []>} : vector<80x64xbf16>, vector<64x64xbf16>, vector<80x64xf32> -> vector<80x64xf32>
    %108 = arith.addf %102, %107 : vector<80x64xf32>
    %c0_123 = arith.constant 0 : index
    %c0_124 = arith.constant 0 : index
    %c0_125 = arith.constant 0 : index
    %c0_126 = arith.constant 0 : index
    %109 = vector.load %arg4[%c0_123, %c0_124, %c0_125, %c0_126] : memref<1x1x104x64xbf16, #tpu.memory_space<vmem>>, vector<1x1x80x64xbf16>
    %110 = vector.shape_cast %109 : vector<1x1x80x64xbf16> to vector<80x64xbf16>
    %c18 = arith.constant 18 : index
    %c0_127 = arith.constant 0 : index
    %c0_128 = arith.constant 0 : index
    %111 = vector.load %arg5[%c18, %c0_127, %c0_128] : memref<27x64x64xbf16, #tpu.memory_space<vmem>>, vector<1x64x64xbf16>
    %112 = vector.shape_cast %111 : vector<1x64x64xbf16> to vector<64x64xbf16>
    %cst_129 = arith.constant dense<0.000000e+00> : vector<80x64xf32>
    %113 = tpu.matmul %110, %112, %cst_129 {dimension_numbers = #tpu.dot_dimension_numbers<[1], [0], [0], [1], [0, 0, 1, 1], [], []>} : vector<80x64xbf16>, vector<64x64xbf16>, vector<80x64xf32> -> vector<80x64xf32>
    %114 = arith.addf %108, %113 : vector<80x64xf32>
    %c0_130 = arith.constant 0 : index
    %c0_131 = arith.constant 0 : index
    %c1_132 = arith.constant 1 : index
    %c0_133 = arith.constant 0 : index
    %115 = vector.load %arg4[%c0_130, %c0_131, %c1_132, %c0_133] : memref<1x1x104x64xbf16, #tpu.memory_space<vmem>>, vector<1x1x80x64xbf16>
    %116 = vector.shape_cast %115 : vector<1x1x80x64xbf16> to vector<80x64xbf16>
    %c19 = arith.constant 19 : index
    %c0_134 = arith.constant 0 : index
    %c0_135 = arith.constant 0 : index
    %117 = vector.load %arg5[%c19, %c0_134, %c0_135] : memref<27x64x64xbf16, #tpu.memory_space<vmem>>, vector<1x64x64xbf16>
    %118 = vector.shape_cast %117 : vector<1x64x64xbf16> to vector<64x64xbf16>
    %cst_136 = arith.constant dense<0.000000e+00> : vector<80x64xf32>
    %119 = tpu.matmul %116, %118, %cst_136 {dimension_numbers = #tpu.dot_dimension_numbers<[1], [0], [0], [1], [0, 0, 1, 1], [], []>} : vector<80x64xbf16>, vector<64x64xbf16>, vector<80x64xf32> -> vector<80x64xf32>
    %120 = arith.addf %114, %119 : vector<80x64xf32>
    %c0_137 = arith.constant 0 : index
    %c0_138 = arith.constant 0 : index
    %c2_139 = arith.constant 2 : index
    %c0_140 = arith.constant 0 : index
    %121 = vector.load %arg4[%c0_137, %c0_138, %c2_139, %c0_140] : memref<1x1x104x64xbf16, #tpu.memory_space<vmem>>, vector<1x1x80x64xbf16>
    %122 = vector.shape_cast %121 : vector<1x1x80x64xbf16> to vector<80x64xbf16>
    %c20_141 = arith.constant 20 : index
    %c0_142 = arith.constant 0 : index
    %c0_143 = arith.constant 0 : index
    %123 = vector.load %arg5[%c20_141, %c0_142, %c0_143] : memref<27x64x64xbf16, #tpu.memory_space<vmem>>, vector<1x64x64xbf16>
    %124 = vector.shape_cast %123 : vector<1x64x64xbf16> to vector<64x64xbf16>
    %cst_144 = arith.constant dense<0.000000e+00> : vector<80x64xf32>
    %125 = tpu.matmul %122, %124, %cst_144 {dimension_numbers = #tpu.dot_dimension_numbers<[1], [0], [0], [1], [0, 0, 1, 1], [], []>} : vector<80x64xbf16>, vector<64x64xbf16>, vector<80x64xf32> -> vector<80x64xf32>
    %126 = arith.addf %120, %125 : vector<80x64xf32>
    %c0_145 = arith.constant 0 : index
    %c0_146 = arith.constant 0 : index
    %c10_147 = arith.constant 10 : index
    %c0_148 = arith.constant 0 : index
    %127 = vector.load %arg4[%c0_145, %c0_146, %c10_147, %c0_148] : memref<1x1x104x64xbf16, #tpu.memory_space<vmem>>, vector<1x1x80x64xbf16>
    %128 = vector.shape_cast %127 : vector<1x1x80x64xbf16> to vector<80x64xbf16>
    %c21_149 = arith.constant 21 : index
    %c0_150 = arith.constant 0 : index
    %c0_151 = arith.constant 0 : index
    %129 = vector.load %arg5[%c21_149, %c0_150, %c0_151] : memref<27x64x64xbf16, #tpu.memory_space<vmem>>, vector<1x64x64xbf16>
    %130 = vector.shape_cast %129 : vector<1x64x64xbf16> to vector<64x64xbf16>
    %cst_152 = arith.constant dense<0.000000e+00> : vector<80x64xf32>
    %131 = tpu.matmul %128, %130, %cst_152 {dimension_numbers = #tpu.dot_dimension_numbers<[1], [0], [0], [1], [0, 0, 1, 1], [], []>} : vector<80x64xbf16>, vector<64x64xbf16>, vector<80x64xf32> -> vector<80x64xf32>
    %132 = arith.addf %126, %131 : vector<80x64xf32>
    %c0_153 = arith.constant 0 : index
    %c0_154 = arith.constant 0 : index
    %c11_155 = arith.constant 11 : index
    %c0_156 = arith.constant 0 : index
    %133 = vector.load %arg4[%c0_153, %c0_154, %c11_155, %c0_156] : memref<1x1x104x64xbf16, #tpu.memory_space<vmem>>, vector<1x1x80x64xbf16>
    %134 = vector.shape_cast %133 : vector<1x1x80x64xbf16> to vector<80x64xbf16>
    %c22_157 = arith.constant 22 : index
    %c0_158 = arith.constant 0 : index
    %c0_159 = arith.constant 0 : index
    %135 = vector.load %arg5[%c22_157, %c0_158, %c0_159] : memref<27x64x64xbf16, #tpu.memory_space<vmem>>, vector<1x64x64xbf16>
    %136 = vector.shape_cast %135 : vector<1x64x64xbf16> to vector<64x64xbf16>
    %cst_160 = arith.constant dense<0.000000e+00> : vector<80x64xf32>
    %137 = tpu.matmul %134, %136, %cst_160 {dimension_numbers = #tpu.dot_dimension_numbers<[1], [0], [0], [1], [0, 0, 1, 1], [], []>} : vector<80x64xbf16>, vector<64x64xbf16>, vector<80x64xf32> -> vector<80x64xf32>
    %138 = arith.addf %132, %137 : vector<80x64xf32>
    %c0_161 = arith.constant 0 : index
    %c0_162 = arith.constant 0 : index
    %c12_163 = arith.constant 12 : index
    %c0_164 = arith.constant 0 : index
    %139 = vector.load %arg4[%c0_161, %c0_162, %c12_163, %c0_164] : memref<1x1x104x64xbf16, #tpu.memory_space<vmem>>, vector<1x1x80x64xbf16>
    %140 = vector.shape_cast %139 : vector<1x1x80x64xbf16> to vector<80x64xbf16>
    %c23 = arith.constant 23 : index
    %c0_165 = arith.constant 0 : index
    %c0_166 = arith.constant 0 : index
    %141 = vector.load %arg5[%c23, %c0_165, %c0_166] : memref<27x64x64xbf16, #tpu.memory_space<vmem>>, vector<1x64x64xbf16>
    %142 = vector.shape_cast %141 : vector<1x64x64xbf16> to vector<64x64xbf16>
    %cst_167 = arith.constant dense<0.000000e+00> : vector<80x64xf32>
    %143 = tpu.matmul %140, %142, %cst_167 {dimension_numbers = #tpu.dot_dimension_numbers<[1], [0], [0], [1], [0, 0, 1, 1], [], []>} : vector<80x64xbf16>, vector<64x64xbf16>, vector<80x64xf32> -> vector<80x64xf32>
    %144 = arith.addf %138, %143 : vector<80x64xf32>
    %c0_168 = arith.constant 0 : index
    %c0_169 = arith.constant 0 : index
    %c20_170 = arith.constant 20 : index
    %c0_171 = arith.constant 0 : index
    %145 = vector.load %arg4[%c0_168, %c0_169, %c20_170, %c0_171] : memref<1x1x104x64xbf16, #tpu.memory_space<vmem>>, vector<1x1x80x64xbf16>
    %146 = vector.shape_cast %145 : vector<1x1x80x64xbf16> to vector<80x64xbf16>
    %c24 = arith.constant 24 : index
    %c0_172 = arith.constant 0 : index
    %c0_173 = arith.constant 0 : index
    %147 = vector.load %arg5[%c24, %c0_172, %c0_173] : memref<27x64x64xbf16, #tpu.memory_space<vmem>>, vector<1x64x64xbf16>
    %148 = vector.shape_cast %147 : vector<1x64x64xbf16> to vector<64x64xbf16>
    %cst_174 = arith.constant dense<0.000000e+00> : vector<80x64xf32>
    %149 = tpu.matmul %146, %148, %cst_174 {dimension_numbers = #tpu.dot_dimension_numbers<[1], [0], [0], [1], [0, 0, 1, 1], [], []>} : vector<80x64xbf16>, vector<64x64xbf16>, vector<80x64xf32> -> vector<80x64xf32>
    %150 = arith.addf %144, %149 : vector<80x64xf32>
    %c0_175 = arith.constant 0 : index
    %c0_176 = arith.constant 0 : index
    %c21_177 = arith.constant 21 : index
    %c0_178 = arith.constant 0 : index
    %151 = vector.load %arg4[%c0_175, %c0_176, %c21_177, %c0_178] : memref<1x1x104x64xbf16, #tpu.memory_space<vmem>>, vector<1x1x80x64xbf16>
    %152 = vector.shape_cast %151 : vector<1x1x80x64xbf16> to vector<80x64xbf16>
    %c25 = arith.constant 25 : index
    %c0_179 = arith.constant 0 : index
    %c0_180 = arith.constant 0 : index
    %153 = vector.load %arg5[%c25, %c0_179, %c0_180] : memref<27x64x64xbf16, #tpu.memory_space<vmem>>, vector<1x64x64xbf16>
    %154 = vector.shape_cast %153 : vector<1x64x64xbf16> to vector<64x64xbf16>
    %cst_181 = arith.constant dense<0.000000e+00> : vector<80x64xf32>
    %155 = tpu.matmul %152, %154, %cst_181 {dimension_numbers = #tpu.dot_dimension_numbers<[1], [0], [0], [1], [0, 0, 1, 1], [], []>} : vector<80x64xbf16>, vector<64x64xbf16>, vector<80x64xf32> -> vector<80x64xf32>
    %156 = arith.addf %150, %155 : vector<80x64xf32>
    %c0_182 = arith.constant 0 : index
    %c0_183 = arith.constant 0 : index
    %c22_184 = arith.constant 22 : index
    %c0_185 = arith.constant 0 : index
    %157 = vector.load %arg4[%c0_182, %c0_183, %c22_184, %c0_185] : memref<1x1x104x64xbf16, #tpu.memory_space<vmem>>, vector<1x1x80x64xbf16>
    %158 = vector.shape_cast %157 : vector<1x1x80x64xbf16> to vector<80x64xbf16>
    %c26 = arith.constant 26 : index
    %c0_186 = arith.constant 0 : index
    %c0_187 = arith.constant 0 : index
    %159 = vector.load %arg5[%c26, %c0_186, %c0_187] : memref<27x64x64xbf16, #tpu.memory_space<vmem>>, vector<1x64x64xbf16>
    %160 = vector.shape_cast %159 : vector<1x64x64xbf16> to vector<64x64xbf16>
    %cst_188 = arith.constant dense<0.000000e+00> : vector<80x64xf32>
    %161 = tpu.matmul %158, %160, %cst_188 {dimension_numbers = #tpu.dot_dimension_numbers<[1], [0], [0], [1], [0, 0, 1, 1], [], []>} : vector<80x64xbf16>, vector<64x64xbf16>, vector<80x64xf32> -> vector<80x64xf32>
    %162 = arith.addf %156, %161 : vector<80x64xf32>
    %c0_189 = arith.constant 0 : index
    %c0_190 = arith.constant 0 : index
    %163 = vector.load %arg6[%c0_189, %c0_190] : memref<1x64xf32, #tpu.memory_space<vmem>>, vector<1x64xf32>
    %164 = vector.broadcast %163 : vector<1x64xf32> to vector<80x64xf32>
    %165 = arith.addf %162, %164 : vector<80x64xf32>
    %cst_191 = arith.constant 0.000000e+00 : f32
    %166 = vector.broadcast %cst_191 : f32 to vector<80x64xf32>
    %167 = arith.cmpf oge, %165, %166 : vector<80x64xf32>
    %cst_192 = arith.constant 0.00999999977 : f32
    %168 = vector.broadcast %cst_192 : f32 to vector<80x64xf32>
    %169 = arith.mulf %168, %165 : vector<80x64xf32>
    %170 = arith.select %167, %165, %169 : vector<80x64xi1>, vector<80x64xf32>
    %171 = arith.truncf %170 : vector<80x64xf32> to vector<80x64xbf16>
    %c0_193 = arith.constant 0 : index
    %c0_194 = arith.constant 0 : index
    %c0_195 = arith.constant 0 : index
    %c0_196 = arith.constant 0 : index
    %172 = vector.load %arg7[%c0_193, %c0_194, %c0_195, %c0_196] : memref<1x1x80x64xbf16, #tpu.memory_space<vmem>>, vector<1x1x80x64xbf16>
    %173 = vector.shape_cast %172 : vector<1x1x80x64xbf16> to vector<80x64xbf16>
    %174 = vector.shape_cast %171 : vector<80x64xbf16> to vector<1x1x80x64xbf16>
    tpu.vector_store %arg7[%c0_193, %c0_194, %c0_195, %c0_196], %174 {strides = array<i32>} : memref<1x1x80x64xbf16, #tpu.memory_space<vmem>>, vector<1x1x80x64xbf16>,
    return
  }
  func.func @transform_0(%arg0: i32, %arg1: i32) -> (i32, i32, i32, i32) {
    %c0_i32 = arith.constant 0 : i32
    %c0_i32_0 = arith.constant 0 : i32
    %c0_i32_1 = arith.constant 0 : i32
    return %arg0, %arg1, %c0_i32, %c0_i32_0 : i32, i32, i32, i32
  }
  func.func @transform_1(%arg0: i32, %arg1: i32) -> (i32, i32, i32, i32) {
    %c1_i32 = arith.constant 1 : i32
    %0 = arith.addi %arg1, %c1_i32 : i32
    %c0_i32 = arith.constant 0 : i32
    %c0_i32_0 = arith.constant 0 : i32
    %c0_i32_1 = arith.constant 0 : i32
    return %arg0, %0, %c0_i32, %c0_i32_0 : i32, i32, i32, i32
  }
  func.func @transform_2(%arg0: i32, %arg1: i32) -> (i32, i32, i32, i32) {
    %c2_i32 = arith.constant 2 : i32
    %0 = arith.addi %arg1, %c2_i32 : i32
    %c0_i32 = arith.constant 0 : i32
    %c0_i32_0 = arith.constant 0 : i32
    %c0_i32_1 = arith.constant 0 : i32
    return %arg0, %0, %c0_i32, %c0_i32_0 : i32, i32, i32, i32
  }
  func.func @transform_3(%arg0: i32, %arg1: i32) -> (i32, i32, i32) {
    %c0_i32 = arith.constant 0 : i32
    %c0_i32_0 = arith.constant 0 : i32
    %c0_i32_1 = arith.constant 0 : i32
    %c0_i32_2 = arith.constant 0 : i32
    return %c0_i32, %c0_i32_0, %c0_i32_1 : i32, i32, i32
  }
  func.func @transform_4(%arg0: i32, %arg1: i32) -> (i32, i32) {
    %c0_i32 = arith.constant 0 : i32
    %c0_i32_0 = arith.constant 0 : i32
    %c0_i32_1 = arith.constant 0 : i32
    return %c0_i32, %c0_i32_0 : i32, i32
  }
  func.func @transform_5(%arg0: i32, %arg1: i32) -> (i32, i32, i32, i32) {
    %c0_i32 = arith.constant 0 : i32
    %c0_i32_0 = arith.constant 0 : i32
    %c0_i32_1 = arith.constant 0 : i32
    return %arg0, %arg1, %c0_i32, %c0_i32_0 : i32, i32, i32, i32
  }
}

module attributes {stable_mosaic.version = 11 : i64} {
  func.func @_tail_kernel(%arg0: i32, %arg1: memref<256x64xbf16, #tpu.memory_space<vmem>>, %arg2: memref<64x64xbf16, #tpu.memory_space<vmem>>, %arg3: memref<1x64xf32, #tpu.memory_space<vmem>>, %arg4: memref<64x64xbf16, #tpu.memory_space<vmem>>, %arg5: memref<1x64xf32, #tpu.memory_space<vmem>>, %arg6: memref<64x4xbf16, #tpu.memory_space<vmem>>, %arg7: memref<1x4xf32, #tpu.memory_space<vmem>>, %arg8: memref<256x4xf32, #tpu.memory_space<vmem>>) attributes {dimension_semantics = [#tpu.dimension_semantics<parallel>], iteration_bounds = array<i64: 2>, scalar_prefetch = 0 : i64, scratch_operands = 0 : i64, tpu.core_type = #tpu.core_type<tc>, window_params = [{transform_indices = @transform_0, window_bounds = array<i64: 256, 64>}, {pipeline_mode = #tpu.pipeline_mode<synchronous>, transform_indices = @transform_1, window_bounds = array<i64: 64, 64>}, {pipeline_mode = #tpu.pipeline_mode<synchronous>, transform_indices = @transform_2, window_bounds = array<i64: 1, 64>}, {pipeline_mode = #tpu.pipeline_mode<synchronous>, transform_indices = @transform_3, window_bounds = array<i64: 64, 64>}, {pipeline_mode = #tpu.pipeline_mode<synchronous>, transform_indices = @transform_4, window_bounds = array<i64: 1, 64>}, {pipeline_mode = #tpu.pipeline_mode<synchronous>, transform_indices = @transform_5, window_bounds = array<i64: 64, 4>}, {pipeline_mode = #tpu.pipeline_mode<synchronous>, transform_indices = @transform_6, window_bounds = array<i64: 1, 4>}, {transform_indices = @transform_7, window_bounds = array<i64: 256, 4>}]} {
    %c0 = arith.constant 0 : index
    %c0_0 = arith.constant 0 : index
    %0 = vector.load %arg1[%c0, %c0_0] : memref<256x64xbf16, #tpu.memory_space<vmem>>, vector<256x64xbf16>
    %c0_1 = arith.constant 0 : index
    %c0_2 = arith.constant 0 : index
    %1 = vector.load %arg2[%c0_1, %c0_2] : memref<64x64xbf16, #tpu.memory_space<vmem>>, vector<64x64xbf16>
    %cst = arith.constant dense<0.000000e+00> : vector<256x64xf32>
    %2 = tpu.matmul %0, %1, %cst {dimension_numbers = #tpu.dot_dimension_numbers<[1], [0], [0], [1], [0, 0, 1, 1], [], []>} : vector<256x64xbf16>, vector<64x64xbf16>, vector<256x64xf32> -> vector<256x64xf32>
    %c0_3 = arith.constant 0 : index
    %c0_4 = arith.constant 0 : index
    %3 = vector.load %arg3[%c0_3, %c0_4] : memref<1x64xf32, #tpu.memory_space<vmem>>, vector<1x64xf32>
    %4 = vector.broadcast %3 : vector<1x64xf32> to vector<256x64xf32>
    %5 = arith.addf %2, %4 : vector<256x64xf32>
    %cst_5 = arith.constant 0.000000e+00 : f32
    %6 = vector.broadcast %cst_5 : f32 to vector<256x64xf32>
    %7 = arith.cmpf oge, %5, %6 : vector<256x64xf32>
    %cst_6 = arith.constant 0.00999999977 : f32
    %8 = vector.broadcast %cst_6 : f32 to vector<256x64xf32>
    %9 = arith.mulf %8, %5 : vector<256x64xf32>
    %10 = arith.select %7, %5, %9 : vector<256x64xi1>, vector<256x64xf32>
    %11 = arith.truncf %10 : vector<256x64xf32> to vector<256x64xbf16>
    %c0_7 = arith.constant 0 : index
    %c0_8 = arith.constant 0 : index
    %12 = vector.load %arg4[%c0_7, %c0_8] : memref<64x64xbf16, #tpu.memory_space<vmem>>, vector<64x64xbf16>
    %cst_9 = arith.constant dense<0.000000e+00> : vector<256x64xf32>
    %13 = tpu.matmul %11, %12, %cst_9 {dimension_numbers = #tpu.dot_dimension_numbers<[1], [0], [0], [1], [0, 0, 1, 1], [], []>} : vector<256x64xbf16>, vector<64x64xbf16>, vector<256x64xf32> -> vector<256x64xf32>
    %c0_10 = arith.constant 0 : index
    %c0_11 = arith.constant 0 : index
    %14 = vector.load %arg5[%c0_10, %c0_11] : memref<1x64xf32, #tpu.memory_space<vmem>>, vector<1x64xf32>
    %15 = vector.broadcast %14 : vector<1x64xf32> to vector<256x64xf32>
    %16 = arith.addf %13, %15 : vector<256x64xf32>
    %cst_12 = arith.constant 0.000000e+00 : f32
    %17 = vector.broadcast %cst_12 : f32 to vector<256x64xf32>
    %18 = arith.cmpf oge, %16, %17 : vector<256x64xf32>
    %cst_13 = arith.constant 0.00999999977 : f32
    %19 = vector.broadcast %cst_13 : f32 to vector<256x64xf32>
    %20 = arith.mulf %19, %16 : vector<256x64xf32>
    %21 = arith.select %18, %16, %20 : vector<256x64xi1>, vector<256x64xf32>
    %22 = arith.truncf %21 : vector<256x64xf32> to vector<256x64xbf16>
    %c0_14 = arith.constant 0 : index
    %c0_15 = arith.constant 0 : index
    %23 = vector.load %arg6[%c0_14, %c0_15] : memref<64x4xbf16, #tpu.memory_space<vmem>>, vector<64x4xbf16>
    %cst_16 = arith.constant dense<0.000000e+00> : vector<256x4xf32>
    %24 = tpu.matmul %22, %23, %cst_16 {dimension_numbers = #tpu.dot_dimension_numbers<[1], [0], [0], [1], [0, 0, 1, 1], [], []>} : vector<256x64xbf16>, vector<64x4xbf16>, vector<256x4xf32> -> vector<256x4xf32>
    %c0_17 = arith.constant 0 : index
    %c0_18 = arith.constant 0 : index
    %25 = vector.load %arg7[%c0_17, %c0_18] : memref<1x4xf32, #tpu.memory_space<vmem>>, vector<1x4xf32>
    %26 = vector.broadcast %25 : vector<1x4xf32> to vector<256x4xf32>
    %27 = arith.addf %24, %26 : vector<256x4xf32>
    %28 = tpu.iota {dimensions = array<i32: 1>} : vector<256x4xi32>
    %c1_i32 = arith.constant 1 : i32
    %29 = vector.broadcast %c1_i32 : i32 to vector<256x4xi32>
    %30 = arith.cmpi slt, %28, %29 : vector<256x4xi32>
    %31 = arith.negf %27 : vector<256x4xf32>
    %32 = math.exp %31 : vector<256x4xf32>
    %cst_19 = arith.constant 1.000000e+00 : f32
    %33 = vector.broadcast %cst_19 : f32 to vector<256x4xf32>
    %34 = arith.addf %33, %32 : vector<256x4xf32>
    %35 = arith.divf %33, %34 : vector<256x4xf32>
    %36 = arith.select %30, %35, %27 : vector<256x4xi1>, vector<256x4xf32>
    %c0_20 = arith.constant 0 : index
    %c0_21 = arith.constant 0 : index
    %37 = vector.load %arg8[%c0_20, %c0_21] : memref<256x4xf32, #tpu.memory_space<vmem>>, vector<256x4xf32>
    tpu.vector_store %arg8[%c0_20, %c0_21], %36 {strides = array<i32>} : memref<256x4xf32, #tpu.memory_space<vmem>>, vector<256x4xf32>,
    return
  }
  func.func @transform_0(%arg0: i32) -> (i32, i32) {
    %c0_i32 = arith.constant 0 : i32
    %c0_i32_0 = arith.constant 0 : i32
    return %arg0, %c0_i32 : i32, i32
  }
  func.func @transform_1(%arg0: i32) -> (i32, i32) {
    %c0_i32 = arith.constant 0 : i32
    %c0_i32_0 = arith.constant 0 : i32
    %c0_i32_1 = arith.constant 0 : i32
    return %c0_i32, %c0_i32_0 : i32, i32
  }
  func.func @transform_2(%arg0: i32) -> (i32, i32) {
    %c0_i32 = arith.constant 0 : i32
    %c0_i32_0 = arith.constant 0 : i32
    %c0_i32_1 = arith.constant 0 : i32
    return %c0_i32, %c0_i32_0 : i32, i32
  }
  func.func @transform_3(%arg0: i32) -> (i32, i32) {
    %c0_i32 = arith.constant 0 : i32
    %c0_i32_0 = arith.constant 0 : i32
    %c0_i32_1 = arith.constant 0 : i32
    return %c0_i32, %c0_i32_0 : i32, i32
  }
  func.func @transform_4(%arg0: i32) -> (i32, i32) {
    %c0_i32 = arith.constant 0 : i32
    %c0_i32_0 = arith.constant 0 : i32
    %c0_i32_1 = arith.constant 0 : i32
    return %c0_i32, %c0_i32_0 : i32, i32
  }
  func.func @transform_5(%arg0: i32) -> (i32, i32) {
    %c0_i32 = arith.constant 0 : i32
    %c0_i32_0 = arith.constant 0 : i32
    %c0_i32_1 = arith.constant 0 : i32
    return %c0_i32, %c0_i32_0 : i32, i32
  }
  func.func @transform_6(%arg0: i32) -> (i32, i32) {
    %c0_i32 = arith.constant 0 : i32
    %c0_i32_0 = arith.constant 0 : i32
    %c0_i32_1 = arith.constant 0 : i32
    return %c0_i32, %c0_i32_0 : i32, i32
  }
  func.func @transform_7(%arg0: i32) -> (i32, i32) {
    %c0_i32 = arith.constant 0 : i32
    %c0_i32_0 = arith.constant 0 : i32
    return %arg0, %c0_i32 : i32, i32
  }
}

</mosaic_0001>

<bundles_post_ra>
// kernel: cnn_3d_rec7_forward.4
= control target key start
LH: loop header
LB: loop body
LE: loop exit
PB: predicated region body
PF: predicated region fallthrough
CT: control target
= control target key end

     0   :  { %s1767_s12 = smov 0   ;;  %s2127_s0 = inlined_call_operand.vmem [shape: bf16[2048,27], index: 0, kind: input, shape index: {}]   ;;  %s2128_s1 = inlined_call_operand.vmem [shape: bf16[27,64], index: 1, kind: input, shape index: {}]   ;;  %s2129_s2 = inlined_call_operand.vmem [shape: f32[1,64], index: 2, kind: input, shape index: {}]   ;;  %s2130_s3 = inlined_call_operand.vmem [shape: bf16[2048,64], index: 3, kind: output, shape index: {}]  }
   0x1 LB: > { %s1383_s13 = sadd.s32 4294967295, %s1744_s12   ;;  %p1387_p0 = scmp.ge.s32.totalorder %s1744_s12, 1  ;;  %s1744_s12 = sphi %s1767_s12, %s13_s12  }
   0x2   : > { %p138_p1 = scmp.lt.s32.totalorder %s1744_s12, 5 }
   0x4   : > { %p139_p2 = pnand %p1387_p0, %p138_p1 }
   0x5   : > { %v1704_v0 = vld [vmem:[%s2128_s1] sm:$0xff] (!%p139_p2)   ;;  %vm518_vm0 = vcmask (!%p139_p2), 1044480   ;;  %v1705_v1 = vld [vmem:[%s2128_s1 + $0x8] sm:$0x3f] (!%p139_p2)   ;;  %vm519_vm1 = vcmask (!%p139_p2), 1045504   ;;  %s1388_s18 = sshll.u32 (!%p139_p2), %s1383_s13, 6 }
   0x6   : > { %142 = sbr.rel (%p139_p2) target bundleno = 317 (0x13d), region = 32  ;;  %1623 = vmatprep.subr.bf16.mxu0 (!%p139_p2), %v1704_v0  ;;  %1691 = vmatprep.subr.bf16.mxu1 (!%p139_p2), %v1704_v0  ;;  %v1746_v2 = vmov (!%p139_p2), 65535   ;;  %p163_p3 = scmp.lt.s32.totalorder (!%p139_p2), %s1388_s18, 255  ;;  %vm421_vm2 = vcmask (!%p139_p2), 220160   ;;  %v1858_v38 = vld [vmem:[%s2129_s2] ss:$0 sm:$0xff] (!%p139_p2) }
   0x7   : > { %1624 = vmatpush3.bf16.msra.mxu0 (!%p139_p2), %v1704_v0  ;;  %1693 = vmatpush3.bf16.msra.mxu1 (!%p139_p2), %v1704_v0  ;;  %v520_v3 = vsel (!%p139_p2), %vm518_vm0, 4294967295, %v1746_v2  ;;  %vm1262_vm3 = vcmask (!%p139_p2), 519168  }
   0x8   : > { %v521_v4 = vsel (!%p139_p2), %vm519_vm1, %v520_v3, 0 }
   0x9   : > { %v523_v5 = vand.u32 (!%p139_p2), %v1705_v1, %v521_v4 }
   0xb   : > { %1625 = vmatprep.subr.bf16.mxu0 (!%p139_p2), %v523_v5  ;;  %1692 = vmatprep.subr.bf16.mxu1 (!%p139_p2), %v523_v5 }
   0xc   : > { %1626 = vmatpush3.bf16.msra.mxu0 (!%p139_p2), %v523_v5  ;;  %1694 = vmatpush3.bf16.msra.mxu1 (!%p139_p2), %v523_v5 }
   0xd   : > { %s2132_s18 = smov (!%p163_p3, %s1388_s18), 255 }
   0xe   : > { %s1389_s19 = sshll.u32 %s2132_s18, 2 }
   0xf   : > { %s1789_s22 = scalar_lea.vmem %s2127_s0, %s1389_s19  ;;  %s1870_s27 = scalar_lea.vmem %s2130_s3, %s1389_s19 }
  0x10   : > { %v1706_v6 = vld [vmem:[%s1789_s22] sm:$0xff]   ;;  %v1708_v8 = vld [vmem:[%s1789_s22 + $0x8] sm:$0xff]   ;;  %v1710_v10 = vld [vmem:[%s1789_s22 + $0x10] sm:$0xff]  }
  0x11   : > { %v1707_v7 = vld [vmem:[%s1789_s22 + $0x80] sm:$0xff]   ;;  %1627 = vmatprep.mubr.msk.bf16.mxu0 %vm421_vm2, %v1706_v6  ;;  %v1709_v9 = vld [vmem:[%s1789_s22 + $0x88] sm:$0xff]   ;;  %v1711_v11 = vld [vmem:[%s1789_s22 + $0x90] sm:$0xff]  }
  0x12   : > { %1659 = vmatprep.mubr.msk.bf16.mxu1 %vm421_vm2, %v1707_v7  ;;  %1628 = vmatmul.mubr.msk.bf16.vlgmr.msra.gmra.mrb[0].mxu0 %vm421_vm2, %v1708_v8  ;;  %v1712_v12 = vld [vmem:[%s1789_s22 + $0x18] sm:$0xff]   ;;  %v1714_v14 = vld [vmem:[%s1789_s22 + $0x20] sm:$0xff]   ;;  %v1716_v16 = vld [vmem:[%s1789_s22 + $0x28] sm:$0xff]  }
  0x13   : > { %1660 = vmatmul.mubr.msk.bf16.vlgmr.msra.gmra.mrb[0].mxu1 %vm421_vm2, %v1709_v9  ;;  %1631 = vmatprep.mubr.msk.bf16.mxu0 %vm421_vm2, %v1710_v10  ;;  %v1713_v13 = vld [vmem:[%s1789_s22 + $0x98] sm:$0xff]   ;;  %v1715_v15 = vld [vmem:[%s1789_s22 + $0xa0] sm:$0xff]   ;;  %v1717_v17 = vld [vmem:[%s1789_s22 + $0xa8] sm:$0xff]  }
  0x14   : > { %1663 = vmatprep.mubr.msk.bf16.mxu1 %vm421_vm2, %v1711_v11  ;;  %v1718_v18 = vld [vmem:[%s1789_s22 + $0x30] sm:$0xff]   ;;  %v1720_v20 = vld [vmem:[%s1789_s22 + $0x38] sm:$0xff]   ;;  %v1722_v22 = vld [vmem:[%s1789_s22 + $0x40] sm:$0xff]  }
  0x15   : > { %v1719_v19 = vld [vmem:[%s1789_s22 + $0xb0] sm:$0xff]   ;;  %v1721_v21 = vld [vmem:[%s1789_s22 + $0xb8] sm:$0xff]   ;;  %v1723_v23 = vld [vmem:[%s1789_s22 + $0xc0] sm:$0xff]  }
  0x16   : > { %v1724_v24 = vld [vmem:[%s1789_s22 + $0x48] sm:$0xff]   ;;  %v1726_v26 = vld [vmem:[%s1789_s22 + $0x50] sm:$0xff]   ;;  %v1728_v28 = vld [vmem:[%s1789_s22 + $0x58] sm:$0xff]  }
  0x17   : > { %v1725_v25 = vld [vmem:[%s1789_s22 + $0xc8] sm:$0xff]   ;;  %v1727_v27 = vld [vmem:[%s1789_s22 + $0xd0] sm:$0xff]   ;;  %v1729_v29 = vld [vmem:[%s1789_s22 + $0xd8] sm:$0xff]  }
  0x18   : > { %v1730_v30 = vld [vmem:[%s1789_s22 + $0x60] sm:$0xff]   ;;  %v1732_v32 = vld [vmem:[%s1789_s22 + $0x68] sm:$0xff]   ;;  %v1734_v34 = vld [vmem:[%s1789_s22 + $0x70] sm:$0xff]  }
  0x19   : > { %v1731_v31 = vld [vmem:[%s1789_s22 + $0xe0] sm:$0xff]   ;;  %v1733_v33 = vld [vmem:[%s1789_s22 + $0xe8] sm:$0xff]   ;;  %v1735_v35 = vld [vmem:[%s1789_s22 + $0xf0] sm:$0xff]  }
  0x1a   : > { %1632 = vmatmul.mubr.msk.bf16.gmra.mrb[4].mxu0 %vm421_vm2, %v1712_v12  ;;  %v1736_v36 = vld [vmem:[%s1789_s22 + $0x78] sm:$0xff]  }
  0x1b   : > { %1664 = vmatmul.mubr.msk.bf16.gmra.mrb[4].mxu1 %vm421_vm2, %v1713_v13  ;;  %1635 = vmatprep.mubr.msk.bf16.mxu0 %vm421_vm2, %v1714_v14  ;;  %v1737_v37 = vld [vmem:[%s1789_s22 + $0xf8] sm:$0xff]  }
  0x1c   : > { %1667 = vmatprep.mubr.msk.bf16.mxu1 %vm421_vm2, %v1715_v15 }
  0x22   : > { %1636 = vmatmul.mubr.msk.bf16.gmra.mrb[8].mxu0 %vm421_vm2, %v1716_v16 }
  0x23   : > { %1668 = vmatmul.mubr.msk.bf16.gmra.mrb[8].mxu1 %vm421_vm2, %v1717_v17  ;;  %1639 = vmatprep.mubr.msk.bf16.mxu0 %vm421_vm2, %v1718_v18 }
  0x24   : > { %1671 = vmatprep.mubr.msk.bf16.mxu1 %vm421_vm2, %v1719_v19 }
  0x2a   : > { %1640 = vmatmul.mubr.msk.bf16.gmra.mrb[12].mxu0 %vm421_vm2, %v1720_v20 }
  0x2b   : > { %1672 = vmatmul.mubr.msk.bf16.gmra.mrb[12].mxu1 %vm421_vm2, %v1721_v21  ;;  %1643 = vmatprep.mubr.msk.bf16.mxu0 %vm421_vm2, %v1722_v22 }
  0x2c   : > { %1675 = vmatprep.mubr.msk.bf16.mxu1 %vm421_vm2, %v1723_v23 }
  0x32   : > { %1644 = vmatmul.mubr.msk.bf16.gmra.mrb[16].mxu0 %vm421_vm2, %v1724_v24 }
  0x33   : > { %1676 = vmatmul.mubr.msk.bf16.gmra.mrb[16].mxu1 %vm421_vm2, %v1725_v25  ;;  %1647 = vmatprep.mubr.msk.bf16.mxu0 %vm421_vm2, %v1726_v26 }
  0x34   : > { %1679 = vmatprep.mubr.msk.bf16.mxu1 %vm421_vm2, %v1727_v27 }
  0x3a   : > { %1648 = vmatmul.mubr.msk.bf16.gmra.mrb[20].mxu0 %vm421_vm2, %v1728_v28 }
  0x3b   : > { %1680 = vmatmul.mubr.msk.bf16.gmra.mrb[20].mxu1 %vm421_vm2, %v1729_v29  ;;  %1651 = vmatprep.mubr.msk.bf16.mxu0 %vm421_vm2, %v1730_v30 }
  0x3c   : > { %1683 = vmatprep.mubr.msk.bf16.mxu1 %vm421_vm2, %v1731_v31 }
  0x42   : > { %1652 = vmatmul.mubr.msk.bf16.gmra.mrb[24].mxu0 %vm421_vm2, %v1732_v32 }
  0x43   : > { %1684 = vmatmul.mubr.msk.bf16.gmra.mrb[24].mxu1 %vm421_vm2, %v1733_v33  ;;  %1655 = vmatprep.mubr.msk.bf16.mxu0 %vm421_vm2, %v1734_v34 }
  0x44   : > { %1687 = vmatprep.mubr.msk.bf16.mxu1 %vm421_vm2, %v1735_v35 }
  0x4a   : > { %1656 = vmatmul.mubr.msk.bf16.gmra.mrb[28].mxu0 %vm421_vm2, %v1736_v36 }
  0x4b   : > { %1688 = vmatmul.mubr.msk.bf16.gmra.mrb[28].mxu1 %vm421_vm2, %v1737_v37 }
  0xe5   : > { %v1629_v39 = vpop.f32.mrb[0].mxu0 }
  0xe6   : > { %v568_v40 = vadd.f32 %v1629_v39, %v1858_v38  ;;  %v1661_v41 = vpop.f32.mrb[0].mxu1  ;;  %v559_v42 = vpop.f32.mrb[1].mxu0 }
  0xe7   : > { %v696_v43 = vadd.f32 %v1661_v41, %v1858_v38  ;;  %v560_v44 = vadd.f32 %v1858_v38, %v559_v42  ;;  %v687_v45 = vpop.f32.mrb[1].mxu1  ;;  %v1630_v46 = vpop.f32.mrb[2].mxu0 }
  0xe8   : > { %vm816_vm4 = vcmp.ge.f32.partialorder %v568_v40, 0.0  ;;  %v880_v47 = vmul.f32 0.01, %v568_v40  ;;  %v688_v48 = vadd.f32 %v1858_v38, %v687_v45  ;;  %v571_v49 = vadd.f32 %v1630_v46, %v1858_v38  ;;  %v1662_v50 = vpop.f32.mrb[2].mxu1  ;;  %v562_v51 = vpop.f32.mrb[3].mxu0 }
  0xe9   : > { %vm848_vm5 = vcmp.ge.f32.partialorder %v696_v43, 0.0  ;;  %v912_v52 = vmul.f32 0.01, %v696_v43  ;;  %vm814_vm6 = vcmp.ge.f32.partialorder %v560_v44, 0.0  ;;  %v878_v53 = vmul.f32 0.01, %v560_v44 }
  0xea   : > { %v944_v54 = vsel %vm816_vm4, %v568_v40, %v880_v47  ;;  %vm846_vm7 = vcmp.ge.f32.partialorder %v688_v48, 0.0  ;;  %v910_v55 = vmul.f32 0.01, %v688_v48  ;;  %vm817_vm8 = vcmp.ge.f32.partialorder %v571_v49, 0.0  ;;  %v690_v56 = vpop.f32.mrb[3].mxu1 }
  0xeb   : > { %v1527_v57 = vpack.c.bf16 %v944_v54, %v944_v54  ;;  %v976_v58 = vsel %vm848_vm5, %v696_v43, %v912_v52  ;;  %v942_v59 = vsel %vm814_vm6, %v560_v44, %v878_v53  ;;  %v881_v60 = vmul.f32 0.01, %v571_v49 }
  0xec   : > { %v1559_v61 = vpack.c.bf16 %v976_v58, %v976_v58  ;;  %v1525_v62 = vpack.c.bf16 %v942_v59, %v942_v59  ;;  %v974_v63 = vsel %vm846_vm7, %v688_v48, %v910_v55  ;;  %v699_v0 = vadd.f32 %v1662_v50, %v1858_v38 }
  0xed   : > { %1265 = vst.msk [vmem:[%s1870_s27 + $0x8] sm:$0xf] %vm1262_vm3, %v1527_v57  ;;  %v1557_v1 = vpack.c.bf16 %v974_v63, %v974_v63  ;;  %v945_v2 = vsel %vm817_vm8, %v571_v49, %v881_v60  ;;  %v563_v3 = vadd.f32 %v1858_v38, %v562_v51  ;;  %v691_v4 = vadd.f32 %v1858_v38, %v690_v56  ;;  %v1633_v5 = vpop.f32.mrb[4].mxu0 }
  0xee   : > { %1297 = vst.msk [vmem:[%s1870_s27 + $0x88] sm:$0xf] %vm1262_vm3, %v1559_v61  ;;  %1263 = vst.msk [vmem:[%s1870_s27] sm:$0xf] %vm1262_vm3, %v1525_v62  ;;  %v1528_v6 = vpack.c.bf16 %v945_v2, %v945_v2  ;;  %vm849_vm9 = vcmp.ge.f32.partialorder %v699_v0, 0.0  ;;  %v584_v8 = vadd.f32 %v1633_v5, %v1858_v38  ;;  %v1665_v9 = vpop.f32.mrb[4].mxu1 }
  0xef   : > { %v913_v7 = vmul.f32 0.01, %v699_v0  ;;  %v575_v10 = vpop.f32.mrb[5].mxu0  ;;  %1295 = vst.msk [vmem:[%s1870_s27 + $0x80] sm:$0xf] %vm1262_vm3, %v1557_v1  ;;  %vm815_vm10 = vcmp.ge.f32.partialorder %v563_v3, 0.0  ;;  %v712_v15 = vadd.f32 %v1665_v9, %v1858_v38 }
  0xf0   : > { %v879_v11 = vmul.f32 0.01, %v563_v3  ;;  %vm847_vm11 = vcmp.ge.f32.partialorder %v691_v4, 0.0  ;;  %v911_v12 = vmul.f32 0.01, %v691_v4  ;;  %vm820_vm12 = vcmp.ge.f32.partialorder %v584_v8, 0.0 }
  0xf1   : > { %1266 = vst.msk [vmem:[%s1870_s27 + $0xc] sm:$0xf] %vm1262_vm3, %v1528_v6  ;;  %v977_v13 = vsel %vm849_vm9, %v699_v0, %v913_v7  ;;  %v884_v14 = vmul.f32 0.01, %v584_v8  ;;  %v703_v16 = vpop.f32.mrb[5].mxu1  ;;  %v1634_v17 = vpop.f32.mrb[6].mxu0  ;;  %v576_v21 = vadd.f32 %v1858_v38, %v575_v10 }
  0xf2   : > { %v1560_v18 = vpack.c.bf16 %v977_v13, %v977_v13  ;;  %v943_v19 = vsel %vm815_vm10, %v563_v3, %v879_v11  ;;  %v975_v20 = vsel %vm847_vm11, %v691_v4, %v911_v12  ;;  %v1666_v22 = vpop.f32.mrb[6].mxu1  ;;  %v578_v23 = vpop.f32.mrb[7].mxu0  ;;  %vm852_vm13 = vcmp.ge.f32.partialorder %v712_v15, 0.0 }
  0xf3   : > { %v1526_v24 = vpack.c.bf16 %v943_v19, %v943_v19  ;;  %v1558_v25 = vpack.c.bf16 %v975_v20, %v975_v20  ;;  %v948_v26 = vsel %vm820_vm12, %v584_v8, %v884_v14  ;;  %v706_v27 = vpop.f32.mrb[7].mxu1  ;;  %v916_v29 = vmul.f32 0.01, %v712_v15 }
  0xf4   : > { %1298 = vst.msk [vmem:[%s1870_s27 + $0x8c] sm:$0xf] %vm1262_vm3, %v1560_v18  ;;  %v1531_v28 = vpack.c.bf16 %v948_v26, %v948_v26  ;;  %vm818_vm14 = vcmp.ge.f32.partialorder %v576_v21, 0.0  ;;  %v882_v30 = vmul.f32 0.01, %v576_v21  ;;  %v704_v31 = vadd.f32 %v1858_v38, %v703_v16 }
  0xf5   : > { %1264 = vst.msk [vmem:[%s1870_s27 + $0x4] sm:$0xf] %vm1262_vm3, %v1526_v24  ;;  %1296 = vst.msk [vmem:[%s1870_s27 + $0x84] sm:$0xf] %vm1262_vm3, %v1558_v25  ;;  %v587_v32 = vadd.f32 %v1634_v17, %v1858_v38  ;;  %v715_v33 = vadd.f32 %v1666_v22, %v1858_v38  ;;  %v579_v34 = vadd.f32 %v1858_v38, %v578_v23  ;;  %v1637_v39 = vpop.f32.mrb[8].mxu0 }
  0xf6   : > { %1269 = vst.msk [vmem:[%s1870_s27 + $0x18] sm:$0xf] %vm1262_vm3, %v1531_v28  ;;  %v980_v35 = vsel %vm852_vm13, %v712_v15, %v916_v29  ;;  %v946_v36 = vsel %vm818_vm14, %v576_v21, %v882_v30  ;;  %v707_v37 = vadd.f32 %v1858_v38, %v706_v27  ;;  %vm850_vm15 = vcmp.ge.f32.partialorder %v704_v31, 0.0  ;;  %v1669_v43 = vpop.f32.mrb[8].mxu1  ;;  %v591_v44 = vpop.f32.mrb[9].mxu0 }
  0xf7   : > { %v1563_v40 = vpack.c.bf16 %v980_v35, %v980_v35  ;;  %v1529_v41 = vpack.c.bf16 %v946_v36, %v946_v36  ;;  %v914_v42 = vmul.f32 0.01, %v704_v31  ;;  %vm821_vm0 = vcmp.ge.f32.partialorder %v587_v32, 0.0  ;;  %v719_v49 = vpop.f32.mrb[9].mxu1  ;;  %v1638_v50 = vpop.f32.mrb[10].mxu0 }
  0xf8   : > { %v885_v45 = vmul.f32 0.01, %v587_v32  ;;  %vm853_vm1 = vcmp.ge.f32.partialorder %v715_v33, 0.0  ;;  %v917_v46 = vmul.f32 0.01, %v715_v33  ;;  %vm819_vm2 = vcmp.ge.f32.partialorder %v579_v34, 0.0 }
  0xf9   : > { %1301 = vst.msk [vmem:[%s1870_s27 + $0x98] sm:$0xf] %vm1262_vm3, %v1563_v40  ;;  %1267 = vst.msk [vmem:[%s1870_s27 + $0x10] sm:$0xf] %vm1262_vm3, %v1529_v41  ;;  %v978_v47 = vsel %vm850_vm15, %v704_v31, %v914_v42  ;;  %v883_v48 = vmul.f32 0.01, %v579_v34  ;;  %v600_v60 = vadd.f32 %v1637_v39, %v1858_v38  ;;  %v728_v0 = vadd.f32 %v1669_v43, %v1858_v38 }
  0xfa   : > { %vm851_vm4 = vcmp.ge.f32.partialorder %v707_v37, 0.0  ;;  %v1561_v51 = vpack.c.bf16 %v978_v47, %v978_v47  ;;  %v949_v52 = vsel %vm821_vm0, %v587_v32, %v885_v45  ;;  %v981_v53 = vsel %vm853_vm1, %v715_v33, %v917_v46  ;;  %v1670_v55 = vpop.f32.mrb[10].mxu1  ;;  %v594_v56 = vpop.f32.mrb[11].mxu0 }
  0xfb   : > { %v915_v54 = vmul.f32 0.01, %v707_v37  ;;  %v1532_v57 = vpack.c.bf16 %v949_v52, %v949_v52  ;;  %v1564_v58 = vpack.c.bf16 %v981_v53, %v981_v53  ;;  %v947_v59 = vsel %vm819_vm2, %v579_v34, %v883_v48  ;;  %v722_v61 = vpop.f32.mrb[11].mxu1 }
  0xfc   : > { %1299 = vst.msk [vmem:[%s1870_s27 + $0x90] sm:$0xf] %vm1262_vm3, %v1561_v51  ;;  %v1530_v62 = vpack.c.bf16 %v947_v59, %v947_v59  ;;  %v592_v1 = vadd.f32 %v1858_v38, %v591_v44  ;;  %vm824_vm5 = vcmp.ge.f32.partialorder %v600_v60, 0.0  ;;  %v888_v3 = vmul.f32 0.01, %v600_v60 }
  0xfd   : > { %v979_v63 = vsel %vm851_vm4, %v707_v37, %v915_v54  ;;  %1270 = vst.msk [vmem:[%s1870_s27 + $0x1c] sm:$0xf] %vm1262_vm3, %v1532_v57  ;;  %1302 = vst.msk [vmem:[%s1870_s27 + $0x9c] sm:$0xf] %vm1262_vm3, %v1564_v58  ;;  %v720_v4 = vadd.f32 %v1858_v38, %v719_v49  ;;  %vm856_vm6 = vcmp.ge.f32.partialorder %v728_v0, 0.0  ;;  %v603_v9 = vadd.f32 %v1638_v50, %v1858_v38  ;;  %v1641_v10 = vpop.f32.mrb[12].mxu0 }
  0xfe   : > { %v1562_v2 = vpack.c.bf16 %v979_v63, %v979_v63  ;;  %1268 = vst.msk [vmem:[%s1870_s27 + $0x14] sm:$0xf] %vm1262_vm3, %v1530_v62  ;;  %v920_v5 = vmul.f32 0.01, %v728_v0  ;;  %vm822_vm7 = vcmp.ge.f32.partialorder %v592_v1, 0.0  ;;  %v952_v7 = vsel %vm824_vm5, %v600_v60, %v888_v3  ;;  %v1673_v11 = vpop.f32.mrb[12].mxu1 }
  0xff   : > { %v886_v6 = vmul.f32 0.01, %v592_v1  ;;  %vm854_vm8 = vcmp.ge.f32.partialorder %v720_v4, 0.0  ;;  %v918_v8 = vmul.f32 0.01, %v720_v4  ;;  %v1535_v12 = vpack.c.bf16 %v952_v7, %v952_v7  ;;  %v607_v16 = vpop.f32.mrb[13].mxu0 }
 0x100   : > { %1300 = vst.msk [vmem:[%s1870_s27 + $0x94] sm:$0xf] %vm1262_vm3, %v1562_v2  ;;  %v984_v13 = vsel %vm856_vm6, %v728_v0, %v920_v5  ;;  %v731_v15 = vadd.f32 %v1670_v55, %v1858_v38  ;;  %v735_v17 = vpop.f32.mrb[13].mxu1  ;;  %vm825_vm9 = vcmp.ge.f32.partialorder %v603_v9, 0.0  ;;  %v1642_v21 = vpop.f32.mrb[14].mxu0  ;;  %v595_v27 = vadd.f32 %v1858_v38, %v594_v56 }
 0x101   : > { %v950_v14 = vsel %vm822_vm7, %v592_v1, %v886_v6  ;;  %v1567_v18 = vpack.c.bf16 %v984_v13, %v984_v13  ;;  %v982_v20 = vsel %vm854_vm8, %v720_v4, %v918_v8  ;;  %v1674_v22 = vpop.f32.mrb[14].mxu1  ;;  %1273 = vst.msk [vmem:[%s1870_s27 + $0x28] sm:$0xf] %vm1262_vm3, %v1535_v12  ;;  %v889_v24 = vmul.f32 0.01, %v603_v9  ;;  %v610_v26 = vpop.f32.mrb[15].mxu0 }
 0x102   : > { %v1533_v19 = vpack.c.bf16 %v950_v14, %v950_v14  ;;  %v1565_v23 = vpack.c.bf16 %v982_v20, %v982_v20  ;;  %vm857_vm10 = vcmp.ge.f32.partialorder %v731_v15, 0.0  ;;  %v921_v25 = vmul.f32 0.01, %v731_v15  ;;  %v738_v31 = vpop.f32.mrb[15].mxu1 }
 0x103   : > { %1305 = vst.msk [vmem:[%s1870_s27 + $0xa8] sm:$0xf] %vm1262_vm3, %v1567_v18  ;;  %v723_v28 = vadd.f32 %v1858_v38, %v722_v61  ;;  %v616_v29 = vadd.f32 %v1641_v10, %v1858_v38  ;;  %v744_v30 = vadd.f32 %v1673_v11, %v1858_v38  ;;  %v953_v32 = vsel %vm825_vm9, %v603_v9, %v889_v24 }
 0x104   : > { %1271 = vst.msk [vmem:[%s1870_s27 + $0x20] sm:$0xf] %vm1262_vm3, %v1533_v19  ;;  %1303 = vst.msk [vmem:[%s1870_s27 + $0xa0] sm:$0xf] %vm1262_vm3, %v1565_v23  ;;  %v985_v33 = vsel %vm857_vm10, %v731_v15, %v921_v25  ;;  %v608_v34 = vadd.f32 %v1858_v38, %v607_v16  ;;  %v736_v35 = vadd.f32 %v1858_v38, %v735_v17  ;;  %vm823_vm11 = vcmp.ge.f32.partialorder %v595_v27, 0.0 }
 0x105   : > { %v1536_v36 = vpack.c.bf16 %v953_v32, %v953_v32  ;;  %v1568_v37 = vpack.c.bf16 %v985_v33, %v985_v33  ;;  %v887_v39 = vmul.f32 0.01, %v595_v27  ;;  %vm855_vm12 = vcmp.ge.f32.partialorder %v723_v28, 0.0  ;;  %v1645_v44 = vpop.f32.mrb[16].mxu0 }
 0x106   : > { %v919_v40 = vmul.f32 0.01, %v723_v28  ;;  %vm828_vm13 = vcmp.ge.f32.partialorder %v616_v29, 0.0  ;;  %v892_v41 = vmul.f32 0.01, %v616_v29  ;;  %vm860_vm14 = vcmp.ge.f32.partialorder %v744_v30, 0.0 }
 0x107   : > { %1274 = vst.msk [vmem:[%s1870_s27 + $0x2c] sm:$0xf] %vm1262_vm3, %v1536_v36  ;;  %1306 = vst.msk [vmem:[%s1870_s27 + $0xac] sm:$0xf] %vm1262_vm3, %v1568_v37  ;;  %v951_v42 = vsel %vm823_vm11, %v595_v27, %v887_v39  ;;  %v924_v43 = vmul.f32 0.01, %v744_v30  ;;  %v619_v60 = vadd.f32 %v1642_v21, %v1858_v38  ;;  %v747_v0 = vadd.f32 %v1674_v22, %v1858_v38 }
 0x108   : > { %vm826_vm15 = vcmp.ge.f32.partialorder %v608_v34, 0.0  ;;  %v1677_v45 = vpop.f32.mrb[16].mxu1  ;;  %v1534_v46 = vpack.c.bf16 %v951_v42, %v951_v42  ;;  %v983_v47 = vsel %vm855_vm12, %v723_v28, %v919_v40  ;;  %v956_v48 = vsel %vm828_vm13, %v616_v29, %v892_v41  ;;  %v623_v50 = vpop.f32.mrb[17].mxu0 }
 0x109   : > { %v890_v49 = vmul.f32 0.01, %v608_v34  ;;  %v751_v51 = vpop.f32.mrb[17].mxu1  ;;  %v1566_v52 = vpack.c.bf16 %v983_v47, %v983_v47  ;;  %v1539_v53 = vpack.c.bf16 %v956_v48, %v956_v48  ;;  %v988_v54 = vsel %vm860_vm14, %v744_v30, %v924_v43  ;;  %v1646_v55 = vpop.f32.mrb[18].mxu0 }
 0x10a   : > { %vm858_vm0 = vcmp.ge.f32.partialorder %v736_v35, 0.0  ;;  %v1678_v56 = vpop.f32.mrb[18].mxu1  ;;  %1272 = vst.msk [vmem:[%s1870_s27 + $0x24] sm:$0xf] %vm1262_vm3, %v1534_v46  ;;  %v1571_v57 = vpack.c.bf16 %v988_v54, %v988_v54  ;;  %v922_v59 = vmul.f32 0.01, %v736_v35  ;;  %v611_v1 = vadd.f32 %v1858_v38, %v610_v26 }
 0x10b   : > { %v954_v58 = vsel %vm826_vm15, %v608_v34, %v890_v49  ;;  %v626_v61 = vpop.f32.mrb[19].mxu0  ;;  %v1945_v62 = vpop.f32.mrb[19].mxu1  ;;  %1304 = vst.msk [vmem:[%s1870_s27 + $0xa4] sm:$0xf] %vm1262_vm3, %v1566_v52  ;;  %1277 = vst.msk [vmem:[%s1870_s27 + $0x38] sm:$0xf] %vm1262_vm3, %v1539_v53  ;;  %v739_v2 = vadd.f32 %v1858_v38, %v738_v31  ;;  %v632_v5 = vadd.f32 %v1645_v44, %v1858_v38 }
 0x10c   : > { %v1537_v63 = vpack.c.bf16 %v954_v58, %v954_v58  ;;  %1309 = vst.msk [vmem:[%s1870_s27 + $0xb8] sm:$0xf] %vm1262_vm3, %v1571_v57  ;;  %v986_v3 = vsel %vm858_vm0, %v736_v35, %v922_v59  ;;  %vm829_vm1 = vcmp.ge.f32.partialorder %v619_v60, 0.0  ;;  %v893_v4 = vmul.f32 0.01, %v619_v60 }
 0x10d   : > { %v1569_v6 = vpack.c.bf16 %v986_v3, %v986_v3  ;;  %vm861_vm2 = vcmp.ge.f32.partialorder %v747_v0, 0.0  ;;  %v925_v7 = vmul.f32 0.01, %v747_v0  ;;  %vm827_vm4 = vcmp.ge.f32.partialorder %v611_v1, 0.0  ;;  %v1649_v11 = vpop.f32.mrb[20].mxu0 }
 0x10e   : > { %1275 = vst.msk [vmem:[%s1870_s27 + $0x30] sm:$0xf] %vm1262_vm3, %v1537_v63  ;;  %v957_v8 = vsel %vm829_vm1, %v619_v60, %v893_v4  ;;  %v891_v9 = vmul.f32 0.01, %v611_v1  ;;  %vm859_vm5 = vcmp.ge.f32.partialorder %v739_v2, 0.0  ;;  %vm832_vm6 = vcmp.ge.f32.partialorder %v632_v5, 0.0 }
 0x10f   : > { %v923_v10 = vmul.f32 0.01, %v739_v2  ;;  %1307 = vst.msk [vmem:[%s1870_s27 + $0xb0] sm:$0xf] %vm1262_vm3, %v1569_v6  ;;  %v1540_v12 = vpack.c.bf16 %v957_v8, %v957_v8  ;;  %v989_v13 = vsel %vm861_vm2, %v747_v0, %v925_v7  ;;  %v896_v14 = vmul.f32 0.01, %v632_v5 }
 0x110   : > { %v1681_v15 = vpop.f32.mrb[20].mxu1  ;;  %v639_v16 = vpop.f32.mrb[21].mxu0  ;;  %v1572_v17 = vpack.c.bf16 %v989_v13, %v989_v13  ;;  %v955_v18 = vsel %vm827_vm4, %v611_v1, %v891_v9  ;;  %v760_v20 = vadd.f32 %v1677_v45, %v1858_v38  ;;  %v624_v26 = vadd.f32 %v1858_v38, %v623_v50 }
 0x111   : > { %v987_v19 = vsel %vm859_vm5, %v739_v2, %v923_v10  ;;  %v1963_v21 = vpop.f32.mrb[21].mxu1  ;;  %v1965_v22 = vpop.f32.mrb[22].mxu0  ;;  %1278 = vst.msk [vmem:[%s1870_s27 + $0x3c] sm:$0xf] %vm1262_vm3, %v1540_v12  ;;  %v1538_v23 = vpack.c.bf16 %v955_v18, %v955_v18  ;;  %v960_v25 = vsel %vm832_vm6, %v632_v5, %v896_v14  ;;  %v752_v31 = vadd.f32 %v1858_v38, %v751_v51 }
 0x112   : > { %v1570_v24 = vpack.c.bf16 %v987_v19, %v987_v19  ;;  %v1970_v27 = vpop.f32.mrb[22].mxu1  ;;  %v1972_v28 = vpop.f32.mrb[23].mxu0  ;;  %1310 = vst.msk [vmem:[%s1870_s27 + $0xbc] sm:$0xf] %vm1262_vm3, %v1572_v17  ;;  %v1543_v29 = vpack.c.bf16 %v960_v25, %v960_v25  ;;  %vm864_vm7 = vcmp.ge.f32.partialorder %v760_v20, 0.0  ;;  %vm830_vm8 = vcmp.ge.f32.partialorder %v624_v26, 0.0 }
 0x113   : > { %v928_v30 = vmul.f32 0.01, %v760_v20  ;;  %v1977_v32 = vpop.f32.mrb[23].mxu1  ;;  %1276 = vst.msk [vmem:[%s1870_s27 + $0x34] sm:$0xf] %vm1262_vm3, %v1538_v23  ;;  %v635_v34 = vadd.f32 %v1646_v55, %v1858_v38  ;;  %v763_v35 = vadd.f32 %v1678_v56, %v1858_v38  ;;  %vm862_vm9 = vcmp.ge.f32.partialorder %v752_v31, 0.0 }
 0x114   : > { %1308 = vst.msk [vmem:[%s1870_s27 + $0xb4] sm:$0xf] %vm1262_vm3, %v1570_v24  ;;  %v894_v33 = vmul.f32 0.01, %v624_v26  ;;  %1281 = vst.msk [vmem:[%s1870_s27 + $0x48] sm:$0xf] %vm1262_vm3, %v1543_v29  ;;  %v627_v39 = vadd.f32 %v1858_v38, %v626_v61  ;;  %v755_v54 = vadd.f32 %v1858_v38, %v1945_v62  ;;  %v648_v55 = vadd.f32 %v1649_v11, %v1858_v38 }
 0x115   : > { %v992_v36 = vsel %vm864_vm7, %v760_v20, %v928_v30  ;;  %v926_v37 = vmul.f32 0.01, %v752_v31  ;;  %vm833_vm10 = vcmp.ge.f32.partialorder %v635_v34, 0.0  ;;  %v897_v42 = vmul.f32 0.01, %v635_v34  ;;  %v1988_v46 = vpop.f32.mrb[24].mxu0 }
 0x116   : > { %v1575_v40 = vpack.c.bf16 %v992_v36, %v992_v36  ;;  %v958_v41 = vsel %vm830_vm8, %v624_v26, %v894_v33  ;;  %vm865_vm11 = vcmp.ge.f32.partialorder %v763_v35, 0.0  ;;  %v929_v45 = vmul.f32 0.01, %v763_v35  ;;  %v1685_v50 = vpop.f32.mrb[24].mxu1  ;;  %v1992_v51 = vpop.f32.mrb[25].mxu0 }
 0x117   : > { %v1541_v43 = vpack.c.bf16 %v958_v41, %v958_v41  ;;  %v990_v44 = vsel %vm862_vm9, %v752_v31, %v926_v37  ;;  %v961_v48 = vsel %vm833_vm10, %v635_v34, %v897_v42  ;;  %vm831_vm12 = vcmp.ge.f32.partialorder %v627_v39, 0.0  ;;  %v1999_v56 = vpop.f32.mrb[25].mxu1  ;;  %v2001_v57 = vpop.f32.mrb[26].mxu0 }
 0x118   : > { %1313 = vst.msk [vmem:[%s1870_s27 + $0xc8] sm:$0xf] %vm1262_vm3, %v1575_v40  ;;  %v1573_v47 = vpack.c.bf16 %v990_v44, %v990_v44  ;;  %v895_v49 = vmul.f32 0.01, %v627_v39  ;;  %v1544_v52 = vpack.c.bf16 %v961_v48, %v961_v48  ;;  %v993_v53 = vsel %vm865_vm11, %v763_v35, %v929_v45  ;;  %v2007_v63 = vpop.f32.mrb[26].mxu1  ;;  %v2009_v0 = vpop.f32.mrb[27].mxu0 }
 0x119   : > { %1279 = vst.msk [vmem:[%s1870_s27 + $0x40] sm:$0xf] %vm1262_vm3, %v1541_v43  ;;  %v1576_v58 = vpack.c.bf16 %v993_v53, %v993_v53  ;;  %v776_v60 = vadd.f32 %v1681_v15, %v1858_v38  ;;  %v640_v61 = vadd.f32 %v1858_v38, %v639_v16  ;;  %vm863_vm13 = vcmp.ge.f32.partialorder %v755_v54, 0.0  ;;  %v2013_v2 = vpop.f32.mrb[27].mxu1 }
 0x11a   : > { %1311 = vst.msk [vmem:[%s1870_s27 + $0xc0] sm:$0xf] %vm1262_vm3, %v1573_v47  ;;  %v959_v59 = vsel %vm831_vm12, %v627_v39, %v895_v49  ;;  %1282 = vst.msk [vmem:[%s1870_s27 + $0x4c] sm:$0xf] %vm1262_vm3, %v1544_v52  ;;  %v927_v1 = vmul.f32 0.01, %v755_v54  ;;  %v768_v7 = vadd.f32 %v1858_v38, %v1963_v21  ;;  %v651_v8 = vadd.f32 %v1965_v22, %v1858_v38 }
 0x11b   : > { %v1542_v62 = vpack.c.bf16 %v959_v59, %v959_v59  ;;  %vm836_vm14 = vcmp.ge.f32.partialorder %v648_v55, 0.0  ;;  %1314 = vst.msk [vmem:[%s1870_s27 + $0xcc] sm:$0xf] %vm1262_vm3, %v1576_v58  ;;  %v900_v3 = vmul.f32 0.01, %v648_v55  ;;  %vm868_vm15 = vcmp.ge.f32.partialorder %v776_v60, 0.0 }
 0x11c   : > { %v932_v4 = vmul.f32 0.01, %v776_v60  ;;  %vm834_vm0 = vcmp.ge.f32.partialorder %v640_v61, 0.0  ;;  %v991_v5 = vsel %vm863_vm13, %v755_v54, %v927_v1  ;;  %v898_v6 = vmul.f32 0.01, %v640_v61 }
 0x11d   : > { %1280 = vst.msk [vmem:[%s1870_s27 + $0x44] sm:$0xf] %vm1262_vm3, %v1542_v62  ;;  %v1574_v9 = vpack.c.bf16 %v991_v5, %v991_v5  ;;  %v964_v10 = vsel %vm836_vm14, %v648_v55, %v900_v3  ;;  %v779_v12 = vadd.f32 %v1970_v27, %v1858_v38  ;;  %vm866_vm1 = vcmp.ge.f32.partialorder %v768_v7, 0.0  ;;  %v1657_v16 = vpop.f32.mrb[28].mxu0 }
 0x11e   : > { %v996_v11 = vsel %vm868_vm15, %v776_v60, %v932_v4  ;;  %v1547_v13 = vpack.c.bf16 %v964_v10, %v964_v10  ;;  %v962_v15 = vsel %vm834_vm0, %v640_v61, %v898_v6  ;;  %v930_v18 = vmul.f32 0.01, %v768_v7  ;;  %v2027_v20 = vpop.f32.mrb[28].mxu1  ;;  %v2037_v24 = vpop.f32.mrb[29].mxu0 }
 0x11f   : > { %v1579_v14 = vpack.c.bf16 %v996_v11, %v996_v11  ;;  %1312 = vst.msk [vmem:[%s1870_s27 + $0xc4] sm:$0xf] %vm1262_vm3, %v1574_v9  ;;  %v1545_v17 = vpack.c.bf16 %v962_v15, %v962_v15  ;;  %vm837_vm2 = vcmp.ge.f32.partialorder %v651_v8, 0.0  ;;  %v901_v19 = vmul.f32 0.01, %v651_v8  ;;  %v2039_v25 = vpop.f32.mrb[29].mxu1 }
 0x120   : > { %1285 = vst.msk [vmem:[%s1870_s27 + $0x58] sm:$0xf] %vm1262_vm3, %v1547_v13  ;;  %vm869_vm4 = vcmp.ge.f32.partialorder %v779_v12, 0.0  ;;  %v933_v21 = vmul.f32 0.01, %v779_v12  ;;  %v643_v22 = vadd.f32 %v1858_v38, %v1972_v28  ;;  %v771_v23 = vadd.f32 %v1858_v38, %v1977_v32  ;;  %v2047_v28 = vpop.f32.mrb[30].mxu0 }
 0x121   : > { %1317 = vst.msk [vmem:[%s1870_s27 + $0xd8] sm:$0xf] %vm1262_vm3, %v1579_v14  ;;  %1283 = vst.msk [vmem:[%s1870_s27 + $0x50] sm:$0xf] %vm1262_vm3, %v1545_v17  ;;  %v994_v26 = vsel %vm866_vm1, %v768_v7, %v930_v18  ;;  %v965_v27 = vsel %vm837_vm2, %v651_v8, %v901_v19  ;;  %v664_v29 = vadd.f32 %v1988_v46, %v1858_v38  ;;  %v2049_v31 = vpop.f32.mrb[30].mxu1  ;;  %v2051_v35 = vpop.f32.mrb[31].mxu0 }
 0x122   : > { %v792_v30 = vadd.f32 %v1685_v50, %v1858_v38  ;;  %v1577_v32 = vpack.c.bf16 %v994_v26, %v994_v26  ;;  %v1548_v33 = vpack.c.bf16 %v965_v27, %v965_v27  ;;  %v997_v34 = vsel %vm869_vm4, %v779_v12, %v933_v21  ;;  %v2053_v36 = vpop.f32.mrb[31].mxu1 }
 0x123   : > { %vm835_vm5 = vcmp.ge.f32.partialorder %v643_v22, 0.0  ;;  %v1580_v37 = vpack.c.bf16 %v997_v34, %v997_v34  ;;  %v899_v39 = vmul.f32 0.01, %v643_v22  ;;  %vm867_vm6 = vcmp.ge.f32.partialorder %v771_v23, 0.0 }
 0x124   : > { %v931_v40 = vmul.f32 0.01, %v771_v23  ;;  %1315 = vst.msk [vmem:[%s1870_s27 + $0xd0] sm:$0xf] %vm1262_vm3, %v1577_v32  ;;  %1286 = vst.msk [vmem:[%s1870_s27 + $0x5c] sm:$0xf] %vm1262_vm3, %v1548_v33  ;;  %v656_v45 = vadd.f32 %v1858_v38, %v1992_v51  ;;  %v784_v46 = vadd.f32 %v1858_v38, %v1999_v56  ;;  %v667_v51 = vadd.f32 %v2001_v57, %v1858_v38 }
 0x125   : > { %vm840_vm7 = vcmp.ge.f32.partialorder %v664_v29, 0.0  ;;  %v904_v41 = vmul.f32 0.01, %v664_v29  ;;  %vm872_vm8 = vcmp.ge.f32.partialorder %v792_v30, 0.0  ;;  %v936_v42 = vmul.f32 0.01, %v792_v30 }
 0x126   : > { %1318 = vst.msk [vmem:[%s1870_s27 + $0xdc] sm:$0xf] %vm1262_vm3, %v1580_v37  ;;  %v963_v43 = vsel %vm835_vm5, %v643_v22, %v899_v39  ;;  %v995_v44 = vsel %vm867_vm6, %v771_v23, %v931_v40  ;;  %vm838_vm9 = vcmp.ge.f32.partialorder %v656_v45, 0.0  ;;  %v902_v54 = vmul.f32 0.01, %v656_v45 }
 0x127   : > { %v1546_v47 = vpack.c.bf16 %v963_v43, %v963_v43  ;;  %v1578_v48 = vpack.c.bf16 %v995_v44, %v995_v44  ;;  %v968_v49 = vsel %vm840_vm7, %v664_v29, %v904_v41  ;;  %v1000_v50 = vsel %vm872_vm8, %v792_v30, %v936_v42 }
 0x128   : > { %v1551_v52 = vpack.c.bf16 %v968_v49, %v968_v49  ;;  %v1583_v53 = vpack.c.bf16 %v1000_v50, %v1000_v50  ;;  %vm870_vm10 = vcmp.ge.f32.partialorder %v784_v46, 0.0  ;;  %v934_v55 = vmul.f32 0.01, %v784_v46 }
 0x129   : > { %1284 = vst.msk [vmem:[%s1870_s27 + $0x54] sm:$0xf] %vm1262_vm3, %v1546_v47  ;;  %1316 = vst.msk [vmem:[%s1870_s27 + $0xd4] sm:$0xf] %vm1262_vm3, %v1578_v48  ;;  %v795_v56 = vadd.f32 %v2007_v63, %v1858_v38  ;;  %v966_v58 = vsel %vm838_vm9, %v656_v45, %v902_v54  ;;  %v659_v59 = vadd.f32 %v1858_v38, %v2009_v0  ;;  %vm841_vm11 = vcmp.ge.f32.partialorder %v667_v51, 0.0 }
 0x12a   : > { %1289 = vst.msk [vmem:[%s1870_s27 + $0x68] sm:$0xf] %vm1262_vm3, %v1551_v52  ;;  %1321 = vst.msk [vmem:[%s1870_s27 + $0xe8] sm:$0xf] %vm1262_vm3, %v1583_v53  ;;  %v787_v60 = vadd.f32 %v1858_v38, %v2013_v2  ;;  %v680_v61 = vadd.f32 %v1657_v16, %v1858_v38  ;;  %v1549_v62 = vpack.c.bf16 %v966_v58, %v966_v58  ;;  %v905_v1 = vmul.f32 0.01, %v667_v51 }
 0x12b   : > { %v998_v57 = vsel %vm870_vm10, %v784_v46, %v934_v55  ;;  %vm873_vm12 = vcmp.ge.f32.partialorder %v795_v56, 0.0  ;;  %v937_v63 = vmul.f32 0.01, %v795_v56  ;;  %vm839_vm13 = vcmp.ge.f32.partialorder %v659_v59, 0.0 }
 0x12c   : > { %v1581_v3 = vpack.c.bf16 %v998_v57, %v998_v57  ;;  %1287 = vst.msk [vmem:[%s1870_s27 + $0x60] sm:$0xf] %vm1262_vm3, %v1549_v62  ;;  %v969_v4 = vsel %vm841_vm11, %v667_v51, %v905_v1  ;;  %v903_v5 = vmul.f32 0.01, %v659_v59  ;;  %vm871_vm14 = vcmp.ge.f32.partialorder %v787_v60, 0.0 }
 0x12d   : > { %v935_v0 = vmul.f32 0.01, %v787_v60  ;;  %v1552_v2 = vpack.c.bf16 %v969_v4, %v969_v4  ;;  %v1001_v6 = vsel %vm873_vm12, %v795_v56, %v937_v63  ;;  %vm844_vm15 = vcmp.ge.f32.partialorder %v680_v61, 0.0 }
 0x12e   : > { %1319 = vst.msk [vmem:[%s1870_s27 + $0xe0] sm:$0xf] %vm1262_vm3, %v1581_v3  ;;  %v908_v7 = vmul.f32 0.01, %v680_v61  ;;  %v1584_v8 = vpack.c.bf16 %v1001_v6, %v1001_v6  ;;  %v967_v9 = vsel %vm839_vm13, %v659_v59, %v903_v5  ;;  %v808_v11 = vadd.f32 %v2027_v20, %v1858_v38 }
 0x12f   : > { %v999_v10 = vsel %vm871_vm14, %v787_v60, %v935_v0  ;;  %1290 = vst.msk [vmem:[%s1870_s27 + $0x6c] sm:$0xf] %vm1262_vm3, %v1552_v2  ;;  %v1550_v12 = vpack.c.bf16 %v967_v9, %v967_v9  ;;  %v672_v15 = vadd.f32 %v1858_v38, %v2037_v24  ;;  %v800_v18 = vadd.f32 %v1858_v38, %v2039_v25 }
 0x130   : > { %v1582_v13 = vpack.c.bf16 %v999_v10, %v999_v10  ;;  %v972_v14 = vsel %vm844_vm15, %v680_v61, %v908_v7  ;;  %1322 = vst.msk [vmem:[%s1870_s27 + $0xec] sm:$0xf] %vm1262_vm3, %v1584_v8  ;;  %vm876_vm0 = vcmp.ge.f32.partialorder %v808_v11, 0.0  ;;  %v940_v17 = vmul.f32 0.01, %v808_v11 }
 0x131   : > { %v1555_v16 = vpack.c.bf16 %v972_v14, %v972_v14  ;;  %1288 = vst.msk [vmem:[%s1870_s27 + $0x64] sm:$0xf] %vm1262_vm3, %v1550_v12  ;;  %vm842_vm1 = vcmp.ge.f32.partialorder %v672_v15, 0.0  ;;  %v906_v19 = vmul.f32 0.01, %v672_v15  ;;  %v683_v20 = vadd.f32 %v2047_v28, %v1858_v38 }
 0x132   : > { %1320 = vst.msk [vmem:[%s1870_s27 + $0xe4] sm:$0xf] %vm1262_vm3, %v1582_v13  ;;  %v811_v21 = vadd.f32 %v2049_v31, %v1858_v38  ;;  %v1004_v22 = vsel %vm876_vm0, %v808_v11, %v940_v17  ;;  %vm874_vm2 = vcmp.ge.f32.partialorder %v800_v18, 0.0  ;;  %v938_v23 = vmul.f32 0.01, %v800_v18 }
 0x133   : > { %1293 = vst.msk [vmem:[%s1870_s27 + $0x78] sm:$0xf] %vm1262_vm3, %v1555_v16  ;;  %v675_v24 = vadd.f32 %v1858_v38, %v2051_v35  ;;  %v1587_v25 = vpack.c.bf16 %v1004_v22, %v1004_v22  ;;  %v970_v26 = vsel %vm842_vm1, %v672_v15, %v906_v19  ;;  %vm845_vm4 = vcmp.ge.f32.partialorder %v683_v20, 0.0 }
 0x134   : > { %v909_v27 = vmul.f32 0.01, %v683_v20  ;;  %v1553_v29 = vpack.c.bf16 %v970_v26, %v970_v26  ;;  %v1002_v30 = vsel %vm874_vm2, %v800_v18, %v938_v23  ;;  %vm877_vm5 = vcmp.ge.f32.partialorder %v811_v21, 0.0 }
 0x135   : > { %v941_v28 = vmul.f32 0.01, %v811_v21  ;;  %1325 = vst.msk [vmem:[%s1870_s27 + $0xf8] sm:$0xf] %vm1262_vm3, %v1587_v25  ;;  %v1585_v31 = vpack.c.bf16 %v1002_v30, %v1002_v30  ;;  %vm843_vm6 = vcmp.ge.f32.partialorder %v675_v24, 0.0  ;;  %v803_v37 = vadd.f32 %v1858_v38, %v2053_v36 }
 0x136   : > { %v973_v32 = vsel %vm845_vm4, %v683_v20, %v909_v27  ;;  %v907_v33 = vmul.f32 0.01, %v675_v24  ;;  %1291 = vst.msk [vmem:[%s1870_s27 + $0x70] sm:$0xf] %vm1262_vm3, %v1553_v29 }
 0x137   : > { %v1556_v34 = vpack.c.bf16 %v973_v32, %v973_v32  ;;  %v1005_v35 = vsel %vm877_vm5, %v811_v21, %v941_v28  ;;  %1323 = vst.msk [vmem:[%s1870_s27 + $0xf0] sm:$0xf] %vm1262_vm3, %v1585_v31  ;;  %vm875_vm7 = vcmp.ge.f32.partialorder %v803_v37, 0.0  ;;  %v939_v42 = vmul.f32 0.01, %v803_v37 }
 0x138   : > { %v1588_v39 = vpack.c.bf16 %v1005_v35, %v1005_v35  ;;  %v971_v40 = vsel %vm843_vm6, %v675_v24, %v907_v33 }
 0x139   : > { %1294 = vst.msk [vmem:[%s1870_s27 + $0x7c] sm:$0xf] %vm1262_vm3, %v1556_v34  ;;  %v1554_v41 = vpack.c.bf16 %v971_v40, %v971_v40  ;;  %v1003_v43 = vsel %vm875_vm7, %v803_v37, %v939_v42 }
 0x13a   : > { %1326 = vst.msk [vmem:[%s1870_s27 + $0xfc] sm:$0xf] %vm1262_vm3, %v1588_v39  ;;  %v1586_v44 = vpack.c.bf16 %v1003_v43, %v1003_v43 }
 0x13b   : > { %1292 = vst.msk [vmem:[%s1870_s27 + $0x74] sm:$0xf] %vm1262_vm3, %v1554_v41 }
 0x13c   : > { %1324 = vst.msk [vmem:[%s1870_s27 + $0xf4] sm:$0xf] %vm1262_vm3, %v1586_v44 }
 0x13d PF: > { %s13_s12 = sadd.s32 1, %s1744_s12  }
 0x13e   : > { %p10_p4 = scmp.ge.s32.totalorder %s13_s12, 6  }
 0x140   :  { %12 = sbr.rel (!%p10_p4) target bundleno = 1 (0x1), region = 62 }

// kernel: cnn_3d_rec7_forward.5
= control target key start
LH: loop header
LB: loop body
LE: loop exit
PB: predicated region body
PF: predicated region fallthrough
CT: control target
= control target key end

     0   :  { %s9032_s18 = smov 0   ;;  %s9034_s19 = smov 0   ;;  %s10669_s0 = inlined_call_operand.vmem [shape: bf16[1,12,152,64], index: 0, kind: input, shape index: {}, may-alias: {0,1,2}]   ;;  %s10670_s1 = inlined_call_operand.vmem [shape: bf16[1,12,152,64], index: 1, kind: input, shape index: {}, may-alias: {0,1,2}]   ;;  %s10671_s2 = inlined_call_operand.vmem [shape: bf16[1,12,152,64], index: 2, kind: input, shape index: {}, may-alias: {0,1,2}]   ;;  %s10672_s3 = inlined_call_operand.vmem [shape: bf16[27,64,64], index: 3, kind: input, shape index: {}]   ;;  %s10673_s4 = inlined_call_operand.vmem [shape: f32[1,64], index: 4, kind: input, shape index: {}]   ;;  %s10674_s5 = inlined_call_operand.vmem [shape: bf16[1,10,120,64], index: 5, kind: output, shape index: {}]  }
   0x1   :  { %s9036_s20 = smov 0  }
   0x2 LB: > { %s24_s21 = sadd.s32 1, %s8996_s19  ;;  %p6719_p0 = scmp.ge.s32.totalorder %s9000_s20, 1  ;;  %s9000_s20 = sphi %s9036_s20, %s15_s20   ;;  %s8996_s19 = sphi %s9034_s19, %s10678_s19   ;;  %s8992_s18 = sphi %s9032_s18, %s10677_s18  }
   0x3   : > { %p25_p1 = scmp.ge.s32.totalorder %s24_s21, 10  ;;  %p247_p2 = scmp.lt.s32.totalorder %s9000_s20, 11 }
   0x5   : > { %s10680_s21 = smov (%p25_p1, %s24_s21), 0  ;;  %p248_p3 = pnand %p6719_p0, %p247_p2 }
   0x7   : > { %251 = sbr.rel (%p248_p3) target bundleno = 707 (0x2c3), region = 40 }
   0xe   : > { %v8734_v0 = vld [vmem:[%s10672_s3 + $0x20] sm:$0xff]   ;;  %p305_p4 = scmp.lt.s32.totalorder %s8992_s18, 11  ;;  %v8736_v2 = vld [vmem:[%s10672_s3 + $0x28] sm:$0xff]   ;;  %s312_s6 = sadd.s32 1, %s8992_s18  ;;  %v8738_v4 = vld [vmem:[%s10672_s3 + $0x30] sm:$0xff]   ;;  %vm505_vm0 = vcmask 523264  }
   0xf   : > { %v8735_v1 = vld [vmem:[%s10672_s3 + $0x1a0] sm:$0xff]   ;;  %7738 = vmatprep.subr.bf16.mxu1 %v8734_v0  ;;  %v8737_v3 = vld [vmem:[%s10672_s3 + $0x1a8] sm:$0xff]   ;;  %v8739_v5 = vld [vmem:[%s10672_s3 + $0x1b0] sm:$0xff]   ;;  %p315_p5 = scmp.lt.s32.totalorder %s312_s6, 11  ;;  %vm417_vm1 = vsmask.f32 7424 }
  0x10   : > { %s306_s28 = scalar_select %p305_p4, %s8992_s18, 11  ;;  %8050 = vmatprep.subr.bf16.mxu0 %v8735_v1  ;;  %7739 = vmatpush3.bf16.msra.mxu1 %v8734_v0  ;;  %v8740_v6 = vld [vmem:[%s10672_s3 + $0x38] sm:$0xff]   ;;  %vm1205_vm2 = vsmask.f32 5376  ;;  %v8747_v17 = vld [vmem:[%s10672_s3] sm:$0xff]   ;;  %v8750_v50 = vld [vmem:[%s10672_s3 + $0x1c8] sm:$0xff]  }
  0x11   : > { %8051 = vmatpush3.bf16.msra.mxu0 %v8735_v1  ;;  %7740 = vmatprep.subr.bf16.mxu1 %v8736_v2  ;;  %s10682_s6 = smov (!%p315_p5, %s312_s6), 11  ;;  %v8741_v9 = vld [vmem:[%s10672_s3 + $0x1b8] sm:$0xff]   ;;  %v8749_v30 = vld [vmem:[%s10672_s3 + $0x1c0] sm:$0xff]   ;;  %v8754_v59 = vld [vmem:[%s10672_s3 + $0x8] sm:$0xff]   ;;  %vm1449_vm3 = vcmask 1044480   ;;  %vm777_vm4 = vcmask 1046528  }
  0x12   : > { %s8706_s9 = smul.u32 76, %s306_s28  ;;  %8052 = vmatprep.subr.bf16.mxu0 %v8737_v3  ;;  %s323_s29 = sadd.s32 2, %s8992_s18  ;;  %vm1017_vm5 = vcmask 1045504   ;;  %vm6565_vm8 = vcmask 519168  }
  0x13   : > { %s8707_s23 = smul.u32 76, %s10682_s6  ;;  %p326_p6 = scmp.lt.s32.totalorder %s323_s29, 11 }
  0x14   : > { %s9076_s14 = scalar_lea.vmem %s10669_s0, %s8706_s9  ;;  %7741 = vmatpush3.bf16.msra.mxu1 %v8736_v2  ;;  %p336_p7 = scmp.lt.s32.totalorder %s8992_s18, 9 }
  0x15   : > { %8053 = vmatpush3.bf16.msra.mxu0 %v8737_v3  ;;  %7742 = vmatprep.subr.bf16.mxu1 %v8738_v4  ;;  %v344_v7 = vld [vmem:[%s9076_s14] sm:$0xf]  ;;  %v9083_v8 = vld [vmem:[%s9076_s14 + $0x4] sm:$0xf]  ;;  %v9092_v11 = vld [vmem:[%s9076_s14 + $0x8] sm:$0xff]   ;;  %s9101_s26 = scalar_lea.vmem %s10670_s1, %s8707_s23  ;;  %s10684_s29 = smov (!%p326_p6, %s323_s29), 11 }
  0x16   : > { %8054 = vmatprep.subr.bf16.mxu0 %v8739_v5  ;;  %v9089_v10 = vcombine.low %v344_v7, %v9083_v8  ;;  %v426_v14 = vshll.u32 %v9092_v11, 16  ;;  %v430_v15 = vshrl.u32 %v9092_v11, 16  ;;  %v9104_v16 = vld [vmem:[%s9076_s14 + $0x10] sm:$0xff]   ;;  %v3014_v18 = vld [vmem:[%s9101_s26 + $0x4] sm:$0xc]  ;;  %v9133_v38 = vld [vmem:[%s9076_s14 + $0x18] sm:$0xff]  }
  0x17   : > { %v9111_v19 = vld [vmem:[%s9101_s26 + $0x8] sm:$0xf]  ;;  %v9117_v23 = vld [vmem:[%s9101_s26 + $0xc] sm:$0xff]   ;;  %v434_v24 = vshll.u32 %v9104_v16, 16  ;;  %v9123_v29 = vld [vmem:[%s9101_s26 + $0x14] sm:$0xff]   ;;  %v438_v46 = vshrl.u32 %v9104_v16, 16 }
  0x18   : > { %7743 = vmatpush3.bf16.msra.mxu1 %v8738_v4  ;;  %v419_v12 = vshrl.u32 %v9089_v10, 16  ;;  %v421_v13 = vshll.u32 %v9089_v10, 16  ;;  %v428_v21 = vrot.slane %v426_v14, 1  ;;  %v9114_v22 = vcombine.low %v3014_v18, %v9111_v19  ;;  %v9139_v43 = vld [vmem:[%s9101_s26 + $0x1c] sm:$0xff]   ;;  %v9162_v2 = vld [vmem:[%s9101_s26 + $0x24] sm:$0xff]   ;;  %s8708_s16 = smul.u32 76, %s10684_s29 }
  0x19   : > { %8055 = vmatpush3.bf16.msra.mxu0 %v8739_v5  ;;  %7744 = vmatprep.subr.bf16.mxu1 %v8740_v6  ;;  %v3275_v31 = vshrl.u32 %v9117_v23, 16  ;;  %v3278_v32 = vshll.u32 %v9117_v23, 16  ;;  %v436_v33 = vrot.slane %v434_v24, 1  ;;  %v3284_v37 = vshrl.u32 %v9123_v29, 16  ;;  %v9151_v57 = vld [vmem:[%s9076_s14 + $0x20] sm:$0xff]   ;;  %s10686_s18 = smov (!%p336_p7, %s8992_s18), 9 }
  0x1a   : > { %8056 = vmatprep.subr.bf16.mxu0 %v8741_v9  ;;  %v423_v20 = vrot.slane %v421_v13, 1  ;;  %v432_v26 = vor.u32 %v430_v15, %v428_v21  ;;  %v3267_v27 = vshrl.u32 %v9114_v22, 16  ;;  %v3270_v28 = vshll.u32 %v9114_v22, 16  ;;  %v3496_v18 = vld [vmem:[%s9101_s26 + $0x4] sm:$0x8]  ;;  %s9416_s25 = scalar_lea.vmem %s10671_s2, %s8708_s16 }
  0x1b   : > { %v3277_v39 = vrot.slane %v3275_v31, 2  ;;  %v3280_v40 = vrot.slane %v3278_v32, 3  ;;  %v3287_v42 = vshll.u32 %v9123_v29, 16  ;;  %v3286_v45 = vrot.slane %v3284_v37, 2  ;;  %v367_v37 = vld [vmem:[%s9076_s14 + $0x3c] sm:$0x1] }
  0x1c   : > { %7745 = vmatpush3.bf16.msra.mxu1 %v8740_v6  ;;  %v424_v25 = vor.u32 %v423_v20, %v419_v12  ;;  %v3269_v35 = vrot.slane %v3267_v27, 2  ;;  %v3272_v36 = vrot.slane %v3270_v28, 3  ;;  %v437_v41 = vsel %vm417_vm1, %v432_v26, %v436_v33  ;;  %v9180_v20 = vld [vmem:[%s9076_s14 + $0x30] sm:$0xff]  }
  0x1d   : > { %8057 = vmatpush3.bf16.msra.mxu0 %v8741_v9  ;;  %7762 = vmatprep.subr.bf16.mxu1 %v8747_v17  ;;  %v3281_v47 = vor.u32 %v3280_v40, %v3277_v39  ;;  %v3289_v48 = vrot.slane %v3287_v42, 3  ;;  %v442_v49 = vshll.u32 %v9133_v38, 16  ;;  %v440_v51 = vor.u32 %v438_v46, %v436_v33  ;;  %v8756_v9 = vld [vmem:[%s10672_s3 + $0x1d0] sm:$0xff]   ;;  %v9200_v33 = vld [vmem:[%s9076_s14 + $0x38] sm:$0xf]  ;;  %v9214_v42 = vld [vmem:[%s10672_s3 + $0x40] sm:$0xff]  }
  0x1e   : > { %v429_v34 = vsel %vm417_vm1, %v424_v25, %v428_v21  ;;  %8074 = vmatprep.subr.bf16.mxu0 %v8749_v30  ;;  %v3273_v44 = vor.u32 %v3272_v36, %v3269_v35  ;;  %v3293_v52 = vshrl.u32 %v9139_v43, 16  ;;  %v3296_v53 = vshll.u32 %v9139_v43, 16  ;;  %v8761_v26 = vld [vmem:[%s10672_s3 + $0x10] sm:$0xff]  }
  0x1f   : > { %7746 = vmatprep.mubr.msk.bf16.mxu1 %vm505_vm0, %v429_v34  ;;  %v3290_v55 = vor.u32 %v3289_v48, %v3286_v45  ;;  %v444_v56 = vrot.slane %v442_v49, 1  ;;  %v446_v58 = vshrl.u32 %v9133_v38, 16  ;;  %v450_v1 = vshll.u32 %v9151_v57, 16 }
  0x20   : > { %7747 = vmatmul.mubr.msk.bf16.vlgmr.msra.gmra.mrb[0].mxu1 %vm505_vm0, %v437_v41  ;;  %v3282_v54 = vsel %vm1205_vm2, %v3273_v44, %v3281_v47  ;;  %v3295_v60 = vrot.slane %v3293_v52, 2  ;;  %v3298_v61 = vrot.slane %v3296_v53, 3  ;;  %v454_v4 = vshrl.u32 %v9151_v57, 16 }
  0x21   : > { %7763 = vmatpush3.bf16.msra.mxu1 %v8747_v17  ;;  %8058 = vmatprep.mubr.msk.bf16.mxu0 %vm505_vm0, %v3282_v54  ;;  %v3291_v62 = vsel %vm1205_vm2, %v3281_v47, %v3290_v55  ;;  %v445_v63 = vsel %vm417_vm1, %v440_v51, %v444_v56  ;;  %v448_v0 = vor.u32 %v446_v58, %v444_v56  ;;  %v452_v5 = vrot.slane %v450_v1, 1  ;;  %v9176_v17 = vld [vmem:[%s9076_s14 + $0x28] sm:$0xff]   ;;  %v8767_v51 = vld [vmem:[%s10672_s3 + $0x1e0] sm:$0xff]   ;;  %v8771_v1 = vld [vmem:[%s10672_s3 + $0x1f0] sm:$0xff]  }
  0x22   : > { %7764 = vmatprep.subr.bf16.mxu1 %v8754_v59  ;;  %8059 = vmatmul.mubr.msk.bf16.vlgmr.msra.gmra.mrb[0].mxu0 %vm505_vm0, %v3291_v62  ;;  %v3299_v3 = vor.u32 %v3298_v61, %v3295_v60  ;;  %v3302_v6 = vshrl.u32 %v9162_v2, 16  ;;  %v3305_v7 = vshll.u32 %v9162_v2, 16  ;;  %v7067_v24 = vcombine.low %v3496_v18, %v9111_v19  ;;  %v8763_v19 = vld [vmem:[%s10672_s3 + $0x18] sm:$0xff]   ;;  %v8768_v58 = vld [vmem:[%s10672_s3 + $0x1e8] sm:$0xff]  }
  0x23   : > { %7750 = vmatprep.mubr.msk.bf16.mxu1 %vm505_vm0, %v445_v63  ;;  %8075 = vmatpush3.bf16.msra.mxu0 %v8749_v30  ;;  %v453_v13 = vsel %vm417_vm1, %v448_v0, %v452_v5  ;;  %v456_v21 = vor.u32 %v454_v4, %v452_v5  ;;  %v3510_v25 = vrot.slane %v9117_v23, 3  ;;  %v458_v28 = vshll.u32 %v9176_v17, 16  ;;  %v8757_v23 = vld [vmem:[%s10672_s3 + $0x1d8] sm:$0xff]   ;;  %v3253_v0 = vld [vmem:[%s9101_s26 + $0x40] sm:$0x7] }
  0x24   : > { %8076 = vmatprep.subr.bf16.mxu0 %v8750_v50  ;;  %v3300_v12 = vsel %vm1205_vm2, %v3290_v55, %v3299_v3  ;;  %v3304_v14 = vrot.slane %v3302_v6, 2  ;;  %v3307_v15 = vrot.slane %v3305_v7, 3  ;;  %v462_v30 = vshrl.u32 %v9176_v17, 16  ;;  %v3028_v63 = vld [vmem:[%s9101_s26 + $0x3c] sm:$0xf]  ;;  %v8766_v5 = vld [vmem:[%s9101_s26 + $0x34] sm:$0xff]  }
  0x25   : > { %7765 = vmatpush3.bf16.msra.mxu1 %v8754_v59  ;;  %8062 = vmatprep.mubr.msk.bf16.mxu0 %vm505_vm0, %v3300_v12  ;;  %v466_v31 = vshll.u32 %v9180_v20, 16  ;;  %v3509_v32 = vrot.slane %v7067_v24, 3  ;;  %v460_v35 = vrot.slane %v458_v28, 1  ;;  %v470_v39 = vshrl.u32 %v9180_v20, 16 }
  0x26   : > { %v9188_v27 = vor.u32 %v3307_v15, %v3304_v14  ;;  %7766 = vmatprep.subr.bf16.mxu1 %v8761_v26  ;;  %v9209_v41 = vcombine.low %v9200_v33, %v367_v37  ;;  %v3512_v46 = vrot.slane %v9123_v29, 3  ;;  %v3514_v49 = vrot.slane %v9139_v43, 3 }
  0x27   : > { %8077 = vmatpush3.bf16.msra.mxu0 %v8750_v50  ;;  %v468_v36 = vrot.slane %v466_v31, 1  ;;  %v3511_v40 = vsel %vm1449_vm3, %v3509_v32, %v3510_v25  ;;  %v461_v44 = vsel %vm417_vm1, %v456_v21, %v460_v35  ;;  %v464_v45 = vor.u32 %v462_v30, %v460_v35  ;;  %v8764_v50 = vld [vmem:[%s9101_s26 + $0x2c] sm:$0xff]   ;;  %v8776_v35 = vld [vmem:[%s9101_s26 + $0x1c] sm:$0xff]  }
  0x28   : > { %7751 = vmatmul.mubr.msk.bf16.gmra.mrb[4].mxu1 %vm505_vm0, %v453_v13  ;;  %8078 = vmatprep.subr.bf16.mxu0 %v8756_v9  ;;  %v3309_v34 = vsel %vm1205_vm2, %v3299_v3, %v9188_v27  ;;  %v474_v48 = vshll.u32 %v9209_v41, 16  ;;  %v478_v29 = vshrl.u32 %v9209_v41, 16  ;;  %v3513_v54 = vsel %vm1449_vm3, %v3510_v25, %v3512_v46  ;;  %v8774_v32 = vld [vmem:[%s10672_s3 + $0x50] sm:$0xff]  }
  0x29   : > { %7767 = vmatpush3.bf16.msra.mxu1 %v8761_v26  ;;  %7754 = vmatprep.mubr.msk.bf16.mxu1 %vm505_vm0, %v461_v44  ;;  %v472_v47 = vor.u32 %v470_v39, %v468_v36  ;;  %v469_v52 = vsel %vm417_vm1, %v464_v45, %v468_v36  ;;  %v3515_v55 = vsel %vm1449_vm3, %v3512_v46, %v3514_v49  ;;  %v3516_v56 = vrot.slane %v9162_v2, 3  ;;  %v8770_v26 = vld [vmem:[%s10672_s3 + $0x48] sm:$0xff]   ;;  %v8789_v39 = vld [vmem:[%s10672_s3 + $0x210] sm:$0xff]  }
  0x2a   : > { %8063 = vmatmul.mubr.msk.bf16.gmra.mrb[4].mxu0 %vm505_vm0, %v3309_v34  ;;  %7768 = vmatprep.subr.bf16.mxu1 %v8763_v19  ;;  %v476_v53 = vrot.slane %v474_v48, 1  ;;  %v779_v59 = vrot.slane %v9092_v11, 1  ;;  %v3518_v61 = vrot.slane %v8764_v50, 3  ;;  %v781_v62 = vrot.slane %v9104_v16, 1  ;;  %v8782_v34 = vld [vmem:[%s10672_s3 + $0x60] sm:$0xff]   ;;  %v8785_v36 = vld [vmem:[%s10672_s3 + $0x208] sm:$0xff]  }
  0x2b   : > { %8079 = vmatpush3.bf16.msra.mxu0 %v8756_v9  ;;  %8082 = vmatprep.mubr.msk.bf16.mxu0 %vm505_vm0, %v3511_v40  ;;  %v783_v3 = vrot.slane %v9133_v38, 1  ;;  %v785_v4 = vrot.slane %v9151_v57, 1  ;;  %v3517_v7 = vsel %vm1449_vm3, %v3514_v49, %v3516_v56  ;;  %v8772_v9 = vld [vmem:[%s10672_s3 + $0x1f8] sm:$0xff]   ;;  %v9269_v14 = vcombine.low %v3028_v63, %v3253_v0  ;;  %v3904_v40 = vld [vmem:[%s9101_s26 + $0xc] sm:$0xf]  ;;  %v8779_v44 = vld [vmem:[%s9101_s26 + $0x24] sm:$0xff]  }
  0x2c   : > { %8080 = vmatprep.subr.bf16.mxu0 %v8757_v23  ;;  %v477_v43 = vsel %vm417_vm1, %v472_v47, %v476_v53  ;;  %v480_v60 = vor.u32 %v478_v29, %v476_v53  ;;  %v9248_v2 = vsel %vm777_vm4, %v779_v59, %v781_v62  ;;  %v3519_v13 = vsel %vm1449_vm3, %v3516_v56, %v3518_v61  ;;  %v8781_v45 = vld [vmem:[%s9101_s26 + $0x2c] sm:$0xff]   ;;  %v9352_v48 = vld [vmem:[%s9101_s26 + $0x14] sm:$0xff]   ;;  %v9357_v50 = vld [vmem:[%s10672_s3 + $0x220] sm:$0xff]  }
  0x2d   : > { %7769 = vmatpush3.bf16.msra.mxu1 %v8763_v19  ;;  %v9255_v6 = vsel %vm777_vm4, %v781_v62, %v783_v3  ;;  %v9266_v12 = vsel %vm777_vm4, %v783_v3, %v785_v4  ;;  %v789_v15 = vrot.slane %v9180_v20, 1  ;;  %v791_v18 = vrot.slane %v9209_v41, 1  ;;  %v8787_v47 = vld [vmem:[%s10672_s3 + $0x68] sm:$0xff]   ;;  %v8788_v56 = vld [vmem:[%s9101_s26 + $0x44] ss:$0 sps:$4 sm:$0xff]   ;;  %v8796_v62 = vld [vmem:[%s10672_s3 + $0x78] sm:$0xff]  }
  0x2e   : > { %7786 = vmatprep.subr.bf16.mxu1 %v9214_v42  ;;  %v3520_v25 = vrot.slane %v8766_v5, 3  ;;  %v3522_v28 = vrot.slane %v9269_v14, 3  ;;  %v6752_v37 = vcombine.low %v9200_v33, %v9200_v33  ;;  %v8790_v33 = vld [vmem:[%s10672_s3 + $0x218] sm:$0xff]   ;;  %v787_v53 = vrot.slane %v9176_v17, 1  ;;  %v9391_v0 = vld [vmem:[%s9101_s26 + $0x2c] sm:$0xff]  }
  0x2f   : > { %8081 = vmatpush3.bf16.msra.mxu0 %v8757_v23  ;;  %v9281_v24 = vsel %vm777_vm4, %v789_v15, %v791_v18  ;;  %v3981_v63 = vshrl.u32 %v9352_v48, 16  ;;  %v9399_v3 = vld [vmem:[%s9076_s14 + $0xc] sm:$0xff]   ;;  %v953_v5 = vld [vmem:[%s9076_s14 + $0x8] sm:$0xf] }
  0x30   : > { %7755 = vmatmul.mubr.msk.bf16.gmra.mrb[8].mxu1 %vm505_vm0, %v469_v52  ;;  %8098 = vmatprep.subr.bf16.mxu0 %v8767_v51  ;;  %v3521_v19 = vsel %vm1449_vm3, %v3518_v61, %v3520_v25  ;;  %v3523_v23 = vsel %vm1449_vm3, %v3520_v25, %v3522_v28  ;;  %v8786_v52 = vld [vmem:[%s9101_s26 + $0x3c] sm:$0xff]   ;;  %v9383_v61 = vld [vmem:[%s9101_s26 + $0x24] sm:$0xff]  }
  0x31   : > { %7758 = vmatprep.mubr.msk.bf16.mxu1 %vm505_vm0, %v477_v43 }
  0x32   : > { %8083 = vmatmul.mubr.msk.bf16.vlgmr.msra.gmra.mrb[0].mxu0 %vm505_vm0, %v3513_v54  ;;  %v8793_v54 = vld [vmem:[%s10672_s3 + $0x70] sm:$0xff]  }
  0x33   : > { %8086 = vmatprep.mubr.msk.bf16.mxu0 %vm505_vm0, %v3515_v55  ;;  %8099 = vmatpush3.bf16.msra.mxu0 %v8767_v51  ;;  %v8783_v51 = vld [vmem:[%s9101_s26 + $0x34] sm:$0xff]   ;;  %v3977_v55 = vshll.u32 %v9352_v48, 16 }
  0x34   : > { %8100 = vmatprep.subr.bf16.mxu0 %v8768_v58 }
  0x37   : > { %8101 = vmatpush3.bf16.msra.mxu0 %v8768_v58  ;;  %v788_v58 = vsel %vm777_vm4, %v785_v4, %v787_v53  ;;  %v9402_v4 = vld [vmem:[%s9101_s26 + $0x34] sm:$0xff]  }
  0x38   : > { %7759 = vmatmul.mubr.msk.bf16.gmra.mrb[12].mxu1 %vm505_vm0, %v480_v60  ;;  %8102 = vmatprep.subr.bf16.mxu0 %v8771_v1  ;;  %v3979_v60 = vrot.slane %v3977_v55, 1  ;;  %v4009_v25 = vshll.u32 %v9402_v4, 16 }
  0x39   : > { %7770 = vmatprep.mubr.msk.bf16.mxu1 %vm505_vm0, %v9089_v10  ;;  %v764_v10 = vld [vmem:[%s9076_s14] sm:$0xe] }
  0x3a   : > { %8087 = vmatmul.mubr.msk.bf16.gmra.mrb[4].mxu0 %vm505_vm0, %v3517_v7  ;;  %v6773_v21 = vcombine.low %v764_v10, %v9083_v8  ;;  %v8784_v8 = vld [vmem:[%s10672_s3 + $0x200] sm:$0xff]   ;;  %v3993_v7 = vshll.u32 %v9383_v61, 16 }
  0x3b   : > { %8090 = vmatprep.mubr.msk.bf16.mxu0 %vm505_vm0, %v3519_v13  ;;  %8103 = vmatpush3.bf16.msra.mxu0 %v8771_v1  ;;  %v952_v1 = vld [vmem:[%s9076_s14 + $0x4] sm:$0xc]  ;;  %v9420_v13 = vld [vmem:[%s9076_s14 + $0x14] sm:$0xff]  }
  0x3c   : > { %8104 = vmatprep.subr.bf16.mxu0 %v8772_v9  ;;  %v778_v30 = vrot.slane %v6773_v21, 1  ;;  %v9423_v21 = vcombine.low %v952_v1, %v953_v5 }
  0x3e   : > { %v780_v31 = vsel %vm777_vm4, %v778_v30, %v779_v59  ;;  %v3997_v30 = vshrl.u32 %v9383_v61, 16 }
  0x3f   : > { %8105 = vmatpush3.bf16.msra.mxu0 %v8772_v9  ;;  %v9411_v9 = vld [vmem:[%s10672_s3 + $0x80] sm:$0xff]  }
  0x40   : > { %7771 = vmatmul.mubr.msk.bf16.vlgmr.msra.gmra.mrb[0].mxu1 %vm505_vm0, %v9092_v11  ;;  %8122 = vmatprep.subr.bf16.mxu0 %v8784_v8  ;;  %v8778_v11 = vld [vmem:[%s10672_s3 + $0x58] sm:$0xff]  }
  0x41   : > { %7787 = vmatpush3.bf16.msra.mxu1 %v9214_v42  ;;  %7774 = vmatprep.mubr.msk.bf16.mxu1 %vm505_vm0, %v9104_v16  ;;  %v8773_v16 = vld [vmem:[%s9101_s26 + $0xc] sm:$0xff]  }
  0x42   : > { %7788 = vmatprep.subr.bf16.mxu1 %v8770_v26  ;;  %8091 = vmatmul.mubr.msk.bf16.gmra.mrb[8].mxu0 %vm505_vm0, %v3521_v19  ;;  %v9335_v42 = vld [vmem:[%s9101_s26 + $0x10] sm:$0xf]  ;;  %v1019_v19 = vrot.slane %v9399_v3, 2 }
  0x43   : > { %8094 = vmatprep.mubr.msk.bf16.mxu0 %vm505_vm0, %v3523_v23  ;;  %v7116_v46 = vcombine.low %v3904_v40, %v9335_v42  ;;  %v4005_v23 = vshrl.u32 %v9391_v0, 16  ;;  %v1451_v40 = vrot.slane %v9399_v3, 3 }
  0x45   : > { %7789 = vmatpush3.bf16.msra.mxu1 %v8770_v26  ;;  %v3972_v49 = vshll.u32 %v7116_v46, 16  ;;  %v3970_v29 = vshrl.u32 %v7116_v46, 16  ;;  %v3983_v26 = vor.u32 %v3981_v63, %v3979_v60  ;;  %v9459_v46 = vld [vmem:[%s9101_s26 + $0x44] sm:$0x1f]  }
  0x46   : > { %7790 = vmatprep.subr.bf16.mxu1 %v8774_v32 }
  0x47   : > { %v3974_v43 = vrot.slane %v3972_v49, 1 }
  0x48   : > { %7775 = vmatmul.mubr.msk.bf16.gmra.mrb[4].mxu1 %vm505_vm0, %v9133_v38  ;;  %v8775_v38 = vld [vmem:[%s9101_s26 + $0x14] sm:$0xff]  }
  0x49   : > { %7778 = vmatprep.mubr.msk.bf16.mxu1 %vm505_vm0, %v9151_v57  ;;  %7791 = vmatpush3.bf16.msra.mxu1 %v8774_v32  ;;  %v3975_v59 = vor.u32 %v3974_v43, %v3970_v29  ;;  %v9471_v29 = vld [vmem:[%s9076_s14 + $0x2c] sm:$0xff]   ;;  %v9475_v43 = vld [vmem:[%s9076_s14 + $0x34] sm:$0xff]  }
  0x4a   : > { %7792 = vmatprep.subr.bf16.mxu1 %v8778_v11  ;;  %8095 = vmatmul.mubr.msk.bf16.gmra.mrb[12].mxu0 %vm505_vm0, %v3522_v28  ;;  %v790_v28 = vsel %vm777_vm4, %v787_v53, %v789_v15  ;;  %v1018_v15 = vrot.slane %v9423_v21, 2 }
  0x4b   : > { %8106 = vmatprep.mubr.msk.bf16.mxu0 %vm505_vm0, %v8773_v16 }
  0x4d   : > { %7793 = vmatpush3.bf16.msra.mxu1 %v8778_v11  ;;  %v4011_v11 = vrot.slane %v4009_v25, 1 }
  0x4e   : > { %7810 = vmatprep.subr.bf16.mxu1 %v8782_v34 }
  0x50   : > { %7779 = vmatmul.mubr.msk.bf16.gmra.mrb[8].mxu1 %vm505_vm0, %v9176_v17  ;;  %v9375_v17 = vld [vmem:[%s9101_s26 + $0x1c] sm:$0xff]  }
  0x51   : > { %7782 = vmatprep.mubr.msk.bf16.mxu1 %vm505_vm0, %v9180_v20  ;;  %v3985_v57 = vshll.u32 %v9375_v17, 16  ;;  %v1021_v20 = vrot.slane %v9420_v13, 2 }
  0x52   : > { %8107 = vmatmul.mubr.msk.bf16.vlgmr.msra.gmra.mrb[0].mxu0 %vm505_vm0, %v8775_v38  ;;  %v8805_v38 = vld [vmem:[%s10672_s3 + $0x228] sm:$0xff]  }
  0x53   : > { %8110 = vmatprep.mubr.msk.bf16.mxu0 %vm505_vm0, %v8776_v35  ;;  %8123 = vmatpush3.bf16.msra.mxu0 %v8784_v8  ;;  %v3987_v10 = vrot.slane %v3985_v57, 1  ;;  %v4025_v57 = vshll.u32 %v9459_v46, 16 }
  0x54   : > { %8124 = vmatprep.subr.bf16.mxu0 %v8785_v36 }
  0x55   : > { %v3988_v16 = vsel %vm417_vm1, %v3983_v26, %v3987_v10 }
  0x57   : > { %8125 = vmatpush3.bf16.msra.mxu0 %v8785_v36  ;;  %v9446_v36 = vld [vmem:[%s9101_s26 + $0x3c] sm:$0xff]  }
  0x58   : > { %7783 = vmatmul.mubr.msk.bf16.gmra.mrb[16].mxu1 %vm505_vm0, %v6752_v37  ;;  %8126 = vmatprep.subr.bf16.mxu0 %v8789_v39  ;;  %v9449_v37 = vld [vmem:[%s9076_s14 + $0x1c] sm:$0xff]   ;;  %v4021_v63 = vshrl.u32 %v9446_v36, 16 }
  0x59   : > { %7794 = vmatprep.mubr.msk.bf16.mxu1 %vm505_vm0, %v780_v31  ;;  %v3995_v31 = vrot.slane %v3993_v7, 1 }
  0x5a   : > { %8111 = vmatmul.mubr.msk.bf16.gmra.mrb[4].mxu0 %vm505_vm0, %v8779_v44  ;;  %v9454_v44 = vld [vmem:[%s9076_s14 + $0x24] sm:$0xff]  }
  0x5b   : > { %8114 = vmatprep.mubr.msk.bf16.mxu0 %vm505_vm0, %v8781_v45  ;;  %8127 = vmatpush3.bf16.msra.mxu0 %v8789_v39  ;;  %v1436_v39 = vld [vmem:[%s9076_s14 + $0x4] sm:$0x8]  ;;  %v1453_v45 = vrot.slane %v9420_v13, 3  ;;  %v1457_v55 = vrot.slane %v9454_v44, 3 }
  0x5c   : > { %8128 = vmatprep.subr.bf16.mxu0 %v8790_v33 }
  0x5f   : > { %8129 = vmatpush3.bf16.msra.mxu0 %v8790_v33  ;;  %v3999_v33 = vor.u32 %v3997_v30, %v3995_v31  ;;  %v8809_v30 = vld [vmem:[%s10672_s3 + $0x88] sm:$0xff]  }
  0x60   : > { %7795 = vmatmul.mubr.msk.bf16.vlgmr.msra.gmra.mrb[0].mxu1 %vm505_vm0, %v9248_v2  ;;  %8146 = vmatprep.subr.bf16.mxu0 %v9357_v50  ;;  %v3989_v2 = vshrl.u32 %v9375_v17, 16 }
  0x61   : > { %7811 = vmatpush3.bf16.msra.mxu1 %v8782_v34  ;;  %7798 = vmatprep.mubr.msk.bf16.mxu1 %vm505_vm0, %v9255_v6  ;;  %v3980_v6 = vsel %vm417_vm1, %v3975_v59, %v3979_v60  ;;  %v4013_v34 = vshrl.u32 %v9402_v4, 16  ;;  %v1459_v60 = vrot.slane %v9471_v29, 3 }
  0x62   : > { %7812 = vmatprep.subr.bf16.mxu1 %v8787_v47  ;;  %8115 = vmatmul.mubr.msk.bf16.gmra.mrb[8].mxu0 %vm505_vm0, %v8783_v51  ;;  %v3991_v8 = vor.u32 %v3989_v2, %v3987_v10  ;;  %v9467_v51 = vsel %vm1449_vm3, %v1451_v40, %v1453_v45  ;;  %v8811_v2 = vld [vmem:[%s10672_s3 + $0x238] sm:$0xff]  }
  0x63   : > { %8118 = vmatprep.mubr.msk.bf16.mxu0 %vm505_vm0, %v8786_v52  ;;  %v1020_v52 = vsel %vm1017_vm5, %v1018_v15, %v1019_v19  ;;  %v4015_v10 = vor.u32 %v4013_v34, %v4011_v11  ;;  %v967_v34 = vld [vmem:[%s9076_s14 + $0x40] sm:$0x3] }
  0x64   : > { %v3996_v35 = vsel %vm417_vm1, %v3991_v8, %v3995_v31  ;;  %v4191_v8 = vld [vmem:[%s9101_s26 + $0xc] sm:$0xe]  ;;  %v9521_v31 = vld [vmem:[%s10672_s3 + $0x240] sm:$0xff]  }
  0x65   : > { %7813 = vmatpush3.bf16.msra.mxu1 %v8787_v47  ;;  %v8810_v47 = vld [vmem:[%s10672_s3 + $0x230] sm:$0xff]   ;;  %v7144_v15 = vcombine.low %v4191_v8, %v9335_v42  ;;  %v4205_v42 = vrot.slane %v9352_v48, 1  ;;  %v1215_v48 = vshrl.u32 %v9399_v3, 16 }
  0x66   : > { %7814 = vmatprep.subr.bf16.mxu1 %v8793_v54 }
  0x68   : > { %7799 = vmatmul.mubr.msk.bf16.gmra.mrb[4].mxu1 %vm505_vm0, %v9266_v12  ;;  %v4001_v12 = vshll.u32 %v9391_v0, 16 }
  0x69   : > { %7802 = vmatprep.mubr.msk.bf16.mxu1 %vm505_vm0, %v788_v58  ;;  %7815 = vmatpush3.bf16.msra.mxu1 %v8793_v54  ;;  %v1455_v54 = vrot.slane %v9449_v37, 3  ;;  %v4017_v58 = vshll.u32 %v9446_v36, 16 }
  0x6a   : > { %7816 = vmatprep.subr.bf16.mxu1 %v8796_v62  ;;  %8119 = vmatmul.mubr.msk.bf16.gmra.mrb[16].mxu0 %vm505_vm0, %v8788_v56  ;;  %v4003_v32 = vrot.slane %v4001_v12, 1  ;;  %v1022_v12 = vsel %vm1017_vm5, %v1019_v19, %v1021_v20 }
  0x6b   : > { %8130 = vmatprep.mubr.msk.bf16.mxu0 %vm505_vm0, %v3980_v6  ;;  %v9487_v59 = vsel %vm1449_vm3, %v1453_v45, %v1455_v54  ;;  %v9494_v41 = vsel %vm1449_vm3, %v1455_v54, %v1457_v55  ;;  %v4019_v7 = vrot.slane %v4017_v58, 1  ;;  %v1029_v45 = vrot.slane %v9475_v43, 2 }
  0x6c   : > { %v4007_v53 = vor.u32 %v4005_v23, %v4003_v32  ;;  %v4004_v56 = vsel %vm417_vm1, %v3999_v33, %v4003_v32  ;;  %v1025_v23 = vrot.slane %v9454_v44, 2  ;;  %v4209_v58 = vrot.slane %v9383_v61, 1 }
  0x6d   : > { %7817 = vmatpush3.bf16.msra.mxu1 %v8796_v62  ;;  %v1023_v62 = vrot.slane %v9449_v37, 2  ;;  %v4023_v26 = vor.u32 %v4021_v63, %v4019_v7  ;;  %v4020_v19 = vsel %vm417_vm1, %v4015_v10, %v4019_v7  ;;  %v1227_v61 = vshll.u32 %v9420_v13, 16  ;;  %v8821_v10 = vld [vmem:[%s10672_s3 + $0x248] sm:$0xff]  }
  0x6e   : > { %7834 = vmatprep.subr.bf16.mxu1 %v9411_v9  ;;  %v4012_v1 = vsel %vm417_vm1, %v4007_v53, %v4011_v11  ;;  %v8815_v11 = vld [vmem:[%s10672_s3 + $0x90] sm:$0xff]  }
  0x6f   : > { %v1024_v25 = vsel %vm1017_vm5, %v1021_v20, %v1023_v62  ;;  %v1027_v20 = vrot.slane %v9471_v29, 2 }
  0x70   : > { %7803 = vmatmul.mubr.msk.bf16.gmra.mrb[8].mxu1 %vm505_vm0, %v790_v28  ;;  %v4027_v28 = vrot.slane %v4025_v57, 1  ;;  %v1224_v57 = vshrl.u32 %v9420_v13, 16  ;;  %v1229_v13 = vrot.slane %v1227_v61, 3 }
  0x71   : > { %7806 = vmatprep.mubr.msk.bf16.mxu1 %vm505_vm0, %v9281_v24  ;;  %v6843_v24 = vcombine.low %v1436_v39, %v953_v5  ;;  %v9503_v5 = vsel %vm1449_vm3, %v1457_v55, %v1459_v60  ;;  %v4204_v39 = vrot.slane %v7144_v15, 1  ;;  %v9560_v55 = vld [vmem:[%s10672_s3 + $0xa0] sm:$0xff]   ;;  %v1245_v15 = vshll.u32 %v9454_v44, 16 }
  0x72   : > { %8131 = vmatmul.mubr.msk.bf16.vlgmr.msra.gmra.mrb[0].mxu0 %vm505_vm0, %v3988_v16  ;;  %v4028_v32 = vsel %vm417_vm1, %v4023_v26, %v4027_v28  ;;  %v9535_v16 = vld [vmem:[%s9076_s14 + $0x3c] sm:$0xf]  ;;  %v1236_v26 = vshll.u32 %v9449_v37, 16  ;;  %v1226_v8 = vrot.slane %v1224_v57, 2 }
  0x73   : > { %8134 = vmatprep.mubr.msk.bf16.mxu0 %vm505_vm0, %v3996_v35  ;;  %8147 = vmatpush3.bf16.msra.mxu0 %v9357_v50  ;;  %v1450_v49 = vrot.slane %v6843_v24, 3  ;;  %v1028_v35 = vsel %vm1017_vm5, %v1025_v23, %v1027_v20  ;;  %v8818_v24 = vld [vmem:[%s10672_s3 + $0x98] sm:$0xff]   ;;  %v4206_v53 = vsel %vm777_vm4, %v4204_v39, %v4205_v42  ;;  %v4217_v39 = vrot.slane %v9459_v46, 1 }
  0x74   : > { %8148 = vmatprep.subr.bf16.mxu0 %v8805_v38  ;;  %v8829_v57 = vld [vmem:[%s10672_s3 + $0xb8] sm:$0xff]  }
  0x75   : > { %v9478_v50 = vsel %vm1449_vm3, %v1450_v49, %v1451_v40  ;;  %v6801_v40 = vcombine.low %v9535_v16, %v967_v34  ;;  %v1210_v49 = vshll.u32 %v9423_v21, 16 }
  0x77   : > { %8149 = vmatpush3.bf16.msra.mxu0 %v8805_v38  ;;  %v1026_v38 = vsel %vm1017_vm5, %v1023_v62, %v1025_v23  ;;  %v1031_v54 = vrot.slane %v6801_v40, 2  ;;  %v1217_v62 = vrot.slane %v1215_v48, 2 }
  0x78   : > { %7807 = vmatmul.mubr.msk.bf16.gmra.mrb[20].mxu1 %vm505_vm0, %v791_v18  ;;  %v1461_v18 = vrot.slane %v9475_v43, 3  ;;  %8150 = vmatprep.subr.bf16.mxu0 %v8810_v47 }
  0x79   : > { %7818 = vmatprep.mubr.msk.bf16.mxu1 %vm505_vm0, %v1020_v52  ;;  %v1218_v52 = vshll.u32 %v9399_v3, 16 }
  0x7a   : > { %v9508_v6 = vsel %vm1449_vm3, %v1459_v60, %v1461_v18  ;;  %8135 = vmatmul.mubr.msk.bf16.gmra.mrb[4].mxu0 %vm505_vm0, %v4004_v56  ;;  %v4207_v56 = vrot.slane %v9375_v17, 1  ;;  %v1212_v60 = vrot.slane %v1210_v49, 3 }
  0x7b   : > { %8138 = vmatprep.mubr.msk.bf16.mxu0 %vm505_vm0, %v4012_v1  ;;  %8151 = vmatpush3.bf16.msra.mxu0 %v8810_v47  ;;  %v1207_v47 = vshrl.u32 %v9423_v21, 16  ;;  %v1030_v21 = vsel %vm1017_vm5, %v1027_v20, %v1029_v45  ;;  %v1220_v63 = vrot.slane %v1218_v52, 3  ;;  %v1032_v1 = vsel %vm1017_vm5, %v1029_v45, %v1031_v54 }
  0x7c   : > { %8152 = vmatprep.subr.bf16.mxu0 %v8811_v2  ;;  %v4210_v17 = vsel %vm777_vm4, %v4207_v56, %v4209_v58  ;;  %v1230_v20 = vor.u32 %v1229_v13, %v1226_v8  ;;  %v1263_v52 = vshll.u32 %v9475_v43, 16  ;;  %v4599_v8 = vld [vmem:[%s9416_s25] sm:$0xf]  ;;  %v9659_v13 = vld [vmem:[%s9416_s25 + $0x4] sm:$0xf] }
  0x7d   : > { %v1209_v3 = vrot.slane %v1207_v47, 2 }
  0x7f   : > { %8153 = vmatpush3.bf16.msra.mxu0 %v8811_v2  ;;  %v4208_v2 = vsel %vm777_vm4, %v4205_v42, %v4207_v56  ;;  %v1213_v7 = vor.u32 %v1212_v60, %v1209_v3  ;;  %v1254_v42 = vshll.u32 %v9471_v29, 16  ;;  %v8826_v56 = vld [vmem:[%s10672_s3 + $0xb0] sm:$0xff]   ;;  %v1265_v60 = vrot.slane %v1263_v52, 3  ;;  %v9730_v52 = vld [vmem:[%s9416_s25 + $0x8] sm:$0xf] }
  0x80   : > { %7819 = vmatmul.mubr.msk.bf16.vlgmr.msra.gmra.mrb[0].mxu1 %vm505_vm0, %v1022_v12  ;;  %8170 = vmatprep.subr.bf16.mxu0 %v9521_v31  ;;  %v1221_v12 = vor.u32 %v1220_v63, %v1217_v62 }
  0x81   : > { %7835 = vmatpush3.bf16.msra.mxu1 %v9411_v9  ;;  %7822 = vmatprep.mubr.msk.bf16.mxu1 %vm505_vm0, %v1024_v25  ;;  %v4029_v9 = vshrl.u32 %v9459_v46, 16  ;;  %v1233_v25 = vshrl.u32 %v9449_v37, 16  ;;  %v1256_v47 = vrot.slane %v1254_v42, 3  ;;  %v8835_v46 = vld [vmem:[%s10672_s3 + $0x260] sm:$0xff]  }
  0x82   : > { %7836 = vmatprep.subr.bf16.mxu1 %v8809_v30  ;;  %8139 = vmatmul.mubr.msk.bf16.gmra.mrb[8].mxu0 %vm505_vm0, %v4020_v19  ;;  %v8823_v19 = vld [vmem:[%s10672_s3 + $0x250] sm:$0xff]   ;;  %v1222_v23 = vsel %vm1205_vm2, %v1213_v7, %v1221_v12  ;;  %v8833_v7 = vld [vmem:[%s10672_s3 + $0xc0] sm:$0xff]  }
  0x83   : > { %8142 = vmatprep.mubr.msk.bf16.mxu0 %vm505_vm0, %v4028_v32  ;;  %v4031_v33 = vor.u32 %v4029_v9, %v4027_v28  ;;  %v4211_v28 = vrot.slane %v9391_v0, 1  ;;  %v1235_v37 = vrot.slane %v1233_v25, 2  ;;  %v1238_v32 = vrot.slane %v1236_v26, 3  ;;  %v1192_v0 = vld [vmem:[%s9076_s14 + $0x40] sm:$0x7]  ;;  %v8824_v9 = vld [vmem:[%s10672_s3 + $0x258] sm:$0xff]  }
  0x84   : > { %v9608_v40 = vcombine.low %v9535_v16, %v1192_v0  ;;  %v1260_v16 = vshrl.u32 %v9475_v43, 16  ;;  %v8827_v25 = vld [vmem:[%s9416_s25 + $0x8] sm:$0xff]   ;;  %v8828_v26 = vld [vmem:[%s9416_s25 + $0x10] sm:$0xff]  }
  0x85   : > { %7837 = vmatpush3.bf16.msra.mxu1 %v8809_v30  ;;  %v4213_v30 = vrot.slane %v9402_v4, 1  ;;  %v4212_v4 = vsel %vm777_vm4, %v4209_v58, %v4211_v28  ;;  %v1239_v34 = vor.u32 %v1238_v32, %v1235_v37  ;;  %v8841_v37 = vld [vmem:[%s10672_s3 + $0x278] sm:$0xff]   ;;  %v7193_v32 = vcombine.low %v4599_v8, %v9659_v13  ;;  %v9672_v0 = vld [vmem:[%s9416_s25 + $0x8] sm:$0xff]  }
  0x86   : > { %7838 = vmatprep.subr.bf16.mxu1 %v8815_v11  ;;  %v1272_v58 = vshll.u32 %v9608_v40, 16  ;;  %v8855_v43 = vld [vmem:[%s10672_s3 + $0x288] sm:$0xff]  }
  0x88   : > { %7823 = vmatmul.mubr.msk.bf16.gmra.mrb[4].mxu1 %vm505_vm0, %v1026_v38  ;;  %v1251_v38 = vshrl.u32 %v9471_v29, 16  ;;  %v1240_v29 = vsel %vm1205_vm2, %v1230_v20, %v1239_v34 }
  0x89   : > { %7826 = vmatprep.mubr.msk.bf16.mxu1 %vm505_vm0, %v1028_v35  ;;  %7839 = vmatpush3.bf16.msra.mxu1 %v8815_v11  ;;  %v4214_v11 = vsel %vm777_vm4, %v4211_v28, %v4213_v30  ;;  %v4215_v35 = vrot.slane %v9446_v36, 1  ;;  %v8836_v28 = vld [vmem:[%s10672_s3 + $0x268] sm:$0xff]  }
  0x8a   : > { %7840 = vmatprep.subr.bf16.mxu1 %v8818_v24  ;;  %8143 = vmatmul.mubr.msk.bf16.gmra.mrb[20].mxu0 %vm505_vm0, %v4031_v33  ;;  %v1247_v33 = vrot.slane %v1245_v15, 3  ;;  %v1253_v36 = vrot.slane %v1251_v38, 2  ;;  %v8837_v15 = vld [vmem:[%s9416_s25 + $0x30] sm:$0xff]  }
  0x8b   : > { %8154 = vmatprep.mubr.msk.bf16.mxu0 %vm505_vm0, %v4206_v53  ;;  %v4216_v49 = vsel %vm777_vm4, %v4213_v30, %v4215_v35  ;;  %v1269_v53 = vshrl.u32 %v9608_v40, 16  ;;  %v8840_v30 = vld [vmem:[%s10672_s3 + $0x270] sm:$0xff]  }
  0x8c   : > { %v8844_v38 = vld [vmem:[%s10672_s3 + $0xd0] sm:$0xff]  }
  0x8d   : > { %7841 = vmatpush3.bf16.msra.mxu1 %v8818_v24  ;;  %v1231_v24 = vsel %vm1205_vm2, %v1221_v12, %v1230_v20  ;;  %v1271_v62 = vrot.slane %v1269_v53, 2  ;;  %v8834_v20 = vld [vmem:[%s9416_s25 + $0x28] sm:$0xff]  }
  0x8e   : > { %7858 = vmatprep.subr.bf16.mxu1 %v9560_v55  ;;  %v9733_v53 = vld [vmem:[%s9416_s25 + $0xc] sm:$0xff]  }
  0x90   : > { %7827 = vmatmul.mubr.msk.bf16.gmra.mrb[8].mxu1 %vm505_vm0, %v1030_v21  ;;  %v1257_v21 = vor.u32 %v1256_v47, %v1253_v36  ;;  %v9712_v47 = vld [vmem:[%s9416_s25 + $0x20] sm:$0xff]  }
  0x91   : > { %7830 = vmatprep.mubr.msk.bf16.mxu1 %vm505_vm0, %v1032_v1  ;;  %v1274_v1 = vrot.slane %v1272_v58, 3 }
  0x92   : > { %8155 = vmatmul.mubr.msk.bf16.vlgmr.msra.gmra.mrb[0].mxu0 %vm505_vm0, %v4208_v2  ;;  %v8825_v2 = vld [vmem:[%s9416_s25] sm:$0xff]  }
  0x93   : > { %8158 = vmatprep.mubr.msk.bf16.mxu0 %vm505_vm0, %v4210_v17  ;;  %8171 = vmatpush3.bf16.msra.mxu0 %v9521_v31  ;;  %v1242_v31 = vshrl.u32 %v9454_v44, 16  ;;  %v8822_v44 = vld [vmem:[%s10672_s3 + $0xa8] sm:$0xff]   ;;  %v1275_v61 = vor.u32 %v1274_v1, %v1271_v62  ;;  %v4700_v62 = vshrl.u32 %v9712_v47, 16  ;;  %v5569_v1 = vrot.slane %v9733_v53, 3 }
  0x94   : > { %8172 = vmatprep.subr.bf16.mxu0 %v8821_v10 }
  0x95   : > { %v1244_v45 = vrot.slane %v1242_v31, 2  ;;  %v9682_v31 = vld [vmem:[%s10672_s3 + $0x280] sm:$0xff]  }
  0x97   : > { %8173 = vmatpush3.bf16.msra.mxu0 %v8821_v10  ;;  %v1248_v48 = vor.u32 %v1247_v33, %v1244_v45  ;;  %v8847_v45 = vld [vmem:[%s10672_s3 + $0xd8] sm:$0xff]  }
  0x98   : > { %7831 = vmatmul.mubr.msk.bf16.gmra.mrb[24].mxu1 %vm505_vm0, %v1031_v54  ;;  %8174 = vmatprep.subr.bf16.mxu0 %v8823_v19  ;;  %v4218_v54 = vsel %vm777_vm4, %v4215_v35, %v4217_v39  ;;  %v8839_v33 = vld [vmem:[%s9416_s25 + $0x38] ss:$0 sps:$4 sm:$0xff]  }
  0x99   : > { %7842 = vmatprep.mubr.msk.bf16.mxu1 %vm505_vm0, %v1222_v23  ;;  %v1249_v3 = vsel %vm1205_vm2, %v1239_v34, %v1248_v48  ;;  %v1258_v63 = vsel %vm1205_vm2, %v1248_v48, %v1257_v21  ;;  %v8832_v23 = vld [vmem:[%s9416_s25 + $0x20] sm:$0xff]   ;;  %v9689_v34 = vld [vmem:[%s9416_s25 + $0x10] sm:$0xff]   ;;  %v4696_v48 = vshll.u32 %v9712_v47, 16 }
  0x9a   : > { %8159 = vmatmul.mubr.msk.bf16.gmra.mrb[4].mxu0 %vm505_vm0, %v4212_v4  ;;  %v4667_v4 = vshll.u32 %v7193_v32, 16 }
  0x9b   : > { %8162 = vmatprep.mubr.msk.bf16.mxu0 %vm505_vm0, %v4214_v11  ;;  %8175 = vmatpush3.bf16.msra.mxu0 %v8823_v19  ;;  %v8830_v19 = vld [vmem:[%s9416_s25 + $0x18] sm:$0xff]   ;;  %v4672_v11 = vshll.u32 %v9672_v0, 16 }
  0x9c   : > { %8176 = vmatprep.subr.bf16.mxu0 %v8824_v9  ;;  %v4669_v42 = vrot.slane %v4667_v4, 1 }
  0x9d   : > { %v4674_v35 = vrot.slane %v4672_v11, 1 }
  0x9f   : > { %8177 = vmatpush3.bf16.msra.mxu0 %v8824_v9  ;;  %v4665_v9 = vshrl.u32 %v7193_v32, 16 }
  0xa0   : > { %7843 = vmatmul.mubr.msk.bf16.vlgmr.msra.gmra.mrb[0].mxu1 %vm505_vm0, %v1231_v24  ;;  %8194 = vmatprep.subr.bf16.mxu0 %v8835_v46  ;;  %v4684_v24 = vshrl.u32 %v9689_v34, 16 }
  0xa1   : > { %7859 = vmatpush3.bf16.msra.mxu1 %v9560_v55  ;;  %7846 = vmatprep.mubr.msk.bf16.mxu1 %vm505_vm0, %v1240_v29  ;;  %v1262_v55 = vrot.slane %v1260_v16, 2  ;;  %v4670_v29 = vor.u32 %v4669_v42, %v4665_v9  ;;  %v9720_v16 = vld [vmem:[%s9416_s25 + $0x28] sm:$0xff]  }
  0xa2   : > { %7860 = vmatprep.subr.bf16.mxu1 %v8822_v44  ;;  %8163 = vmatmul.mubr.msk.bf16.gmra.mrb[8].mxu0 %vm505_vm0, %v4216_v49  ;;  %v4708_v32 = vshrl.u32 %v9720_v16, 16 }
  0xa3   : > { %8166 = vmatprep.mubr.msk.bf16.mxu0 %vm505_vm0, %v4218_v54  ;;  %v1266_v17 = vor.u32 %v1265_v60, %v1262_v55  ;;  %v4675_v49 = vsel %vm417_vm1, %v4670_v29, %v4674_v35  ;;  %v4698_v60 = vrot.slane %v4696_v48, 1  ;;  %v9817_v29 = vld [vmem:[%s10672_s3 + $0x2a0] sm:$0xff]   ;;  %v8865_v48 = vld [vmem:[%s10672_s3 + $0xf0] sm:$0xff]  }
  0xa5   : > { %7861 = vmatpush3.bf16.msra.mxu1 %v8822_v44  ;;  %v1267_v12 = vsel %vm1205_vm2, %v1257_v21, %v1266_v17  ;;  %v1276_v10 = vsel %vm1205_vm2, %v1266_v17, %v1275_v61  ;;  %v1463_v44 = vrot.slane %v9608_v40, 3  ;;  %v9738_v21 = vld [vmem:[%s9416_s25 + $0x14] sm:$0xff]  }
  0xa6   : > { %7862 = vmatprep.subr.bf16.mxu1 %v8826_v56 }
  0xa7   : > { %v1464_v58 = vsel %vm1449_vm3, %v1461_v18, %v1463_v44  ;;  %v9755_v18 = vld [vmem:[%s9416_s25 + $0x1c] sm:$0xff]  }
  0xa8   : > { %7847 = vmatmul.mubr.msk.bf16.gmra.mrb[4].mxu1 %vm505_vm0, %v1249_v3 }
  0xa9   : > { %7850 = vmatprep.mubr.msk.bf16.mxu1 %vm505_vm0, %v1258_v63  ;;  %7863 = vmatpush3.bf16.msra.mxu1 %v8826_v56  ;;  %v5555_v56 = vld [vmem:[%s9416_s25 + $0x4] sm:$0x8]  ;;  %v4704_v63 = vshll.u32 %v9720_v16, 16 }
  0xaa   : > { %7864 = vmatprep.subr.bf16.mxu1 %v8829_v57  ;;  %8167 = vmatmul.mubr.msk.bf16.gmra.mrb[24].mxu0 %vm505_vm0, %v4217_v39  ;;  %v4676_v39 = vshrl.u32 %v9672_v0, 16  ;;  %v7291_v3 = vcombine.low %v5555_v56, %v9730_v52 }
  0xab   : > { %8178 = vmatprep.mubr.msk.bf16.mxu0 %vm505_vm0, %v8825_v2  ;;  %v5571_v2 = vrot.slane %v9738_v21, 3  ;;  %v4706_v8 = vrot.slane %v4704_v63, 1  ;;  %v4900_v63 = vrot.slane %v9672_v0, 1 }
  0xad   : > { %7865 = vmatpush3.bf16.msra.mxu1 %v8829_v57  ;;  %v5568_v57 = vrot.slane %v7291_v3, 3  ;;  %v9837_v3 = vld [vmem:[%s9076_s14 + $0x10] sm:$0xf] }
  0xae   : > { %7882 = vmatprep.subr.bf16.mxu1 %v8833_v7 }
  0xb0   : > { %7851 = vmatmul.mubr.msk.bf16.gmra.mrb[8].mxu1 %vm505_vm0, %v1267_v12  ;;  %v9768_v12 = vsel %vm1449_vm3, %v5569_v1, %v5571_v2 }
  0xb1   : > { %7854 = vmatprep.mubr.msk.bf16.mxu1 %vm505_vm0, %v1276_v10  ;;  %v8849_v10 = vld [vmem:[%s9076_s14 + $0xc] sm:$0xff]  }
  0xb2   : > { %8179 = vmatmul.mubr.msk.bf16.vlgmr.msra.gmra.mrb[0].mxu0 %vm505_vm0, %v8827_v25  ;;  %v9773_v25 = vld [vmem:[%s9416_s25 + $0x38] sm:$0x1f]  }
  0xb3   : > { %8182 = vmatprep.mubr.msk.bf16.mxu0 %vm505_vm0, %v8828_v26  ;;  %8195 = vmatpush3.bf16.msra.mxu0 %v8835_v46  ;;  %v8860_v26 = vld [vmem:[%s10672_s3 + $0x290] sm:$0xff]   ;;  %v4720_v9 = vshll.u32 %v9773_v25, 16 }
  0xb4   : > { %8196 = vmatprep.subr.bf16.mxu0 %v8836_v28 }
  0xb7   : > { %8197 = vmatpush3.bf16.msra.mxu0 %v8836_v28  ;;  %v5573_v28 = vrot.slane %v9755_v18, 3 }
  0xb8   : > { %7855 = vmatmul.mubr.msk.bf16.gmra.mrb[28].mxu1 %vm505_vm0, %v1275_v61  ;;  %8198 = vmatprep.subr.bf16.mxu0 %v8840_v30 }
  0xb9   : > { %7866 = vmatprep.mubr.msk.bf16.mxu1 %vm505_vm0, %v9478_v50  ;;  %v8838_v50 = vld [vmem:[%s10672_s3 + $0xc8] sm:$0xff]  }
  0xba   : > { %8183 = vmatmul.mubr.msk.bf16.gmra.mrb[4].mxu0 %vm505_vm0, %v8830_v19  ;;  %v9782_v19 = vld [vmem:[%s9416_s25 + $0x24] sm:$0xff]  }
  0xbb   : > { %8186 = vmatprep.mubr.msk.bf16.mxu0 %vm505_vm0, %v8832_v23  ;;  %8199 = vmatpush3.bf16.msra.mxu0 %v8840_v30  ;;  %v4702_v23 = vor.u32 %v4700_v62, %v4698_v60  ;;  %v4724_v62 = vshrl.u32 %v9773_v25, 16 }
  0xbc   : > { %8200 = vmatprep.subr.bf16.mxu0 %v8841_v37 }
  0xbd   : > { %v4707_v11 = vsel %vm417_vm1, %v4702_v23, %v4706_v8 }
  0xbf   : > { %8201 = vmatpush3.bf16.msra.mxu0 %v8841_v37  ;;  %v9785_v37 = vsel %vm1449_vm3, %v5571_v2, %v5573_v28 }
  0xc0   : > { %7867 = vmatmul.mubr.msk.bf16.vlgmr.msra.gmra.mrb[0].mxu1 %vm505_vm0, %v9467_v51  ;;  %v9697_v51 = vld [vmem:[%s9416_s25 + $0x18] sm:$0xff]   ;;  %8218 = vmatprep.subr.bf16.mxu0 %v9682_v31 }
  0xc1   : > { %7883 = vmatpush3.bf16.msra.mxu1 %v8833_v7  ;;  %7870 = vmatprep.mubr.msk.bf16.mxu1 %vm505_vm0, %v9487_v59  ;;  %v4680_v59 = vshll.u32 %v9689_v34, 16  ;;  %v4688_v36 = vshll.u32 %v9697_v51, 16  ;;  %v4692_v46 = vshrl.u32 %v9697_v51, 16  ;;  %v9762_v7 = vld [vmem:[%s9416_s25 + $0x30] sm:$0xff]   ;;  %v4904_v23 = vrot.slane %v9697_v51, 1 }
  0xc2   : > { %7884 = vmatprep.subr.bf16.mxu1 %v8838_v50  ;;  %8187 = vmatmul.mubr.msk.bf16.gmra.mrb[8].mxu0 %vm505_vm0, %v8834_v20  ;;  %v4716_v4 = vshrl.u32 %v9762_v7, 16  ;;  %v8861_v20 = vld [vmem:[%s10672_s3 + $0x298] sm:$0xff]  }
  0xc3   : > { %8190 = vmatprep.mubr.msk.bf16.mxu0 %vm505_vm0, %v8837_v15  ;;  %v4682_v40 = vrot.slane %v4680_v59, 1  ;;  %v4690_v54 = vrot.slane %v4688_v36, 1  ;;  %v8856_v59 = vld [vmem:[%s9076_s14 + $0x1c] sm:$0xff]  }
  0xc5   : > { %7885 = vmatpush3.bf16.msra.mxu1 %v8838_v50  ;;  %v4686_v55 = vor.u32 %v4684_v24, %v4682_v40  ;;  %v4694_v30 = vor.u32 %v4692_v46, %v4690_v54  ;;  %v4712_v50 = vshll.u32 %v9762_v7, 16  ;;  %v9820_v46 = vld [vmem:[%s9416_s25 + $0x34] sm:$0xff]  }
  0xc6   : > { %7886 = vmatprep.subr.bf16.mxu1 %v8844_v38 }
  0xc7   : > { %v4691_v61 = vsel %vm417_vm1, %v4686_v55, %v4690_v54  ;;  %v4699_v15 = vsel %vm417_vm1, %v4694_v30, %v4698_v60  ;;  %v1845_v55 = vld [vmem:[%s9076_s14 + $0xc] sm:$0xf]  ;;  %v4902_v30 = vrot.slane %v9689_v34, 1 }
  0xc8   : > { %7871 = vmatmul.mubr.msk.bf16.gmra.mrb[4].mxu1 %vm505_vm0, %v9494_v41  ;;  %v9727_v41 = vld [vmem:[%s10672_s3 + $0xe0] sm:$0xff]  }
  0xc9   : > { %7874 = vmatprep.mubr.msk.bf16.mxu1 %vm505_vm0, %v9503_v5  ;;  %7887 = vmatpush3.bf16.msra.mxu1 %v8844_v38  ;;  %v4678_v5 = vor.u32 %v4676_v39, %v4674_v35  ;;  %v9800_v38 = vld [vmem:[%s9416_s25 + $0x2c] sm:$0xff]   ;;  %v8851_v35 = vld [vmem:[%s9076_s14 + $0x14] sm:$0xff]   ;;  %v4714_v39 = vrot.slane %v4712_v50, 1  ;;  %v4903_v34 = vsel %vm777_vm4, %v4900_v63, %v4902_v30  ;;  %v4905_v51 = vsel %vm777_vm4, %v4902_v30, %v4904_v23 }
  0xca   : > { %7888 = vmatprep.subr.bf16.mxu1 %v8847_v45  ;;  %8191 = vmatmul.mubr.msk.bf16.gmra.mrb[28].mxu0 %vm505_vm0, %v8839_v33  ;;  %v5577_v24 = vrot.slane %v9800_v38, 3  ;;  %v4886_v33 = vld [vmem:[%s9416_s25] sm:$0xe] }
  0xcb   : > { %8202 = vmatprep.mubr.msk.bf16.mxu0 %vm505_vm0, %v4675_v49  ;;  %v4683_v17 = vsel %vm417_vm1, %v4678_v5, %v4682_v40  ;;  %v4718_v36 = vor.u32 %v4716_v4, %v4714_v39  ;;  %v4722_v40 = vrot.slane %v4720_v9, 1  ;;  %v5579_v5 = vrot.slane %v9820_v46, 3  ;;  %v9875_v4 = vld [vmem:[%s9076_s14 + $0x1c] sm:$0xff]   ;;  %v8867_v9 = vld [vmem:[%s9076_s14 + $0x44] ss:$0 sps:$4 sm:$0xff]  }
  0xcd   : > { %7889 = vmatpush3.bf16.msra.mxu1 %v8847_v45  ;;  %v4710_v45 = vor.u32 %v4708_v32, %v4706_v8  ;;  %v4723_v56 = vsel %vm417_vm1, %v4718_v36, %v4722_v40  ;;  %v9842_v60 = vsel %vm1449_vm3, %v5577_v24, %v5579_v5  ;;  %v4726_v2 = vor.u32 %v4724_v62, %v4722_v40  ;;  %v8866_v8 = vld [vmem:[%s9076_s14 + $0x3c] sm:$0xff]   ;;  %v8878_v36 = vld [vmem:[%s10672_s3 + $0x2b0] sm:$0xff]  }
  0xce   : > { %7906 = vmatprep.subr.bf16.mxu1 %v9727_v41  ;;  %v9903_v40 = vld [vmem:[%s9076_s14 + $0x2c] sm:$0xff]  }
  0xcf   : > { %v4715_v54 = vsel %vm417_vm1, %v4710_v45, %v4714_v39  ;;  %v4906_v39 = vrot.slane %v9712_v47, 1  ;;  %v1930_v45 = vshrl.u32 %v9875_v4, 16 }
  0xd0   : > { %7875 = vmatmul.mubr.msk.bf16.gmra.mrb[8].mxu1 %vm505_vm0, %v9508_v6  ;;  %v9765_v6 = vsel %vm1449_vm3, %v5568_v57, %v5569_v1  ;;  %v6892_v57 = vcombine.low %v1845_v55, %v9837_v3  ;;  %v9912_v55 = vld [vmem:[%s9076_s14 + $0x34] sm:$0xff]  }
  0xd1   : > { %7878 = vmatprep.mubr.msk.bf16.mxu1 %vm505_vm0, %v1464_v58  ;;  %v7221_v58 = vcombine.low %v4886_v33, %v9659_v13  ;;  %v8862_v13 = vld [vmem:[%s9076_s14 + $0x2c] sm:$0xff]  }
  0xd2   : > { %8203 = vmatmul.mubr.msk.bf16.vlgmr.msra.gmra.mrb[0].mxu0 %vm505_vm0, %v4683_v17  ;;  %v9857_v17 = vld [vmem:[%s9076_s14 + $0x14] sm:$0xff]   ;;  %v1911_v32 = vshrl.u32 %v6892_v57, 16 }
  0xd3   : > { %8206 = vmatprep.mubr.msk.bf16.mxu0 %vm505_vm0, %v4691_v61  ;;  %8219 = vmatpush3.bf16.msra.mxu0 %v9682_v31  ;;  %v5575_v31 = vrot.slane %v9782_v19, 3  ;;  %v4899_v1 = vrot.slane %v7221_v58, 1  ;;  %v1913_v61 = vshll.u32 %v6892_v57, 16  ;;  %v8879_v58 = vld [vmem:[%s10672_s3 + $0x2b8] sm:$0xff]   ;;  %v8877_v57 = vld [vmem:[%s10672_s3 + $0x108] sm:$0xff]  }
  0xd4   : > { %8220 = vmatprep.subr.bf16.mxu0 %v8855_v43 }
  0xd5   : > { %v9803_v42 = vsel %vm1449_vm3, %v5573_v28, %v5575_v31  ;;  %v9823_v49 = vsel %vm1449_vm3, %v5575_v31, %v5577_v24  ;;  %v4901_v0 = vsel %vm777_vm4, %v4899_v1, %v4900_v63  ;;  %v1918_v28 = vshll.u32 %v9857_v17, 16  ;;  %v8874_v31 = vld [vmem:[%s10672_s3 + $0x2a8] sm:$0xff]  }
  0xd6   : > { %v1915_v50 = vrot.slane %v1913_v61, 1  ;;  %v4908_v24 = vrot.slane %v9720_v16, 1  ;;  %v5073_v61 = vld [vmem:[%s9416_s25 + $0x4] sm:$0xc] }
  0xd7   : > { %8221 = vmatpush3.bf16.msra.mxu0 %v8855_v43  ;;  %v8868_v43 = vld [vmem:[%s10672_s3 + $0xf8] sm:$0xff]  }
  0xd8   : > { %7879 = vmatmul.mubr.msk.bf16.gmra.mrb[32].mxu1 %vm505_vm0, %v1463_v44  ;;  %8222 = vmatprep.subr.bf16.mxu0 %v8860_v26  ;;  %v8859_v44 = vld [vmem:[%s10672_s3 + $0xe8] sm:$0xff]   ;;  %v4909_v16 = vsel %vm777_vm4, %v4906_v39, %v4908_v24 }
  0xd9   : > { %7890 = vmatprep.mubr.msk.bf16.mxu1 %vm505_vm0, %v8849_v10  ;;  %v9864_v10 = vld [vmem:[%s10672_s3 + $0x100] sm:$0xff]  }
  0xda   : > { %8207 = vmatmul.mubr.msk.bf16.gmra.mrb[4].mxu0 %vm505_vm0, %v4699_v15  ;;  %v9882_v15 = vld [vmem:[%s9076_s14 + $0x24] sm:$0xff]  }
  0xdb   : > { %8210 = vmatprep.mubr.msk.bf16.mxu0 %vm505_vm0, %v4707_v11  ;;  %8223 = vmatpush3.bf16.msra.mxu0 %v8860_v26  ;;  %v8864_v26 = vld [vmem:[%s9076_s14 + $0x34] sm:$0xff]   ;;  %v1916_v11 = vor.u32 %v1915_v50, %v1911_v32  ;;  %v1934_v33 = vshll.u32 %v9882_v15, 16  ;;  %v1938_v63 = vshrl.u32 %v9882_v15, 16 }
  0xdc   : > { %8224 = vmatprep.subr.bf16.mxu0 %v8861_v20 }
  0xdf   : > { %8225 = vmatpush3.bf16.msra.mxu0 %v8861_v20  ;;  %v1920_v20 = vrot.slane %v1918_v28, 1 }
  0xe0   : > { %7891 = vmatmul.mubr.msk.bf16.vlgmr.msra.gmra.mrb[0].mxu1 %vm505_vm0, %v8851_v35  ;;  %8242 = vmatprep.subr.bf16.mxu0 %v9817_v29  ;;  %v1926_v35 = vshll.u32 %v9875_v4, 16 }
  0xe1   : > { %7907 = vmatpush3.bf16.msra.mxu1 %v9727_v41  ;;  %7894 = vmatprep.mubr.msk.bf16.mxu1 %vm505_vm0, %v8856_v59  ;;  %v8858_v41 = vld [vmem:[%s9076_s14 + $0x24] sm:$0xff]   ;;  %v1922_v59 = vshrl.u32 %v9857_v17, 16 }
  0xe2   : > { %7908 = vmatprep.subr.bf16.mxu1 %v8859_v44  ;;  %8211 = vmatmul.mubr.msk.bf16.gmra.mrb[8].mxu0 %vm505_vm0, %v4715_v54  ;;  %v1928_v47 = vrot.slane %v1926_v35, 1 }
  0xe3   : > { %8214 = vmatprep.mubr.msk.bf16.mxu0 %vm505_vm0, %v4723_v56  ;;  %v1936_v56 = vrot.slane %v1934_v33, 1 }
  0xe4   : > { %v1932_v54 = vor.u32 %v1930_v45, %v1928_v47 }
  0xe5   : > { %7909 = vmatpush3.bf16.msra.mxu1 %v8859_v44  ;;  %v1921_v44 = vsel %vm417_vm1, %v1916_v11, %v1920_v20  ;;  %v1940_v30 = vor.u32 %v1938_v63, %v1936_v56 }
  0xe6   : > { %7910 = vmatprep.subr.bf16.mxu1 %v8865_v48  ;;  %v1937_v1 = vsel %vm417_vm1, %v1932_v54, %v1936_v56 }
  0xe8   : > { %7895 = vmatmul.mubr.msk.bf16.gmra.mrb[4].mxu1 %vm505_vm0, %v8858_v41  ;;  %v1942_v41 = vshll.u32 %v9903_v40, 16 }
  0xe9   : > { %7898 = vmatprep.mubr.msk.bf16.mxu1 %vm505_vm0, %v8862_v13  ;;  %7911 = vmatpush3.bf16.msra.mxu1 %v8865_v48  ;;  %v1924_v48 = vor.u32 %v1922_v59, %v1920_v20  ;;  %v4910_v13 = vrot.slane %v9762_v7, 1  ;;  %v9931_v7 = vld [vmem:[%s10672_s3 + $0x2c0] sm:$0xff]   ;;  %v8884_v20 = vld [vmem:[%s10672_s3 + $0x110] sm:$0xff]   ;;  %v8888_v59 = vld [vmem:[%s10672_s3 + $0x118] sm:$0xff]  }
  0xea   : > { %7912 = vmatprep.subr.bf16.mxu1 %v8868_v43  ;;  %8215 = vmatmul.mubr.msk.bf16.gmra.mrb[32].mxu0 %vm505_vm0, %v4726_v2  ;;  %v1946_v2 = vshrl.u32 %v9903_v40, 16 }
  0xeb   : > { %8226 = vmatprep.mubr.msk.bf16.mxu0 %vm505_vm0, %v4901_v0  ;;  %v1929_v62 = vsel %vm417_vm1, %v1924_v48, %v1928_v47  ;;  %v1950_v0 = vshll.u32 %v9912_v55, 16  ;;  %v4911_v28 = vsel %vm777_vm4, %v4908_v24, %v4910_v13  ;;  %v9970_v47 = vld [vmem:[%s10672_s3 + $0x120] sm:$0xff]   ;;  %v2132_v48 = vld [vmem:[%s9076_s14 + $0xc] sm:$0xe] }
  0xec   : > { %v6920_v63 = vcombine.low %v2132_v48, %v9837_v3  ;;  %v8895_v3 = vld [vmem:[%s10672_s3 + $0x2c8] sm:$0xff]   ;;  %v2154_v48 = vrot.slane %v9912_v55, 1 }
  0xed   : > { %7913 = vmatpush3.bf16.msra.mxu1 %v8868_v43  ;;  %v4912_v43 = vrot.slane %v9773_v25, 1  ;;  %v9935_v25 = vld [vmem:[%s9076_s14 + $0x3c] sm:$0xff]   ;;  %v1952_v50 = vrot.slane %v1950_v0, 1  ;;  %v2146_v0 = vrot.slane %v9857_v17, 1 }
  0xee   : > { %7930 = vmatprep.subr.bf16.mxu1 %v9864_v10  ;;  %v1962_v35 = vshrl.u32 %v9935_v25, 16  ;;  %v5088_v17 = vld [vmem:[%s9416_s25 + $0x40] sm:$0x3] }
  0xf0   : > { %7899 = vmatmul.mubr.msk.bf16.gmra.mrb[8].mxu1 %vm505_vm0, %v8864_v26  ;;  %v1944_v26 = vrot.slane %v1942_v41, 1 }
  0xf1   : > { %7902 = vmatprep.mubr.msk.bf16.mxu1 %vm505_vm0, %v8866_v8  ;;  %v9941_v8 = vcombine.low %v5073_v61, %v9730_v52 }
  0xf2   : > { %8227 = vmatmul.mubr.msk.bf16.vlgmr.msra.gmra.mrb[0].mxu0 %vm505_vm0, %v4903_v34  ;;  %v1948_v32 = vor.u32 %v1946_v2, %v1944_v26  ;;  %v1945_v52 = vsel %vm417_vm1, %v1940_v30, %v1944_v26  ;;  %v2145_v2 = vrot.slane %v6920_v63, 1  ;;  %v5145_v26 = vrot.slane %v9782_v19, 2  ;;  %v8901_v63 = vld [vmem:[%s10672_s3 + $0x130] sm:$0xff]  }
  0xf3   : > { %8230 = vmatprep.mubr.msk.bf16.mxu0 %vm505_vm0, %v4905_v51  ;;  %8243 = vmatpush3.bf16.msra.mxu0 %v9817_v29  ;;  %v4907_v29 = vsel %vm777_vm4, %v4904_v23, %v4906_v39  ;;  %v4913_v23 = vsel %vm777_vm4, %v4910_v13, %v4912_v43  ;;  %v5138_v34 = vrot.slane %v9941_v8, 2  ;;  %v1954_v51 = vshrl.u32 %v9912_v55, 16 }
  0xf4   : > { %8244 = vmatprep.subr.bf16.mxu0 %v8874_v31  ;;  %v1953_v11 = vsel %vm417_vm1, %v1948_v32, %v1952_v50  ;;  %v5143_v13 = vrot.slane %v9755_v18, 2  ;;  %v5147_v30 = vrot.slane %v9800_v38, 2  ;;  %v8899_v32 = vld [vmem:[%s10672_s3 + $0x2d0] sm:$0xff]  }
  0xf5   : > { %v1956_v24 = vor.u32 %v1954_v51, %v1952_v50 }
  0xf6   : > { %v5146_v50 = vsel %vm1017_vm5, %v5143_v13, %v5145_v26 }
  0xf7   : > { %8245 = vmatpush3.bf16.msra.mxu0 %v8874_v31  ;;  %v9948_v31 = vld [vmem:[%s9076_s14 + $0x44] sm:$0x1f]   ;;  %s8709_s14 = smul.u32 60, %s10686_s18 }
  0xf8   : > { %7903 = vmatmul.mubr.msk.bf16.gmra.mrb[36].mxu1 %vm505_vm0, %v8867_v9  ;;  %8246 = vmatprep.subr.bf16.mxu0 %v8878_v36  ;;  %v5139_v9 = vrot.slane %v9733_v53, 2  ;;  %v1966_v39 = vshll.u32 %v9948_v31, 16 }
  0xf9   : > { %7914 = vmatprep.mubr.msk.bf16.mxu1 %vm505_vm0, %v1921_v44  ;;  %s10576_s11 = scalar_lea.vmem %s10674_s5, %s8709_s14 }
  0xfa   : > { %8231 = vmatmul.mubr.msk.bf16.gmra.mrb[4].mxu0 %vm505_vm0, %v4907_v29  ;;  %v5140_v45 = vsel %vm1017_vm5, %v5138_v34, %v5139_v9  ;;  %v8900_v34 = vld [vmem:[%s10672_s3 + $0x2d8] sm:$0xff]  }
  0xfb   : > { %8234 = vmatprep.mubr.msk.bf16.mxu0 %vm505_vm0, %v4909_v16  ;;  %8247 = vmatpush3.bf16.msra.mxu0 %v8878_v36  ;;  %v1968_v36 = vrot.slane %v1966_v39, 1  ;;  %v5329_v39 = vshll.u32 %v9941_v8, 16 }
  0xfc   : > { %8248 = vmatprep.subr.bf16.mxu0 %v8879_v58 }
  0xff   : > { %8249 = vmatpush3.bf16.msra.mxu0 %v8879_v58  ;;  %v5141_v58 = vrot.slane %v9738_v21, 2 }
 0x100   : > { %7915 = vmatmul.mubr.msk.bf16.vlgmr.msra.gmra.mrb[0].mxu1 %vm505_vm0, %v1929_v62  ;;  %8266 = vmatprep.subr.bf16.mxu0 %v9931_v7 }
 0x101   : > { %7931 = vmatpush3.bf16.msra.mxu1 %v9864_v10  ;;  %7918 = vmatprep.mubr.msk.bf16.mxu1 %vm505_vm0, %v1937_v1  ;;  %v1958_v10 = vshll.u32 %v9935_v25, 16  ;;  %v1970_v1 = vshrl.u32 %v9948_v31, 16 }
 0x102   : > { %7932 = vmatprep.subr.bf16.mxu1 %v8877_v57  ;;  %8235 = vmatmul.mubr.msk.bf16.gmra.mrb[8].mxu0 %vm505_vm0, %v4911_v28  ;;  %v2147_v28 = vsel %vm777_vm4, %v2145_v2, %v2146_v0 }
 0x103   : > { %8238 = vmatprep.mubr.msk.bf16.mxu0 %vm505_vm0, %v4913_v23  ;;  %v1960_v44 = vrot.slane %v1958_v10, 1  ;;  %v1972_v61 = vor.u32 %v1970_v1, %v1968_v36  ;;  %v10003_v23 = vld [vmem:[%s9416_s25 + $0x3c] sm:$0xf]  ;;  %v5343_v1 = vshrl.u32 %v9738_v21, 16 }
 0x104   : > { %v7249_v10 = vcombine.low %v10003_v23, %v5088_v17  ;;  %v2158_v17 = vrot.slane %v9948_v31, 1 }
 0x105   : > { %7933 = vmatpush3.bf16.msra.mxu1 %v8877_v57  ;;  %v1964_v33 = vor.u32 %v1962_v35, %v1960_v44  ;;  %v1961_v56 = vsel %vm417_vm1, %v1956_v24, %v1960_v44  ;;  %v5144_v57 = vsel %vm1017_vm5, %v5141_v58, %v5143_v13  ;;  %v5326_v35 = vshrl.u32 %v9941_v8, 16 }
 0x106   : > { %7934 = vmatprep.subr.bf16.mxu1 %v8884_v20  ;;  %v5337_v44 = vshll.u32 %v9733_v53, 16 }
 0x107   : > { %v1969_v62 = vsel %vm417_vm1, %v1964_v33, %v1968_v36 }
 0x108   : > { %7919 = vmatmul.mubr.msk.bf16.gmra.mrb[4].mxu1 %vm505_vm0, %v1945_v52  ;;  %v5148_v52 = vsel %vm1017_vm5, %v5145_v26, %v5147_v30  ;;  %v5339_v13 = vrot.slane %v5337_v44, 3  ;;  %v2156_v26 = vrot.slane %v9935_v25, 1 }
 0x109   : > { %7922 = vmatprep.mubr.msk.bf16.mxu1 %vm505_vm0, %v1953_v11  ;;  %7935 = vmatpush3.bf16.msra.mxu1 %v8884_v20  ;;  %v2150_v20 = vrot.slane %v9882_v15, 1  ;;  %v5151_v15 = vrot.slane %v7249_v10, 2 }
 0x10a   : > { %7936 = vmatprep.subr.bf16.mxu1 %v8888_v59  ;;  %8239 = vmatmul.mubr.msk.bf16.gmra.mrb[36].mxu0 %vm505_vm0, %v4912_v43  ;;  %v5142_v43 = vsel %vm1017_vm5, %v5139_v9, %v5141_v58  ;;  %v8898_v9 = vld [vmem:[%s10672_s3 + $0x128] sm:$0xff]   ;;  %v5331_v58 = vrot.slane %v5329_v39, 3  ;;  %v2157_v10 = vsel %vm777_vm4, %v2154_v48, %v2156_v26 }
 0x10b   : > { %v9972_v29 = vpop.f32.mrb[12].mxu1  ;;  %8250 = vmatprep.mubr.msk.bf16.mxu0 %vm505_vm0, %v5140_v45  ;;  %v10036_v45 = vld [vmem:[%s10672_s3 + $0x2e0] sm:$0xff]  }
 0x10c   : > { %v9976_v16 = vpop.f32.mrb[13].mxu1 }
 0x10d   : > { %v7761_v54 = vpop.f32.mrb[14].mxu1  ;;  %7937 = vmatpush3.bf16.msra.mxu1 %v8888_v59  ;;  %v5334_v59 = vshrl.u32 %v9733_v53, 16  ;;  %v2152_v53 = vrot.slane %v9903_v40, 1 }
 0x10e   : > { %v9981_v41 = vpop.f32.mrb[15].mxu1  ;;  %7954 = vmatprep.subr.bf16.mxu1 %v9970_v47 }
 0x10f   : > { %v2153_v40 = vsel %vm777_vm4, %v2150_v20, %v2152_v53  ;;  %v2155_v55 = vsel %vm777_vm4, %v2152_v53, %v2154_v48 }
 0x110   : > { %7923 = vmatmul.mubr.msk.bf16.gmra.mrb[8].mxu1 %vm505_vm0, %v1961_v56  ;;  %v5328_v56 = vrot.slane %v5326_v35, 2  ;;  %v5373_v35 = vshll.u32 %v9800_v38, 16 }
 0x111   : > { %7926 = vmatprep.mubr.msk.bf16.mxu1 %vm505_vm0, %v1969_v62  ;;  %v5336_v62 = vrot.slane %v5334_v59, 2 }
 0x112   : > { %8251 = vmatmul.mubr.msk.bf16.vlgmr.msra.gmra.mrb[0].mxu0 %vm505_vm0, %v5142_v43  ;;  %v5346_v43 = vshll.u32 %v9738_v21, 16  ;;  %v5375_v53 = vrot.slane %v5373_v35, 3 }
 0x113   : > { %8254 = vmatprep.mubr.msk.bf16.mxu0 %vm505_vm0, %v5144_v57  ;;  %8267 = vmatpush3.bf16.msra.mxu0 %v9931_v7  ;;  %v2148_v7 = vrot.slane %v9875_v4, 1  ;;  %v5149_v4 = vrot.slane %v9820_v46, 2  ;;  %v5332_v57 = vor.u32 %v5331_v58, %v5328_v56  ;;  %v5340_v2 = vor.u32 %v5339_v13, %v5336_v62 }
 0x114   : > { %8268 = vmatprep.subr.bf16.mxu0 %v8895_v3  ;;  %v5379_v56 = vshrl.u32 %v9820_v46, 16  ;;  %v5382_v58 = vshll.u32 %v9820_v46, 16 }
 0x115   : > { %v2149_v51 = vsel %vm777_vm4, %v2146_v0, %v2148_v7  ;;  %v2151_v11 = vsel %vm777_vm4, %v2148_v7, %v2150_v20  ;;  %v5150_v36 = vsel %vm1017_vm5, %v5147_v30, %v5149_v4  ;;  %v5152_v8 = vsel %vm1017_vm5, %v5149_v4, %v5151_v15 }
 0x116   : > { %v5352_v0 = vshrl.u32 %v9755_v18, 16  ;;  %v5348_v30 = vrot.slane %v5346_v43, 3  ;;  %v5341_v21 = vsel %vm1205_vm2, %v5332_v57, %v5340_v2  ;;  %v5364_v4 = vshll.u32 %v9782_v19, 16 }
 0x117   : > { %8269 = vmatpush3.bf16.msra.mxu0 %v8895_v3  ;;  %v5355_v3 = vshll.u32 %v9755_v18, 16  ;;  %v10072_v18 = vld [vmem:[%s10672_s3 + $0x140] sm:$0xff]  }
 0x118   : > { %7927 = vmatmul.mubr.msk.bf16.gmra.mrb[40].mxu1 %vm505_vm0, %v1972_v61  ;;  %8270 = vmatprep.subr.bf16.mxu0 %v8899_v32  ;;  %v8902_v61 = vld [vmem:[%s10672_s3 + $0x138] sm:$0xff]   ;;  %v5366_v44 = vrot.slane %v5364_v4, 3 }
 0x119   : > { %7938 = vmatprep.mubr.msk.bf16.mxu1 %vm505_vm0, %v2147_v28  ;;  %v5345_v28 = vrot.slane %v5343_v1, 2  ;;  %v8919_v4 = vld [vmem:[%s10672_s3 + $0x158] sm:$0xff]  }
 0x11a   : > { %8255 = vmatmul.mubr.msk.bf16.gmra.mrb[4].mxu0 %vm505_vm0, %v5146_v50  ;;  %v5357_v50 = vrot.slane %v5355_v3, 3 }
 0x11b   : > { %8258 = vmatprep.mubr.msk.bf16.mxu0 %vm505_vm0, %v5148_v52  ;;  %8271 = vmatpush3.bf16.msra.mxu0 %v8899_v32  ;;  %v5354_v32 = vrot.slane %v5352_v0, 2  ;;  %v8904_v0 = vld [vmem:[%s9101_s26 + $0x8] sm:$0xff]  }
 0x11c   : > { %8272 = vmatprep.subr.bf16.mxu0 %v8900_v34 }
 0x11d   : > { %v10031_v24 = vpop.f32.mrb[12].mxu0 }
 0x11e   : > { %v10039_v33 = vpop.f32.mrb[13].mxu0 }
 0x11f   : > { %v8097_v54 = vpop.f32.mrb[14].mxu0  ;;  %8273 = vmatpush3.bf16.msra.mxu0 %v8900_v34  ;;  %v5349_v34 = vor.u32 %v5348_v30, %v5345_v28  ;;  %v8910_v28 = vld [vmem:[%s10672_s3 + $0x148] sm:$0xff]  }
 0x120   : > { %7939 = vmatmul.mubr.msk.bf16.vlgmr.msra.gmra.mrb[0].mxu1 %vm505_vm0, %v2149_v51  ;;  %8290 = vmatprep.subr.bf16.mxu0 %v10036_v45  ;;  %v5361_v51 = vshrl.u32 %v9782_v19, 16  ;;  %v8903_v54 = vld [vmem:[%s9101_s26] sm:$0xff]  }
 0x121   : > { %7955 = vmatpush3.bf16.msra.mxu1 %v9970_v47  ;;  %7942 = vmatprep.mubr.msk.bf16.mxu1 %vm505_vm0, %v2151_v11  ;;  %v10050_v47 = vpop.f32.mrb[15].mxu0  ;;  %v5350_v19 = vsel %vm1205_vm2, %v5340_v2, %v5349_v34  ;;  %v8912_v2 = vld [vmem:[%s10672_s3 + $0x2f8] sm:$0xff]  }
 0x122   : > { %7956 = vmatprep.subr.bf16.mxu1 %v8898_v9  ;;  %8259 = vmatmul.mubr.msk.bf16.gmra.mrb[8].mxu0 %vm505_vm0, %v5150_v36  ;;  %v5363_v59 = vrot.slane %v5361_v51, 2  ;;  %v8913_v51 = vld [vmem:[%s9101_s26 + $0x20] sm:$0xff]  }
 0x123   : > { %8262 = vmatprep.mubr.msk.bf16.mxu0 %vm505_vm0, %v5152_v8 }
 0x124   : > { %v5367_v48 = vor.u32 %v5366_v44, %v5363_v59  ;;  %v8915_v59 = vld [vmem:[%s9101_s26 + $0x28] sm:$0xff]  }
 0x125   : > { %7957 = vmatpush3.bf16.msra.mxu1 %v8898_v9  ;;  %v5370_v9 = vshrl.u32 %v9800_v38, 16 }
 0x126   : > { %7958 = vmatprep.subr.bf16.mxu1 %v8901_v63 }
 0x127   : > { %v5372_v8 = vrot.slane %v5370_v9, 2  ;;  %v10165_v9 = vld [vmem:[%s10672_s3 + $0x160] sm:$0xff]  }
 0x128   : > { %7943 = vmatmul.mubr.msk.bf16.gmra.mrb[4].mxu1 %vm505_vm0, %v2153_v40 }
 0x129   : > { %7946 = vmatprep.mubr.msk.bf16.mxu1 %vm505_vm0, %v2155_v55  ;;  %7959 = vmatpush3.bf16.msra.mxu1 %v8901_v63  ;;  %v8911_v63 = vld [vmem:[%s10672_s3 + $0x2f0] sm:$0xff]   ;;  %v5381_v55 = vrot.slane %v5379_v56, 2 }
 0x12a   : > { %7960 = vmatprep.subr.bf16.mxu1 %v8902_v61  ;;  %8263 = vmatmul.mubr.msk.bf16.gmra.mrb[40].mxu0 %vm505_vm0, %v5151_v15  ;;  %v5358_v15 = vor.u32 %v5357_v50, %v5354_v32 }
 0x12b   : > { %v7784_v7 = vpop.f32.mrb[16].mxu1  ;;  %8274 = vmatprep.mubr.msk.bf16.mxu0 %vm505_vm0, %v5341_v21  ;;  %v8924_v21 = vld [vmem:[%s10672_s3 + $0x300] sm:$0xff]  }
 0x12c   : > { %v10076_v25 = vadd.f32 %v7784_v7, %v9972_v29  ;;  %v750_v20 = vpop.f32.mrb[17].mxu1  ;;  %v2159_v29 = vsel %vm777_vm4, %v2156_v26, %v2158_v17  ;;  %v5359_v38 = vsel %vm1205_vm2, %v5349_v34, %v5358_v15  ;;  %v5368_v40 = vsel %vm1205_vm2, %v5358_v15, %v5367_v48  ;;  %v10147_v34 = vld [vmem:[%s9101_s26 + $0x4] sm:$0xf] }
 0x12d   : > { %v10080_v31 = vadd.f32 %v750_v20, %v9976_v16  ;;  %v7785_v52 = vpop.f32.mrb[18].mxu1  ;;  %7961 = vmatpush3.bf16.msra.mxu1 %v8902_v61  ;;  %v5312_v16 = vld [vmem:[%s9416_s25 + $0x40] sm:$0x7]  ;;  %v8908_v61 = vld [vmem:[%s9101_s26 + $0x10] sm:$0xff]  }
 0x12e   : > { %v753_v11 = vpop.f32.mrb[19].mxu1  ;;  %7978 = vmatprep.subr.bf16.mxu1 %v10072_v18  ;;  %v10097_v36 = vcombine.low %v10003_v23, %v5312_v16  ;;  %v5376_v23 = vor.u32 %v5375_v53, %v5372_v8  ;;  %v8916_v20 = vld [vmem:[%s10672_s3 + $0x150] sm:$0xff]   ;;  %v2540_v52 = vld [vmem:[%s9101_s26] sm:$0xf] }
 0x12f   : > { %v10091_v39 = vadd.f32 %v753_v11, %v9981_v41  ;;  %v8907_v41 = vld [vmem:[%s10672_s3 + $0x2e8] sm:$0xff]   ;;  %v6969_v11 = vcombine.low %v2540_v52, %v10147_v34  ;;  %v8917_v8 = vld [vmem:[%s9101_s26 + $0x30] sm:$0xff]  }
 0x130   : > { %7947 = vmatmul.mubr.msk.bf16.gmra.mrb[8].mxu1 %vm505_vm0, %v2157_v10  ;;  %v5388_v62 = vshrl.u32 %v10097_v36, 16  ;;  %v5391_v13 = vshll.u32 %v10097_v36, 16  ;;  %v5377_v1 = vsel %vm1205_vm2, %v5367_v48, %v5376_v23 }
 0x131   : > { %7950 = vmatprep.mubr.msk.bf16.mxu1 %vm505_vm0, %v2159_v29  ;;  %v10160_v29 = vld [vmem:[%s9101_s26 + $0x8] sm:$0xff]   ;;  %v2608_v15 = vshll.u32 %v6969_v11, 16 }
 0x132   : > { %8275 = vmatmul.mubr.msk.bf16.vlgmr.msra.gmra.mrb[0].mxu0 %vm505_vm0, %v5350_v19  ;;  %v5390_v43 = vrot.slane %v5388_v62, 2  ;;  %v5393_v57 = vrot.slane %v5391_v13, 3  ;;  %v2617_v13 = vshrl.u32 %v10160_v29, 16 }
 0x133   : > { %8278 = vmatprep.mubr.msk.bf16.mxu0 %vm505_vm0, %v5359_v38  ;;  %8291 = vmatpush3.bf16.msra.mxu0 %v10036_v45  ;;  %v5384_v45 = vrot.slane %v5382_v58, 3  ;;  %v2610_v48 = vrot.slane %v2608_v15, 1  ;;  %v8925_v58 = vld [vmem:[%s10672_s3 + $0x308] sm:$0xff]  }
 0x134   : > { %8292 = vmatprep.subr.bf16.mxu0 %v8907_v41  ;;  %v5394_v26 = vor.u32 %v5393_v57, %v5390_v43 }
 0x135   : > { %v5385_v3 = vor.u32 %v5384_v45, %v5381_v55 }
 0x137   : > { %8293 = vmatpush3.bf16.msra.mxu0 %v8907_v41  ;;  %v5386_v32 = vsel %vm1205_vm2, %v5376_v23, %v5385_v3  ;;  %v5395_v7 = vsel %vm1205_vm2, %v5385_v3, %v5394_v26  ;;  %v2606_v41 = vshrl.u32 %v6969_v11, 16  ;;  %v10192_v23 = vld [vmem:[%s9101_s26 + $0x18] sm:$0xff]  }
 0x138   : > { %7951 = vmatmul.mubr.msk.bf16.gmra.mrb[44].mxu1 %vm505_vm0, %v2158_v17  ;;  %8294 = vmatprep.subr.bf16.mxu0 %v8911_v63  ;;  %v2629_v55 = vshll.u32 %v10192_v23, 16 }
 0x139   : > { %7962 = vmatprep.mubr.msk.bf16.mxu1 %vm505_vm0, %v8903_v54  ;;  %v2613_v54 = vshll.u32 %v10160_v29, 16 }
 0x13a   : > { %8279 = vmatmul.mubr.msk.bf16.gmra.mrb[4].mxu0 %vm505_vm0, %v5368_v40  ;;  %v2631_v57 = vrot.slane %v2629_v55, 1 }
 0x13b   : > { %8282 = vmatprep.mubr.msk.bf16.mxu0 %vm505_vm0, %v5377_v1  ;;  %8295 = vmatpush3.bf16.msra.mxu0 %v8911_v63  ;;  %v2615_v56 = vrot.slane %v2613_v54, 1  ;;  %v10209_v1 = vld [vmem:[%s9101_s26 + $0x20] sm:$0xff]  }
 0x13c   : > { %8296 = vmatprep.subr.bf16.mxu0 %v8912_v2  ;;  %v2637_v3 = vshll.u32 %v10209_v1, 16 }
 0x13d   : > { %v10128_v30 = vpop.f32.mrb[16].mxu0 }
 0x13e   : > { %v10134_v17 = vpop.f32.mrb[17].mxu0 }
 0x13f   : > { %v8121_v50 = vpop.f32.mrb[18].mxu0  ;;  %8297 = vmatpush3.bf16.msra.mxu0 %v8912_v2  ;;  %v8930_v2 = vld [vmem:[%s10672_s3 + $0x318] sm:$0xff]  }
 0x140   : > { %7963 = vmatmul.mubr.msk.bf16.vlgmr.msra.gmra.mrb[0].mxu1 %vm505_vm0, %v8904_v0  ;;  %v10143_v10 = vpop.f32.mrb[19].mxu0  ;;  %8314 = vmatprep.subr.bf16.mxu0 %v8924_v21  ;;  %v10216_v0 = vld [vmem:[%s9101_s26 + $0x28] sm:$0xff]  }
 0x141   : > { %7979 = vmatpush3.bf16.msra.mxu1 %v10072_v18  ;;  %7966 = vmatprep.mubr.msk.bf16.mxu1 %vm505_vm0, %v8908_v61  ;;  %v8909_v18 = vld [vmem:[%s9101_s26 + $0x18] sm:$0xff]   ;;  %v2645_v50 = vshll.u32 %v10216_v0, 16 }
 0x142   : > { %7980 = vmatprep.subr.bf16.mxu1 %v8910_v28  ;;  %8283 = vmatmul.mubr.msk.bf16.gmra.mrb[8].mxu0 %vm505_vm0, %v5386_v32  ;;  %v8928_v32 = vld [vmem:[%s10672_s3 + $0x168] sm:$0xff]  }
 0x143   : > { %8286 = vmatprep.mubr.msk.bf16.mxu0 %vm505_vm0, %v5395_v7  ;;  %v2647_v15 = vrot.slane %v2645_v50, 1 }
 0x145   : > { %7981 = vmatpush3.bf16.msra.mxu1 %v8910_v28 }
 0x146   : > { %7982 = vmatprep.subr.bf16.mxu1 %v8916_v20 }
 0x148   : > { %7967 = vmatmul.mubr.msk.bf16.gmra.mrb[4].mxu1 %vm505_vm0, %v8909_v18 }
 0x149   : > { %7970 = vmatprep.mubr.msk.bf16.mxu1 %vm505_vm0, %v8913_v51  ;;  %7983 = vmatpush3.bf16.msra.mxu1 %v8916_v20  ;;  %v10241_v20 = vld [vmem:[%s9101_s26 + $0x30] sm:$0xff]  }
 0x14a   : > { %7984 = vmatprep.subr.bf16.mxu1 %v8919_v4  ;;  %8287 = vmatmul.mubr.msk.bf16.gmra.mrb[44].mxu0 %vm505_vm0, %v5394_v26  ;;  %v2633_v26 = vshrl.u32 %v10192_v23, 16  ;;  %v2653_v46 = vshll.u32 %v10241_v20, 16 }
 0x14b   : > { %v7808_v35 = vpop.f32.mrb[20].mxu1  ;;  %8298 = vmatprep.mubr.msk.bf16.mxu0 %vm505_vm0, %v9765_v6  ;;  %v2611_v6 = vor.u32 %v2610_v48, %v2606_v41  ;;  %v8932_v48 = vld [vmem:[%s9416_s25 + $0xc] sm:$0xff]  }
 0x14c   : > { %v10169_v16 = vadd.f32 %v7808_v35, %v10076_v25  ;;  %v923_v19 = vpop.f32.mrb[21].mxu1  ;;  %v2635_v18 = vor.u32 %v2633_v26, %v2631_v57  ;;  %v8934_v35 = vld [vmem:[%s10672_s3 + $0x170] sm:$0xff]   ;;  %v2655_v41 = vrot.slane %v2653_v46, 1 }
 0x14d   : > { %v10173_v44 = vadd.f32 %v923_v19, %v10080_v31  ;;  %v7809_v38 = vpop.f32.mrb[22].mxu1  ;;  %7985 = vmatpush3.bf16.msra.mxu1 %v8919_v4  ;;  %v10185_v31 = vld [vmem:[%s9101_s26 + $0x10] sm:$0xff]   ;;  %v2616_v63 = vsel %vm417_vm1, %v2611_v6, %v2615_v56 }
 0x14e   : > { %v926_v53 = vpop.f32.mrb[23].mxu1  ;;  %8002 = vmatprep.subr.bf16.mxu1 %v10165_v9  ;;  %v2621_v62 = vshll.u32 %v10185_v31, 16  ;;  %v2625_v40 = vshrl.u32 %v10185_v31, 16  ;;  %v2843_v50 = vrot.slane %v10185_v31, 1  ;;  %v8943_v46 = vld [vmem:[%s9416_s25 + $0x34] sm:$0xff]  }
 0x14f   : > { %v10181_v25 = vadd.f32 %v926_v53, %v10091_v39  ;;  %v8918_v39 = vld [vmem:[%s9101_s26 + $0x38] ss:$0 sps:$4 sm:$0xff]  }
 0x150   : > { %7971 = vmatmul.mubr.msk.bf16.gmra.mrb[8].mxu1 %vm505_vm0, %v8915_v59  ;;  %v2623_v45 = vrot.slane %v2621_v62, 1  ;;  %v10256_v59 = vld [vmem:[%s9101_s26 + $0x38] sm:$0x1f]   ;;  %v2827_v62 = vld [vmem:[%s9101_s26] sm:$0xe] }
 0x151   : > { %7974 = vmatprep.mubr.msk.bf16.mxu1 %vm505_vm0, %v8917_v8  ;;  %v2657_v8 = vshrl.u32 %v10241_v20, 16  ;;  %v2661_v53 = vshll.u32 %v10256_v59, 16 }
 0x152   : > { %8299 = vmatmul.mubr.msk.bf16.vlgmr.msra.gmra.mrb[0].mxu0 %vm505_vm0, %v9768_v12  ;;  %v8929_v12 = vld [vmem:[%s10672_s3 + $0x310] sm:$0xff]   ;;  %v2627_v43 = vor.u32 %v2625_v40, %v2623_v45 }
 0x153   : > { %8302 = vmatprep.mubr.msk.bf16.mxu0 %vm505_vm0, %v9785_v37  ;;  %8315 = vmatpush3.bf16.msra.mxu0 %v8924_v21  ;;  %v2619_v37 = vor.u32 %v2617_v13, %v2615_v56  ;;  %v5581_v21 = vrot.slane %v10097_v36, 3  ;;  %v2639_v36 = vrot.slane %v2637_v3, 1  ;;  %v2659_v6 = vor.u32 %v2657_v8, %v2655_v41 }
 0x154   : > { %8316 = vmatprep.subr.bf16.mxu0 %v8925_v58  ;;  %v2632_v28 = vsel %vm417_vm1, %v2627_v43, %v2631_v57  ;;  %v2663_v56 = vrot.slane %v2661_v53, 1  ;;  %v6997_v43 = vcombine.low %v2827_v62, %v10147_v34  ;;  %v2665_v57 = vshrl.u32 %v10256_v59, 16  ;;  %v8945_v34 = vld [vmem:[%s10672_s3 + $0x328] sm:$0xff]  }
 0x155   : > { %v2624_v61 = vsel %vm417_vm1, %v2619_v37, %v2623_v45  ;;  %v5582_v4 = vsel %vm1449_vm3, %v5579_v5, %v5581_v21  ;;  %v2640_v5 = vsel %vm417_vm1, %v2635_v18, %v2639_v36  ;;  %v2849_v53 = vrot.slane %v10216_v0, 1 }
 0x156   : > { %v2664_v37 = vsel %vm417_vm1, %v2659_v6, %v2663_v56  ;;  %v2840_v3 = vrot.slane %v6997_v43, 1 }
 0x157   : > { %8317 = vmatpush3.bf16.msra.mxu0 %v8925_v58  ;;  %v8942_v58 = vld [vmem:[%s10672_s3 + $0x180] sm:$0xff]  }
 0x158   : > { %7975 = vmatmul.mubr.msk.bf16.gmra.mrb[48].mxu1 %vm505_vm0, %v8918_v39  ;;  %8318 = vmatprep.subr.bf16.mxu0 %v8929_v12 }
 0x159   : > { %7986 = vmatprep.mubr.msk.bf16.mxu1 %vm505_vm0, %v2616_v63 }
 0x15a   : > { %8303 = vmatmul.mubr.msk.bf16.gmra.mrb[4].mxu0 %vm505_vm0, %v9803_v42  ;;  %v2641_v42 = vshrl.u32 %v10209_v1, 16 }
 0x15b   : > { %8306 = vmatprep.mubr.msk.bf16.mxu0 %vm505_vm0, %v9823_v49  ;;  %8319 = vmatpush3.bf16.msra.mxu0 %v8929_v12  ;;  %v10237_v49 = vld [vmem:[%s10672_s3 + $0x320] sm:$0xff]  }
 0x15c   : > { %8320 = vmatprep.subr.bf16.mxu0 %v8930_v2  ;;  %v2643_v11 = vor.u32 %v2641_v42, %v2639_v36  ;;  %v8941_v42 = vld [vmem:[%s9416_s25 + $0x2c] sm:$0xff]   ;;  %v8950_v36 = vld [vmem:[%s10672_s3 + $0x338] sm:$0xff]  }
 0x15d   : > { %v10232_v7 = vpop.f32.mrb[20].mxu0 }
 0x15e   : > { %v10243_v52 = vpop.f32.mrb[21].mxu0  ;;  %v2648_v38 = vsel %vm417_vm1, %v2643_v11, %v2647_v15 }
 0x15f   : > { %v8145_v51 = vpop.f32.mrb[22].mxu0  ;;  %8321 = vmatpush3.bf16.msra.mxu0 %v8930_v2  ;;  %v8937_v2 = vld [vmem:[%s9416_s25 + $0x1c] sm:$0xff]  }
 0x160   : > { %7987 = vmatmul.mubr.msk.bf16.vlgmr.msra.gmra.mrb[0].mxu1 %vm505_vm0, %v2624_v61  ;;  %v10253_v19 = vpop.f32.mrb[23].mxu0  ;;  %8338 = vmatprep.subr.bf16.mxu0 %v10237_v49  ;;  %v2841_v61 = vrot.slane %v10160_v29, 1  ;;  %v10310_v29 = vld [vmem:[%s9416_s25 + $0x10] sm:$0xf] }
 0x161   : > { %8003 = vmatpush3.bf16.msra.mxu1 %v10165_v9  ;;  %7990 = vmatprep.mubr.msk.bf16.mxu1 %vm505_vm0, %v2632_v28  ;;  %v2649_v9 = vshrl.u32 %v10216_v0, 16  ;;  %v8949_v28 = vld [vmem:[%s10672_s3 + $0x330] sm:$0xff]   ;;  %v10361_v0 = vld [vmem:[%s9416_s25 + $0x24] sm:$0xff]  }
 0x162   : > { %8004 = vmatprep.subr.bf16.mxu1 %v8928_v32  ;;  %8307 = vmatmul.mubr.msk.bf16.gmra.mrb[8].mxu0 %vm505_vm0, %v9842_v60  ;;  %v8938_v60 = vld [vmem:[%s10672_s3 + $0x178] sm:$0xff]   ;;  %v2842_v26 = vsel %vm777_vm4, %v2840_v3, %v2841_v61  ;;  %v2844_v51 = vsel %vm777_vm4, %v2841_v61, %v2843_v50 }
 0x163   : > { %8310 = vmatprep.mubr.msk.bf16.mxu0 %vm505_vm0, %v5582_v4  ;;  %v2651_v54 = vor.u32 %v2649_v9, %v2647_v15  ;;  %v10330_v4 = vld [vmem:[%s9416_s25 + $0x14] sm:$0xff]   ;;  %v8946_v9 = vld [vmem:[%s9416_s25 + $0x3c] sm:$0xff]  }
 0x165   : > { %8005 = vmatpush3.bf16.msra.mxu1 %v8928_v32  ;;  %v2656_v12 = vsel %vm417_vm1, %v2651_v54, %v2655_v41  ;;  %v8939_v32 = vld [vmem:[%s9416_s25 + $0x24] sm:$0xff]   ;;  %v8953_v54 = vld [vmem:[%s10672_s3 + $0x190] sm:$0xff]  }
 0x166   : > { %8006 = vmatprep.subr.bf16.mxu1 %v8934_v35 }
 0x168   : > { %7991 = vmatmul.mubr.msk.bf16.gmra.mrb[4].mxu1 %vm505_vm0, %v2640_v5 }
 0x169   : > { %7994 = vmatprep.mubr.msk.bf16.mxu1 %vm505_vm0, %v2648_v38  ;;  %8007 = vmatpush3.bf16.msra.mxu1 %v8934_v35  ;;  %v10337_v35 = vld [vmem:[%s10672_s3 + $0x340] sm:$0xff]   ;;  %v2847_v38 = vrot.slane %v10209_v1, 1 }
 0x16a   : > { %8008 = vmatprep.subr.bf16.mxu1 %v8938_v60  ;;  %8311 = vmatmul.mubr.msk.bf16.gmra.mrb[48].mxu0 %vm505_vm0, %v5581_v21  ;;  %v5963_v21 = vld [vmem:[%s9416_s25 + $0xc] sm:$0xf] }
 0x16b   : > { %v7832_v39 = vpop.f32.mrb[24].mxu1  ;;  %8322 = vmatprep.mubr.msk.bf16.mxu0 %vm505_vm0, %v8932_v48  ;;  %v7340_v18 = vcombine.low %v5963_v21, %v10310_v29  ;;  %v6036_v48 = vshll.u32 %v10330_v4, 16 }
 0x16c   : > { %v10280_v13 = vadd.f32 %v7832_v39, %v10169_v16  ;;  %v1163_v63 = vpop.f32.mrb[25].mxu1 }
 0x16d   : > { %v10283_v40 = vadd.f32 %v1163_v63, %v10173_v44  ;;  %v7833_v55 = vpop.f32.mrb[26].mxu1  ;;  %8009 = vmatpush3.bf16.msra.mxu1 %v8938_v60  ;;  %v8935_v44 = vld [vmem:[%s9416_s25 + $0x14] sm:$0xff]   ;;  %v6031_v11 = vshll.u32 %v7340_v18, 16  ;;  %v6029_v60 = vshrl.u32 %v7340_v18, 16  ;;  %v6038_v62 = vrot.slane %v6036_v48, 1 }
 0x16e   : > { %v1166_v45 = vpop.f32.mrb[27].mxu1  ;;  %8026 = vmatprep.subr.bf16.mxu1 %v8942_v58  ;;  %v8956_v63 = vld [vmem:[%s10672_s3 + $0x198] sm:$0xff]  }
 0x16f   : > { %v10290_v16 = vadd.f32 %v1166_v45, %v10181_v25  ;;  %v2667_v25 = vor.u32 %v2665_v57, %v2663_v56  ;;  %v6033_v41 = vrot.slane %v6031_v11, 1  ;;  %v10354_v56 = vld [vmem:[%s9416_s25 + $0x1c] sm:$0xff]   ;;  %v6040_v45 = vshrl.u32 %v10330_v4, 16 }
 0x170   : > { %7995 = vmatmul.mubr.msk.bf16.gmra.mrb[8].mxu1 %vm505_vm0, %v2656_v12  ;;  %v6044_v55 = vshll.u32 %v10354_v56, 16  ;;  %v8948_v12 = vld [vmem:[%s9416_s25 + $0x44] ss:$0 sps:$4 sm:$0xff]   ;;  %v6048_v43 = vshrl.u32 %v10354_v56, 16  ;;  %v3079_v11 = vrot.slane %v9114_v22, 2 }
 0x171   : > { %7998 = vmatprep.mubr.msk.bf16.mxu1 %vm505_vm0, %v2664_v37  ;;  %v6034_v39 = vor.u32 %v6033_v41, %v6029_v60  ;;  %v2851_v37 = vrot.slane %v10241_v20, 1  ;;  %v6042_v20 = vor.u32 %v6040_v45, %v6038_v62  ;;  %v10414_v60 = vld [vmem:[%s9416_s25 + $0x3c] sm:$0xff]  }
 0x172   : > { %8323 = vmatmul.mubr.msk.bf16.vlgmr.msra.gmra.mrb[0].mxu0 %vm505_vm0, %v8935_v44  ;;  %v6052_v44 = vshll.u32 %v10361_v0, 16  ;;  %v6046_v61 = vrot.slane %v6044_v55, 1  ;;  %v8970_v45 = vld [vmem:[%s9101_s26 + $0x1c] sm:$0xff]  }
 0x173   : > { %8326 = vmatprep.mubr.msk.bf16.mxu0 %vm505_vm0, %v8937_v2  ;;  %8339 = vmatpush3.bf16.msra.mxu0 %v10237_v49  ;;  %v2845_v49 = vrot.slane %v10192_v23, 1  ;;  %v8947_v23 = vld [vmem:[%s10672_s3 + $0x188] sm:$0xff]   ;;  %v6039_v57 = vsel %vm417_vm1, %v6034_v39, %v6038_v62  ;;  %v2853_v2 = vrot.slane %v10256_v59, 1  ;;  %v2852_v59 = vsel %vm777_vm4, %v2849_v53, %v2851_v37 }
 0x174   : > { %8340 = vmatprep.subr.bf16.mxu0 %v8945_v34  ;;  %v6076_v39 = vshll.u32 %v10414_v60, 16 }
 0x175   : > { %v2846_v31 = vsel %vm777_vm4, %v2843_v50, %v2845_v49  ;;  %v2848_v1 = vsel %vm777_vm4, %v2845_v49, %v2847_v38  ;;  %v10391_v49 = vld [vmem:[%s9416_s25 + $0x34] sm:$0xff]  }
 0x176   : > { %v6072_v55 = vshrl.u32 %v10391_v49, 16 }
 0x177   : > { %8341 = vmatpush3.bf16.msra.mxu0 %v8945_v34 }
 0x178   : > { %7999 = vmatmul.mubr.msk.bf16.gmra.mrb[52].mxu1 %vm505_vm0, %v2667_v25  ;;  %8342 = vmatprep.subr.bf16.mxu0 %v8949_v28 }
 0x179   : > { %8010 = vmatprep.mubr.msk.bf16.mxu1 %vm505_vm0, %v2842_v26  ;;  %v10382_v26 = vld [vmem:[%s9416_s25 + $0x2c] sm:$0xff]  }
 0x17a   : > { %8327 = vmatmul.mubr.msk.bf16.gmra.mrb[4].mxu0 %vm505_vm0, %v8939_v32  ;;  %v6050_v32 = vor.u32 %v6048_v43, %v6046_v61  ;;  %v6060_v18 = vshll.u32 %v10382_v26, 16  ;;  %v6080_v43 = vshrl.u32 %v10414_v60, 16 }
 0x17b   : > { %8330 = vmatprep.mubr.msk.bf16.mxu0 %vm505_vm0, %v8941_v42  ;;  %8343 = vmatpush3.bf16.msra.mxu0 %v8949_v28  ;;  %v6054_v42 = vrot.slane %v6052_v44, 1 }
 0x17c   : > { %8344 = vmatprep.subr.bf16.mxu0 %v8950_v36 }
 0x17d   : > { %v10332_v15 = vpop.f32.mrb[24].mxu0 }
 0x17e   : > { %v10341_v5 = vpop.f32.mrb[25].mxu0 }
 0x17f   : > { %v8169_v8 = vpop.f32.mrb[26].mxu0  ;;  %8345 = vmatpush3.bf16.msra.mxu0 %v8950_v36  ;;  %v8967_v36 = vld [vmem:[%s10672_s3 + $0x1a0] sm:$0xff]  }
 0x180   : > { %8011 = vmatmul.mubr.msk.bf16.vlgmr.msra.gmra.mrb[0].mxu1 %vm505_vm0, %v2844_v51  ;;  %v10351_v6 = vpop.f32.mrb[27].mxu0  ;;  %8362 = vmatprep.subr.bf16.mxu0 %v10337_v35  ;;  %v6047_v51 = vsel %vm417_vm1, %v6042_v20, %v6046_v61  ;;  %v8961_v8 = vld [vmem:[%s10672_s3 + $0x348] sm:$0xff]  }
 0x181   : > { %8027 = vmatpush3.bf16.msra.mxu1 %v8942_v58  ;;  %8014 = vmatprep.mubr.msk.bf16.mxu1 %vm505_vm0, %v2846_v31  ;;  %v2850_v58 = vsel %vm777_vm4, %v2847_v38, %v2849_v53  ;;  %v6055_v31 = vsel %vm417_vm1, %v6050_v32, %v6054_v42  ;;  %v6068_v38 = vshll.u32 %v10391_v49, 16  ;;  %v6062_v53 = vrot.slane %v6060_v18, 1 }
 0x182   : > { %8028 = vmatprep.subr.bf16.mxu1 %v8947_v23  ;;  %8331 = vmatmul.mubr.msk.bf16.gmra.mrb[8].mxu0 %vm505_vm0, %v8943_v46  ;;  %v8968_v46 = vld [vmem:[%s9101_s26 + $0xc] sm:$0xff]  }
 0x183   : > { %8334 = vmatprep.mubr.msk.bf16.mxu0 %vm505_vm0, %v8946_v9  ;;  %v3080_v9 = vrot.slane %v8968_v46, 2 }
 0x185   : > { %8029 = vmatpush3.bf16.msra.mxu1 %v8947_v23  ;;  %v6056_v23 = vshrl.u32 %v10361_v0, 16  ;;  %v3081_v41 = vsel %vm1017_vm5, %v3079_v11, %v3080_v9  ;;  %v8973_v11 = vld [vmem:[%s9101_s26 + $0x2c] sm:$0xff]  }
 0x186   : > { %8030 = vmatprep.subr.bf16.mxu1 %v8953_v54  ;;  %v3088_v46 = vrot.slane %v8973_v11, 2 }
 0x187   : > { %v6058_v22 = vor.u32 %v6056_v23, %v6054_v42  ;;  %v8972_v23 = vld [vmem:[%s10672_s3 + $0x1a8] sm:$0xff]  }
 0x188   : > { %8015 = vmatmul.mubr.msk.bf16.gmra.mrb[4].mxu1 %vm505_vm0, %v2848_v1  ;;  %v10420_v1 = vld [vmem:[%s9416_s25 + $0x44] sm:$0x1f]  }
 0x189   : > { %8018 = vmatprep.mubr.msk.bf16.mxu1 %vm505_vm0, %v2850_v58  ;;  %8031 = vmatpush3.bf16.msra.mxu1 %v8953_v54  ;;  %v6070_v54 = vrot.slane %v6068_v38, 1  ;;  %v8963_v58 = vld [vmem:[%s10672_s3 + $0x350] sm:$0xff]   ;;  %v6063_v62 = vsel %vm417_vm1, %v6058_v22, %v6062_v53  ;;  %v6084_v44 = vshll.u32 %v10420_v1, 16  ;;  %v6088_v38 = vshrl.u32 %v10420_v1, 16 }
 0x18a   : > { %8032 = vmatprep.subr.bf16.mxu1 %v8956_v63  ;;  %8335 = vmatmul.mubr.msk.bf16.gmra.mrb[52].mxu0 %vm505_vm0, %v8948_v12 }
 0x18b   : > { %v7856_v3 = vpop.f32.mrb[28].mxu1  ;;  %8346 = vmatprep.mubr.msk.bf16.mxu0 %vm505_vm0, %v6039_v57  ;;  %v8964_v57 = vld [vmem:[%s10672_s3 + $0x358] sm:$0xff]   ;;  %v6074_v61 = vor.u32 %v6072_v55, %v6070_v54  ;;  %v3311_v55 = vshrl.u32 %v8973_v11, 16 }
 0x18c   : > { %v10379_v34 = vadd.f32 %v7856_v3, %v10280_v13  ;;  %v1407_v25 = vpop.f32.mrb[29].mxu1  ;;  %v2854_v13 = vsel %vm777_vm4, %v2851_v37, %v2853_v2  ;;  %v3084_v37 = vrot.slane %v8970_v45, 2 }
 0x18d   : > { %v10385_v28 = vadd.f32 %v1407_v25, %v10283_v40  ;;  %v7857_v21 = vpop.f32.mrb[30].mxu1  ;;  %8033 = vmatpush3.bf16.msra.mxu1 %v8956_v63 }
 0x18e   : > { %v1410_v50 = vpop.f32.mrb[31].mxu1  ;;  %8386 = vmatprep.subr.bf16.mxu1 %v8967_v36  ;;  %v6086_v21 = vrot.slane %v6084_v44, 1 }
 0x18f   : > { %v10397_v40 = vadd.f32 %v1410_v50, %v10290_v16  ;;  %v6064_v16 = vshrl.u32 %v10382_v26, 16 }
 0x190   : > { %8019 = vmatmul.mubr.msk.bf16.gmra.mrb[8].mxu1 %vm505_vm0, %v2852_v59  ;;  %v6250_v59 = vld [vmem:[%s9416_s25 + $0xc] sm:$0xe] }
 0x191   : > { %8022 = vmatprep.mubr.msk.bf16.mxu1 %vm505_vm0, %v2854_v13  ;;  %v6066_v48 = vor.u32 %v6064_v16, %v6062_v53  ;;  %v8971_v13 = vld [vmem:[%s9101_s26 + $0x24] sm:$0xff]  }
 0x192   : > { %8347 = vmatmul.mubr.msk.bf16.vlgmr.msra.gmra.mrb[0].mxu0 %vm505_vm0, %v6047_v51  ;;  %v3086_v18 = vrot.slane %v8971_v13, 2 }
 0x193   : > { %8350 = vmatprep.mubr.msk.bf16.mxu0 %vm505_vm0, %v6055_v31  ;;  %8363 = vmatpush3.bf16.msra.mxu0 %v10337_v35  ;;  %v8969_v35 = vld [vmem:[%s9101_s26 + $0x14] sm:$0xff]   ;;  %v6071_v12 = vsel %vm417_vm1, %v6066_v48, %v6070_v54  ;;  %v8975_v48 = vld [vmem:[%s9101_s26 + $0x3c] sm:$0xf] }
 0x194   : > { %8364 = vmatprep.subr.bf16.mxu0 %v8961_v8  ;;  %v3082_v63 = vrot.slane %v8969_v35, 2  ;;  %v3089_v53 = vsel %vm1017_vm5, %v3086_v18, %v3088_v46 }
 0x196   : > { %v3083_v3 = vsel %vm1017_vm5, %v3080_v9, %v3082_v63  ;;  %v3085_v25 = vsel %vm1017_vm5, %v3082_v63, %v3084_v37  ;;  %v7368_v9 = vcombine.low %v6250_v59, %v10310_v29  ;;  %v8974_v29 = vld [vmem:[%s10672_s3 + $0x1b0] sm:$0xff]  }
 0x197   : > { %8365 = vmatpush3.bf16.msra.mxu0 %v8961_v8  ;;  %v3087_v8 = vsel %vm1017_vm5, %v3084_v37, %v3086_v18 }
 0x198   : > { %8023 = vmatmul.mubr.msk.bf16.gmra.mrb[56].mxu1 %vm505_vm0, %v2853_v2  ;;  %8366 = vmatprep.subr.bf16.mxu0 %v8963_v58  ;;  %v6078_v2 = vrot.slane %v6076_v39, 1  ;;  %v6263_v22 = vrot.slane %v7368_v9, 1  ;;  %v8976_v39 = vld [vmem:[%s9101_s26 + $0x34] sm:$0xff]  }
 0x199   : > { %8034 = vmatprep.mubr.msk.bf16.mxu1 %vm505_vm0, %v3081_v41  ;;  %v6264_v41 = vrot.slane %v10330_v4, 1  ;;  %v8977_v4 = vld [vmem:[%s10672_s3 + $0x1b8] sm:$0xff]   ;;  %v3323_v13 = vshll.u32 %v8976_v39, 16 }
 0x19a   : > { %8351 = vmatmul.mubr.msk.bf16.gmra.mrb[4].mxu0 %vm505_vm0, %v6063_v62  ;;  %v6082_v20 = vor.u32 %v6080_v43, %v6078_v2  ;;  %v6079_v50 = vsel %vm417_vm1, %v6074_v61, %v6078_v2  ;;  %v3090_v62 = vrot.slane %v8976_v39, 2 }
 0x19b   : > { %8354 = vmatprep.mubr.msk.bf16.mxu0 %vm505_vm0, %v6071_v12  ;;  %8367 = vmatpush3.bf16.msra.mxu0 %v8963_v58  ;;  %v6090_v58 = vor.u32 %v6088_v38, %v6086_v21  ;;  %v6265_v35 = vsel %vm777_vm4, %v6263_v22, %v6264_v41  ;;  %v3314_v12 = vshll.u32 %v8973_v11, 16  ;;  %v6276_v22 = vrot.slane %v10420_v1, 1 }
 0x19c   : > { %8368 = vmatprep.subr.bf16.mxu0 %v8964_v57  ;;  %v6087_v31 = vsel %vm417_vm1, %v6082_v20, %v6086_v21  ;;  %v3091_v2 = vsel %vm1017_vm5, %v3088_v46, %v3090_v62  ;;  %v6268_v20 = vrot.slane %v10361_v0, 1  ;;  %v3313_v21 = vrot.slane %v3311_v55, 2 }
 0x19d   : > { %v10443_v32 = vpop.f32.mrb[28].mxu0  ;;  %v3316_v59 = vrot.slane %v3314_v12, 3  ;;  %v6270_v0 = vrot.slane %v10382_v26, 1  ;;  %v6272_v46 = vrot.slane %v10391_v49, 1  ;;  %v6274_v26 = vrot.slane %v10414_v60, 1 }
 0x19e   : > { %v10446_v42 = vpop.f32.mrb[29].mxu0 }
 0x19f   : > { %v8193_v51 = vpop.f32.mrb[30].mxu0  ;;  %8369 = vmatpush3.bf16.msra.mxu0 %v8964_v57  ;;  %v3317_v18 = vor.u32 %v3316_v59, %v3313_v21  ;;  %v6271_v38 = vsel %vm777_vm4, %v6268_v20, %v6270_v0 }
 0x1a0   : > { %8035 = vmatmul.mubr.msk.bf16.vlgmr.msra.gmra.mrb[0].mxu1 %vm505_vm0, %v3083_v3  ;;  %v10457_v16 = vpop.f32.mrb[31].mxu0  ;;  %v6266_v3 = vrot.slane %v10354_v56, 1  ;;  %v3329_v51 = vshrl.u32 %v9269_v14, 16 }
 0x1a1   : > { %8390 = vmatpush3.bf16.msra.mxu1 %v8967_v36  ;;  %8038 = vmatprep.mubr.msk.bf16.mxu1 %vm505_vm0, %v3085_v25  ;;  %v3029_v36 = vld [vmem:[%s9101_s26 + $0x40] sm:$0x3]  ;;  %v3318_v11 = vsel %vm1205_vm2, %v9188_v27, %v3317_v18 }
 0x1a2   : > { %8387 = vmatprep.subr.bf16.mxu1 %v8972_v23  ;;  %8355 = vmatmul.mubr.msk.bf16.gmra.mrb[8].mxu0 %vm505_vm0, %v6079_v50  ;;  %v7025_v54 = vcombine.low %v8975_v48, %v3029_v36  ;;  %v3320_v50 = vshrl.u32 %v8976_v39, 16  ;;  %v6269_v56 = vsel %vm777_vm4, %v6266_v3, %v6268_v20  ;;  %v3331_v9 = vrot.slane %v3329_v51, 2 }
 0x1a3   : > { %8358 = vmatprep.mubr.msk.bf16.mxu0 %vm505_vm0, %v6087_v31  ;;  %v3332_v31 = vshll.u32 %v9269_v14, 16  ;;  %v6275_v48 = vsel %vm777_vm4, %v6272_v46, %v6274_v26  ;;  %v6277_v39 = vsel %vm777_vm4, %v6274_v26, %v6276_v22 }
 0x1a4   : > { %v3092_v63 = vrot.slane %v7025_v54, 2 }
 0x1a5   : > { %8391 = vmatpush3.bf16.msra.mxu1 %v8972_v23  ;;  %v3325_v23 = vrot.slane %v3323_v13, 3  ;;  %v3334_v36 = vrot.slane %v3332_v31, 3 }
 0x1a6   : > { %8388 = vmatprep.subr.bf16.mxu1 %v8974_v29  ;;  %v3093_v25 = vsel %vm1017_vm5, %v3090_v62, %v3092_v63 }
 0x1a8   : > { %8039 = vmatmul.mubr.msk.bf16.gmra.mrb[4].mxu1 %vm505_vm0, %v3087_v8  ;;  %v6273_v8 = vsel %vm777_vm4, %v6270_v0, %v6272_v46 }
 0x1a9   : > { %8042 = vmatprep.mubr.msk.bf16.mxu1 %vm505_vm0, %v3089_v53  ;;  %8392 = vmatpush3.bf16.msra.mxu1 %v8974_v29  ;;  %v3335_v53 = vor.u32 %v3334_v36, %v3331_v9 }
 0x1aa   : > { %8389 = vmatprep.subr.bf16.mxu1 %v8977_v4  ;;  %8359 = vmatmul.mubr.msk.bf16.gmra.mrb[56].mxu0 %vm505_vm0, %v6090_v58 }
 0x1ab   : > { %v7880_v45 = vpop.f32.mrb[32].mxu1  ;;  %8370 = vmatprep.mubr.msk.bf16.mxu0 %vm505_vm0, %v6265_v35 }
 0x1ac   : > { %v1623_v37 = vadd.f32 %v7880_v45, %v10379_v34  ;;  %v1595_v43 = vpop.f32.mrb[33].mxu1 }
 0x1ad   : > { %v1621_v44 = vadd.f32 %v1595_v43, %v10385_v28  ;;  %v7881_v57 = vpop.f32.mrb[34].mxu1  ;;  %8393 = vmatpush3.bf16.msra.mxu1 %v8977_v4  ;;  %v6267_v28 = vsel %vm777_vm4, %v6264_v41, %v6266_v3 }
 0x1ae   : > { %v1598_v61 = vpop.f32.mrb[35].mxu1 }
 0x1af   : > { %v1622_v34 = vadd.f32 %v1598_v61, %v10397_v40  ;;  %v3322_v40 = vrot.slane %v3320_v50, 2 }
 0x1b0   : > { %8043 = vmatmul.mubr.msk.bf16.gmra.mrb[8].mxu1 %vm505_vm0, %v3091_v2 }
 0x1b1   : > { %8046 = vmatprep.mubr.msk.bf16.mxu1 %vm505_vm0, %v3093_v25  ;;  %v3326_v14 = vor.u32 %v3325_v23, %v3322_v40 }
 0x1b2   : > { %8371 = vmatmul.mubr.msk.bf16.vlgmr.msra.gmra.mrb[0].mxu0 %vm505_vm0, %v6267_v28 }
 0x1b3   : > { %8374 = vmatprep.mubr.msk.bf16.mxu0 %vm505_vm0, %v6269_v56  ;;  %v3327_v27 = vsel %vm1205_vm2, %v3317_v18, %v3326_v14  ;;  %v3336_v49 = vsel %vm1205_vm2, %v3326_v14, %v3335_v53 }
 0x1b8   : > { %8047 = vmatmul.mubr.msk.bf16.gmra.mrb[60].mxu1 %vm505_vm0, %v3092_v63 }
 0x1b9   : > { %8066 = vmatprep.mubr.msk.bf16.mxu1 %vm505_vm0, %v3318_v11 }
 0x1ba   : > { %8375 = vmatmul.mubr.msk.bf16.gmra.mrb[4].mxu0 %vm505_vm0, %v6271_v38 }
 0x1bb   : > { %8378 = vmatprep.mubr.msk.bf16.mxu0 %vm505_vm0, %v6273_v8 }
 0x1bd   : > { %v10508_v41 = vpop.f32.mrb[32].mxu0 }
 0x1be   : > { %v10511_v29 = vpop.f32.mrb[33].mxu0 }
 0x1bf   : > { %v8217_v54 = vpop.f32.mrb[34].mxu0 }
 0x1c0   : > { %8067 = vmatmul.mubr.msk.bf16.vlgmr.msra.gmra.mrb[8].mxu1 %vm505_vm0, %v3327_v27  ;;  %v10515_v58 = vpop.f32.mrb[35].mxu0 }
 0x1c1   : > { %8070 = vmatprep.mubr.msk.bf16.mxu1 %vm505_vm0, %v3336_v49 }
 0x1c2   : > { %8379 = vmatmul.mubr.msk.bf16.gmra.mrb[8].mxu0 %vm505_vm0, %v6275_v48 }
 0x1c3   : > { %8382 = vmatprep.mubr.msk.bf16.mxu0 %vm505_vm0, %v6277_v39 }
 0x1c8   : > { %8071 = vmatmul.mubr.msk.bf16.gmra.mrb[64].mxu1 %vm505_vm0, %v3335_v53 }
 0x1ca   : > { %8383 = vmatmul.mubr.msk.bf16.gmra.mrb[60].mxu0 %vm505_vm0, %v6276_v22 }
 0x1cb   : > { %v7904_v60 = vpop.f32.mrb[36].mxu1 }
 0x1cc   : > { %v1844_v1 = vadd.f32 %v7904_v60, %v1623_v37  ;;  %v1816_v62 = vpop.f32.mrb[37].mxu1 }
 0x1cd   : > { %v1842_v35 = vadd.f32 %v1816_v62, %v1621_v44  ;;  %v7905_v63 = vpop.f32.mrb[38].mxu1 }
 0x1ce   : > { %v1819_v4 = vpop.f32.mrb[39].mxu1 }
 0x1cf   : > { %v1843_v55 = vadd.f32 %v1819_v4, %v1622_v34 }
 0x1dd   : > { %v10522_v12 = vpop.f32.mrb[36].mxu0 }
 0x1de   : > { %v10524_v45 = vpop.f32.mrb[37].mxu0 }
 0x1df   : > { %v8241_v43 = vpop.f32.mrb[38].mxu0 }
 0x1e0   : > { %v10526_v57 = vpop.f32.mrb[39].mxu0 }
 0x1eb   : > { %v7928_v2 = vpop.f32.mrb[40].mxu1 }
 0x1ec   : > { %v2131_v3 = vadd.f32 %v7928_v2, %v1844_v1  ;;  %v2103_v61 = vpop.f32.mrb[41].mxu1 }
 0x1ed   : > { %v2129_v25 = vadd.f32 %v2103_v61, %v1842_v35  ;;  %v7929_v20 = vpop.f32.mrb[42].mxu1 }
 0x1ee   : > { %v2106_v37 = vpop.f32.mrb[43].mxu1 }
 0x1ef   : > { %v2130_v21 = vadd.f32 %v2106_v37, %v1843_v55 }
 0x1fd   : > { %v10528_v59 = vpop.f32.mrb[40].mxu0 }
 0x1fe   : > { %v10530_v44 = vpop.f32.mrb[41].mxu0 }
 0x1ff   : > { %v8265_v28 = vpop.f32.mrb[42].mxu0 }
 0x200   : > { %v10532_v34 = vpop.f32.mrb[43].mxu0 }
 0x20b   : > { %v7952_v50 = vpop.f32.mrb[44].mxu1 }
 0x20c   : > { %v2318_v13 = vadd.f32 %v7952_v50, %v2131_v3  ;;  %v2290_v56 = vpop.f32.mrb[45].mxu1 }
 0x20d   : > { %v2316_v18 = vadd.f32 %v2290_v56, %v2129_v25  ;;  %v7953_v51 = vpop.f32.mrb[46].mxu1 }
 0x20e   : > { %v2293_v31 = vpop.f32.mrb[47].mxu1 }
 0x20f   : > { %v2317_v0 = vadd.f32 %v2293_v31, %v2130_v21 }
 0x21d   : > { %v10534_v40 = vpop.f32.mrb[44].mxu0 }
 0x21e   : > { %v10536_v23 = vpop.f32.mrb[45].mxu0 }
 0x21f   : > { %v8289_v11 = vpop.f32.mrb[46].mxu0 }
 0x220   : > { %v10538_v46 = vpop.f32.mrb[47].mxu0 }
 0x22b   : > { %v7976_v9 = vpop.f32.mrb[48].mxu1 }
 0x22c   : > { %v2539_v36 = vadd.f32 %v7976_v9, %v2318_v13  ;;  %v2511_v38 = vpop.f32.mrb[49].mxu1 }
 0x22d   : > { %v2537_v14 = vadd.f32 %v2511_v38, %v2316_v18  ;;  %v7977_v8 = vpop.f32.mrb[50].mxu1 }
 0x22e   : > { %v2514_v53 = vpop.f32.mrb[51].mxu1 }
 0x22f   : > { %v2538_v27 = vadd.f32 %v2514_v53, %v2317_v0  ;;  %v10563_v53 = vld [vmem:[%s10673_s4] ss:$0 sm:$0xff] }
 0x23d   : > { %v10540_v26 = vpop.f32.mrb[48].mxu0 }
 0x23e   : > { %v10542_v49 = vpop.f32.mrb[49].mxu0 }
 0x23f   : > { %v8313_v22 = vpop.f32.mrb[50].mxu0 }
 0x240   : > { %v10544_v48 = vpop.f32.mrb[51].mxu0 }
 0x24b   : > { %v8000_v54 = vpop.f32.mrb[52].mxu1 }
 0x24c   : > { %v2826_v39 = vadd.f32 %v8000_v54, %v2539_v36  ;;  %v2798_v60 = vpop.f32.mrb[53].mxu1 }
 0x24d   : > { %v2824_v1 = vadd.f32 %v2798_v60, %v2537_v14  ;;  %v8001_v62 = vpop.f32.mrb[54].mxu1 }
 0x24e   : > { %v2801_v35 = vpop.f32.mrb[55].mxu1 }
 0x24f   : > { %v2825_v63 = vadd.f32 %v2801_v35, %v2538_v27 }
 0x25d   : > { %v10546_v4 = vpop.f32.mrb[52].mxu0 }
 0x25e   : > { %v10548_v55 = vpop.f32.mrb[53].mxu0 }
 0x25f   : > { %v8337_v43 = vpop.f32.mrb[54].mxu0 }
 0x260   : > { %v10550_v2 = vpop.f32.mrb[55].mxu0 }
 0x26b   : > { %v8024_v3 = vpop.f32.mrb[56].mxu1 }
 0x26c   : > { %v3013_v61 = vadd.f32 %v8024_v3, %v2826_v39  ;;  %v2985_v25 = vpop.f32.mrb[57].mxu1 }
 0x26d   : > { %v3011_v20 = vadd.f32 %v2985_v25, %v2824_v1  ;;  %v8025_v37 = vpop.f32.mrb[58].mxu1 }
 0x26e   : > { %v2988_v21 = vpop.f32.mrb[59].mxu1 }
 0x26f   : > { %v3012_v28 = vadd.f32 %v2988_v21, %v2825_v63 }
 0x273   : > { %v8036_v50 = vpop.f32.mrb[0].mxu1 }
 0x274   : > { %v3176_v13 = vpop.f32.mrb[1].mxu1 }
 0x275   : > { %v8037_v56 = vpop.f32.mrb[2].mxu1 }
 0x276   : > { %v3179_v18 = vpop.f32.mrb[3].mxu1 }
 0x27b   : > { %v8040_v51 = vpop.f32.mrb[4].mxu1 }
 0x27c   : > { %v3192_v31 = vpop.f32.mrb[5].mxu1 }
 0x27d   : > { %v8041_v0 = vpop.f32.mrb[6].mxu1  ;;  %v10552_v9 = vpop.f32.mrb[56].mxu0 }
 0x27e   : > { %v3195_v11 = vpop.f32.mrb[7].mxu1  ;;  %v10554_v36 = vpop.f32.mrb[57].mxu0 }
 0x27f   : > { %v8361_v38 = vpop.f32.mrb[58].mxu0 }
 0x280   : > { %v10556_v14 = vpop.f32.mrb[59].mxu0 }
 0x281   : > { %10675 = vst [vmem:[#allocation2_spill] sm:$0xff] %v10556_v14 }
 0x285   : > { %v8372_v8 = vpop.f32.mrb[0].mxu0 }
 0x286   : > { %v8394_v27 = vadd.f32 %v8372_v8, %v8036_v50  ;;  %v6360_v22 = vpop.f32.mrb[1].mxu0 }
 0x287   : > { %v8395_v54 = vadd.f32 %v6360_v22, %v3176_v13  ;;  %v8373_v39 = vpop.f32.mrb[2].mxu0 }
 0x288   : > { %v6446_v60 = vadd.f32 %v8394_v27, %v10563_v53  ;;  %v8396_v1 = vadd.f32 %v8373_v39, %v8037_v56  ;;  %v6363_v62 = vpop.f32.mrb[3].mxu0 }
 0x289   : > { %v6444_v35 = vadd.f32 %v8395_v54, %v10563_v53  ;;  %v8397_v63 = vadd.f32 %v6363_v62, %v3179_v18 }
 0x28a   : > { %vm6461_vm6 = vcmp.ge.f32.partialorder %v6446_v60, 0.0  ;;  %v6476_v3 = vmul.f32 0.01, %v6446_v60  ;;  %v6447_v25 = vadd.f32 %v8396_v1, %v10563_v53 }
 0x28b   : > { %v8048_v43 = vpop.f32.mrb[60].mxu1  ;;  %vm6459_vm7 = vcmp.ge.f32.partialorder %v6444_v35, 0.0  ;;  %v6474_v50 = vmul.f32 0.01, %v6444_v35  ;;  %v6445_v13 = vadd.f32 %v8397_v63, %v10563_v53 }
 0x28c   : > { %v10568_v37 = vadd.f32 %v8048_v43, %v3013_v61  ;;  %v3224_v21 = vpop.f32.mrb[61].mxu1  ;;  %v6491_v56 = vsel %vm6461_vm6, %v6446_v60, %v6476_v3  ;;  %vm6462_vm9 = vcmp.ge.f32.partialorder %v6447_v25, 0.0  ;;  %v6477_v18 = vmul.f32 0.01, %v6447_v25 }
 0x28d   : > { %v10571_v38 = vadd.f32 %v3224_v21, %v3011_v20  ;;  %v8049_v8 = vpop.f32.mrb[62].mxu1  ;;  %v7401_v27 = vpack.c.bf16 %v6491_v56, %v6491_v56  ;;  %v6489_v22 = vsel %vm6459_vm7, %v6444_v35, %v6474_v50  ;;  %vm6460_vm10 = vcmp.ge.f32.partialorder %v6445_v13, 0.0  ;;  %v8376_v39 = vpop.f32.mrb[4].mxu0 }
 0x28e   : > { %v3227_v61 = vpop.f32.mrb[63].mxu1  ;;  %v6475_v54 = vmul.f32 0.01, %v6445_v13  ;;  %v7399_v20 = vpack.c.bf16 %v6489_v22, %v6489_v22  ;;  %v6492_v1 = vsel %vm6462_vm9, %v6447_v25, %v6477_v18  ;;  %v8398_v62 = vadd.f32 %v8376_v39, %v8040_v51  ;;  %v6376_v63 = vpop.f32.mrb[5].mxu0 }
 0x28f   : > { %v10578_v43 = vadd.f32 %v3227_v61, %v3012_v28  ;;  %6568 = vst.msk [vmem:[%s10576_s11 + $0x8] sm:$0xf] %vm6565_vm8, %v7401_v27  ;;  %v7402_v60 = vpack.c.bf16 %v6492_v1, %v6492_v1  ;;  %v8399_v21 = vadd.f32 %v6376_v63, %v3192_v31  ;;  %v8377_v8 = vpop.f32.mrb[6].mxu0 }
 0x290   : > { %v6490_v3 = vsel %vm6460_vm10, %v6445_v13, %v6475_v54  ;;  %6566 = vst.msk [vmem:[%s10576_s11] sm:$0xf] %vm6565_vm8, %v7399_v20  ;;  %v6450_v50 = vadd.f32 %v8398_v62, %v10563_v53  ;;  %v8400_v56 = vadd.f32 %v8377_v8, %v8041_v0  ;;  %v6379_v14 = vpop.f32.mrb[7].mxu0 }
 0x291   : > { %v7400_v35 = vpack.c.bf16 %v6490_v3, %v6490_v3  ;;  %6569 = vst.msk [vmem:[%s10576_s11 + $0xc] sm:$0xf] %vm6565_vm8, %v7402_v60  ;;  %v6448_v51 = vadd.f32 %v8399_v21, %v10563_v53  ;;  %v8401_v25 = vadd.f32 %v6379_v14, %v3195_v11 }
 0x292   : > { %vm6465_vm11 = vcmp.ge.f32.partialorder %v6450_v50, 0.0  ;;  %v6480_v18 = vmul.f32 0.01, %v6450_v50  ;;  %v6451_v31 = vadd.f32 %v8400_v56, %v10563_v53 }
 0x293   : > { %v8068_v28 = vpop.f32.mrb[8].mxu1  ;;  %6567 = vst.msk [vmem:[%s10576_s11 + $0x4] sm:$0xf] %vm6565_vm8, %v7400_v35  ;;  %vm6463_vm12 = vcmp.ge.f32.partialorder %v6448_v51, 0.0  ;;  %v6478_v61 = vmul.f32 0.01, %v6448_v51  ;;  %v6449_v27 = vadd.f32 %v8401_v25, %v10563_v53 }
 0x294   : > { %v3451_v13 = vpop.f32.mrb[9].mxu1  ;;  %v6495_v22 = vsel %vm6465_vm11, %v6450_v50, %v6480_v18  ;;  %vm6466_vm13 = vcmp.ge.f32.partialorder %v6451_v31, 0.0  ;;  %v6481_v54 = vmul.f32 0.01, %v6451_v31 }
 0x295   : > { %v8069_v0 = vpop.f32.mrb[10].mxu1  ;;  %v7405_v11 = vpack.c.bf16 %v6495_v22, %v6495_v22  ;;  %v6493_v14 = vsel %vm6463_vm12, %v6448_v51, %v6478_v61  ;;  %vm6464_vm14 = vcmp.ge.f32.partialorder %v6449_v27, 0.0  ;;  %v6479_v20 = vmul.f32 0.01, %v6449_v27  ;;  %v8380_v1 = vpop.f32.mrb[8].mxu0 }
 0x296   : > { %v3454_v39 = vpop.f32.mrb[11].mxu1  ;;  %v7403_v62 = vpack.c.bf16 %v6493_v14, %v6493_v14  ;;  %v6496_v63 = vsel %vm6466_vm13, %v6451_v31, %v6481_v54  ;;  %v8402_v60 = vadd.f32 %v8380_v1, %v8068_v28  ;;  %v6392_v3 = vpop.f32.mrb[9].mxu0 }
 0x297   : > { %6572 = vst.msk [vmem:[%s10576_s11 + $0x18] sm:$0xf] %vm6565_vm8, %v7405_v11  ;;  %v7406_v21 = vpack.c.bf16 %v6496_v63, %v6496_v63  ;;  %v6494_v8 = vsel %vm6464_vm14, %v6449_v27, %v6479_v20  ;;  %v8403_v35 = vadd.f32 %v6392_v3, %v3451_v13  ;;  %v8381_v50 = vpop.f32.mrb[10].mxu0 }
 0x298   : > { %6570 = vst.msk [vmem:[%s10576_s11 + $0x10] sm:$0xf] %vm6565_vm8, %v7403_v62  ;;  %v7404_v56 = vpack.c.bf16 %v6494_v8, %v6494_v8  ;;  %v6454_v51 = vadd.f32 %v8402_v60, %v10563_v53  ;;  %v8404_v25 = vadd.f32 %v8381_v50, %v8069_v0  ;;  %v6395_v18 = vpop.f32.mrb[11].mxu0 }
 0x299   : > { %6573 = vst.msk [vmem:[%s10576_s11 + $0x1c] sm:$0xf] %vm6565_vm8, %v7406_v21  ;;  %v6452_v31 = vadd.f32 %v8403_v35, %v10563_v53  ;;  %v8405_v28 = vadd.f32 %v6395_v18, %v3454_v39 }
 0x29a   : > { %6571 = vst.msk [vmem:[%s10576_s11 + $0x14] sm:$0xf] %vm6565_vm8, %v7404_v56  ;;  %vm6469_vm15 = vcmp.ge.f32.partialorder %v6454_v51, 0.0  ;;  %v6484_v22 = vmul.f32 0.01, %v6454_v51  ;;  %v6455_v13 = vadd.f32 %v8404_v25, %v10563_v53 }
 0x29b   : > { %v8072_v61 = vpop.f32.mrb[64].mxu1  ;;  %vm6467_vm0 = vcmp.ge.f32.partialorder %v6452_v31, 0.0  ;;  %v6482_v11 = vmul.f32 0.01, %v6452_v31  ;;  %v6453_v0 = vadd.f32 %v8405_v28, %v10563_v53 }
 0x29c   : > { %v3495_v27 = vadd.f32 %v8072_v61, %v10568_v37  ;;  %v3467_v54 = vpop.f32.mrb[65].mxu1  ;;  %v6499_v1 = vsel %vm6469_vm15, %v6454_v51, %v6484_v22  ;;  %vm6470_vm1 = vcmp.ge.f32.partialorder %v6455_v13, 0.0  ;;  %v6485_v39 = vmul.f32 0.01, %v6455_v13 }
 0x29d   : > { %v3493_v14 = vadd.f32 %v3467_v54, %v10571_v38  ;;  %v8073_v20 = vpop.f32.mrb[66].mxu1  ;;  %v7409_v60 = vpack.c.bf16 %v6499_v1, %v6499_v1  ;;  %v6497_v3 = vsel %vm6467_vm0, %v6452_v31, %v6482_v11  ;;  %vm6468_vm2 = vcmp.ge.f32.partialorder %v6453_v0, 0.0  ;;  %v8384_v21 = vpop.f32.mrb[60].mxu0 }
 0x29e   : > { %v3682_v62 = vadd.f32 %v10031_v24, %v3495_v27  ;;  %v3470_v63 = vpop.f32.mrb[67].mxu1  ;;  %v6483_v37 = vmul.f32 0.01, %v6453_v0  ;;  %v7407_v8 = vpack.c.bf16 %v6497_v3, %v6497_v3  ;;  %v6500_v35 = vsel %vm6470_vm1, %v6455_v13, %v6485_v39  ;;  %v6408_v56 = vpop.f32.mrb[61].mxu0 }
 0x29f   : > { %v3680_v50 = vadd.f32 %v10039_v33, %v3493_v14  ;;  %6576 = vst.msk [vmem:[%s10576_s11 + $0x28] sm:$0xf] %vm6565_vm8, %v7409_v60  ;;  %v7410_v51 = vpack.c.bf16 %v6500_v35, %v6500_v35  ;;  %v3494_v25 = vadd.f32 %v3470_v63, %v10578_v43  ;;  %v8385_v18 = vpop.f32.mrb[62].mxu0 }
 0x2a0   : > { %v3903_v38 = vadd.f32 %v10128_v30, %v3682_v62  ;;  %v6498_v24 = vsel %vm6468_vm2, %v6453_v0, %v6483_v37  ;;  %6574 = vst.msk [vmem:[%s10576_s11 + $0x20] sm:$0xf] %vm6565_vm8, %v7407_v8  ;;  %v6411_v22 = vpop.f32.mrb[63].mxu0 }
 0x2a1   : > { %v7408_v31 = vpack.c.bf16 %v6498_v24, %v6498_v24  ;;  %v3901_v61 = vadd.f32 %v10134_v17, %v3680_v50  ;;  %6577 = vst.msk [vmem:[%s10576_s11 + $0x2c] sm:$0xf] %vm6565_vm8, %v7410_v51  ;;  %v3681_v33 = vadd.f32 %v10050_v47, %v3494_v25 }
 0x2a2   : > { %v4190_v28 = vadd.f32 %v10232_v7, %v3903_v38 }
 0x2a3   : > { %6575 = vst.msk [vmem:[%s10576_s11 + $0x24] sm:$0xf] %vm6565_vm8, %v7408_v31  ;;  %v4188_v13 = vadd.f32 %v10243_v52, %v3901_v61  ;;  %v3902_v43 = vadd.f32 %v10143_v10, %v3681_v33 }
 0x2a4   : > { %v4377_v30 = vadd.f32 %v10332_v15, %v4190_v28 }
 0x2a5   : > { %v4375_v54 = vadd.f32 %v10341_v5, %v4188_v13  ;;  %v4189_v7 = vadd.f32 %v10253_v19, %v3902_v43 }
 0x2a6   : > { %v4598_v27 = vadd.f32 %v10443_v32, %v4377_v30 }
 0x2a7   : > { %v4596_v11 = vadd.f32 %v10446_v42, %v4375_v54  ;;  %v4376_v47 = vadd.f32 %v10351_v6, %v4189_v7 }
 0x2a8   : > { %v4885_v17 = vadd.f32 %v10508_v41, %v4598_v27 }
 0x2a9   : > { %v4883_v0 = vadd.f32 %v10511_v29, %v4596_v11  ;;  %v4597_v52 = vadd.f32 %v10457_v16, %v4376_v47 }
 0x2aa   : > { %v5072_v15 = vadd.f32 %v10522_v12, %v4885_v17 }
 0x2ab   : > { %v5070_v32 = vadd.f32 %v10524_v45, %v4883_v0  ;;  %v4884_v5 = vadd.f32 %v10515_v58, %v4597_v52 }
 0x2ac   : > { %v5311_v10 = vadd.f32 %v10528_v59, %v5072_v15 }
 0x2ad   : > { %v5309_v41 = vadd.f32 %v10530_v44, %v5070_v32  ;;  %v5071_v42 = vadd.f32 %v10526_v57, %v4884_v5 }
 0x2ae   : > { %v5554_v19 = vadd.f32 %v10534_v40, %v5311_v10 }
 0x2af   : > { %v5552_v29 = vadd.f32 %v10536_v23, %v5309_v41  ;;  %v5310_v12 = vadd.f32 %v10532_v34, %v5071_v42 }
 0x2b0   : > { %v5741_v6 = vadd.f32 %v10540_v26, %v5554_v19 }
 0x2b1   : > { %v5739_v59 = vadd.f32 %v10542_v49, %v5552_v29  ;;  %v5553_v45 = vadd.f32 %v10538_v46, %v5310_v12 }
 0x2b2   : > { %v5962_v16 = vadd.f32 %v10546_v4, %v5741_v6  ;;  %v10676_v4 = vld [vmem:[#allocation2_spill] sm:$0xff] }
 0x2b3   : > { %v5960_v40 = vadd.f32 %v10548_v55, %v5739_v59  ;;  %v5740_v44 = vadd.f32 %v10544_v48, %v5553_v45 }
 0x2b4   : > { %v6249_v58 = vadd.f32 %v10552_v9, %v5962_v16 }
 0x2b5   : > { %v6247_v57 = vadd.f32 %v10554_v36, %v5960_v40  ;;  %v5961_v23 = vadd.f32 %v10550_v2, %v5740_v44 }
 0x2b6   : > { %v6436_v14 = vadd.f32 %v8384_v21, %v6249_v58 }
 0x2b7   : > { %v6434_v26 = vadd.f32 %v6408_v56, %v6247_v57  ;;  %v6248_v49 = vadd.f32 %v10676_v4, %v5961_v23 }
 0x2b8   : > { %v6458_v34 = vadd.f32 %v10563_v53, %v6436_v14 }
 0x2b9   : > { %v6456_v9 = vadd.f32 %v10563_v53, %v6434_v26  ;;  %v6435_v55 = vadd.f32 %v6411_v22, %v6248_v49 }
 0x2ba   : > { %vm6473_vm3 = vcmp.ge.f32.partialorder %v6458_v34, 0.0  ;;  %v6488_v46 = vmul.f32 0.01, %v6458_v34 }
 0x2bb   : > { %vm6471_vm4 = vcmp.ge.f32.partialorder %v6456_v9, 0.0  ;;  %v6486_v48 = vmul.f32 0.01, %v6456_v9  ;;  %v6457_v36 = vadd.f32 %v10563_v53, %v6435_v55 }
 0x2bc   : > { %v6503_v20 = vsel %vm6473_vm3, %v6458_v34, %v6488_v46 }
 0x2bd   : > { %v7413_v1 = vpack.c.bf16 %v6503_v20, %v6503_v20  ;;  %v6501_v39 = vsel %vm6471_vm4, %v6456_v9, %v6486_v48  ;;  %vm6472_vm5 = vcmp.ge.f32.partialorder %v6457_v36, 0.0  ;;  %v6487_v62 = vmul.f32 0.01, %v6457_v36 }
 0x2be   : > { %v7411_v2 = vpack.c.bf16 %v6501_v39, %v6501_v39 }
 0x2bf   : > { %6580 = vst.msk [vmem:[%s10576_s11 + $0x38] sm:$0xf] %vm6565_vm8, %v7413_v1  ;;  %v6502_v63 = vsel %vm6472_vm5, %v6457_v36, %v6487_v62 }
 0x2c0   : > { %6578 = vst.msk [vmem:[%s10576_s11 + $0x30] sm:$0xf] %vm6565_vm8, %v7411_v2  ;;  %v7412_v60 = vpack.c.bf16 %v6502_v63, %v6502_v63 }
 0x2c2   : > { %6579 = vst.msk [vmem:[%s10576_s11 + $0x34] sm:$0xf] %vm6565_vm8, %v7412_v60 }
 0x2c3 PF: > { %s15_s20 = sadd.s32 1, %s9000_s20   ;;  %s10677_s18 = smov %s8996_s19 }
 0x2c4   : > { %p12_p8 = scmp.ge.s32.totalorder %s15_s20, 12   ;;  %s10678_s19 = smov %s10680_s21 }
 0x2c6   :  { %14 = sbr.rel (!%p12_p8) target bundleno = 2 (0x2), region = 102 }

// kernel: cnn_3d_rec7_forward.7
= control target key start
LH: loop header
LB: loop body
LE: loop exit
PB: predicated region body
PF: predicated region fallthrough
CT: control target
= control target key end

     0   :  { %s2202_s24 = smov 0   ;;  %s2735_s0 = inlined_call_operand.vmem [shape: bf16[512,64], index: 0, kind: input, shape index: {}]   ;;  %s2736_s1 = inlined_call_operand.vmem [shape: bf16[64,64], index: 1, kind: input, shape index: {}]   ;;  %s2737_s2 = inlined_call_operand.vmem [shape: f32[1,64], index: 2, kind: input, shape index: {}]   ;;  %s2738_s3 = inlined_call_operand.vmem [shape: bf16[64,64], index: 3, kind: input, shape index: {}]   ;;  %s2739_s4 = inlined_call_operand.vmem [shape: f32[1,64], index: 4, kind: input, shape index: {}]   ;;  %s2740_s5 = inlined_call_operand.vmem [shape: bf16[64,4], index: 5, kind: input, shape index: {}]   ;;  %s2741_s6 = inlined_call_operand.vmem [shape: f32[1,4], index: 6, kind: input, shape index: {}]   ;;  %s2742_s7 = inlined_call_operand.vmem [shape: f32[512,4], index: 7, kind: output, shape index: {}]  }
   0x1 LB: > { %s1680_s25 = sadd.s32 4294967295, %s2160_s24   ;;  %p1684_p0 = scmp.ge.s32.totalorder %s2160_s24, 1  ;;  %s2160_s24 = sphi %s2202_s24, %s17_s24  }
   0x2   : > { %p238_p1 = scmp.lt.s32.totalorder %s2160_s24, 3 }
   0x4   : > { %p239_p2 = pnand %p1684_p0, %p238_p1 }
   0x5   : > { %v1998_v0 = vld [vmem:[%s2736_s1] sm:$0xff] (!%p239_p2)   ;;  %s1685_s28 = sshll.u32 (!%p239_p2), %s1680_s25, 5  ;;  %v1999_v1 = vld [vmem:[%s2736_s1 + $0x8] sm:$0xff] (!%p239_p2)   ;;  %v2000_v2 = vld [vmem:[%s2736_s1 + $0x10] sm:$0xff] (!%p239_p2)   ;;  %vm434_vm0 = vcmask (!%p239_p2), 523264  }
   0x6   : > { %242 = sbr.rel (%p239_p2) target bundleno = 772 (0x304), region = 48  ;;  %p271_p3 = scmp.lt.s32.totalorder (!%p239_p2), %s1685_s28, 63  ;;  %1862 = vmatprep.subr.bf16.mxu0 (!%p239_p2), %v1998_v0  ;;  %1982 = vmatprep.subr.bf16.mxu1 (!%p239_p2), %v1998_v0  ;;  %v2001_v4 = vld [vmem:[%s2736_s1 + $0x18] sm:$0xff] (!%p239_p2)   ;;  %v2018_v5 = vld [vmem:[%s2738_s3] sm:$0xff] (!%p239_p2)   ;;  %v2019_v9 = vld [vmem:[%s2738_s3 + $0x8] sm:$0xff] (!%p239_p2)  }
   0x7   : > { %1863 = vmatpush3.bf16.msra.mxu0 (!%p239_p2), %v1998_v0  ;;  %1986 = vmatpush3.bf16.msra.mxu1 (!%p239_p2), %v1998_v0  ;;  %v2020_v16 = vld [vmem:[%s2738_s3 + $0x10] sm:$0xff] (!%p239_p2)   ;;  %v2021_v23 = vld [vmem:[%s2738_s3 + $0x18] sm:$0xff] (!%p239_p2)   ;;  %v2022_v24 = vld [vmem:[%s2740_s5] sm:$0xff] (!%p239_p2)  }
   0x8   : > { %1864 = vmatprep.subr.bf16.mxu0 (!%p239_p2), %v1999_v1  ;;  %1983 = vmatprep.subr.bf16.mxu1 (!%p239_p2), %v1999_v1  ;;  %v2023_v25 = vld [vmem:[%s2740_s5 + $0x8] sm:$0xff] (!%p239_p2)   ;;  %v2024_v26 = vld [vmem:[%s2740_s5 + $0x10] sm:$0xff] (!%p239_p2)   ;;  %v2286_v27 = vld [vmem:[%s2737_s2] ss:$0 sm:$0xff] (!%p239_p2) }
   0xb   : > { %1865 = vmatpush3.bf16.msra.mxu0 (!%p239_p2), %v1999_v1  ;;  %1987 = vmatpush3.bf16.msra.mxu1 (!%p239_p2), %v1999_v1 }
   0xc   : > { %1866 = vmatprep.subr.bf16.mxu0 (!%p239_p2), %v2000_v2  ;;  %1984 = vmatprep.subr.bf16.mxu1 (!%p239_p2), %v2000_v2 }
   0xd   : > { %s2744_s28 = smov (!%p271_p3, %s1685_s28), 63 }
   0xe   : > { %s1686_s10 = sshll.u32 %s2744_s28, 2  ;;  %s1688_s17 = sshll.u32 %s2744_s28, 3 }
   0xf   : > { %s2225_s13 = scalar_lea.vmem %s2735_s0, %s1686_s10  ;;  %1867 = vmatpush3.bf16.msra.mxu0 %v2000_v2  ;;  %1988 = vmatpush3.bf16.msra.mxu1 %v2000_v2  ;;  %s2496_s19 = scalar_lea.vmem %s2742_s7, %s1688_s17 }
  0x10   : > { %v2002_v3 = vld [vmem:[%s2225_s13] sm:$0xff]   ;;  %1868 = vmatprep.subr.bf16.mxu0 %v2001_v4  ;;  %1985 = vmatprep.subr.bf16.mxu1 %v2001_v4  ;;  %v2003_v6 = vld [vmem:[%s2225_s13 + $0x8] sm:$0xff]   ;;  %v2004_v7 = vld [vmem:[%s2225_s13 + $0x10] sm:$0xff]  }
  0x11   : > { %1870 = vmatprep.mubr.msk.bf16.mxu0 %vm434_vm0, %v2002_v3  ;;  %v2010_v8 = vld [vmem:[%s2225_s13 + $0x40] sm:$0xff]   ;;  %v2011_v10 = vld [vmem:[%s2225_s13 + $0x48] sm:$0xff]   ;;  %v2012_v11 = vld [vmem:[%s2225_s13 + $0x50] sm:$0xff]  }
  0x12   : > { %1886 = vmatprep.mubr.msk.bf16.mxu1 %vm434_vm0, %v2010_v8  ;;  %v2005_v12 = vld [vmem:[%s2225_s13 + $0x18] sm:$0xff]   ;;  %v2006_v13 = vld [vmem:[%s2225_s13 + $0x20] sm:$0xff]   ;;  %v2007_v17 = vld [vmem:[%s2225_s13 + $0x28] sm:$0xff]  }
  0x13   : > { %1869 = vmatpush3.bf16.msra.mxu0 %v2001_v4  ;;  %1989 = vmatpush3.bf16.msra.mxu1 %v2001_v4  ;;  %v2013_v14 = vld [vmem:[%s2225_s13 + $0x58] sm:$0xff]   ;;  %v2014_v15 = vld [vmem:[%s2225_s13 + $0x60] sm:$0xff]   ;;  %v2015_v18 = vld [vmem:[%s2225_s13 + $0x68] sm:$0xff]  }
  0x14   : > { %1902 = vmatprep.subr.bf16.mxu1 %v2018_v5  ;;  %v2008_v19 = vld [vmem:[%s2225_s13 + $0x30] sm:$0xff]   ;;  %v2009_v21 = vld [vmem:[%s2225_s13 + $0x38] sm:$0xff]   ;;  %1942 = vmatprep.subr.bf16.mxu0 %v2022_v24 }
  0x15   : > { %v2016_v20 = vld [vmem:[%s2225_s13 + $0x70] sm:$0xff]   ;;  %v2017_v22 = vld [vmem:[%s2225_s13 + $0x78] sm:$0xff]  }
  0x16   : > { %1871 = vmatmul.mubr.msk.bf16.vlgmr.msra.gmra.mrb[0].mxu0 %vm434_vm0, %v2003_v6  ;;  %1887 = vmatmul.mubr.msk.bf16.vlgmr.msra.gmra.mrb[0].mxu1 %vm434_vm0, %v2011_v10 }
  0x17   : > { %1874 = vmatprep.mubr.msk.bf16.mxu0 %vm434_vm0, %v2004_v7  ;;  %1890 = vmatprep.mubr.msk.bf16.mxu1 %vm434_vm0, %v2012_v11 }
  0x18   : > { %1903 = vmatpush3.bf16.msra.mxu1 %v2018_v5  ;;  %1943 = vmatpush3.bf16.msra.mxu0 %v2022_v24 }
  0x19   : > { %1904 = vmatprep.subr.bf16.mxu1 %v2019_v9  ;;  %1944 = vmatprep.subr.bf16.mxu0 %v2023_v25 }
  0x1c   : > { %1905 = vmatpush3.bf16.msra.mxu1 %v2019_v9  ;;  %1945 = vmatpush3.bf16.msra.mxu0 %v2023_v25 }
  0x1d   : > { %1906 = vmatprep.subr.bf16.mxu1 %v2020_v16  ;;  %1946 = vmatprep.subr.bf16.mxu0 %v2024_v26 }
  0x1e   : > { %1875 = vmatmul.mubr.msk.bf16.gmra.mrb[4].mxu0 %vm434_vm0, %v2005_v12  ;;  %1891 = vmatmul.mubr.msk.bf16.gmra.mrb[4].mxu1 %vm434_vm0, %v2013_v14 }
  0x1f   : > { %1878 = vmatprep.mubr.msk.bf16.mxu0 %vm434_vm0, %v2006_v13  ;;  %1894 = vmatprep.mubr.msk.bf16.mxu1 %vm434_vm0, %v2014_v15 }
  0x20   : > { %1907 = vmatpush3.bf16.msra.mxu1 %v2020_v16  ;;  %1947 = vmatpush3.bf16.msra.mxu0 %v2024_v26 }
  0x21   : > { %1908 = vmatprep.subr.bf16.mxu1 %v2021_v23 }
  0x24   : > { %1909 = vmatpush3.bf16.msra.mxu1 %v2021_v23 }
  0x26   : > { %1879 = vmatmul.mubr.msk.bf16.gmra.mrb[8].mxu0 %vm434_vm0, %v2007_v17  ;;  %1895 = vmatmul.mubr.msk.bf16.gmra.mrb[8].mxu1 %vm434_vm0, %v2015_v18 }
  0x27   : > { %1882 = vmatprep.mubr.msk.bf16.mxu0 %vm434_vm0, %v2008_v19  ;;  %1898 = vmatprep.mubr.msk.bf16.mxu1 %vm434_vm0, %v2016_v20 }
  0x2e   : > { %1883 = vmatmul.mubr.msk.bf16.gmra.mrb[12].mxu0 %vm434_vm0, %v2009_v21  ;;  %1899 = vmatmul.mubr.msk.bf16.gmra.mrb[12].mxu1 %vm434_vm0, %v2017_v22 }
  0xe9   : > { %v1872_v28 = vpop.f32.mrb[0].mxu0  ;;  %v1888_v29 = vpop.f32.mrb[0].mxu1 }
  0xea   : > { %v526_v30 = vadd.f32 %v1872_v28, %v2286_v27  ;;  %v517_v31 = vpop.f32.mrb[1].mxu0  ;;  %v590_v32 = vadd.f32 %v1888_v29, %v2286_v27  ;;  %v581_v33 = vpop.f32.mrb[1].mxu1 }
  0xeb   : > { %v518_v34 = vadd.f32 %v2286_v27, %v517_v31  ;;  %v1873_v35 = vpop.f32.mrb[2].mxu0  ;;  %v582_v36 = vadd.f32 %v2286_v27, %v581_v33  ;;  %v1889_v37 = vpop.f32.mrb[2].mxu1 }
  0xec   : > { %vm646_vm1 = vcmp.ge.f32.partialorder %v526_v30, 0.0  ;;  %v678_v38 = vmul.f32 0.01, %v526_v30  ;;  %v529_v39 = vadd.f32 %v1873_v35, %v2286_v27  ;;  %v520_v40 = vpop.f32.mrb[3].mxu0  ;;  %v584_v41 = vpop.f32.mrb[3].mxu1  ;;  %vm662_vm4 = vcmp.ge.f32.partialorder %v590_v32, 0.0 }
  0xed   : > { %v676_v42 = vmul.f32 0.01, %v518_v34  ;;  %v521_v43 = vadd.f32 %v2286_v27, %v520_v40  ;;  %v694_v44 = vmul.f32 0.01, %v590_v32  ;;  %vm644_vm2 = vcmp.ge.f32.partialorder %v518_v34, 0.0 }
  0xee   : > { %vm647_vm3 = vcmp.ge.f32.partialorder %v529_v39, 0.0  ;;  %v679_v45 = vmul.f32 0.01, %v529_v39  ;;  %v710_v46 = vsel %vm646_vm1, %v526_v30, %v678_v38  ;;  %vm660_vm6 = vcmp.ge.f32.partialorder %v582_v36, 0.0 }
  0xef   : > { %vm645_vm5 = vcmp.ge.f32.partialorder %v521_v43, 0.0  ;;  %v677_v47 = vmul.f32 0.01, %v521_v43  ;;  %v692_v49 = vmul.f32 0.01, %v582_v36  ;;  %v593_v50 = vadd.f32 %v1889_v37, %v2286_v27 }
  0xf0   : > { %v711_v48 = vsel %vm647_vm3, %v529_v39, %v679_v45  ;;  %v585_v51 = vadd.f32 %v2286_v27, %v584_v41  ;;  %v708_v52 = vsel %vm644_vm2, %v518_v34, %v676_v42  ;;  %v2296_v56 = vsel %vm662_vm4, %v590_v32, %v694_v44 }
  0xf1   : > { %v741_v53 = vpack.c.bf16 %v711_v48, %v710_v46  ;;  %v709_v54 = vsel %vm645_vm5, %v521_v43, %v677_v47  ;;  %v1876_v55 = vpop.f32.mrb[4].mxu0  ;;  %v1892_v57 = vpop.f32.mrb[4].mxu1  ;;  %v2299_v61 = vsel %vm660_vm6, %v582_v36, %v692_v49  ;;  %vm663_vm7 = vcmp.ge.f32.partialorder %v593_v50, 0.0 }
  0xf2   : > { %v740_v58 = vpack.c.bf16 %v709_v54, %v708_v52  ;;  %v542_v59 = vadd.f32 %v1876_v55, %v2286_v27  ;;  %v533_v60 = vpop.f32.mrb[5].mxu0  ;;  %v597_v62 = vpop.f32.mrb[5].mxu1  ;;  %v695_v1 = vmul.f32 0.01, %v593_v50  ;;  %vm661_vm8 = vcmp.ge.f32.partialorder %v585_v51, 0.0 }
  0xf3   : > { %v534_v63 = vadd.f32 %v2286_v27, %v533_v60  ;;  %v1877_v0 = vpop.f32.mrb[6].mxu0  ;;  %v693_v2 = vmul.f32 0.01, %v585_v51  ;;  %v606_v6 = vadd.f32 %v1892_v57, %v2286_v27  ;;  %v1893_v7 = vpop.f32.mrb[6].mxu1  ;;  %v598_v24 = vadd.f32 %v2286_v27, %v597_v62 }
  0xf4   : > { %vm650_vm9 = vcmp.ge.f32.partialorder %v542_v59, 0.0  ;;  %v682_v3 = vmul.f32 0.01, %v542_v59  ;;  %v545_v4 = vadd.f32 %v1877_v0, %v2286_v27  ;;  %v536_v5 = vpop.f32.mrb[7].mxu0  ;;  %1910 = vmatprep.mubr.msk.bf16.mxu1 %vm434_vm0, %v740_v58  ;;  %v2308_v10 = vsel %vm663_vm7, %v593_v50, %v695_v1  ;;  %v600_v11 = vpop.f32.mrb[7].mxu1 }
  0xf5   : > { %vm648_vm10 = vcmp.ge.f32.partialorder %v534_v63, 0.0  ;;  %v680_v8 = vmul.f32 0.01, %v534_v63  ;;  %v537_v9 = vadd.f32 %v2286_v27, %v536_v5  ;;  %1911 = vmatmul.mubr.msk.bf16.vlgmr.msra.gmra.mrb[16].mxu1 %vm434_vm0, %v741_v53  ;;  %v749_v14 = vpack.c.bf16 %v2308_v10, %v2296_v56  ;;  %v2380_v56 = vld [vmem:[%s2739_s4] ss:$0 sm:$0xff] }
  0xf6   : > { %v714_v12 = vsel %vm650_vm9, %v542_v59, %v682_v3  ;;  %vm651_vm11 = vcmp.ge.f32.partialorder %v545_v4, 0.0  ;;  %v683_v13 = vmul.f32 0.01, %v545_v4  ;;  %v2313_v17 = vsel %vm661_vm8, %v585_v51, %v693_v2 }
  0xf7   : > { %v712_v15 = vsel %vm648_vm10, %v534_v63, %v680_v8  ;;  %vm649_vm12 = vcmp.ge.f32.partialorder %v537_v9, 0.0  ;;  %v681_v16 = vmul.f32 0.01, %v537_v9  ;;  %v748_v19 = vpack.c.bf16 %v2313_v17, %v2299_v61 }
  0xf8   : > { %v715_v18 = vsel %vm651_vm11, %v545_v4, %v683_v13  ;;  %vm666_vm13 = vcmp.ge.f32.partialorder %v606_v6, 0.0  ;;  %v698_v20 = vmul.f32 0.01, %v606_v6  ;;  %v609_v25 = vadd.f32 %v1893_v7, %v2286_v27 }
  0xf9   : > { %v743_v21 = vpack.c.bf16 %v715_v18, %v714_v12  ;;  %v713_v22 = vsel %vm649_vm12, %v537_v9, %v681_v16  ;;  %v1880_v23 = vpop.f32.mrb[8].mxu0  ;;  %v1896_v26 = vpop.f32.mrb[8].mxu1  ;;  %v601_v32 = vadd.f32 %v2286_v27, %v600_v11  ;;  %vm664_vm14 = vcmp.ge.f32.partialorder %v598_v24, 0.0 }
  0xfa   : > { %v742_v28 = vpack.c.bf16 %v713_v22, %v712_v15  ;;  %v558_v29 = vadd.f32 %v1880_v23, %v2286_v27  ;;  %v549_v30 = vpop.f32.mrb[9].mxu0  ;;  %v2320_v31 = vsel %vm666_vm13, %v606_v6, %v698_v20  ;;  %v613_v33 = vpop.f32.mrb[9].mxu1  ;;  %v696_v36 = vmul.f32 0.01, %v598_v24 }
  0xfb   : > { %v550_v34 = vadd.f32 %v2286_v27, %v549_v30  ;;  %v1881_v35 = vpop.f32.mrb[10].mxu0  ;;  %vm667_vm15 = vcmp.ge.f32.partialorder %v609_v25, 0.0  ;;  %v1897_v37 = vpop.f32.mrb[10].mxu1  ;;  %v699_v41 = vmul.f32 0.01, %v609_v25  ;;  %vm665_vm5 = vcmp.ge.f32.partialorder %v601_v32, 0.0 }
  0xfc   : > { %vm654_vm1 = vcmp.ge.f32.partialorder %v558_v29, 0.0  ;;  %v686_v38 = vmul.f32 0.01, %v558_v29  ;;  %v561_v39 = vadd.f32 %v1881_v35, %v2286_v27  ;;  %v552_v40 = vpop.f32.mrb[11].mxu0  ;;  %1914 = vmatprep.mubr.msk.bf16.mxu1 %vm434_vm0, %v742_v28  ;;  %v2328_v44 = vsel %vm664_vm14, %v598_v24, %v696_v36  ;;  %v616_v45 = vpop.f32.mrb[11].mxu1 }
  0xfd   : > { %vm652_vm2 = vcmp.ge.f32.partialorder %v550_v34, 0.0  ;;  %v684_v42 = vmul.f32 0.01, %v550_v34  ;;  %v553_v43 = vadd.f32 %v2286_v27, %v552_v40  ;;  %1915 = vmatmul.mubr.msk.bf16.gmra.mrb[20].mxu1 %vm434_vm0, %v743_v21  ;;  %v2331_v48 = vsel %vm667_vm15, %v609_v25, %v699_v41 }
  0xfe   : > { %v718_v46 = vsel %vm654_vm1, %v558_v29, %v686_v38  ;;  %vm655_vm3 = vcmp.ge.f32.partialorder %v561_v39, 0.0  ;;  %v687_v47 = vmul.f32 0.01, %v561_v39  ;;  %v751_v51 = vpack.c.bf16 %v2331_v48, %v2320_v31 }
  0xff   : > { %v716_v49 = vsel %vm652_vm2, %v550_v34, %v684_v42  ;;  %vm653_vm4 = vcmp.ge.f32.partialorder %v553_v43, 0.0  ;;  %v685_v50 = vmul.f32 0.01, %v553_v43  ;;  %v697_v53 = vmul.f32 0.01, %v601_v32 }
 0x100   : > { %v719_v52 = vsel %vm655_vm3, %v561_v39, %v687_v47  ;;  %v622_v54 = vadd.f32 %v1896_v26, %v2286_v27  ;;  %v614_v59 = vadd.f32 %v2286_v27, %v613_v33  ;;  %v625_v60 = vadd.f32 %v1897_v37, %v2286_v27 }
 0x101   : > { %v745_v55 = vpack.c.bf16 %v719_v52, %v718_v46  ;;  %v717_v57 = vsel %vm653_vm4, %v553_v43, %v685_v50  ;;  %v1884_v58 = vpop.f32.mrb[12].mxu0  ;;  %v1900_v62 = vpop.f32.mrb[12].mxu1  ;;  %v2339_v2 = vsel %vm665_vm5, %v601_v32, %v697_v53  ;;  %v617_v29 = vadd.f32 %v2286_v27, %v616_v45 }
 0x102   : > { %v744_v63 = vpack.c.bf16 %v717_v57, %v716_v49  ;;  %v574_v0 = vadd.f32 %v1884_v58, %v2286_v27  ;;  %v565_v1 = vpop.f32.mrb[13].mxu0  ;;  %vm670_vm6 = vcmp.ge.f32.partialorder %v622_v54, 0.0  ;;  %v629_v3 = vpop.f32.mrb[13].mxu1  ;;  %v750_v6 = vpack.c.bf16 %v2339_v2, %v2328_v44 }
 0x103   : > { %v566_v4 = vadd.f32 %v2286_v27, %v565_v1  ;;  %v1885_v5 = vpop.f32.mrb[14].mxu0  ;;  %v702_v7 = vmul.f32 0.01, %v622_v54  ;;  %vm668_vm7 = vcmp.ge.f32.partialorder %v614_v59, 0.0  ;;  %v1901_v8 = vpop.f32.mrb[14].mxu1  ;;  %vm671_vm12 = vcmp.ge.f32.partialorder %v625_v60, 0.0 }
 0x104   : > { %vm658_vm8 = vcmp.ge.f32.partialorder %v574_v0, 0.0  ;;  %v690_v9 = vmul.f32 0.01, %v574_v0  ;;  %v577_v11 = vadd.f32 %v1885_v5, %v2286_v27  ;;  %v568_v12 = vpop.f32.mrb[15].mxu0  ;;  %1918 = vmatprep.mubr.msk.bf16.mxu1 %vm434_vm0, %v744_v63  ;;  %v700_v13 = vmul.f32 0.01, %v614_v59 }
 0x105   : > { %vm656_vm9 = vcmp.ge.f32.partialorder %v566_v4, 0.0  ;;  %v688_v15 = vmul.f32 0.01, %v566_v4  ;;  %v569_v16 = vadd.f32 %v2286_v27, %v568_v12  ;;  %1919 = vmatmul.mubr.msk.bf16.gmra.mrb[24].mxu1 %vm434_vm0, %v745_v55  ;;  %v734_v18 = vsel %vm670_vm6, %v622_v54, %v702_v7  ;;  %v632_v20 = vpop.f32.mrb[15].mxu1 }
 0x106   : > { %v722_v21 = vsel %vm658_vm8, %v574_v0, %v690_v9  ;;  %vm659_vm10 = vcmp.ge.f32.partialorder %v577_v11, 0.0  ;;  %v691_v22 = vmul.f32 0.01, %v577_v11  ;;  %v732_v23 = vsel %vm668_vm7, %v614_v59, %v700_v13 }
 0x107   : > { %v720_v24 = vsel %vm656_vm9, %v566_v4, %v688_v15  ;;  %vm657_vm11 = vcmp.ge.f32.partialorder %v569_v16, 0.0  ;;  %v689_v25 = vmul.f32 0.01, %v569_v16  ;;  %v703_v28 = vmul.f32 0.01, %v625_v60 }
 0x108   : > { %v723_v26 = vsel %vm659_vm10, %v577_v11, %v691_v22  ;;  %v638_v30 = vadd.f32 %v1900_v62, %v2286_v27  ;;  %v630_v34 = vadd.f32 %v2286_v27, %v629_v3  ;;  %v641_v35 = vadd.f32 %v1901_v8, %v2286_v27 }
 0x109   : > { %v747_v32 = vpack.c.bf16 %v723_v26, %v722_v21  ;;  %v721_v33 = vsel %vm657_vm11, %v569_v16, %v689_v25  ;;  %v735_v37 = vsel %vm671_vm12, %v625_v60, %v703_v28  ;;  %vm669_vm13 = vcmp.ge.f32.partialorder %v617_v29, 0.0 }
 0x10a   : > { %v746_v36 = vpack.c.bf16 %v721_v33, %v720_v24  ;;  %v701_v38 = vmul.f32 0.01, %v617_v29  ;;  %v753_v39 = vpack.c.bf16 %v735_v37, %v734_v18  ;;  %vm674_vm14 = vcmp.ge.f32.partialorder %v638_v30, 0.0 }
 0x10b   : > { %v706_v40 = vmul.f32 0.01, %v638_v30  ;;  %vm672_vm15 = vcmp.ge.f32.partialorder %v630_v34, 0.0  ;;  %v704_v42 = vmul.f32 0.01, %v630_v34  ;;  %vm675_vm1 = vcmp.ge.f32.partialorder %v641_v35, 0.0 }
 0x10c   : > { %1922 = vmatprep.mubr.msk.bf16.mxu1 %vm434_vm0, %v746_v36  ;;  %v733_v41 = vsel %vm669_vm13, %v617_v29, %v701_v38  ;;  %v707_v43 = vmul.f32 0.01, %v641_v35  ;;  %v633_v46 = vadd.f32 %v2286_v27, %v632_v20  ;;  %v2025_v27 = vld [vmem:[%s2740_s5 + $0x18] sm:$0xff]  }
 0x10d   : > { %1923 = vmatmul.mubr.msk.bf16.gmra.mrb[28].mxu1 %vm434_vm0, %v747_v32  ;;  %v752_v44 = vpack.c.bf16 %v733_v41, %v732_v23  ;;  %v738_v45 = vsel %vm674_vm14, %v638_v30, %v706_v40  ;;  %v736_v49 = vsel %vm672_vm15, %v630_v34, %v704_v42  ;;  %1948 = vmatprep.subr.bf16.mxu0 %v2025_v27 }
 0x10e   : > { %1926 = vmatprep.mubr.msk.bf16.mxu1 %vm434_vm0, %v748_v19  ;;  %v739_v47 = vsel %vm675_vm1, %v641_v35, %v707_v43  ;;  %vm673_vm2 = vcmp.ge.f32.partialorder %v633_v46, 0.0  ;;  %v705_v52 = vmul.f32 0.01, %v633_v46  ;;  %1949 = vmatpush3.bf16.msra.mxu0 %v2025_v27 }
 0x10f   : > { %v755_v50 = vpack.c.bf16 %v739_v47, %v738_v45 }
 0x110   : > { %v737_v53 = vsel %vm673_vm2, %v633_v46, %v705_v52 }
 0x111   : > { %v754_v54 = vpack.c.bf16 %v737_v53, %v736_v49 }
 0x115   : > { %1927 = vmatmul.mubr.msk.bf16.gmra.mrb[32].mxu1 %vm434_vm0, %v749_v14 }
 0x116   : > { %1930 = vmatprep.mubr.msk.bf16.mxu1 %vm434_vm0, %v750_v6 }
 0x11d   : > { %1931 = vmatmul.mubr.msk.bf16.gmra.mrb[36].mxu1 %vm434_vm0, %v751_v51 }
 0x11e   : > { %1934 = vmatprep.mubr.msk.bf16.mxu1 %vm434_vm0, %v752_v44 }
 0x125   : > { %1935 = vmatmul.mubr.msk.bf16.gmra.mrb[40].mxu1 %vm434_vm0, %v753_v39 }
 0x126   : > { %1938 = vmatprep.mubr.msk.bf16.mxu1 %vm434_vm0, %v754_v54 }
 0x12d   : > { %1939 = vmatmul.mubr.msk.bf16.gmra.mrb[44].mxu1 %vm434_vm0, %v755_v50 }
 0x1c8   : > { %v1912_v61 = vpop.f32.mrb[16].mxu1 }
 0x1c9   : > { %v886_v10 = vadd.f32 %v1912_v61, %v2380_v56  ;;  %v877_v14 = vpop.f32.mrb[17].mxu1 }
 0x1ca   : > { %v878_v17 = vadd.f32 %v2380_v56, %v877_v14  ;;  %v1913_v19 = vpop.f32.mrb[18].mxu1 }
 0x1cb   : > { %v1038_v31 = vmul.f32 0.01, %v886_v10  ;;  %v889_v48 = vadd.f32 %v1913_v19, %v2380_v56  ;;  %v880_v51 = vpop.f32.mrb[19].mxu1  ;;  %vm1006_vm3 = vcmp.ge.f32.partialorder %v886_v10, 0.0 }
 0x1cc   : > { %v1036_v55 = vmul.f32 0.01, %v878_v17  ;;  %v881_v57 = vadd.f32 %v2380_v56, %v880_v51  ;;  %vm1004_vm4 = vcmp.ge.f32.partialorder %v878_v17, 0.0 }
 0x1cd   : > { %vm1007_vm5 = vcmp.ge.f32.partialorder %v889_v48, 0.0  ;;  %v1039_v58 = vmul.f32 0.01, %v889_v48  ;;  %v1070_v60 = vsel %vm1006_vm3, %v886_v10, %v1038_v31 }
 0x1ce   : > { %vm1005_vm6 = vcmp.ge.f32.partialorder %v881_v57, 0.0  ;;  %v1037_v59 = vmul.f32 0.01, %v881_v57  ;;  %v1068_v63 = vsel %vm1004_vm4, %v878_v17, %v1036_v55 }
 0x1cf   : > { %v1071_v62 = vsel %vm1007_vm5, %v889_v48, %v1039_v58 }
 0x1d0   : > { %v1101_v0 = vpack.c.bf16 %v1071_v62, %v1070_v60  ;;  %v1069_v1 = vsel %vm1005_vm6, %v881_v57, %v1037_v59  ;;  %v1916_v2 = vpop.f32.mrb[20].mxu1 }
 0x1d1   : > { %v1100_v3 = vpack.c.bf16 %v1069_v1, %v1068_v63  ;;  %v902_v4 = vadd.f32 %v1916_v2, %v2380_v56  ;;  %v893_v5 = vpop.f32.mrb[21].mxu1 }
 0x1d2   : > { %v894_v6 = vadd.f32 %v2380_v56, %v893_v5  ;;  %v1917_v7 = vpop.f32.mrb[22].mxu1 }
 0x1d3   : > { %v1042_v8 = vmul.f32 0.01, %v902_v4  ;;  %v905_v9 = vadd.f32 %v1917_v7, %v2380_v56  ;;  %v896_v11 = vpop.f32.mrb[23].mxu1  ;;  %1950 = vmatprep.mubr.msk.bf16.mxu0 %vm434_vm0, %v1100_v3  ;;  %vm1010_vm7 = vcmp.ge.f32.partialorder %v902_v4, 0.0 }
 0x1d4   : > { %v1040_v12 = vmul.f32 0.01, %v894_v6  ;;  %v897_v13 = vadd.f32 %v2380_v56, %v896_v11  ;;  %1951 = vmatmul.mubr.msk.bf16.vlgmr.msra.gmra.mrb[16].mxu0 %vm434_vm0, %v1101_v0  ;;  %vm1008_vm8 = vcmp.ge.f32.partialorder %v894_v6, 0.0 }
 0x1d5   : > { %vm1011_vm9 = vcmp.ge.f32.partialorder %v905_v9, 0.0  ;;  %v1043_v15 = vmul.f32 0.01, %v905_v9  ;;  %v1074_v18 = vsel %vm1010_vm7, %v902_v4, %v1042_v8 }
 0x1d6   : > { %vm1009_vm10 = vcmp.ge.f32.partialorder %v897_v13, 0.0  ;;  %v1041_v16 = vmul.f32 0.01, %v897_v13  ;;  %v1072_v21 = vsel %vm1008_vm8, %v894_v6, %v1040_v12 }
 0x1d7   : > { %v1075_v20 = vsel %vm1011_vm9, %v905_v9, %v1043_v15 }
 0x1d8   : > { %v1103_v22 = vpack.c.bf16 %v1075_v20, %v1074_v18  ;;  %v1073_v23 = vsel %vm1009_vm10, %v897_v13, %v1041_v16  ;;  %v1920_v24 = vpop.f32.mrb[24].mxu1 }
 0x1d9   : > { %v1102_v25 = vpack.c.bf16 %v1073_v23, %v1072_v21  ;;  %v918_v26 = vadd.f32 %v1920_v24, %v2380_v56  ;;  %v909_v28 = vpop.f32.mrb[25].mxu1 }
 0x1da   : > { %v910_v29 = vadd.f32 %v2380_v56, %v909_v28  ;;  %v1921_v30 = vpop.f32.mrb[26].mxu1 }
 0x1db   : > { %v1046_v32 = vmul.f32 0.01, %v918_v26  ;;  %v921_v33 = vadd.f32 %v1921_v30, %v2380_v56  ;;  %v912_v34 = vpop.f32.mrb[27].mxu1  ;;  %1954 = vmatprep.mubr.msk.bf16.mxu0 %vm434_vm0, %v1102_v25  ;;  %vm1014_vm11 = vcmp.ge.f32.partialorder %v918_v26, 0.0 }
 0x1dc   : > { %v1044_v35 = vmul.f32 0.01, %v910_v29  ;;  %v913_v36 = vadd.f32 %v2380_v56, %v912_v34  ;;  %1955 = vmatmul.mubr.msk.bf16.gmra.mrb[20].mxu0 %vm434_vm0, %v1103_v22  ;;  %vm1012_vm12 = vcmp.ge.f32.partialorder %v910_v29, 0.0 }
 0x1dd   : > { %vm1015_vm13 = vcmp.ge.f32.partialorder %v921_v33, 0.0  ;;  %v1047_v37 = vmul.f32 0.01, %v921_v33  ;;  %v1078_v39 = vsel %vm1014_vm11, %v918_v26, %v1046_v32 }
 0x1de   : > { %vm1013_vm14 = vcmp.ge.f32.partialorder %v913_v36, 0.0  ;;  %v1045_v38 = vmul.f32 0.01, %v913_v36  ;;  %v1076_v41 = vsel %vm1012_vm12, %v910_v29, %v1044_v35 }
 0x1df   : > { %v1079_v40 = vsel %vm1015_vm13, %v921_v33, %v1047_v37 }
 0x1e0   : > { %v1105_v42 = vpack.c.bf16 %v1079_v40, %v1078_v39  ;;  %v1077_v43 = vsel %vm1013_vm14, %v913_v36, %v1045_v38  ;;  %v1924_v44 = vpop.f32.mrb[28].mxu1 }
 0x1e1   : > { %v1104_v45 = vpack.c.bf16 %v1077_v43, %v1076_v41  ;;  %v934_v46 = vadd.f32 %v1924_v44, %v2380_v56  ;;  %v925_v47 = vpop.f32.mrb[29].mxu1 }
 0x1e2   : > { %v926_v49 = vadd.f32 %v2380_v56, %v925_v47  ;;  %v1925_v50 = vpop.f32.mrb[30].mxu1 }
 0x1e3   : > { %v1050_v52 = vmul.f32 0.01, %v934_v46  ;;  %v937_v53 = vadd.f32 %v1925_v50, %v2380_v56  ;;  %v928_v54 = vpop.f32.mrb[31].mxu1  ;;  %1958 = vmatprep.mubr.msk.bf16.mxu0 %vm434_vm0, %v1104_v45  ;;  %vm1018_vm15 = vcmp.ge.f32.partialorder %v934_v46, 0.0 }
 0x1e4   : > { %v1048_v27 = vmul.f32 0.01, %v926_v49  ;;  %v929_v61 = vadd.f32 %v2380_v56, %v928_v54  ;;  %1959 = vmatmul.mubr.msk.bf16.gmra.mrb[24].mxu0 %vm434_vm0, %v1105_v42  ;;  %vm1016_vm1 = vcmp.ge.f32.partialorder %v926_v49, 0.0 }
 0x1e5   : > { %vm1019_vm2 = vcmp.ge.f32.partialorder %v937_v53, 0.0  ;;  %v1051_v10 = vmul.f32 0.01, %v937_v53  ;;  %v1082_v17 = vsel %vm1018_vm15, %v934_v46, %v1050_v52 }
 0x1e6   : > { %vm1017_vm3 = vcmp.ge.f32.partialorder %v929_v61, 0.0  ;;  %v1049_v14 = vmul.f32 0.01, %v929_v61  ;;  %v1080_v31 = vsel %vm1016_vm1, %v926_v49, %v1048_v27 }
 0x1e7   : > { %v1083_v19 = vsel %vm1019_vm2, %v937_v53, %v1051_v10 }
 0x1e8   : > { %v1107_v48 = vpack.c.bf16 %v1083_v19, %v1082_v17  ;;  %v1081_v51 = vsel %vm1017_vm3, %v929_v61, %v1049_v14  ;;  %v1928_v55 = vpop.f32.mrb[32].mxu1 }
 0x1e9   : > { %v1106_v57 = vpack.c.bf16 %v1081_v51, %v1080_v31  ;;  %v950_v58 = vadd.f32 %v1928_v55, %v2380_v56  ;;  %v941_v59 = vpop.f32.mrb[33].mxu1 }
 0x1ea   : > { %v942_v60 = vadd.f32 %v2380_v56, %v941_v59  ;;  %v1929_v62 = vpop.f32.mrb[34].mxu1 }
 0x1eb   : > { %v1054_v63 = vmul.f32 0.01, %v950_v58  ;;  %v953_v0 = vadd.f32 %v1929_v62, %v2380_v56  ;;  %v944_v1 = vpop.f32.mrb[35].mxu1  ;;  %1962 = vmatprep.mubr.msk.bf16.mxu0 %vm434_vm0, %v1106_v57  ;;  %vm1022_vm4 = vcmp.ge.f32.partialorder %v950_v58, 0.0 }
 0x1ec   : > { %v1052_v2 = vmul.f32 0.01, %v942_v60  ;;  %v945_v3 = vadd.f32 %v2380_v56, %v944_v1  ;;  %1963 = vmatmul.mubr.msk.bf16.gmra.mrb[28].mxu0 %vm434_vm0, %v1107_v48  ;;  %vm1020_vm5 = vcmp.ge.f32.partialorder %v942_v60, 0.0 }
 0x1ed   : > { %vm1023_vm6 = vcmp.ge.f32.partialorder %v953_v0, 0.0  ;;  %v1055_v4 = vmul.f32 0.01, %v953_v0  ;;  %v1086_v6 = vsel %vm1022_vm4, %v950_v58, %v1054_v63 }
 0x1ee   : > { %vm1021_vm7 = vcmp.ge.f32.partialorder %v945_v3, 0.0  ;;  %v1053_v5 = vmul.f32 0.01, %v945_v3  ;;  %v1084_v8 = vsel %vm1020_vm5, %v942_v60, %v1052_v2  ;;  %vm1591_vm5 = vcmask 31744  }
 0x1ef   : > { %v1087_v7 = vsel %vm1023_vm6, %v953_v0, %v1055_v4 }
 0x1f0   : > { %v1109_v9 = vpack.c.bf16 %v1087_v7, %v1086_v6  ;;  %v1085_v11 = vsel %vm1021_vm7, %v945_v3, %v1053_v5  ;;  %v1932_v12 = vpop.f32.mrb[36].mxu1 }
 0x1f1   : > { %v1108_v13 = vpack.c.bf16 %v1085_v11, %v1084_v8  ;;  %v966_v15 = vadd.f32 %v1932_v12, %v2380_v56  ;;  %v957_v16 = vpop.f32.mrb[37].mxu1 }
 0x1f2   : > { %v958_v18 = vadd.f32 %v2380_v56, %v957_v16  ;;  %v1933_v20 = vpop.f32.mrb[38].mxu1 }
 0x1f3   : > { %v1058_v21 = vmul.f32 0.01, %v966_v15  ;;  %v969_v22 = vadd.f32 %v1933_v20, %v2380_v56  ;;  %v960_v23 = vpop.f32.mrb[39].mxu1  ;;  %1966 = vmatprep.mubr.msk.bf16.mxu0 %vm434_vm0, %v1108_v13  ;;  %vm1026_vm8 = vcmp.ge.f32.partialorder %v966_v15, 0.0 }
 0x1f4   : > { %v1056_v24 = vmul.f32 0.01, %v958_v18  ;;  %v961_v25 = vadd.f32 %v2380_v56, %v960_v23  ;;  %1967 = vmatmul.mubr.msk.bf16.gmra.mrb[32].mxu0 %vm434_vm0, %v1109_v9  ;;  %vm1024_vm9 = vcmp.ge.f32.partialorder %v958_v18, 0.0 }
 0x1f5   : > { %vm1027_vm10 = vcmp.ge.f32.partialorder %v969_v22, 0.0  ;;  %v1059_v26 = vmul.f32 0.01, %v969_v22  ;;  %v1090_v29 = vsel %vm1026_vm8, %v966_v15, %v1058_v21 }
 0x1f6   : > { %vm1025_vm11 = vcmp.ge.f32.partialorder %v961_v25, 0.0  ;;  %v1057_v28 = vmul.f32 0.01, %v961_v25  ;;  %v1088_v32 = vsel %vm1024_vm9, %v958_v18, %v1056_v24 }
 0x1f7   : > { %v1091_v30 = vsel %vm1027_vm10, %v969_v22, %v1059_v26 }
 0x1f8   : > { %v1111_v33 = vpack.c.bf16 %v1091_v30, %v1090_v29  ;;  %v1089_v34 = vsel %vm1025_vm11, %v961_v25, %v1057_v28  ;;  %v1936_v35 = vpop.f32.mrb[40].mxu1 }
 0x1f9   : > { %v1110_v36 = vpack.c.bf16 %v1089_v34, %v1088_v32  ;;  %v982_v37 = vadd.f32 %v1936_v35, %v2380_v56  ;;  %v973_v38 = vpop.f32.mrb[41].mxu1 }
 0x1fa   : > { %v974_v39 = vadd.f32 %v2380_v56, %v973_v38  ;;  %v1937_v40 = vpop.f32.mrb[42].mxu1  ;;  %v1364_v38 = vlaneseq }
 0x1fb   : > { %v1062_v41 = vmul.f32 0.01, %v982_v37  ;;  %v985_v42 = vadd.f32 %v1937_v40, %v2380_v56  ;;  %v976_v43 = vpop.f32.mrb[43].mxu1  ;;  %1970 = vmatprep.mubr.msk.bf16.mxu0 %vm434_vm0, %v1110_v36  ;;  %vm1030_vm12 = vcmp.ge.f32.partialorder %v982_v37, 0.0 }
 0x1fc   : > { %v1060_v44 = vmul.f32 0.01, %v974_v39  ;;  %v977_v45 = vadd.f32 %v2380_v56, %v976_v43  ;;  %1971 = vmatmul.mubr.msk.bf16.gmra.mrb[36].mxu0 %vm434_vm0, %v1111_v33  ;;  %vm1028_vm13 = vcmp.ge.f32.partialorder %v974_v39, 0.0 }
 0x1fd   : > { %vm1031_vm14 = vcmp.ge.f32.partialorder %v985_v42, 0.0  ;;  %v1063_v46 = vmul.f32 0.01, %v985_v42  ;;  %v1094_v49 = vsel %vm1030_vm12, %v982_v37, %v1062_v41 }
 0x1fe   : > { %vm1029_vm15 = vcmp.ge.f32.partialorder %v977_v45, 0.0  ;;  %v1061_v47 = vmul.f32 0.01, %v977_v45  ;;  %v1092_v52 = vsel %vm1028_vm13, %v974_v39, %v1060_v44 }
 0x1ff   : > { %v1095_v50 = vsel %vm1031_vm14, %v985_v42, %v1063_v46 }
 0x200   : > { %v1113_v53 = vpack.c.bf16 %v1095_v50, %v1094_v49  ;;  %v1093_v54 = vsel %vm1029_vm15, %v977_v45, %v1061_v47  ;;  %v1940_v27 = vpop.f32.mrb[44].mxu1 }
 0x201   : > { %v1112_v61 = vpack.c.bf16 %v1093_v54, %v1092_v52  ;;  %v998_v10 = vadd.f32 %v1940_v27, %v2380_v56  ;;  %v989_v14 = vpop.f32.mrb[45].mxu1  ;;  %v2481_v54 = vand.u32 127, %v1364_v38 }
 0x202   : > { %v990_v17 = vadd.f32 %v2380_v56, %v989_v14  ;;  %v1941_v19 = vpop.f32.mrb[46].mxu1 }
 0x203   : > { %v1066_v31 = vmul.f32 0.01, %v998_v10  ;;  %v1001_v48 = vadd.f32 %v1941_v19, %v2380_v56  ;;  %v992_v51 = vpop.f32.mrb[47].mxu1  ;;  %1974 = vmatprep.mubr.msk.bf16.mxu0 %vm434_vm0, %v1112_v61  ;;  %vm1034_vm1 = vcmp.ge.f32.partialorder %v998_v10, 0.0 }
 0x204   : > { %v1064_v55 = vmul.f32 0.01, %v990_v17  ;;  %v993_v57 = vadd.f32 %v2380_v56, %v992_v51  ;;  %1975 = vmatmul.mubr.msk.bf16.gmra.mrb[40].mxu0 %vm434_vm0, %v1113_v53  ;;  %vm1032_vm2 = vcmp.ge.f32.partialorder %v990_v17, 0.0  ;;  %v2433_v56 = vld [vmem:[%s2741_s6] ss:$0 sm:$0xff] }
 0x205   : > { %vm1035_vm3 = vcmp.ge.f32.partialorder %v1001_v48, 0.0  ;;  %v1067_v58 = vmul.f32 0.01, %v1001_v48  ;;  %v1098_v60 = vsel %vm1034_vm1, %v998_v10, %v1066_v31 }
 0x206   : > { %vm1033_vm4 = vcmp.ge.f32.partialorder %v993_v57, 0.0  ;;  %v1065_v59 = vmul.f32 0.01, %v993_v57  ;;  %v1096_v63 = vsel %vm1032_vm2, %v990_v17, %v1064_v55 }
 0x207   : > { %v1099_v62 = vsel %vm1035_vm3, %v1001_v48, %v1067_v58 }
 0x208   : > { %v1115_v0 = vpack.c.bf16 %v1099_v62, %v1098_v60  ;;  %v1097_v1 = vsel %vm1033_vm4, %v993_v57, %v1065_v59 }
 0x209   : > { %v1114_v2 = vpack.c.bf16 %v1097_v1, %v1096_v63 }
 0x20b   : > { %1978 = vmatprep.mubr.msk.bf16.mxu0 %vm434_vm0, %v1114_v2 }
 0x20c   : > { %1979 = vmatmul.mubr.msk.bf16.gmra.mrb[44].mxu0 %vm434_vm0, %v1115_v0  ;;  %vm1366_vm0 = vcmp.lt.s32.totalorder %v2481_v54, 1 }
 0x2a7   : > { %v1952_v3 = vpop.f32.mrb[16].mxu0 }
 0x2a8   : > { %v2436_v4 = vadd.f32 %v1952_v3, %v2433_v56  ;;  %v1237_v5 = vpop.f32.mrb[17].mxu0 }
 0x2a9   : > { %v2439_v6 = vadd.f32 %v2433_v56, %v1237_v5  ;;  %v1953_v7 = vpop.f32.mrb[18].mxu0 }
 0x2aa   : > { %v1770_v8 = vmul.f32 -1.442695, %v2436_v4  ;;  %v2443_v9 = vadd.f32 %v1953_v7, %v2433_v56  ;;  %v1240_v11 = vpop.f32.mrb[19].mxu0 }
 0x2ab   : > { %v1768_v12 = vmul.f32 -1.442695, %v2439_v6  ;;  %v2447_v13 = vadd.f32 %v2433_v56, %v1240_v11 }
 0x2ac   : > { %2026 = vpow2.f32 %v1770_v8  ;;  %v1771_v15 = vmul.f32 -1.442695, %v2443_v9 }
 0x2ad   : > { %2028 = vpow2.f32 %v1768_v12  ;;  %v1769_v16 = vmul.f32 -1.442695, %v2447_v13 }
 0x2ae   : > { %2030 = vpow2.f32 %v1771_v15 }
 0x2af   : > { %2032 = vpow2.f32 %v1769_v16  ;;  %v1956_v18 = vpop.f32.mrb[20].mxu0 }
 0x2b0   : > { %v2452_v20 = vadd.f32 %v1956_v18, %v2433_v56  ;;  %v1253_v21 = vpop.f32.mrb[21].mxu0 }
 0x2b1   : > { %v2455_v22 = vadd.f32 %v2433_v56, %v1253_v21  ;;  %v1957_v23 = vpop.f32.mrb[22].mxu0 }
 0x2b2   : > { %v1774_v24 = vmul.f32 -1.442695, %v2452_v20  ;;  %v2459_v25 = vadd.f32 %v1957_v23, %v2433_v56  ;;  %v1256_v26 = vpop.f32.mrb[23].mxu0 }
 0x2b3   : > { %v1772_v28 = vmul.f32 -1.442695, %v2455_v22  ;;  %v2463_v29 = vadd.f32 %v2433_v56, %v1256_v26 }
 0x2b4   : > { %2034 = vpow2.f32 %v1774_v24  ;;  %v1775_v30 = vmul.f32 -1.442695, %v2459_v25 }
 0x2b5   : > { %2036 = vpow2.f32 %v1772_v28  ;;  %v1773_v32 = vmul.f32 -1.442695, %v2463_v29 }
 0x2b6   : > { %v2027_v33 = vpop.eup %2026  ;;  %2038 = vpow2.f32 %v1775_v30 }
 0x2b7   : > { %v2029_v34 = vpop.eup %2028  ;;  %v1465_v35 = vadd.f32 1.0, %v2027_v33  ;;  %2040 = vpow2.f32 %v1773_v32  ;;  %v1960_v36 = vpop.f32.mrb[24].mxu0 }
 0x2b8   : > { %v2031_v37 = vpop.eup %2030  ;;  %v1463_v39 = vadd.f32 1.0, %v2029_v34  ;;  %v2468_v40 = vadd.f32 %v1960_v36, %v2433_v56  ;;  %v1269_v41 = vpop.f32.mrb[25].mxu0 }
 0x2b9   : > { %v2033_v42 = vpop.eup %2032  ;;  %2042 = vrcp.f32 %v1465_v35  ;;  %v1466_v43 = vadd.f32 1.0, %v2031_v37  ;;  %v2471_v44 = vadd.f32 %v2433_v56, %v1269_v41  ;;  %v1961_v45 = vpop.f32.mrb[26].mxu0 }
 0x2ba   : > { %2044 = vrcp.f32 %v1463_v39  ;;  %v1464_v46 = vadd.f32 1.0, %v2033_v42  ;;  %v1778_v47 = vmul.f32 -1.442695, %v2468_v40  ;;  %v2475_v49 = vadd.f32 %v1961_v45, %v2433_v56  ;;  %v1272_v50 = vpop.f32.mrb[27].mxu0 }
 0x2bb   : > { %2046 = vrcp.f32 %v1466_v43  ;;  %v1776_v52 = vmul.f32 -1.442695, %v2471_v44  ;;  %v2479_v53 = vadd.f32 %v2433_v56, %v1272_v50 }
 0x2bc   : > { %2048 = vrcp.f32 %v1464_v46  ;;  %v1779_v27 = vmul.f32 -1.442695, %v2475_v49 }
 0x2bd   : > { %2050 = vpow2.f32 %v1778_v47  ;;  %v1777_v61 = vmul.f32 -1.442695, %v2479_v53 }
 0x2be   : > { %v2035_v10 = vpop.eup %2034  ;;  %2052 = vpow2.f32 %v1776_v52 }
 0x2bf   : > { %v2037_v14 = vpop.eup %2036  ;;  %v1469_v17 = vadd.f32 1.0, %v2035_v10  ;;  %2054 = vpow2.f32 %v1779_v27  ;;  %v1964_v19 = vpop.f32.mrb[28].mxu0 }
 0x2c0   : > { %v2039_v31 = vpop.eup %2038  ;;  %v1467_v48 = vadd.f32 1.0, %v2037_v14  ;;  %2056 = vpow2.f32 %v1777_v61  ;;  %v2488_v51 = vadd.f32 %v1964_v19, %v2433_v56  ;;  %v1285_v55 = vpop.f32.mrb[29].mxu0 }
 0x2c1   : > { %v2041_v57 = vpop.eup %2040  ;;  %2058 = vrcp.f32 %v1469_v17  ;;  %v1470_v58 = vadd.f32 1.0, %v2039_v31  ;;  %v2491_v59 = vadd.f32 %v2433_v56, %v1285_v55  ;;  %v1965_v60 = vpop.f32.mrb[30].mxu0 }
 0x2c2   : > { %2060 = vrcp.f32 %v1467_v48  ;;  %v1468_v62 = vadd.f32 1.0, %v2041_v57  ;;  %v1782_v63 = vmul.f32 -1.442695, %v2488_v51  ;;  %v2500_v0 = vadd.f32 %v1965_v60, %v2433_v56  ;;  %v1288_v1 = vpop.f32.mrb[31].mxu0 }
 0x2c3   : > { %v2043_v2 = vpop.eup %2042  ;;  %2062 = vrcp.f32 %v1470_v58  ;;  %v1780_v3 = vmul.f32 -1.442695, %v2491_v59  ;;  %v2504_v5 = vadd.f32 %v2433_v56, %v1288_v1 }
 0x2c4   : > { %v2045_v7 = vpop.eup %2044  ;;  %v1561_v8 = vsel %vm1366_vm0, %v2043_v2, %v2436_v4  ;;  %2064 = vrcp.f32 %v1468_v62  ;;  %v1783_v11 = vmul.f32 -1.442695, %v2500_v0 }
 0x2c5   : > { %v2047_v12 = vpop.eup %2046  ;;  %1594 = vst.msk [vmem:[%s2496_s19 + $0x10] sm:$0xff] %vm1591_vm5, %v1561_v8  ;;  %v1559_v15 = vsel %vm1366_vm0, %v2045_v7, %v2439_v6  ;;  %2066 = vpow2.f32 %v1782_v63  ;;  %v1781_v16 = vmul.f32 -1.442695, %v2504_v5 }
 0x2c6   : > { %v2049_v18 = vpop.eup %2048  ;;  %1592 = vst.msk [vmem:[%s2496_s19] sm:$0xff] %vm1591_vm5, %v1559_v15  ;;  %v1562_v4 = vsel %vm1366_vm0, %v2047_v12, %v2443_v9  ;;  %2068 = vpow2.f32 %v1780_v3 }
 0x2c7   : > { %v2051_v21 = vpop.eup %2050  ;;  %1595 = vst.msk [vmem:[%s2496_s19 + $0x18] sm:$0xff] %vm1591_vm5, %v1562_v4  ;;  %v1560_v23 = vsel %vm1366_vm0, %v2049_v18, %v2447_v13  ;;  %2070 = vpow2.f32 %v1783_v11  ;;  %v1968_v6 = vpop.f32.mrb[32].mxu0 }
 0x2c8   : > { %v2053_v24 = vpop.eup %2052  ;;  %1593 = vst.msk [vmem:[%s2496_s19 + $0x8] sm:$0xff] %vm1591_vm5, %v1560_v23  ;;  %v1473_v26 = vadd.f32 1.0, %v2051_v21  ;;  %2072 = vpow2.f32 %v1781_v16  ;;  %v2529_v28 = vadd.f32 %v1968_v6, %v2433_v56  ;;  %v1301_v30 = vpop.f32.mrb[33].mxu0 }
 0x2c9   : > { %v2055_v9 = vpop.eup %2054  ;;  %v1471_v32 = vadd.f32 1.0, %v2053_v24  ;;  %v2532_v33 = vadd.f32 %v2433_v56, %v1301_v30  ;;  %v1969_v34 = vpop.f32.mrb[34].mxu0 }
 0x2ca   : > { %v2057_v35 = vpop.eup %2056  ;;  %2074 = vrcp.f32 %v1473_v26  ;;  %v1474_v13 = vadd.f32 1.0, %v2055_v9  ;;  %v1786_v36 = vmul.f32 -1.442695, %v2529_v28  ;;  %v2536_v37 = vadd.f32 %v1969_v34, %v2433_v56  ;;  %v1304_v38 = vpop.f32.mrb[35].mxu0 }
 0x2cb   : > { %v2059_v39 = vpop.eup %2058  ;;  %2076 = vrcp.f32 %v1471_v32  ;;  %v1472_v41 = vadd.f32 1.0, %v2057_v35  ;;  %v1784_v42 = vmul.f32 -1.442695, %v2532_v33  ;;  %v2540_v43 = vadd.f32 %v2433_v56, %v1304_v38 }
 0x2cc   : > { %v2061_v45 = vpop.eup %2060  ;;  %v1565_v46 = vsel %vm1366_vm0, %v2059_v39, %v2452_v20  ;;  %2078 = vrcp.f32 %v1474_v13  ;;  %v1787_v47 = vmul.f32 -1.442695, %v2536_v37 }
 0x2cd   : > { %v2063_v50 = vpop.eup %2062  ;;  %1598 = vst.msk [vmem:[%s2496_s19 + $0x30] sm:$0xff] %vm1591_vm5, %v1565_v46  ;;  %v1563_v52 = vsel %vm1366_vm0, %v2061_v45, %v2455_v22  ;;  %2080 = vrcp.f32 %v1472_v41  ;;  %v1785_v27 = vmul.f32 -1.442695, %v2540_v43 }
 0x2ce   : > { %v2065_v61 = vpop.eup %2064  ;;  %1596 = vst.msk [vmem:[%s2496_s19 + $0x20] sm:$0xff] %vm1591_vm5, %v1563_v52  ;;  %v1566_v20 = vsel %vm1366_vm0, %v2063_v50, %v2459_v25  ;;  %2082 = vpow2.f32 %v1786_v36 }
 0x2cf   : > { %v2067_v10 = vpop.eup %2066  ;;  %1599 = vst.msk [vmem:[%s2496_s19 + $0x38] sm:$0xff] %vm1591_vm5, %v1566_v20  ;;  %v1564_v14 = vsel %vm1366_vm0, %v2065_v61, %v2463_v29  ;;  %2084 = vpow2.f32 %v1784_v42  ;;  %v1972_v22 = vpop.f32.mrb[36].mxu0 }
 0x2d0   : > { %v2069_v17 = vpop.eup %2068  ;;  %1597 = vst.msk [vmem:[%s2496_s19 + $0x28] sm:$0xff] %vm1591_vm5, %v1564_v14  ;;  %v1477_v19 = vadd.f32 1.0, %v2067_v10  ;;  %2086 = vpow2.f32 %v1787_v47  ;;  %v2565_v31 = vadd.f32 %v1972_v22, %v2433_v56  ;;  %v1317_v48 = vpop.f32.mrb[37].mxu0 }
 0x2d1   : > { %v2071_v25 = vpop.eup %2070  ;;  %v1475_v55 = vadd.f32 1.0, %v2069_v17  ;;  %2088 = vpow2.f32 %v1785_v27  ;;  %v2568_v57 = vadd.f32 %v2433_v56, %v1317_v48  ;;  %v1973_v58 = vpop.f32.mrb[38].mxu0 }
 0x2d2   : > { %v2073_v60 = vpop.eup %2072  ;;  %2090 = vrcp.f32 %v1477_v19  ;;  %v1478_v29 = vadd.f32 1.0, %v2071_v25  ;;  %v1790_v62 = vmul.f32 -1.442695, %v2565_v31  ;;  %v2572_v63 = vadd.f32 %v1973_v58, %v2433_v56  ;;  %v1320_v1 = vpop.f32.mrb[39].mxu0 }
 0x2d3   : > { %2092 = vrcp.f32 %v1475_v55  ;;  %v1476_v2 = vadd.f32 1.0, %v2073_v60  ;;  %v1788_v3 = vmul.f32 -1.442695, %v2568_v57  ;;  %v2576_v7 = vadd.f32 %v2433_v56, %v1320_v1 }
 0x2d4   : > { %v2075_v8 = vpop.eup %2074  ;;  %2094 = vrcp.f32 %v1478_v29  ;;  %v1791_v11 = vmul.f32 -1.442695, %v2572_v63 }
 0x2d5   : > { %v2077_v12 = vpop.eup %2076  ;;  %v1569_v15 = vsel %vm1366_vm0, %v2075_v8, %v2468_v40  ;;  %2096 = vrcp.f32 %v1476_v2  ;;  %v1789_v16 = vmul.f32 -1.442695, %v2576_v7 }
 0x2d6   : > { %v2079_v18 = vpop.eup %2078  ;;  %1602 = vst.msk [vmem:[%s2496_s19 + $0x50] sm:$0xff] %vm1591_vm5, %v1569_v15  ;;  %v1567_v4 = vsel %vm1366_vm0, %v2077_v12, %v2471_v44  ;;  %2098 = vpow2.f32 %v1790_v62 }
 0x2d7   : > { %v2081_v21 = vpop.eup %2080  ;;  %1600 = vst.msk [vmem:[%s2496_s19 + $0x40] sm:$0xff] %vm1591_vm5, %v1567_v4  ;;  %v1570_v23 = vsel %vm1366_vm0, %v2079_v18, %v2475_v49  ;;  %2100 = vpow2.f32 %v1788_v3  ;;  %v1976_v40 = vpop.f32.mrb[40].mxu0 }
 0x2d8   : > { %v2083_v6 = vpop.eup %2082  ;;  %1603 = vst.msk [vmem:[%s2496_s19 + $0x58] sm:$0xff] %vm1591_vm5, %v1570_v23  ;;  %v1568_v24 = vsel %vm1366_vm0, %v2081_v21, %v2479_v53  ;;  %2102 = vpow2.f32 %v1791_v11  ;;  %v2599_v44 = vadd.f32 %v1976_v40, %v2433_v56  ;;  %v1333_v26 = vpop.f32.mrb[41].mxu0 }
 0x2d9   : > { %v2085_v30 = vpop.eup %2084  ;;  %1601 = vst.msk [vmem:[%s2496_s19 + $0x48] sm:$0xff] %vm1591_vm5, %v1568_v24  ;;  %v1481_v9 = vadd.f32 1.0, %v2083_v6  ;;  %2104 = vpow2.f32 %v1789_v16  ;;  %v2604_v49 = vadd.f32 %v2433_v56, %v1333_v26  ;;  %v1977_v32 = vpop.f32.mrb[42].mxu0 }
 0x2da   : > { %v2087_v34 = vpop.eup %2086  ;;  %v1479_v35 = vadd.f32 1.0, %v2085_v30  ;;  %v2607_v13 = vadd.f32 %v1977_v32, %v2433_v56  ;;  %v1336_v53 = vpop.f32.mrb[43].mxu0  ;;  %v1794_v39 = vmul.f32 -1.442695, %v2599_v44 }
 0x2db   : > { %v2089_v36 = vpop.eup %2088  ;;  %2106 = vrcp.f32 %v1481_v9  ;;  %v1482_v38 = vadd.f32 1.0, %v2087_v34  ;;  %v2611_v41 = vadd.f32 %v2433_v56, %v1336_v53  ;;  %v1792_v46 = vmul.f32 -1.442695, %v2604_v49 }
 0x2dc   : > { %v2091_v42 = vpop.eup %2090  ;;  %2108 = vrcp.f32 %v1479_v35  ;;  %v1480_v45 = vadd.f32 1.0, %v2089_v36  ;;  %v1795_v52 = vmul.f32 -1.442695, %v2607_v13 }
 0x2dd   : > { %v2093_v47 = vpop.eup %2092  ;;  %v1573_v50 = vsel %vm1366_vm0, %v2091_v42, %v2488_v51  ;;  %2110 = vrcp.f32 %v1482_v38  ;;  %v1793_v20 = vmul.f32 -1.442695, %v2611_v41 }
 0x2de   : > { %v2095_v27 = vpop.eup %2094  ;;  %1606 = vst.msk [vmem:[%s2496_s19 + $0x70] sm:$0xff] %vm1591_vm5, %v1573_v50  ;;  %v1571_v61 = vsel %vm1366_vm0, %v2093_v47, %v2491_v59  ;;  %2112 = vrcp.f32 %v1480_v45 }
 0x2df   : > { %v2097_v10 = vpop.eup %2096  ;;  %1604 = vst.msk [vmem:[%s2496_s19 + $0x60] sm:$0xff] %vm1591_vm5, %v1571_v61  ;;  %v1574_v51 = vsel %vm1366_vm0, %v2095_v27, %v2500_v0  ;;  %2114 = vpow2.f32 %v1794_v39  ;;  %v1980_v14 = vpop.f32.mrb[44].mxu0 }
 0x2e0   : > { %v2099_v22 = vpop.eup %2098  ;;  %1607 = vst.msk [vmem:[%s2496_s19 + $0x78] sm:$0xff] %vm1591_vm5, %v1574_v51  ;;  %v1572_v17 = vsel %vm1366_vm0, %v2097_v10, %v2504_v5  ;;  %2116 = vpow2.f32 %v1792_v46  ;;  %v2635_v59 = vadd.f32 %v1980_v14, %v2433_v56  ;;  %v1349_v19 = vpop.f32.mrb[45].mxu0 }
 0x2e1   : > { %v2101_v48 = vpop.eup %2100  ;;  %1605 = vst.msk [vmem:[%s2496_s19 + $0x68] sm:$0xff] %vm1591_vm5, %v1572_v17  ;;  %v1485_v25 = vadd.f32 1.0, %v2099_v22  ;;  %2118 = vpow2.f32 %v1795_v52  ;;  %v2640_v0 = vadd.f32 %v2433_v56, %v1349_v19  ;;  %v1981_v55 = vpop.f32.mrb[46].mxu0 }
 0x2e2   : > { %v2103_v58 = vpop.eup %2102  ;;  %v1483_v60 = vadd.f32 1.0, %v2101_v48  ;;  %2120 = vpow2.f32 %v1793_v20  ;;  %v2643_v29 = vadd.f32 %v1981_v55, %v2433_v56  ;;  %v1352_v5 = vpop.f32.mrb[47].mxu0  ;;  %v1798_v2 = vmul.f32 -1.442695, %v2635_v59 }
 0x2e3   : > { %v2105_v62 = vpop.eup %2104  ;;  %2122 = vrcp.f32 %v1485_v25  ;;  %v1486_v1 = vadd.f32 1.0, %v2103_v58  ;;  %v2647_v3 = vadd.f32 %v2433_v56, %v1352_v5  ;;  %v1796_v11 = vmul.f32 -1.442695, %v2640_v0 }
 0x2e4   : > { %2124 = vrcp.f32 %v1483_v60  ;;  %v1484_v8 = vadd.f32 1.0, %v2105_v62  ;;  %v1799_v15 = vmul.f32 -1.442695, %v2643_v29 }
 0x2e5   : > { %v2107_v12 = vpop.eup %2106  ;;  %2126 = vrcp.f32 %v1486_v1  ;;  %v1797_v56 = vmul.f32 -1.442695, %v2647_v3 }
 0x2e6   : > { %v2109_v16 = vpop.eup %2108  ;;  %v1577_v18 = vsel %vm1366_vm0, %v2107_v12, %v2529_v28  ;;  %2128 = vrcp.f32 %v1484_v8 }
 0x2e7   : > { %v2111_v4 = vpop.eup %2110  ;;  %1610 = vst.msk [vmem:[%s2496_s19 + $0x90] sm:$0xff] %vm1591_vm5, %v1577_v18  ;;  %v1575_v21 = vsel %vm1366_vm0, %v2109_v16, %v2532_v33  ;;  %2130 = vpow2.f32 %v1798_v2 }
 0x2e8   : > { %v2113_v23 = vpop.eup %2112  ;;  %1608 = vst.msk [vmem:[%s2496_s19 + $0x80] sm:$0xff] %vm1591_vm5, %v1575_v21  ;;  %v1578_v40 = vsel %vm1366_vm0, %v2111_v4, %v2536_v37  ;;  %2132 = vpow2.f32 %v1796_v11 }
 0x2e9   : > { %v2115_v28 = vpop.eup %2114  ;;  %1611 = vst.msk [vmem:[%s2496_s19 + $0x98] sm:$0xff] %vm1591_vm5, %v1578_v40  ;;  %v1576_v6 = vsel %vm1366_vm0, %v2113_v23, %v2540_v43  ;;  %2134 = vpow2.f32 %v1799_v15 }
 0x2ea   : > { %v2117_v24 = vpop.eup %2116  ;;  %1609 = vst.msk [vmem:[%s2496_s19 + $0x88] sm:$0xff] %vm1591_vm5, %v1576_v6  ;;  %v1489_v33 = vadd.f32 1.0, %v2115_v28  ;;  %2136 = vpow2.f32 %v1797_v56 }
 0x2eb   : > { %v2119_v26 = vpop.eup %2118  ;;  %v1487_v30 = vadd.f32 1.0, %v2117_v24 }
 0x2ec   : > { %v2121_v9 = vpop.eup %2120  ;;  %2138 = vrcp.f32 %v1489_v33  ;;  %v1490_v37 = vadd.f32 1.0, %v2119_v26 }
 0x2ed   : > { %v2123_v32 = vpop.eup %2122  ;;  %2140 = vrcp.f32 %v1487_v30  ;;  %v1488_v34 = vadd.f32 1.0, %v2121_v9 }
 0x2ee   : > { %v2125_v35 = vpop.eup %2124  ;;  %v1581_v43 = vsel %vm1366_vm0, %v2123_v32, %v2565_v31  ;;  %2142 = vrcp.f32 %v1490_v37 }
 0x2ef   : > { %v2127_v53 = vpop.eup %2126  ;;  %1614 = vst.msk [vmem:[%s2496_s19 + $0xb0] sm:$0xff] %vm1591_vm5, %v1581_v43  ;;  %v1579_v36 = vsel %vm1366_vm0, %v2125_v35, %v2568_v57  ;;  %2144 = vrcp.f32 %v1488_v34 }
 0x2f0   : > { %v2129_v38 = vpop.eup %2128  ;;  %1612 = vst.msk [vmem:[%s2496_s19 + $0xa0] sm:$0xff] %vm1591_vm5, %v1579_v36  ;;  %v1582_v39 = vsel %vm1366_vm0, %v2127_v53, %v2572_v63 }
 0x2f1   : > { %v2131_v42 = vpop.eup %2130  ;;  %1615 = vst.msk [vmem:[%s2496_s19 + $0xb8] sm:$0xff] %vm1591_vm5, %v1582_v39  ;;  %v1580_v31 = vsel %vm1366_vm0, %v2129_v38, %v2576_v7 }
 0x2f2   : > { %v2133_v45 = vpop.eup %2132  ;;  %1613 = vst.msk [vmem:[%s2496_s19 + $0xa8] sm:$0xff] %vm1591_vm5, %v1580_v31  ;;  %v1493_v57 = vadd.f32 1.0, %v2131_v42 }
 0x2f3   : > { %v2135_v46 = vpop.eup %2134  ;;  %v1491_v47 = vadd.f32 1.0, %v2133_v45 }
 0x2f4   : > { %v2137_v50 = vpop.eup %2136  ;;  %2146 = vrcp.f32 %v1493_v57  ;;  %v1494_v52 = vadd.f32 1.0, %v2135_v46 }
 0x2f5   : > { %2148 = vrcp.f32 %v1491_v47  ;;  %v1492_v63 = vadd.f32 1.0, %v2137_v50 }
 0x2f6   : > { %v2139_v27 = vpop.eup %2138  ;;  %2150 = vrcp.f32 %v1494_v52 }
 0x2f7   : > { %v2141_v61 = vpop.eup %2140  ;;  %v1585_v7 = vsel %vm1366_vm0, %v2139_v27, %v2599_v44  ;;  %2152 = vrcp.f32 %v1492_v63 }
 0x2f8   : > { %v2143_v20 = vpop.eup %2142  ;;  %1618 = vst.msk [vmem:[%s2496_s19 + $0xd0] sm:$0xff] %vm1591_vm5, %v1585_v7  ;;  %v1583_v10 = vsel %vm1366_vm0, %v2141_v61, %v2604_v49 }
 0x2f9   : > { %v2145_v51 = vpop.eup %2144  ;;  %1616 = vst.msk [vmem:[%s2496_s19 + $0xc0] sm:$0xff] %vm1591_vm5, %v1583_v10  ;;  %v1586_v14 = vsel %vm1366_vm0, %v2143_v20, %v2607_v13 }
 0x2fa   : > { %1619 = vst.msk [vmem:[%s2496_s19 + $0xd8] sm:$0xff] %vm1591_vm5, %v1586_v14  ;;  %v1584_v44 = vsel %vm1366_vm0, %v2145_v51, %v2611_v41 }
 0x2fb   : > { %1617 = vst.msk [vmem:[%s2496_s19 + $0xc8] sm:$0xff] %vm1591_vm5, %v1584_v44 }
 0x2fe   : > { %v2147_v22 = vpop.eup %2146 }
 0x2ff   : > { %v2149_v17 = vpop.eup %2148  ;;  %v1589_v49 = vsel %vm1366_vm0, %v2147_v22, %v2635_v59 }
 0x300   : > { %v2151_v19 = vpop.eup %2150  ;;  %1622 = vst.msk [vmem:[%s2496_s19 + $0xf0] sm:$0xff] %vm1591_vm5, %v1589_v49  ;;  %v1587_v13 = vsel %vm1366_vm0, %v2149_v17, %v2640_v0 }
 0x301   : > { %v2153_v48 = vpop.eup %2152  ;;  %1620 = vst.msk [vmem:[%s2496_s19 + $0xe0] sm:$0xff] %vm1591_vm5, %v1587_v13  ;;  %v1590_v41 = vsel %vm1366_vm0, %v2151_v19, %v2643_v29 }
 0x302   : > { %1623 = vst.msk [vmem:[%s2496_s19 + $0xf8] sm:$0xff] %vm1591_vm5, %v1590_v41  ;;  %v1588_v59 = vsel %vm1366_vm0, %v2153_v48, %v2647_v3 }
 0x303   : > { %1621 = vst.msk [vmem:[%s2496_s19 + $0xe8] sm:$0xff] %vm1591_vm5, %v1588_v59 }
 0x304 PF: > { %s17_s24 = sadd.s32 1, %s2160_s24  }
 0x305   : > { %p14_p4 = scmp.ge.s32.totalorder %s17_s24, 4  }
 0x307   :  { %16 = sbr.rel (!%p14_p4) target bundleno = 1 (0x1), region = 78 }

// kernel: cnn_3d_rec7_forward.6
= control target key start
LH: loop header
LB: loop body
LE: loop exit
PB: predicated region body
PF: predicated region fallthrough
CT: control target
= control target key end

     0   :  { %s7032_s18 = smov 0   ;;  %s7034_s19 = smov 0   ;;  %s8737_s0 = inlined_call_operand.vmem [shape: bf16[1,10,104,64], index: 0, kind: input, shape index: {}, may-alias: {0,1,2}]   ;;  %s8738_s1 = inlined_call_operand.vmem [shape: bf16[1,10,104,64], index: 1, kind: input, shape index: {}, may-alias: {0,1,2}]   ;;  %s8739_s2 = inlined_call_operand.vmem [shape: bf16[1,10,104,64], index: 2, kind: input, shape index: {}, may-alias: {0,1,2}]   ;;  %s8740_s3 = inlined_call_operand.vmem [shape: bf16[27,64,64], index: 3, kind: input, shape index: {}]   ;;  %s8741_s4 = inlined_call_operand.vmem [shape: f32[1,64], index: 4, kind: input, shape index: {}]   ;;  %s8742_s5 = inlined_call_operand.vmem [shape: bf16[1,8,80,64], index: 5, kind: output, shape index: {}]  }
   0x1   :  { %s7036_s20 = smov 0  }
   0x2 LB: > { %s24_s21 = sadd.s32 1, %s6994_s19  ;;  %p5194_p0 = scmp.ge.s32.totalorder %s6998_s20, 1  ;;  %s6998_s20 = sphi %s7036_s20, %s15_s20   ;;  %s6994_s19 = sphi %s7034_s19, %s8744_s19   ;;  %s6990_s18 = sphi %s7032_s18, %s8743_s18  }
   0x3   : > { %p25_p1 = scmp.ge.s32.totalorder %s24_s21, 8  ;;  %p247_p2 = scmp.lt.s32.totalorder %s6998_s20, 9 }
   0x5   : > { %s8746_s21 = smov (%p25_p1, %s24_s21), 0  ;;  %p248_p3 = pnand %p5194_p0, %p247_p2 }
   0x6   : > { %v6789_v0 = vld [vmem:[%s8740_s3 + $0x20] sm:$0xff] (!%p248_p3)   ;;  %v7000_v1 = vmov (!%p248_p3), 0.0   ;;  %v6790_v2 = vld [vmem:[%s8740_s3 + $0x28] sm:$0xff] (!%p248_p3)   ;;  %p305_p4 = scmp.lt.s32.totalorder (!%p248_p3), %s6990_s18, 9  ;;  %vm7001_vm0 = vmmov (!%p248_p3), 0   ;;  %v6791_v3 = vld [vmem:[%s8740_s3 + $0x30] sm:$0xff] (!%p248_p3)  }
   0x7   : > { %251 = sbr.rel (%p248_p3) target bundleno = 789 (0x315), region = 40  ;;  %6751 = vmatprep.subr.bf16.mxu1 (!%p248_p3), %v7000_v1  ;;  %5995 = vmatprep.subr.bf16.mxu0 (!%p248_p3), %v7000_v1  ;;  %v6792_v4 = vld [vmem:[%s8740_s3 + $0x38] sm:$0xff] (!%p248_p3)   ;;  %vm400_vm1 = vsmask.f32 (!%p248_p3), 7424  ;;  %vm469_vm2 = vcmask (!%p248_p3), 523264   ;;  %v6795_v21 = vld [vmem:[%s8740_s3] sm:$0xff] (!%p248_p3)  }
   0x8   : > { %6755 = vmatpush3.bf16.msra.mxu1 (!%p248_p3), %v6789_v0  ;;  %5996 = vmatpush3.bf16.msra.mxu0 (!%p248_p3), %v6789_v0  ;;  %v6800_v28 = vld [vmem:[%s8740_s3 + $0x40] sm:$0xff] (!%p248_p3)   ;;  %v6796_v31 = vld [vmem:[%s8740_s3 + $0x8] sm:$0xff] (!%p248_p3)   ;;  %v6801_v35 = vld [vmem:[%s8740_s3 + $0x10] sm:$0xff] (!%p248_p3)   ;;  %vm678_vm3 = vcmask (!%p248_p3), 1046528   ;;  %vm1006_vm4 = vsmask.f32 (!%p248_p3), 6400 }
   0x9   : > { %6752 = vmatprep.subr.bf16.mxu1 (!%p248_p3), %v7000_v1  ;;  %5997 = vmatprep.subr.bf16.mxu0 (!%p248_p3), %v7000_v1  ;;  %v6802_v36 = vld [vmem:[%s8740_s3 + $0x48] sm:$0xff] (!%p248_p3)   ;;  %v6804_v43 = vld [vmem:[%s8740_s3 + $0x50] sm:$0xff] (!%p248_p3)   ;;  %v6805_v47 = vld [vmem:[%s8740_s3 + $0x18] sm:$0xff] (!%p248_p3)   ;;  %vm1195_vm5 = vcmask (!%p248_p3), 1045504   ;;  %vm1712_vm6 = vcmask (!%p248_p3), 1044480   ;;  %s323_s13 = sadd.s32 (!%p248_p3), 2, %s6990_s18 }
   0xa   : > { %6011 = vmatprep.mubr.msk.bf16.mxu1 (!%p248_p3), %vm7001_vm0, %v7000_v1  ;;  %6003 = vmatprep.mubr.msk.bf16.mxu0 (!%p248_p3), %vm7001_vm0, %v7000_v1  ;;  %v6806_v48 = vld [vmem:[%s8740_s3 + $0x58] sm:$0xff] (!%p248_p3)   ;;  %v6809_v53 = vld [vmem:[%s8740_s3 + $0x80] sm:$0xff] (!%p248_p3)   ;;  %v6811_v55 = vld [vmem:[%s8740_s3 + $0x88] sm:$0xff] (!%p248_p3)   ;;  %vm1523_vm7 = vsmask.f32 (!%p248_p3), 5376  ;;  %p326_p6 = scmp.lt.s32.totalorder (!%p248_p3), %s323_s13, 9 }
   0xb   : > { %v6808_v56 = vld [vmem:[%s8740_s3 + $0x60] sm:$0xff] (!%p248_p3)   ;;  %v6813_v58 = vld [vmem:[%s8740_s3 + $0x90] sm:$0xff] (!%p248_p3)   ;;  %v6810_v59 = vld [vmem:[%s8740_s3 + $0x68] sm:$0xff] (!%p248_p3)   ;;  %p336_p7 = scmp.lt.s32.totalorder (!%p248_p3), %s6990_s18, 7  ;;  %vm5045_vm9 = vcmask (!%p248_p3), 519168  }
   0xc   : > { %6756 = vmatpush3.bf16.msra.mxu1 (!%p248_p3), %v6790_v2  ;;  %5998 = vmatpush3.bf16.msra.mxu0 (!%p248_p3), %v6790_v2  ;;  %v6815_v61 = vld [vmem:[%s8740_s3 + $0x98] sm:$0xff] (!%p248_p3)   ;;  %v6812_v62 = vld [vmem:[%s8740_s3 + $0x70] sm:$0xff] (!%p248_p3)  }
   0xd   : > { %6753 = vmatprep.subr.bf16.mxu1 (!%p248_p3), %v7000_v1  ;;  %5999 = vmatprep.subr.bf16.mxu0 (!%p248_p3), %v7000_v1  ;;  %v6814_v2 = vld [vmem:[%s8740_s3 + $0x78] sm:$0xff] (!%p248_p3)  }
   0xe   : > { %s306_s26 = scalar_select %p305_p4, %s6990_s18, 9 }
   0xf   : > { %s8750_s13 = smov (!%p326_p6, %s323_s13), 9 }
  0x10   : > { %s6759_s29 = smul.u32 52, %s306_s26  ;;  %6757 = vmatpush3.bf16.msra.mxu1 %v6791_v3  ;;  %6000 = vmatpush3.bf16.msra.mxu0 %v6791_v3  ;;  %s312_s26 = sadd.s32 1, %s6990_s18 }
  0x11   : > { %6754 = vmatprep.subr.bf16.mxu1 %v7000_v1  ;;  %6001 = vmatprep.subr.bf16.mxu0 %v7000_v1  ;;  %p315_p5 = scmp.lt.s32.totalorder %s312_s26, 9  ;;  %s6761_s14 = smul.u32 52, %s8750_s13 }
  0x12   : > { %s7079_s9 = scalar_lea.vmem %s8737_s0, %s6759_s29  ;;  %s8752_s18 = smov (!%p336_p7, %s6990_s18), 7 }
  0x13   : > { %v7082_v5 = vld [vmem:[%s7079_s9 + $0x10] sm:$0xff]   ;;  %v7085_v6 = vld [vmem:[%s7079_s9 + $0x18] sm:$0xff]   ;;  %v344_v7 = vld [vmem:[%s7079_s9] sm:$0xf]  ;;  %s8748_s26 = smov (!%p315_p5, %s312_s26), 9  ;;  %s6762_s12 = smul.u32 40, %s8752_s18 }
  0x14   : > { %v7091_v8 = vld [vmem:[%s7079_s9 + $0x4] sm:$0xf]  ;;  %v417_v9 = vshll.u32 %v7082_v5, 16  ;;  %v421_v10 = vshrl.u32 %v7082_v5, 16  ;;  %v425_v11 = vshll.u32 %v7085_v6, 16  ;;  %v7100_v13 = vld [vmem:[%s7079_s9 + $0x8] sm:$0xff]   ;;  %6758 = vmatpush3.bf16.msra.mxu1 %v6792_v4  ;;  %6002 = vmatpush3.bf16.msra.mxu0 %v6792_v4 }
  0x15   : > { %v7097_v12 = vcombine.low %v344_v7, %v7091_v8  ;;  %v7103_v14 = vld [vmem:[%s7079_s9 + $0x20] sm:$0xff]   ;;  %6023 = vmatprep.subr.bf16.mxu1 %v7000_v1  ;;  %v409_v19 = vshll.u32 %v7100_v13, 16  ;;  %6051 = vmatprep.subr.bf16.mxu0 %v7000_v1  ;;  %v429_v23 = vshrl.u32 %v7085_v6, 16  ;;  %v413_v29 = vshrl.u32 %v7100_v13, 16  ;;  %v7229_v4 = vld [vmem:[%s7079_s9 + $0x8] sm:$0xf]  ;;  %s8690_s15 = scalar_lea.vmem %s8742_s5, %s6762_s12 }
  0x16   : > { %v419_v15 = vrot.slane %v417_v9, 1  ;;  %v427_v16 = vrot.slane %v425_v11, 1  ;;  %v433_v24 = vshll.u32 %v7103_v14, 16  ;;  %v7122_v30 = vld [vmem:[%s7079_s9 + $0x28] ss:$0 sps:$4 sm:$0x11]  }
  0x17   : > { %v402_v17 = vshrl.u32 %v7097_v12, 16  ;;  %v404_v18 = vshll.u32 %v7097_v12, 16  ;;  %v411_v25 = vrot.slane %v409_v19, 1  ;;  %v665_v38 = vld [vmem:[%s7079_s9] sm:$0xe]  ;;  %v437_v40 = vshrl.u32 %v7103_v14, 16 }
  0x18   : > { %v423_v20 = vor.u32 %v421_v10, %v419_v15  ;;  %v431_v33 = vor.u32 %v429_v23, %v427_v16  ;;  %v435_v34 = vrot.slane %v433_v24, 1  ;;  %v441_v41 = vshll.u32 %v7122_v30, 16  ;;  %v812_v3 = vld [vmem:[%s7079_s9 + $0x4] sm:$0xe]  ;;  %v7235_v9 = vld [vmem:[%s7079_s9 + $0xc] sm:$0xff]   ;;  %s6760_s6 = smul.u32 52, %s8748_s26 }
  0x19   : > { %v406_v22 = vrot.slane %v404_v18, 1  ;;  %v415_v37 = vor.u32 %v413_v29, %v411_v25  ;;  %v5239_v44 = vcombine.low %v665_v38, %v7091_v8  ;;  %v680_v50 = vrot.slane %v7100_v13, 1 }
  0x1a   : > { %v428_v26 = vsel %vm400_vm1, %v423_v20, %v427_v16  ;;  %v436_v39 = vsel %vm400_vm1, %v431_v33, %v435_v34  ;;  %v439_v45 = vor.u32 %v437_v40, %v435_v34  ;;  %v443_v46 = vrot.slane %v441_v41, 1  ;;  %s7285_s10 = scalar_lea.vmem %s8738_s1, %s6760_s6 }
  0x1b   : > { %v407_v27 = vor.u32 %v406_v22, %v402_v17  ;;  %6012 = vmatmul.mubr.msk.bf16.vlgmr.msra.gmra.mrb[0].mxu1 %vm469_vm2, %v428_v26  ;;  %v420_v42 = vsel %vm400_vm1, %v415_v37, %v419_v15  ;;  %v679_v49 = vrot.slane %v5239_v44, 1  ;;  %v682_v54 = vrot.slane %v7082_v5, 1  ;;  %v7295_v37 = vld [vmem:[%s7079_s9 + $0x24] sm:$0xff]  }
  0x1c   : > { %6024 = vmatpush3.bf16.msra.mxu1 %v6795_v21  ;;  %6015 = vmatprep.mubr.msk.bf16.mxu1 %vm7001_vm0, %v7000_v1  ;;  %v444_v51 = vsel %vm400_vm1, %v439_v45, %v443_v46  ;;  %v684_v60 = vrot.slane %v7085_v6, 1  ;;  %v686_v0 = vrot.slane %v7103_v14, 1  ;;  %v5257_v7 = vcombine.low %v812_v3, %v7229_v4  ;;  %v7313_v46 = vld [vmem:[%s7079_s9 + $0x2c] ss:$0 sps:$4 sm:$0x33]  }
  0x1d   : > { %v412_v32 = vsel %vm400_vm1, %v407_v27, %v411_v25  ;;  %6025 = vmatprep.subr.bf16.mxu1 %v7000_v1  ;;  %v681_v52 = vsel %vm678_vm3, %v679_v49, %v680_v50  ;;  %v683_v57 = vsel %vm678_vm3, %v680_v50, %v682_v54  ;;  %v688_v10 = vrot.slane %v7122_v30, 1  ;;  %v7261_v25 = vld [vmem:[%s7079_s9 + $0x1c] sm:$0xff]   ;;  %v6824_v49 = vld [vmem:[%s8740_s3 + $0xb0] sm:$0xff]  }
  0x1e   : > { %6004 = vmatmul.mubr.msk.bf16.vlgmr.msra.gmra.mrb[0].mxu0 %vm469_vm2, %v412_v32  ;;  %v685_v63 = vsel %vm678_vm3, %v682_v54, %v684_v60  ;;  %v687_v8 = vsel %vm678_vm3, %v684_v60, %v686_v0  ;;  %v1008_v11 = vshrl.u32 %v5257_v7, 16  ;;  %v1019_v15 = vshll.u32 %v7235_v9, 16 }
  0x1f   : > { %6052 = vmatpush3.bf16.msra.mxu0 %v6800_v28  ;;  %6007 = vmatprep.mubr.msk.bf16.mxu0 %vm7001_vm0, %v7000_v1  ;;  %v689_v16 = vsel %vm678_vm3, %v686_v0, %v688_v10  ;;  %v860_v29 = vrot.slane %v5257_v7, 1  ;;  %v861_v30 = vrot.slane %v7235_v9, 1  ;;  %v1034_v32 = vshrl.u32 %v7261_v25, 16  ;;  %v7349_v0 = vld [vmem:[%s7079_s9 + $0xc] sm:$0xf]  ;;  %v7359_v10 = vld [vmem:[%s7079_s9 + $0x10] sm:$0xff]  }
  0x20   : > { %6053 = vmatprep.subr.bf16.mxu0 %v7000_v1  ;;  %6026 = vmatpush3.bf16.msra.mxu1 %v6796_v31  ;;  %v1010_v17 = vrot.slane %v1008_v11, 1  ;;  %v1021_v20 = vrot.slane %v1019_v15, 2  ;;  %v6822_v31 = vld [vmem:[%s8740_s3 + $0xc8] sm:$0xff]   ;;  %v1037_v33 = vshll.u32 %v7261_v25, 16  ;;  %v1046_v44 = vshll.u32 %v7295_v37, 16 }
  0x21   : > { %6027 = vmatprep.subr.bf16.mxu1 %v7000_v1  ;;  %v862_v34 = vsel %vm678_vm3, %v860_v29, %v861_v30  ;;  %v1055_v54 = vshll.u32 %v7313_v46, 16 }
  0x22   : > { %v1039_v40 = vrot.slane %v1037_v33, 2  ;;  %v6840_v33 = vld [vmem:[%s8740_s3 + $0xf0] sm:$0xff]  }
  0x23   : > { %6054 = vmatpush3.bf16.msra.mxu0 %v6802_v36  ;;  %6016 = vmatmul.mubr.msk.bf16.gmra.mrb[4].mxu1 %vm469_vm2, %v436_v39  ;;  %v6825_v36 = vld [vmem:[%s8740_s3 + $0xd0] sm:$0xff]   ;;  %v1036_v39 = vrot.slane %v1034_v32, 1 }
  0x24   : > { %6055 = vmatprep.subr.bf16.mxu0 %v7000_v1  ;;  %6028 = vmatpush3.bf16.msra.mxu1 %v6801_v35  ;;  %v6818_v35 = vld [vmem:[%s8740_s3 + $0xa0] sm:$0xff]  }
  0x25   : > { %6019 = vmatprep.mubr.msk.bf16.mxu1 %vm7001_vm0, %v7000_v1  ;;  %6029 = vmatprep.subr.bf16.mxu1 %v7000_v1  ;;  %v1040_v45 = vor.u32 %v1039_v40, %v1036_v39 }
  0x26   : > { %6008 = vmatmul.mubr.msk.bf16.gmra.mrb[4].mxu0 %vm469_vm2, %v420_v42  ;;  %v6821_v42 = vld [vmem:[%s8740_s3 + $0xa8] sm:$0xff]  }
  0x27   : > { %6056 = vmatpush3.bf16.msra.mxu0 %v6804_v43  ;;  %6059 = vmatprep.mubr.msk.bf16.mxu0 %vm7001_vm0, %v7000_v1  ;;  %v1043_v43 = vshrl.u32 %v7295_v37, 16 }
  0x28   : > { %6057 = vmatprep.subr.bf16.mxu0 %v7000_v1  ;;  %6030 = vmatpush3.bf16.msra.mxu1 %v6805_v47  ;;  %v6830_v47 = vld [vmem:[%s8740_s3 + $0xd8] sm:$0xff]  }
  0x29   : > { %6079 = vmatprep.subr.bf16.mxu1 %v7000_v1  ;;  %v1045_v50 = vrot.slane %v1043_v43, 1  ;;  %v1699_v43 = vld [vmem:[%s7079_s9 + $0x8] sm:$0x8] }
  0x2b   : > { %6058 = vmatpush3.bf16.msra.mxu0 %v6806_v48  ;;  %6020 = vmatmul.mubr.msk.bf16.gmra.mrb[8].mxu1 %vm469_vm2, %v444_v51  ;;  %v1048_v51 = vrot.slane %v1046_v44, 2 }
  0x2c   : > { %6107 = vmatprep.subr.bf16.mxu0 %v7000_v1  ;;  %6031 = vmatprep.mubr.msk.bf16.mxu1 %vm7001_vm0, %v7000_v1 }
  0x2e   : > { %6060 = vmatmul.mubr.msk.bf16.vlgmr.msra.gmra.mrb[8].mxu0 %vm469_vm2, %v681_v52 }
  0x2f   : > { %6108 = vmatpush3.bf16.msra.mxu0 %v6809_v53  ;;  %6063 = vmatprep.mubr.msk.bf16.mxu0 %vm7001_vm0, %v7000_v1  ;;  %v1052_v53 = vshrl.u32 %v7313_v46, 16 }
  0x30   : > { %6109 = vmatprep.subr.bf16.mxu0 %v7000_v1 }
  0x33   : > { %6110 = vmatpush3.bf16.msra.mxu0 %v6811_v55  ;;  %6032 = vmatmul.mubr.msk.bf16.vlgmr.msra.gmra.mrb[12].mxu1 %vm469_vm2, %v7097_v12  ;;  %v1011_v12 = vshll.u32 %v5257_v7, 16  ;;  %v865_v55 = vrot.slane %v7261_v25, 1 }
  0x34   : > { %6111 = vmatprep.subr.bf16.mxu0 %v7000_v1  ;;  %6080 = vmatpush3.bf16.msra.mxu1 %v6808_v56  ;;  %v6827_v56 = vld [vmem:[%s8740_s3 + $0xb8] sm:$0xff]  }
  0x35   : > { %6035 = vmatprep.mubr.msk.bf16.mxu1 %vm7001_vm0, %v7000_v1  ;;  %6081 = vmatprep.subr.bf16.mxu1 %v7000_v1  ;;  %v1013_v18 = vrot.slane %v1011_v12, 2 }
  0x36   : > { %6064 = vmatmul.mubr.msk.bf16.gmra.mrb[12].mxu0 %vm469_vm2, %v683_v57  ;;  %v1049_v57 = vor.u32 %v1048_v51, %v1045_v50  ;;  %v1533_v50 = vshrl.u32 %v7359_v10, 16  ;;  %v1536_v51 = vshll.u32 %v7359_v10, 16 }
  0x37   : > { %6067 = vmatprep.mubr.msk.bf16.mxu0 %vm7001_vm0, %v7000_v1  ;;  %6112 = vmatpush3.bf16.msra.mxu0 %v6813_v58  ;;  %v1014_v23 = vor.u32 %v1013_v18, %v1010_v17  ;;  %v1054_v58 = vrot.slane %v1052_v53, 1  ;;  %v1714_v53 = vrot.slane %v7359_v10, 3 }
  0x38   : > { %6113 = vmatprep.subr.bf16.mxu0 %v7000_v1  ;;  %6082 = vmatpush3.bf16.msra.mxu1 %v6810_v59  ;;  %v1057_v59 = vrot.slane %v1055_v54, 2 }
  0x39   : > { %6083 = vmatprep.subr.bf16.mxu1 %v7000_v1 }
  0x3a   : > { %v1058_v3 = vor.u32 %v1057_v59, %v1054_v58  ;;  %v6848_v59 = vld [vmem:[%s8740_s3 + $0x140] sm:$0xff]  }
  0x3b   : > { %6114 = vmatpush3.bf16.msra.mxu0 %v6815_v61  ;;  %6036 = vmatmul.mubr.msk.bf16.gmra.mrb[16].mxu1 %vm469_vm2, %v7100_v13  ;;  %v1016_v13 = vshrl.u32 %v7235_v9, 16  ;;  %v1050_v61 = vsel %vm1006_vm4, %v1040_v45, %v1049_v57 }
  0x3c   : > { %6163 = vmatprep.subr.bf16.mxu0 %v7000_v1  ;;  %6039 = vmatprep.mubr.msk.bf16.mxu1 %vm7001_vm0, %v7000_v1  ;;  %v1059_v11 = vsel %vm1006_vm4, %v1049_v57, %v1058_v3  ;;  %v1538_v57 = vrot.slane %v1536_v51, 3 }
  0x3d   : > { %6084 = vmatpush3.bf16.msra.mxu1 %v6812_v62  ;;  %v1018_v19 = vrot.slane %v1016_v13, 1  ;;  %v867_v62 = vrot.slane %v7295_v37, 1  ;;  %v1182_v13 = vld [vmem:[%s7079_s9 + $0x4] sm:$0xc] }
  0x3e   : > { %6068 = vmatmul.mubr.msk.bf16.gmra.mrb[16].mxu0 %vm469_vm2, %v685_v63  ;;  %6085 = vmatprep.subr.bf16.mxu1 %v7000_v1  ;;  %v1329_v63 = vld [vmem:[%s7079_s9 + $0x8] sm:$0xc]  ;;  %v5298_v17 = vcombine.low %v1182_v13, %v7229_v4  ;;  %v6834_v4 = vld [vmem:[%s8740_s3 + $0xe0] sm:$0xff]  }
  0x3f   : > { %6071 = vmatprep.mubr.msk.bf16.mxu0 %vm7001_vm0, %v7000_v1  ;;  %v1022_v24 = vor.u32 %v1021_v20, %v1018_v19  ;;  %v868_v7 = vsel %vm678_vm3, %v865_v55, %v867_v62  ;;  %v6835_v19 = vld [vmem:[%s8740_s3 + $0x100] sm:$0xff]   ;;  %v7377_v20 = vld [vmem:[%s7079_s9 + $0x18] sm:$0xff]  }
  0x41   : > { %6086 = vmatpush3.bf16.msra.mxu1 %v6814_v2  ;;  %v1023_v28 = vsel %vm1006_vm4, %v1014_v23, %v1022_v24  ;;  %v6828_v2 = vld [vmem:[%s7079_s9 + $0x2c] ss:$0 sps:$4 sm:$0x11]   ;;  %v1197_v23 = vrot.slane %v7235_v9, 2  ;;  %v7396_v9 = vld [vmem:[%s7079_s9 + $0x20] sm:$0xff]  }
  0x42   : > { %6135 = vmatprep.subr.bf16.mxu1 %v7000_v1  ;;  %v869_v12 = vrot.slane %v6828_v2, 1  ;;  %v6850_v2 = vld [vmem:[%s8740_s3 + $0x148] sm:$0xff]  }
  0x43   : > { %6040 = vmatmul.mubr.msk.bf16.gmra.mrb[20].mxu1 %vm469_vm2, %v7082_v5  ;;  %v7249_v5 = vld [vmem:[%s7079_s9 + $0x14] sm:$0xff]  }
  0x44   : > { %6043 = vmatprep.mubr.msk.bf16.mxu1 %vm7001_vm0, %v7000_v1  ;;  %v1025_v21 = vshrl.u32 %v7249_v5, 16  ;;  %v1028_v22 = vshll.u32 %v7249_v5, 16  ;;  %v863_v41 = vrot.slane %v7249_v5, 1  ;;  %v870_v18 = vsel %vm678_vm3, %v867_v62, %v869_v12  ;;  %v6852_v12 = vld [vmem:[%s8740_s3 + $0x150] sm:$0xff]  }
  0x45   : > { %v1542_v62 = vshrl.u32 %v7377_v20, 16 }
  0x46   : > { %6072 = vmatmul.mubr.msk.bf16.gmra.mrb[20].mxu0 %vm469_vm2, %v687_v8  ;;  %v1027_v26 = vrot.slane %v1025_v21, 1  ;;  %v1030_v27 = vrot.slane %v1028_v22, 2  ;;  %v864_v48 = vsel %vm678_vm3, %v861_v30, %v863_v41  ;;  %v866_v60 = vsel %vm678_vm3, %v863_v41, %v865_v55  ;;  %v6837_v30 = vld [vmem:[%s8740_s3 + $0xe8] sm:$0xff]  }
  0x47   : > { %6075 = vmatprep.mubr.msk.bf16.mxu0 %vm7001_vm0, %v7000_v1  ;;  %v7356_v8 = vcombine.low %v1329_v63, %v7349_v0  ;;  %v1196_v22 = vrot.slane %v5298_v17, 2  ;;  %v1203_v41 = vrot.slane %v7295_v37, 2  ;;  %v1205_v37 = vrot.slane %v7313_v46, 2 }
  0x48   : > { %v1545_v63 = vshll.u32 %v7377_v20, 16  ;;  %v1554_v17 = vshll.u32 %v7396_v9, 16 }
  0x49   : > { %v1377_v15 = vrot.slane %v7356_v8, 2  ;;  %v1206_v46 = vsel %vm1195_vm5, %v1203_v41, %v1205_v37 }
  0x4b   : > { %6044 = vmatmul.mubr.msk.bf16.gmra.mrb[24].mxu1 %vm469_vm2, %v7085_v6  ;;  %v6819_v6 = vld [vmem:[%s8740_s3 + $0xc0] sm:$0xff]  }
  0x4c   : > { %6047 = vmatprep.mubr.msk.bf16.mxu1 %vm7001_vm0, %v7000_v1 }
  0x4e   : > { %6076 = vmatmul.mubr.msk.bf16.gmra.mrb[24].mxu0 %vm469_vm2, %v689_v16  ;;  %v1378_v16 = vrot.slane %v7359_v10, 2  ;;  %v1547_v10 = vrot.slane %v1545_v63, 3 }
  0x4f   : > { %6115 = vmatprep.mubr.msk.bf16.mxu0 %vm7001_vm0, %v7000_v1 }
  0x50   : > { %v1379_v21 = vsel %vm1195_vm5, %v1377_v15, %v1378_v16  ;;  %v6849_v15 = vld [vmem:[%s8740_s3 + $0x128] sm:$0xff]  }
  0x53   : > { %6048 = vmatmul.mubr.msk.bf16.gmra.mrb[28].mxu1 %vm469_vm2, %v7103_v14  ;;  %v1031_v14 = vor.u32 %v1030_v27, %v1027_v26  ;;  %v1198_v26 = vsel %vm1195_vm5, %v1196_v22, %v1197_v23  ;;  %v1199_v27 = vrot.slane %v7249_v5, 2  ;;  %v1382_v5 = vrot.slane %v7396_v9, 2 }
  0x54   : > { %6087 = vmatprep.mubr.msk.bf16.mxu1 %vm7001_vm0, %v7000_v1  ;;  %v1556_v22 = vrot.slane %v1554_v17, 3  ;;  %v6871_v17 = vld [vmem:[%s8740_s3 + $0x178] sm:$0xff]  }
  0x55   : > { %v1032_v38 = vsel %vm1006_vm4, %v1022_v24, %v1031_v14  ;;  %v1041_v52 = vsel %vm1006_vm4, %v1031_v14, %v1040_v45  ;;  %v1380_v24 = vrot.slane %v7377_v20, 2  ;;  %v1200_v32 = vsel %vm1195_vm5, %v1197_v23, %v1199_v27  ;;  %v6851_v23 = vld [vmem:[%s8740_s3 + $0x130] sm:$0xff]  }
  0x56   : > { %6116 = vmatmul.mubr.msk.bf16.vlgmr.msra.gmra.mrb[28].mxu0 %vm469_vm2, %v1023_v28  ;;  %v6841_v28 = vld [vmem:[%s8740_s3 + $0x110] sm:$0xff]   ;;  %v1201_v14 = vrot.slane %v7261_v25, 2 }
  0x57   : > { %6164 = vmatpush3.bf16.msra.mxu0 %v6819_v6  ;;  %6119 = vmatprep.mubr.msk.bf16.mxu0 %vm7001_vm0, %v7000_v1  ;;  %v6838_v6 = vld [vmem:[%s8740_s3 + $0x108] sm:$0xff]   ;;  %v1381_v29 = vsel %vm1195_vm5, %v1378_v16, %v1380_v24  ;;  %v1551_v16 = vshrl.u32 %v7396_v9, 16 }
  0x58   : > { %6165 = vmatprep.subr.bf16.mxu0 %v7000_v1  ;;  %v1202_v39 = vsel %vm1195_vm5, %v1199_v27, %v1201_v14  ;;  %v1204_v44 = vsel %vm1195_vm5, %v1201_v14, %v1203_v41 }
  0x5b   : > { %6166 = vmatpush3.bf16.msra.mxu0 %v6822_v31  ;;  %6088 = vmatmul.mubr.msk.bf16.vlgmr.msra.gmra.mrb[32].mxu1 %vm469_vm2, %v862_v34  ;;  %v6845_v31 = vld [vmem:[%s8740_s3 + $0x118] sm:$0xff]   ;;  %v7427_v34 = vld [vmem:[%s7079_s9 + $0x28] sm:$0xff]  }
  0x5c   : > { %6167 = vmatprep.subr.bf16.mxu0 %v7000_v1  ;;  %6136 = vmatpush3.bf16.msra.mxu1 %v6818_v35  ;;  %v1383_v35 = vsel %vm1195_vm5, %v1380_v24, %v1382_v5  ;;  %v1384_v25 = vrot.slane %v7427_v34, 2  ;;  %v1720_v27 = vrot.slane %v7427_v34, 3 }
  0x5d   : > { %6091 = vmatprep.mubr.msk.bf16.mxu1 %vm7001_vm0, %v7000_v1  ;;  %6137 = vmatprep.subr.bf16.mxu1 %v7000_v1 }
  0x5e   : > { %6120 = vmatmul.mubr.msk.bf16.gmra.mrb[32].mxu0 %vm469_vm2, %v1032_v38  ;;  %v6844_v38 = vld [vmem:[%s7079_s9 + $0x30] ss:$0 sps:$4 sm:$0x33]   ;;  %v1385_v40 = vsel %vm1195_vm5, %v1382_v5, %v1384_v25 }
  0x5f   : > { %6123 = vmatprep.mubr.msk.bf16.mxu0 %vm7001_vm0, %v7000_v1  ;;  %6168 = vmatpush3.bf16.msra.mxu0 %v6825_v36  ;;  %v6843_v36 = vld [vmem:[%s8740_s3 + $0xf8] sm:$0xff]  }
  0x60   : > { %6169 = vmatprep.subr.bf16.mxu0 %v7000_v1  ;;  %6138 = vmatpush3.bf16.msra.mxu1 %v6821_v42  ;;  %v1386_v42 = vrot.slane %v6844_v38, 2  ;;  %v7549_v38 = vld [vmem:[%s7285_s10 + $0x8] sm:$0xff]  }
  0x61   : > { %6139 = vmatprep.subr.bf16.mxu1 %v7000_v1 }
  0x62   : > { %v1387_v45 = vsel %vm1195_vm5, %v1384_v25, %v1386_v42 }
  0x63   : > { %6170 = vmatpush3.bf16.msra.mxu0 %v6830_v47  ;;  %6092 = vmatmul.mubr.msk.bf16.gmra.mrb[36].mxu1 %vm469_vm2, %v864_v48  ;;  %v5357_v47 = vcombine.low %v1699_v43, %v7349_v0  ;;  %v1525_v48 = vshrl.u32 %v7356_v8, 16  ;;  %v1716_v0 = vrot.slane %v7377_v20, 3 }
  0x64   : > { %6219 = vmatprep.subr.bf16.mxu0 %v7000_v1  ;;  %6095 = vmatprep.mubr.msk.bf16.mxu1 %vm7001_vm0, %v7000_v1 }
  0x65   : > { %6140 = vmatpush3.bf16.msra.mxu1 %v6824_v49  ;;  %v1528_v49 = vshll.u32 %v7356_v8, 16  ;;  %v1527_v54 = vrot.slane %v1525_v48, 2  ;;  %v1544_v8 = vrot.slane %v1542_v62, 2 }
  0x66   : > { %6124 = vmatmul.mubr.msk.bf16.gmra.mrb[36].mxu0 %vm469_vm2, %v1041_v52  ;;  %6141 = vmatprep.subr.bf16.mxu1 %v7000_v1  ;;  %v1713_v52 = vrot.slane %v5357_v47, 3  ;;  %v2068_v47 = vshll.u32 %v7549_v38, 16 }
  0x67   : > { %6127 = vmatprep.mubr.msk.bf16.mxu0 %vm7001_vm0, %v7000_v1  ;;  %v1530_v55 = vrot.slane %v1528_v49, 3  ;;  %v1548_v13 = vor.u32 %v1547_v10, %v1544_v8  ;;  %v7605_v8 = vld [vmem:[%s7285_s10 + $0x20] sm:$0xff]   ;;  %v6874_v10 = vld [vmem:[%s8740_s3 + $0x198] sm:$0xff]  }
  0x68   : > { %v1715_v58 = vsel %vm1712_vm6, %v1713_v52, %v1714_v53  ;;  %v2070_v49 = vrot.slane %v2068_v47, 1  ;;  %v6879_v47 = vld [vmem:[%s8740_s3 + $0x1c0] sm:$0xff]  }
  0x69   : > { %6142 = vmatpush3.bf16.msra.mxu1 %v6827_v56  ;;  %v1535_v56 = vrot.slane %v1533_v50, 2  ;;  %v7561_v50 = vld [vmem:[%s7285_s10 + $0x10] sm:$0xff]  }
  0x6a   : > { %6191 = vmatprep.subr.bf16.mxu1 %v7000_v1  ;;  %v2080_v62 = vshrl.u32 %v7561_v50, 16 }
  0x6b   : > { %6096 = vmatmul.mubr.msk.bf16.gmra.mrb[40].mxu1 %vm469_vm2, %v866_v60  ;;  %v1531_v60 = vor.u32 %v1530_v55, %v1527_v54  ;;  %v2076_v54 = vshll.u32 %v7561_v50, 16 }
  0x6c   : > { %6099 = vmatprep.mubr.msk.bf16.mxu1 %vm7001_vm0, %v7000_v1 }
  0x6e   : > { %6128 = vmatmul.mubr.msk.bf16.gmra.mrb[40].mxu0 %vm469_vm2, %v1050_v61  ;;  %v1539_v61 = vor.u32 %v1538_v57, %v1535_v56  ;;  %v2078_v56 = vrot.slane %v2076_v54, 1  ;;  %v6864_v57 = vld [vmem:[%s8740_s3 + $0x188] sm:$0xff]   ;;  %v6878_v54 = vld [vmem:[%s8740_s3 + $0x1a0] sm:$0xff]  }
  0x6f   : > { %6131 = vmatprep.mubr.msk.bf16.mxu0 %vm7001_vm0, %v7000_v1 }
  0x70   : > { %v1540_v3 = vsel %vm1523_vm7, %v1531_v60, %v1539_v61  ;;  %v1549_v20 = vsel %vm1523_vm7, %v1539_v61, %v1548_v13  ;;  %v6859_v60 = vld [vmem:[%s8740_s3 + $0x160] sm:$0xff]  }
  0x73   : > { %6100 = vmatmul.mubr.msk.bf16.gmra.mrb[44].mxu1 %vm469_vm2, %v868_v7  ;;  %v6847_v7 = vld [vmem:[%s8740_s3 + $0x120] sm:$0xff]  }
  0x74   : > { %6103 = vmatprep.mubr.msk.bf16.mxu1 %vm7001_vm0, %v7000_v1 }
  0x76   : > { %6132 = vmatmul.mubr.msk.bf16.gmra.mrb[44].mxu0 %vm469_vm2, %v1059_v11  ;;  %v1717_v11 = vsel %vm1712_vm6, %v1714_v53, %v1716_v0  ;;  %v6860_v53 = vld [vmem:[%s8740_s3 + $0x180] sm:$0xff]  }
  0x77   : > { %6171 = vmatprep.mubr.msk.bf16.mxu0 %vm7001_vm0, %v7000_v1 }
  0x7b   : > { %6104 = vmatmul.mubr.msk.bf16.gmra.mrb[48].mxu1 %vm469_vm2, %v870_v18  ;;  %v1718_v18 = vrot.slane %v7396_v9, 3  ;;  %v1563_v9 = vshll.u32 %v7427_v34, 16 }
  0x7c   : > { %6143 = vmatprep.mubr.msk.bf16.mxu1 %vm7001_vm0, %v7000_v1 }
  0x7e   : > { %6172 = vmatmul.mubr.msk.bf16.vlgmr.msra.gmra.mrb[48].mxu0 %vm469_vm2, %v1379_v21  ;;  %v1553_v21 = vrot.slane %v1551_v16, 2  ;;  %v2092_v16 = vshll.u32 %v7605_v8, 16 }
  0x7f   : > { %6220 = vmatpush3.bf16.msra.mxu0 %v6835_v19  ;;  %6175 = vmatprep.mubr.msk.bf16.mxu0 %vm7001_vm0, %v7000_v1  ;;  %v6855_v19 = vld [vmem:[%s8740_s3 + $0x158] sm:$0xff]  }
  0x80   : > { %6221 = vmatprep.subr.bf16.mxu0 %v7000_v1  ;;  %v1557_v24 = vor.u32 %v1556_v22, %v1553_v21  ;;  %v6865_v21 = vld [vmem:[%s7285_s10 + $0x10] sm:$0xff]  }
  0x83   : > { %6222 = vmatpush3.bf16.msra.mxu0 %v6838_v6  ;;  %6144 = vmatmul.mubr.msk.bf16.vlgmr.msra.gmra.mrb[52].mxu1 %vm469_vm2, %v1198_v26  ;;  %v1560_v6 = vshrl.u32 %v7427_v34, 16  ;;  %v6853_v26 = vld [vmem:[%s8740_s3 + $0x138] sm:$0xff]  }
  0x84   : > { %6223 = vmatprep.subr.bf16.mxu0 %v7000_v1  ;;  %6192 = vmatpush3.bf16.msra.mxu1 %v6834_v4  ;;  %v1719_v4 = vsel %vm1712_vm6, %v1716_v0, %v1718_v18  ;;  %v6868_v0 = vld [vmem:[%s8740_s3 + $0x190] sm:$0xff]  }
  0x85   : > { %6147 = vmatprep.mubr.msk.bf16.mxu1 %vm7001_vm0, %v7000_v1  ;;  %6193 = vmatprep.subr.bf16.mxu1 %v7000_v1  ;;  %v1562_v5 = vrot.slane %v1560_v6, 2 }
  0x86   : > { %6176 = vmatmul.mubr.msk.bf16.gmra.mrb[52].mxu0 %vm469_vm2, %v1381_v29  ;;  %v7535_v29 = vld [vmem:[%s7285_s10 + $0x4] sm:$0xf] }
  0x87   : > { %6179 = vmatprep.mubr.msk.bf16.mxu0 %vm7001_vm0, %v7000_v1  ;;  %6224 = vmatpush3.bf16.msra.mxu0 %v6841_v28  ;;  %v2012_v28 = vld [vmem:[%s7285_s10] sm:$0xf] }
  0x88   : > { %6225 = vmatprep.subr.bf16.mxu0 %v7000_v1  ;;  %6194 = vmatpush3.bf16.msra.mxu1 %v6837_v30  ;;  %v1558_v30 = vsel %vm1523_vm7, %v1548_v13, %v1557_v24  ;;  %v5397_v14 = vcombine.low %v2012_v28, %v7535_v29 }
  0x89   : > { %6195 = vmatprep.subr.bf16.mxu1 %v7000_v1 }
  0x8b   : > { %6226 = vmatpush3.bf16.msra.mxu0 %v6845_v31  ;;  %6148 = vmatmul.mubr.msk.bf16.gmra.mrb[56].mxu1 %vm469_vm2, %v1200_v32  ;;  %v1565_v31 = vrot.slane %v1563_v9, 3  ;;  %v6854_v32 = vld [vmem:[%s7079_s9 + $0x30] ss:$0 sps:$4 sm:$0x77]   ;;  %v6869_v9 = vld [vmem:[%s7285_s10 + $0x18] sm:$0xff]   ;;  %s7676_s9 = scalar_lea.vmem %s8739_s2, %s6761_s14 }
  0x8c   : > { %6275 = vmatprep.subr.bf16.mxu0 %v7000_v1  ;;  %6151 = vmatprep.mubr.msk.bf16.mxu1 %vm7001_vm0, %v7000_v1  ;;  %v1722_v25 = vrot.slane %v6854_v32, 3 }
  0x8d   : > { %6196 = vmatpush3.bf16.msra.mxu1 %v6840_v33  ;;  %v1721_v33 = vsel %vm1712_vm6, %v1718_v18, %v1720_v27  ;;  %v1566_v34 = vor.u32 %v1565_v31, %v1562_v5  ;;  %v7656_v31 = vld [vmem:[%s7285_s10 + $0xc] sm:$0xff]  }
  0x8e   : > { %6180 = vmatmul.mubr.msk.bf16.gmra.mrb[56].mxu0 %vm469_vm2, %v1383_v35  ;;  %6197 = vmatprep.subr.bf16.mxu1 %v7000_v1  ;;  %v1569_v35 = vshrl.u32 %v6854_v32, 16  ;;  %v1723_v43 = vsel %vm1712_vm6, %v1720_v27, %v1722_v25  ;;  %v7647_v27 = vld [vmem:[%s7285_s10 + $0x8] sm:$0xf]  ;;  %v7671_v25 = vld [vmem:[%s7285_s10 + $0x14] sm:$0xff]  }
  0x8f   : > { %6183 = vmatprep.mubr.msk.bf16.mxu0 %vm7001_vm0, %v7000_v1 }
  0x90   : > { %v1571_v41 = vrot.slane %v1569_v35, 2 }
  0x91   : > { %6198 = vmatpush3.bf16.msra.mxu1 %v6843_v36  ;;  %v1572_v36 = vshll.u32 %v6854_v32, 16 }
  0x92   : > { %6247 = vmatprep.subr.bf16.mxu1 %v7000_v1 }
  0x93   : > { %6152 = vmatmul.mubr.msk.bf16.gmra.mrb[60].mxu1 %vm469_vm2, %v1202_v39  ;;  %v2063_v39 = vshll.u32 %v5397_v14, 16  ;;  %v1574_v42 = vrot.slane %v1572_v36, 3  ;;  %v6872_v36 = vld [vmem:[%s7285_s10 + $0x20] sm:$0xff]  }
  0x94   : > { %6155 = vmatprep.mubr.msk.bf16.mxu1 %vm7001_vm0, %v7000_v1 }
  0x95   : > { %v1575_v37 = vor.u32 %v1574_v42, %v1571_v41 }
  0x96   : > { %6184 = vmatmul.mubr.msk.bf16.gmra.mrb[60].mxu0 %vm469_vm2, %v1385_v40  ;;  %v1567_v40 = vsel %vm1523_vm7, %v1557_v24, %v1566_v34 }
  0x97   : > { %6187 = vmatprep.mubr.msk.bf16.mxu0 %vm7001_vm0, %v7000_v1  ;;  %v1576_v51 = vsel %vm1523_vm7, %v1566_v34, %v1575_v37  ;;  %v2421_v34 = vrot.slane %v7656_v31, 1 }
  0x9b   : > { %6156 = vmatmul.mubr.msk.bf16.gmra.mrb[64].mxu1 %vm469_vm2, %v1204_v44  ;;  %v2061_v44 = vshrl.u32 %v5397_v14, 16 }
  0x9c   : > { %6159 = vmatprep.mubr.msk.bf16.mxu1 %vm7001_vm0, %v7000_v1 }
  0x9e   : > { %6188 = vmatmul.mubr.msk.bf16.gmra.mrb[64].mxu0 %vm469_vm2, %v1387_v45  ;;  %v2065_v45 = vrot.slane %v2063_v39, 1 }
  0x9f   : > { %6227 = vmatprep.mubr.msk.bf16.mxu0 %vm7001_vm0, %v7000_v1 }
  0xa0   : > { %v2066_v48 = vor.u32 %v2065_v45, %v2061_v44 }
  0xa2   : > { %v2071_v52 = vsel %vm400_vm1, %v2066_v48, %v2070_v49  ;;  %v2423_v48 = vrot.slane %v7671_v25, 1 }
  0xa3   : > { %6160 = vmatmul.mubr.msk.bf16.gmra.mrb[68].mxu1 %vm469_vm2, %v1206_v46  ;;  %v2072_v46 = vshrl.u32 %v7549_v38, 16 }
  0xa4   : > { %6199 = vmatprep.mubr.msk.bf16.mxu1 %vm7001_vm0, %v7000_v1 }
  0xa5   : > { %v2074_v55 = vor.u32 %v2072_v46, %v2070_v49 }
  0xa6   : > { %6228 = vmatmul.mubr.msk.bf16.vlgmr.msra.gmra.mrb[68].mxu0 %vm469_vm2, %v1715_v58  ;;  %v7580_v58 = vld [vmem:[%s7285_s10 + $0x18] sm:$0xff]  }
  0xa7   : > { %6276 = vmatpush3.bf16.msra.mxu0 %v6848_v59  ;;  %6231 = vmatprep.mubr.msk.bf16.mxu0 %vm7001_vm0, %v7000_v1  ;;  %v6856_v59 = vld [vmem:[%s7285_s10] sm:$0xff]   ;;  %v2079_v61 = vsel %vm400_vm1, %v2074_v55, %v2078_v56  ;;  %v2084_v63 = vshll.u32 %v7580_v58, 16 }
  0xa8   : > { %6277 = vmatprep.subr.bf16.mxu0 %v7000_v1 }
  0xab   : > { %6278 = vmatpush3.bf16.msra.mxu0 %v6850_v2  ;;  %6200 = vmatmul.mubr.msk.bf16.vlgmr.msra.gmra.mrb[72].mxu1 %vm469_vm2, %v1540_v3  ;;  %v6863_v2 = vld [vmem:[%s8740_s3 + $0x168] sm:$0xff]   ;;  %v2082_v3 = vor.u32 %v2080_v62, %v2078_v56 }
  0xac   : > { %6279 = vmatprep.subr.bf16.mxu0 %v7000_v1  ;;  %6248 = vmatpush3.bf16.msra.mxu1 %v6847_v7  ;;  %v2086_v7 = vrot.slane %v2084_v63, 1  ;;  %v6881_v62 = vld [vmem:[%s8740_s3 + $0x1a8] sm:$0xff]   ;;  %v6885_v63 = vld [vmem:[%s8740_s3 + $0x1d0] sm:$0xff]  }
  0xad   : > { %6203 = vmatprep.mubr.msk.bf16.mxu1 %vm7001_vm0, %v7000_v1  ;;  %6249 = vmatprep.subr.bf16.mxu1 %v7000_v1 }
  0xae   : > { %6232 = vmatmul.mubr.msk.bf16.gmra.mrb[72].mxu0 %vm469_vm2, %v1717_v11  ;;  %v6861_v11 = vld [vmem:[%s7285_s10 + $0x8] sm:$0xff]   ;;  %v2087_v13 = vsel %vm400_vm1, %v2082_v3, %v2086_v7  ;;  %v6889_v3 = vld [vmem:[%s8740_s3 + $0x1d8] sm:$0xff]  }
  0xaf   : > { %6235 = vmatprep.mubr.msk.bf16.mxu0 %vm7001_vm0, %v7000_v1  ;;  %6280 = vmatpush3.bf16.msra.mxu0 %v6852_v12  ;;  %v6867_v12 = vld [vmem:[%s8740_s3 + $0x170] sm:$0xff]  }
  0xb0   : > { %6281 = vmatprep.subr.bf16.mxu0 %v7000_v1  ;;  %6250 = vmatpush3.bf16.msra.mxu1 %v6849_v15  ;;  %v2088_v15 = vshrl.u32 %v7580_v58, 16 }
  0xb1   : > { %6251 = vmatprep.subr.bf16.mxu1 %v7000_v1 }
  0xb2   : > { %v2090_v18 = vor.u32 %v2088_v15, %v2086_v7 }
  0xb3   : > { %6282 = vmatpush3.bf16.msra.mxu0 %v6855_v19  ;;  %6204 = vmatmul.mubr.msk.bf16.gmra.mrb[76].mxu1 %vm469_vm2, %v1549_v20  ;;  %v2094_v19 = vrot.slane %v2092_v16, 1  ;;  %v7631_v20 = vld [vmem:[%s7285_s10 + $0x28] ss:$0 sps:$4 sm:$0x11]  }
  0xb4   : > { %6331 = vmatprep.subr.bf16.mxu0 %v7000_v1  ;;  %6207 = vmatprep.mubr.msk.bf16.mxu1 %vm7001_vm0, %v7000_v1 }
  0xb5   : > { %6252 = vmatpush3.bf16.msra.mxu1 %v6851_v23  ;;  %v2095_v22 = vsel %vm400_vm1, %v2090_v18, %v2094_v19  ;;  %v2096_v23 = vshrl.u32 %v7605_v8, 16 }
  0xb6   : > { %6236 = vmatmul.mubr.msk.bf16.gmra.mrb[76].mxu0 %vm469_vm2, %v1719_v4  ;;  %6253 = vmatprep.subr.bf16.mxu1 %v7000_v1  ;;  %v2100_v4 = vshll.u32 %v7631_v20, 16 }
  0xb7   : > { %6239 = vmatprep.mubr.msk.bf16.mxu0 %vm7001_vm0, %v7000_v1  ;;  %v2098_v24 = vor.u32 %v2096_v23, %v2094_v19  ;;  %v7747_v19 = vld [vmem:[%s7285_s10 + $0x24] sm:$0xff]   ;;  %v6887_v23 = vld [vmem:[%s8740_s3 + $0x1b8] sm:$0xff]  }
  0xb8   : > { %v2102_v6 = vrot.slane %v2100_v4, 1 }
  0xb9   : > { %6254 = vmatpush3.bf16.msra.mxu1 %v6853_v26  ;;  %v2372_v26 = vld [vmem:[%s7285_s10 + $0x4] sm:$0xe] }
  0xba   : > { %6303 = vmatprep.subr.bf16.mxu1 %v7000_v1  ;;  %v2103_v28 = vsel %vm400_vm1, %v2098_v24, %v2102_v6  ;;  %v7653_v5 = vcombine.low %v2372_v26, %v7647_v27  ;;  %v2427_v24 = vrot.slane %v7747_v19, 1 }
  0xbb   : > { %6208 = vmatmul.mubr.msk.bf16.gmra.mrb[80].mxu1 %vm469_vm2, %v1558_v30  ;;  %v2226_v30 = vld [vmem:[%s7285_s10] sm:$0xe] }
  0xbc   : > { %6211 = vmatprep.mubr.msk.bf16.mxu1 %vm7001_vm0, %v7000_v1  ;;  %v5420_v32 = vcombine.low %v2226_v30, %v7535_v29  ;;  %v2420_v14 = vrot.slane %v7653_v5, 1 }
  0xbe   : > { %6240 = vmatmul.mubr.msk.bf16.gmra.mrb[80].mxu0 %vm469_vm2, %v1721_v33  ;;  %v2239_v42 = vrot.slane %v5420_v32, 1  ;;  %v2422_v45 = vsel %vm678_vm3, %v2420_v14, %v2421_v34 }
  0xbf   : > { %6243 = vmatprep.mubr.msk.bf16.mxu0 %vm7001_vm0, %v7000_v1 }
  0xc3   : > { %6212 = vmatmul.mubr.msk.bf16.gmra.mrb[84].mxu1 %vm469_vm2, %v1567_v40 }
  0xc4   : > { %6215 = vmatprep.mubr.msk.bf16.mxu1 %vm7001_vm0, %v7000_v1 }
  0xc6   : > { %6244 = vmatmul.mubr.msk.bf16.gmra.mrb[84].mxu0 %vm469_vm2, %v1723_v43  ;;  %v2240_v43 = vrot.slane %v7549_v38, 1  ;;  %v6882_v38 = vld [vmem:[%s8740_s3 + $0x1c8] sm:$0xff]  }
  0xc7   : > { %6283 = vmatprep.mubr.msk.bf16.mxu0 %vm7001_vm0, %v7000_v1 }
  0xc8   : > { %v2241_v46 = vsel %vm678_vm3, %v2239_v42, %v2240_v43  ;;  %v2246_v42 = vrot.slane %v7605_v8, 1 }
  0xcb   : > { %6216 = vmatmul.mubr.msk.bf16.gmra.mrb[88].mxu1 %vm469_vm2, %v1576_v51 }
  0xcc   : > { %6255 = vmatprep.mubr.msk.bf16.mxu1 %vm7001_vm0, %v7000_v1 }
  0xce   : > { %6284 = vmatmul.mubr.msk.bf16.vlgmr.msra.gmra.mrb[88].mxu0 %vm469_vm2, %v2071_v52  ;;  %v7703_v52 = vld [vmem:[%s7285_s10 + $0x1c] sm:$0xff]  }
  0xcf   : > { %6332 = vmatpush3.bf16.msra.mxu0 %v6860_v53  ;;  %6287 = vmatprep.mubr.msk.bf16.mxu0 %vm7001_vm0, %v7000_v1 }
  0xd0   : > { %6333 = vmatprep.subr.bf16.mxu0 %v7000_v1 }
  0xd3   : > { %6334 = vmatpush3.bf16.msra.mxu0 %v6864_v57  ;;  %6256 = vmatmul.mubr.msk.bf16.vlgmr.msra.gmra.mrb[92].mxu1 %vm469_vm2, %v6856_v59  ;;  %v2242_v59 = vrot.slane %v7561_v50, 1 }
  0xd4   : > { %6335 = vmatprep.subr.bf16.mxu0 %v7000_v1  ;;  %6304 = vmatpush3.bf16.msra.mxu1 %v6859_v60 }
  0xd5   : > { %6259 = vmatprep.mubr.msk.bf16.mxu1 %vm7001_vm0, %v7000_v1  ;;  %6305 = vmatprep.subr.bf16.mxu1 %v7000_v1 }
  0xd6   : > { %6288 = vmatmul.mubr.msk.bf16.gmra.mrb[92].mxu0 %vm469_vm2, %v2079_v61  ;;  %v2424_v61 = vsel %vm678_vm3, %v2421_v34, %v2423_v48 }
  0xd7   : > { %6291 = vmatprep.mubr.msk.bf16.mxu0 %vm7001_vm0, %v7000_v1  ;;  %6336 = vmatpush3.bf16.msra.mxu0 %v6868_v0 }
  0xd8   : > { %6337 = vmatprep.subr.bf16.mxu0 %v7000_v1  ;;  %6306 = vmatpush3.bf16.msra.mxu1 %v6863_v2  ;;  %v2425_v2 = vrot.slane %v7703_v52, 1 }
  0xd9   : > { %6307 = vmatprep.subr.bf16.mxu1 %v7000_v1 }
  0xda   : > { %v2426_v18 = vsel %vm678_vm3, %v2423_v48, %v2425_v2 }
  0xdb   : > { %6338 = vmatpush3.bf16.msra.mxu0 %v6874_v10  ;;  %6260 = vmatmul.mubr.msk.bf16.gmra.mrb[96].mxu1 %vm469_vm2, %v6861_v11  ;;  %v2243_v11 = vsel %vm678_vm3, %v2240_v43, %v2242_v59 }
  0xdc   : > { %6387 = vmatprep.subr.bf16.mxu0 %v7000_v1  ;;  %6263 = vmatprep.mubr.msk.bf16.mxu1 %vm7001_vm0, %v7000_v1 }
  0xdd   : > { %6308 = vmatpush3.bf16.msra.mxu1 %v6867_v12 }
  0xde   : > { %6292 = vmatmul.mubr.msk.bf16.gmra.mrb[96].mxu0 %vm469_vm2, %v2087_v13  ;;  %6309 = vmatprep.subr.bf16.mxu1 %v7000_v1  ;;  %v6884_v13 = vld [vmem:[%s8740_s3 + $0x1b0] sm:$0xff]  }
  0xdf   : > { %6295 = vmatprep.mubr.msk.bf16.mxu0 %vm7001_vm0, %v7000_v1 }
  0xe1   : > { %6310 = vmatpush3.bf16.msra.mxu1 %v6871_v17 }
  0xe2   : > { %6359 = vmatprep.subr.bf16.mxu1 %v7000_v1 }
  0xe3   : > { %6264 = vmatmul.mubr.msk.bf16.gmra.mrb[100].mxu1 %vm469_vm2, %v6865_v21 }
  0xe4   : > { %6267 = vmatprep.mubr.msk.bf16.mxu1 %vm7001_vm0, %v7000_v1 }
  0xe6   : > { %6296 = vmatmul.mubr.msk.bf16.gmra.mrb[100].mxu0 %vm469_vm2, %v2095_v22  ;;  %v2244_v22 = vrot.slane %v7580_v58, 1 }
  0xe7   : > { %6299 = vmatprep.mubr.msk.bf16.mxu0 %vm7001_vm0, %v7000_v1 }
  0xe8   : > { %v2245_v26 = vsel %vm678_vm3, %v2242_v59, %v2244_v22 }
  0xeb   : > { %6268 = vmatmul.mubr.msk.bf16.gmra.mrb[104].mxu1 %vm469_vm2, %v6869_v9 }
  0xec   : > { %6271 = vmatprep.mubr.msk.bf16.mxu1 %vm7001_vm0, %v7000_v1 }
  0xee   : > { %6300 = vmatmul.mubr.msk.bf16.gmra.mrb[104].mxu0 %vm469_vm2, %v2103_v28  ;;  %v7663_v33 = vpop.f32.mrb[0].mxu1 }
  0xef   : > { %6339 = vmatprep.mubr.msk.bf16.mxu0 %vm7001_vm0, %v7000_v1  ;;  %v6013_v35 = vpop.f32.mrb[1].mxu1 }
  0xf0   : > { %v7678_v29 = vpop.f32.mrb[2].mxu1 }
  0xf1   : > { %v7680_v39 = vpop.f32.mrb[0].mxu0  ;;  %v6014_v40 = vpop.f32.mrb[3].mxu1 }
  0xf2   : > { %v6005_v41 = vpop.f32.mrb[1].mxu0  ;;  %v6888_v40 = vld [vmem:[%s7285_s10 + $0x2c] ss:$0 sps:$4 sm:$0x11]  }
  0xf3   : > { %v7683_v44 = vpop.f32.mrb[2].mxu0  ;;  %6272 = vmatmul.mubr.msk.bf16.gmra.mrb[108].mxu1 %vm469_vm2, %v6872_v36  ;;  %v2428_v36 = vsel %vm678_vm3, %v2425_v2, %v2427_v24  ;;  %v2575_v2 = vshrl.u32 %v7656_v31, 16 }
  0xf4   : > { %v6006_v37 = vpop.f32.mrb[3].mxu0  ;;  %6311 = vmatprep.mubr.msk.bf16.mxu1 %vm7001_vm0, %v7000_v1 }
  0xf5   : > { %v2741_v37 = vld [vmem:[%s7285_s10 + $0x4] sm:$0xc] }
  0xf6   : > { %6340 = vmatmul.mubr.msk.bf16.vlgmr.msra.gmra.mrb[108].mxu0 %vm469_vm2, %v2422_v45  ;;  %v7694_v49 = vpop.f32.mrb[4].mxu1 }
  0xf7   : > { %6388 = vmatpush3.bf16.msra.mxu0 %v6879_v47  ;;  %6343 = vmatprep.mubr.msk.bf16.mxu0 %vm7001_vm0, %v7000_v1  ;;  %v6017_v51 = vpop.f32.mrb[5].mxu1 }
  0xf8   : > { %6389 = vmatprep.subr.bf16.mxu0 %v7000_v1  ;;  %v7705_v53 = vpop.f32.mrb[6].mxu1 }
  0xf9   : > { %v7711_v55 = vpop.f32.mrb[4].mxu0  ;;  %v6018_v56 = vpop.f32.mrb[7].mxu1 }
  0xfa   : > { %v6009_v57 = vpop.f32.mrb[5].mxu0 }
  0xfb   : > { %v7714_v60 = vpop.f32.mrb[6].mxu0  ;;  %6390 = vmatpush3.bf16.msra.mxu0 %v6882_v38  ;;  %6312 = vmatmul.mubr.msk.bf16.vlgmr.msra.gmra.mrb[112].mxu1 %vm469_vm2, %v2241_v46  ;;  %v2247_v38 = vsel %vm678_vm3, %v2244_v22, %v2246_v42 }
  0xfc   : > { %v6010_v0 = vpop.f32.mrb[7].mxu0  ;;  %6391 = vmatprep.subr.bf16.mxu0 %v7000_v1  ;;  %6360 = vmatpush3.bf16.msra.mxu1 %v6878_v54 }
  0xfd   : > { %6315 = vmatprep.mubr.msk.bf16.mxu1 %vm7001_vm0, %v7000_v1  ;;  %6361 = vmatprep.subr.bf16.mxu1 %v7000_v1  ;;  %v2567_v0 = vshrl.u32 %v7653_v5, 16 }
  0xfe   : > { %6344 = vmatmul.mubr.msk.bf16.gmra.mrb[112].mxu0 %vm469_vm2, %v2424_v61  ;;  %v7730_v50 = vpop.f32.mrb[8].mxu1  ;;  %v5479_v61 = vcombine.low %v2741_v37, %v7647_v27 }
  0xff   : > { %6347 = vmatprep.mubr.msk.bf16.mxu0 %vm7001_vm0, %v7000_v1  ;;  %6392 = vmatpush3.bf16.msra.mxu0 %v6885_v63  ;;  %v6021_v7 = vpop.f32.mrb[9].mxu1  ;;  %v2248_v63 = vrot.slane %v7631_v20, 1  ;;  %v2755_v20 = vrot.slane %v7656_v31, 2 }
 0x100   : > { %6393 = vmatprep.subr.bf16.mxu0 %v7000_v1  ;;  %v7738_v10 = vpop.f32.mrb[10].mxu1  ;;  %6362 = vmatpush3.bf16.msra.mxu1 %v6881_v62  ;;  %v2754_v7 = vrot.slane %v5479_v61, 2  ;;  %v2596_v61 = vshll.u32 %v7703_v52, 16 }
 0x101   : > { %v763_v12 = vpop.f32.mrb[8].mxu0  ;;  %v6022_v15 = vpop.f32.mrb[11].mxu1  ;;  %6363 = vmatprep.subr.bf16.mxu1 %v7000_v1 }
 0x102   : > { %v6061_v16 = vpop.f32.mrb[9].mxu0 }
 0x103   : > { %v766_v17 = vpop.f32.mrb[10].mxu0  ;;  %6394 = vmatpush3.bf16.msra.mxu0 %v6889_v3  ;;  %6316 = vmatmul.mubr.msk.bf16.gmra.mrb[116].mxu1 %vm469_vm2, %v2243_v11  ;;  %v2578_v3 = vshll.u32 %v7656_v31, 16  ;;  %v2569_v16 = vrot.slane %v2567_v0, 1  ;;  %v2756_v31 = vsel %vm1195_vm5, %v2754_v7, %v2755_v20  ;;  %v6899_v0 = vld [vmem:[%s8740_s3 + $0x218] sm:$0xff]  }
 0x104   : > { %v6062_v21 = vpop.f32.mrb[11].mxu0  ;;  %6443 = vmatprep.subr.bf16.mxu0 %v7000_v1  ;;  %6319 = vmatprep.mubr.msk.bf16.mxu1 %vm7001_vm0, %v7000_v1 }
 0x105   : > { %6364 = vmatpush3.bf16.msra.mxu1 %v6884_v13  ;;  %v2249_v13 = vsel %vm678_vm3, %v2246_v42, %v2248_v63  ;;  %v2580_v21 = vrot.slane %v2578_v3, 2  ;;  %v2759_v63 = vrot.slane %v7703_v52, 2 }
 0x106   : > { %6348 = vmatmul.mubr.msk.bf16.gmra.mrb[116].mxu0 %vm469_vm2, %v2426_v18  ;;  %6365 = vmatprep.subr.bf16.mxu1 %v7000_v1  ;;  %v626_v4 = vpop.f32.mrb[12].mxu1  ;;  %v2577_v18 = vrot.slane %v2575_v2, 1 }
 0x107   : > { %6351 = vmatprep.mubr.msk.bf16.mxu0 %vm7001_vm0, %v7000_v1  ;;  %v627_v6 = vadd.f32 %v626_v4, %v7680_v39  ;;  %v6033_v9 = vpop.f32.mrb[13].mxu1 }
 0x108   : > { %v629_v58 = vpop.f32.mrb[14].mxu1 }
 0x109   : > { %v771_v28 = vpop.f32.mrb[12].mxu0  ;;  %6366 = vmatpush3.bf16.msra.mxu1 %v6887_v23  ;;  %v630_v30 = vadd.f32 %v629_v58, %v7683_v44  ;;  %v6034_v32 = vpop.f32.mrb[15].mxu1  ;;  %v7766_v34 = vadd.f32 %v763_v12, %v627_v6  ;;  %v2429_v44 = vrot.slane %v6888_v40, 1 }
 0x10a   : > { %v6065_v14 = vpop.f32.mrb[13].mxu0  ;;  %6415 = vmatprep.subr.bf16.mxu1 %v7000_v1 }
 0x10b   : > { %v774_v35 = vpop.f32.mrb[14].mxu0  ;;  %6320 = vmatmul.mubr.msk.bf16.gmra.mrb[120].mxu1 %vm469_vm2, %v2245_v26  ;;  %v7771_v41 = vadd.f32 %v766_v17, %v630_v30  ;;  %v2430_v59 = vsel %vm678_vm3, %v2427_v24, %v2429_v44  ;;  %v2587_v30 = vshll.u32 %v7671_v25, 16  ;;  %v2757_v14 = vrot.slane %v7671_v25, 2 }
 0x10c   : > { %v6066_v39 = vpop.f32.mrb[15].mxu0  ;;  %6323 = vmatprep.mubr.msk.bf16.mxu1 %vm7001_vm0, %v7000_v1 }
 0x10e   : > { %6352 = vmatmul.mubr.msk.bf16.gmra.mrb[120].mxu0 %vm469_vm2, %v2428_v36  ;;  %v634_v43 = vpop.f32.mrb[16].mxu1 }
 0x10f   : > { %6355 = vmatprep.mubr.msk.bf16.mxu0 %vm7001_vm0, %v7000_v1  ;;  %v635_v45 = vadd.f32 %v634_v43, %v7711_v55  ;;  %v6037_v47 = vpop.f32.mrb[17].mxu1  ;;  %v6891_v43 = vld [vmem:[%s8740_s3 + $0x1e0] sm:$0xff]  }
 0x110   : > { %v637_v48 = vpop.f32.mrb[18].mxu1  ;;  %v2589_v47 = vrot.slane %v2587_v30, 2 }
 0x111   : > { %v779_v51 = vpop.f32.mrb[16].mxu0  ;;  %v7782_v46 = vadd.f32 %v771_v28, %v635_v45  ;;  %v638_v54 = vadd.f32 %v637_v48, %v7714_v60  ;;  %v6038_v8 = vpop.f32.mrb[19].mxu1  ;;  %v2570_v60 = vshll.u32 %v7653_v5, 16  ;;  %v2581_v28 = vor.u32 %v2580_v21, %v2577_v18 }
 0x112   : > { %v6069_v56 = vpop.f32.mrb[17].mxu0  ;;  %v2602_v21 = vshrl.u32 %v7747_v19, 16 }
 0x113   : > { %v782_v57 = vpop.f32.mrb[18].mxu0  ;;  %v7787_v62 = vadd.f32 %v774_v35, %v638_v54  ;;  %6324 = vmatmul.mubr.msk.bf16.gmra.mrb[124].mxu1 %vm469_vm2, %v2247_v38  ;;  %v2572_v17 = vrot.slane %v2570_v60, 2  ;;  %v6894_v35 = vld [vmem:[%s8740_s3 + $0x208] sm:$0xff]   ;;  %v6896_v54 = vld [vmem:[%s8740_s3 + $0x210] sm:$0xff]  }
 0x114   : > { %v6070_v55 = vpop.f32.mrb[19].mxu0  ;;  %6327 = vmatprep.mubr.msk.bf16.mxu1 %vm7001_vm0, %v7000_v1 }
 0x115   : > { %v2573_v26 = vor.u32 %v2572_v17, %v2569_v16  ;;  %v2760_v16 = vsel %vm1195_vm5, %v2757_v14, %v2759_v63 }
 0x116   : > { %6356 = vmatmul.mubr.msk.bf16.gmra.mrb[124].mxu0 %vm469_vm2, %v2430_v59  ;;  %v642_v27 = vpop.f32.mrb[20].mxu1  ;;  %v2593_v59 = vshrl.u32 %v7703_v52, 16  ;;  %v6895_v52 = vld [vmem:[%s8740_s3 + $0x1f0] sm:$0xff]  }
 0x117   : > { %6395 = vmatprep.mubr.msk.bf16.mxu0 %vm7001_vm0, %v7000_v1  ;;  %v643_v11 = vadd.f32 %v642_v27, %v7663_v33  ;;  %v6041_v12 = vpop.f32.mrb[21].mxu1  ;;  %v6892_v33 = vld [vmem:[%s8740_s3 + $0x200] sm:$0xff]   ;;  %v2582_v42 = vsel %vm1006_vm4, %v2573_v26, %v2581_v28  ;;  %v2887_v26 = vld [vmem:[%s7285_s10 + $0x8] sm:$0xc] }
 0x118   : > { %v645_v15 = vpop.f32.mrb[22].mxu1 }
 0x119   : > { %v787_v5 = vpop.f32.mrb[20].mxu0  ;;  %v7803_v22 = vadd.f32 %v779_v51, %v643_v11  ;;  %v646_v23 = vadd.f32 %v645_v15, %v7678_v29  ;;  %v6042_v4 = vpop.f32.mrb[23].mxu1  ;;  %v2584_v29 = vshrl.u32 %v7671_v25, 16  ;;  %v2758_v51 = vsel %vm1195_vm5, %v2755_v20, %v2757_v14 }
 0x11a   : > { %v6073_v24 = vpop.f32.mrb[21].mxu0  ;;  %v2595_v20 = vrot.slane %v2593_v59, 1  ;;  %v2598_v11 = vrot.slane %v2596_v61, 2  ;;  %v6897_v4 = vld [vmem:[%s8740_s3 + $0x1f8] sm:$0xff]  }
 0x11b   : > { %v790_v6 = vpop.f32.mrb[22].mxu0  ;;  %v7810_v9 = vadd.f32 %v782_v57, %v646_v23  ;;  %6328 = vmatmul.mubr.msk.bf16.gmra.mrb[128].mxu1 %vm469_vm2, %v2249_v13  ;;  %v2586_v45 = vrot.slane %v2584_v29, 1  ;;  %v6893_v57 = vld [vmem:[%s8740_s3 + $0x1e8] sm:$0xff]   ;;  %v2605_v23 = vshll.u32 %v7747_v19, 16 }
 0x11c   : > { %v6074_v58 = vpop.f32.mrb[23].mxu0  ;;  %6367 = vmatprep.mubr.msk.bf16.mxu1 %vm7001_vm0, %v7000_v1 }
 0x11d   : > { %v2604_v58 = vrot.slane %v2602_v21, 1  ;;  %v2607_v14 = vrot.slane %v2605_v23, 2 }
 0x11e   : > { %6396 = vmatmul.mubr.msk.bf16.vlgmr.msra.gmra.mrb[128].mxu0 %vm469_vm2, %v2756_v31  ;;  %v650_v32 = vpop.f32.mrb[24].mxu1 }
 0x11f   : > { %6444 = vmatpush3.bf16.msra.mxu0 %v6892_v33  ;;  %6399 = vmatprep.mubr.msk.bf16.mxu0 %vm7001_vm0, %v7000_v1  ;;  %v651_v36 = vadd.f32 %v650_v32, %v7694_v49  ;;  %v6045_v40 = vpop.f32.mrb[25].mxu1 }
 0x120   : > { %6445 = vmatprep.subr.bf16.mxu0 %v7000_v1  ;;  %v653_v39 = vpop.f32.mrb[26].mxu1 }
 0x121   : > { %v795_v44 = vpop.f32.mrb[24].mxu0  ;;  %v7830_v25 = vadd.f32 %v787_v5, %v651_v36  ;;  %v654_v37 = vadd.f32 %v653_v39, %v7705_v53  ;;  %v6046_v48 = vpop.f32.mrb[27].mxu1  ;;  %v2590_v53 = vor.u32 %v2589_v47, %v2586_v45 }
 0x122   : > { %v6077_v38 = vpop.f32.mrb[25].mxu0 }
 0x123   : > { %v798_v49 = vpop.f32.mrb[26].mxu0  ;;  %6446 = vmatpush3.bf16.msra.mxu0 %v6894_v35  ;;  %v7837_v8 = vadd.f32 %v790_v6, %v654_v37  ;;  %6368 = vmatmul.mubr.msk.bf16.vlgmr.msra.gmra.mrb[132].mxu1 %vm469_vm2, %v2582_v42  ;;  %v2591_v27 = vsel %vm1006_vm4, %v2581_v28, %v2590_v53  ;;  %v2761_v6 = vrot.slane %v7747_v19, 2  ;;  %v7886_v28 = vld [vmem:[%s7285_s10 + $0xc] sm:$0xf] }
 0x124   : > { %v6078_v56 = vpop.f32.mrb[27].mxu0  ;;  %6447 = vmatprep.subr.bf16.mxu0 %v7000_v1  ;;  %6416 = vmatpush3.bf16.msra.mxu1 %v6891_v43  ;;  %v6898_v35 = vld [vmem:[%s7285_s10 + $0x2c] ss:$0 sps:$4 sm:$0x33]   ;;  %v7896_v43 = vcombine.low %v2887_v26, %v7886_v28 }
 0x125   : > { %6371 = vmatprep.mubr.msk.bf16.mxu1 %vm7001_vm0, %v7000_v1  ;;  %6417 = vmatprep.subr.bf16.mxu1 %v7000_v1  ;;  %v2762_v42 = vsel %vm1195_vm5, %v2759_v63, %v2761_v6  ;;  %v2611_v37 = vshrl.u32 %v6898_v35, 16  ;;  %v2614_v48 = vshll.u32 %v6898_v35, 16  ;;  %v2763_v38 = vrot.slane %v6898_v35, 2 }
 0x126   : > { %6400 = vmatmul.mubr.msk.bf16.gmra.mrb[132].mxu0 %vm469_vm2, %v2758_v51  ;;  %v658_v55 = vpop.f32.mrb[28].mxu1  ;;  %v3082_v51 = vshrl.u32 %v7896_v43, 16 }
 0x127   : > { %6403 = vmatprep.mubr.msk.bf16.mxu0 %vm7001_vm0, %v7000_v1  ;;  %6448 = vmatpush3.bf16.msra.mxu0 %v6896_v54  ;;  %v659_v60 = vadd.f32 %v658_v55, %v7730_v50  ;;  %v6049_v2 = vpop.f32.mrb[29].mxu1  ;;  %v3085_v54 = vshll.u32 %v7896_v43, 16 }
 0x128   : > { %6449 = vmatprep.subr.bf16.mxu0 %v7000_v1  ;;  %v661_v3 = vpop.f32.mrb[30].mxu1  ;;  %6418 = vmatpush3.bf16.msra.mxu1 %v6893_v57 }
 0x129   : > { %v1133_v7 = vpop.f32.mrb[28].mxu0  ;;  %v7862_v12 = vadd.f32 %v795_v44, %v659_v60  ;;  %v662_v13 = vadd.f32 %v661_v3, %v7738_v10  ;;  %v6050_v15 = vpop.f32.mrb[31].mxu1  ;;  %6419 = vmatprep.subr.bf16.mxu1 %v7000_v1  ;;  %v2599_v10 = vor.u32 %v2598_v11, %v2595_v20  ;;  %v7899_v44 = vld [vmem:[%s7285_s10 + $0x10] sm:$0xff]   ;;  %v2616_v60 = vrot.slane %v2614_v48, 2  ;;  %v6906_v48 = vld [vmem:[%s8740_s3 + $0x248] sm:$0xff]  }
 0x12a   : > { %v6117_v50 = vpop.f32.mrb[29].mxu0  ;;  %v3090_v56 = vshrl.u32 %v7899_v44, 16  ;;  %v2764_v20 = vsel %vm1195_vm5, %v2761_v6, %v2763_v38 }
 0x12b   : > { %v1136_v5 = vpop.f32.mrb[30].mxu0  ;;  %6450 = vmatpush3.bf16.msra.mxu0 %v6899_v0  ;;  %v7867_v17 = vadd.f32 %v798_v49, %v662_v13  ;;  %6372 = vmatmul.mubr.msk.bf16.gmra.mrb[136].mxu1 %vm469_vm2, %v2591_v27  ;;  %v2600_v30 = vsel %vm1006_vm4, %v2590_v53, %v2599_v10  ;;  %v3093_v53 = vshll.u32 %v7899_v44, 16  ;;  %v2613_v0 = vrot.slane %v2611_v37, 1  ;;  %v7920_v50 = vld [vmem:[%s7285_s10 + $0x18] sm:$0xff]  }
 0x12c   : > { %v6118_v18 = vpop.f32.mrb[31].mxu0  ;;  %6499 = vmatprep.subr.bf16.mxu0 %v7000_v1  ;;  %6375 = vmatprep.mubr.msk.bf16.mxu1 %vm7001_vm0, %v7000_v1  ;;  %v3087_v13 = vrot.slane %v3085_v54, 3  ;;  %v3099_v23 = vshrl.u32 %v7920_v50, 16 }
 0x12d   : > { %6420 = vmatpush3.bf16.msra.mxu1 %v6895_v52  ;;  %v3084_v52 = vrot.slane %v3082_v51, 2  ;;  %v3095_v15 = vrot.slane %v3093_v53, 3  ;;  %v6902_v53 = vld [vmem:[%s8740_s3 + $0x220] sm:$0xff]  }
 0x12e   : > { %6404 = vmatmul.mubr.msk.bf16.gmra.mrb[136].mxu0 %vm469_vm2, %v2760_v16  ;;  %6421 = vmatprep.subr.bf16.mxu1 %v7000_v1  ;;  %v944_v24 = vpop.f32.mrb[32].mxu1 }
 0x12f   : > { %6407 = vmatprep.mubr.msk.bf16.mxu0 %vm7001_vm0, %v7000_v1  ;;  %v983_v31 = vadd.f32 %v944_v24, %v7766_v34  ;;  %v6089_v33 = vpop.f32.mrb[33].mxu1  ;;  %v3088_v21 = vor.u32 %v3087_v13, %v3084_v52  ;;  %v6905_v52 = vld [vmem:[%s8740_s3 + $0x228] sm:$0xff]  }
 0x130   : > { %v947_v29 = vpop.f32.mrb[34].mxu1 }
 0x131   : > { %v1141_v32 = vpop.f32.mrb[32].mxu0  ;;  %6422 = vmatpush3.bf16.msra.mxu1 %v6897_v4  ;;  %v7890_v36 = vadd.f32 %v1133_v7, %v983_v31  ;;  %v984_v40 = vadd.f32 %v947_v29, %v7771_v41  ;;  %v6090_v19 = vpop.f32.mrb[35].mxu1  ;;  %v2608_v41 = vor.u32 %v2607_v14, %v2604_v58  ;;  %v3102_v4 = vshll.u32 %v7920_v50, 16 }
 0x132   : > { %v6121_v39 = vpop.f32.mrb[33].mxu0  ;;  %6471 = vmatprep.subr.bf16.mxu1 %v7000_v1  ;;  %v3101_v19 = vrot.slane %v3099_v23, 2 }
 0x133   : > { %v1144_v34 = vpop.f32.mrb[34].mxu0  ;;  %v7901_v45 = vadd.f32 %v1136_v5, %v984_v40  ;;  %6376 = vmatmul.mubr.msk.bf16.gmra.mrb[140].mxu1 %vm469_vm2, %v2600_v30  ;;  %v2609_v55 = vsel %vm1006_vm4, %v2599_v10, %v2608_v41  ;;  %v6903_v40 = vld [vmem:[%s8740_s3 + $0x240] sm:$0xff]  }
 0x134   : > { %v6122_v47 = vpop.f32.mrb[35].mxu0  ;;  %6379 = vmatprep.mubr.msk.bf16.mxu1 %vm7001_vm0, %v7000_v1  ;;  %v7942_v39 = vld [vmem:[%s7285_s10 + $0x20] sm:$0xff]  }
 0x135   : > { %v2936_v47 = vrot.slane %v7899_v44, 2  ;;  %v3108_v38 = vshrl.u32 %v7942_v39, 16 }
 0x136   : > { %6408 = vmatmul.mubr.msk.bf16.gmra.mrb[140].mxu0 %vm469_vm2, %v2762_v42  ;;  %v952_v49 = vpop.f32.mrb[36].mxu1 }
 0x137   : > { %6411 = vmatprep.mubr.msk.bf16.mxu0 %vm7001_vm0, %v7000_v1  ;;  %v985_v57 = vadd.f32 %v952_v49, %v7782_v46  ;;  %v6093_v59 = vpop.f32.mrb[37].mxu1  ;;  %v3092_v46 = vrot.slane %v3090_v56, 2  ;;  %v3111_v49 = vshll.u32 %v7942_v39, 16 }
 0x138   : > { %v955_v61 = vpop.f32.mrb[38].mxu1 }
 0x139   : > { %v1149_v63 = vpop.f32.mrb[36].mxu0  ;;  %v7915_v2 = vadd.f32 %v1141_v32, %v985_v57  ;;  %v986_v3 = vadd.f32 %v955_v61, %v7787_v62  ;;  %v6094_v27 = vpop.f32.mrb[39].mxu1  ;;  %v2617_v62 = vor.u32 %v2616_v60, %v2613_v0  ;;  %v3096_v10 = vor.u32 %v3095_v15, %v3092_v46 }
 0x13a   : > { %v6125_v7 = vpop.f32.mrb[37].mxu0  ;;  %v3110_v60 = vrot.slane %v3108_v38, 2  ;;  %v6909_v27 = vld [vmem:[%s8740_s3 + $0x250] sm:$0xff]  }
 0x13b   : > { %v1152_v11 = vpop.f32.mrb[38].mxu0  ;;  %v7922_v5 = vadd.f32 %v1144_v34, %v986_v3  ;;  %6380 = vmatmul.mubr.msk.bf16.gmra.mrb[144].mxu1 %vm469_vm2, %v2609_v55  ;;  %v2618_v33 = vsel %vm1006_vm4, %v2608_v41, %v2617_v62  ;;  %v3097_v35 = vsel %vm1523_vm7, %v3088_v21, %v3096_v10  ;;  %v3113_v3 = vrot.slane %v3111_v49, 3  ;;  %v7973_v7 = vld [vmem:[%s7285_s10 + $0x28] sm:$0xff]   ;;  %v6914_v62 = vld [vmem:[%s8740_s3 + $0x258] sm:$0xff]  }
 0x13c   : > { %v6126_v16 = vpop.f32.mrb[39].mxu0  ;;  %6383 = vmatprep.mubr.msk.bf16.mxu1 %vm7001_vm0, %v7000_v1  ;;  %v3117_v15 = vshrl.u32 %v7973_v7, 16 }
 0x13d   : > { %v3114_v46 = vor.u32 %v3113_v3, %v3110_v60  ;;  %v3120_v16 = vshll.u32 %v7973_v7, 16 }
 0x13e   : > { %6412 = vmatmul.mubr.msk.bf16.gmra.mrb[144].mxu0 %vm469_vm2, %v2764_v20  ;;  %v960_v18 = vpop.f32.mrb[40].mxu1 }
 0x13f   : > { %6451 = vmatprep.mubr.msk.bf16.mxu0 %vm7001_vm0, %v7000_v1  ;;  %v987_v24 = vadd.f32 %v960_v18, %v7803_v22  ;;  %v6097_v6 = vpop.f32.mrb[41].mxu1  ;;  %v3104_v22 = vrot.slane %v3102_v4, 3 }
 0x140   : > { %v963_v31 = vpop.f32.mrb[42].mxu1 }
 0x141   : > { %v1157_v58 = vpop.f32.mrb[40].mxu0  ;;  %v7934_v26 = vadd.f32 %v1149_v63, %v987_v24  ;;  %v988_v29 = vadd.f32 %v963_v31, %v7810_v9  ;;  %v6098_v30 = vpop.f32.mrb[43].mxu1  ;;  %v2935_v9 = vrot.slane %v7896_v43, 2  ;;  %v3105_v37 = vor.u32 %v3104_v22, %v3101_v19  ;;  %v6908_v24 = vld [vmem:[%s8740_s3 + $0x230] sm:$0xff]   ;;  %v6911_v19 = vld [vmem:[%s8740_s3 + $0x238] sm:$0xff]  }
 0x142   : > { %v6129_v32 = vpop.f32.mrb[41].mxu0  ;;  %v3119_v30 = vrot.slane %v3117_v15, 2 }
 0x143   : > { %v1160_v14 = vpop.f32.mrb[42].mxu0  ;;  %v7944_v34 = vadd.f32 %v1152_v11, %v988_v29  ;;  %6384 = vmatmul.mubr.msk.bf16.gmra.mrb[148].mxu1 %vm469_vm2, %v2618_v33  ;;  %v2937_v56 = vsel %vm1195_vm5, %v2935_v9, %v2936_v47  ;;  %v3115_v29 = vsel %vm1523_vm7, %v3105_v37, %v3114_v46  ;;  %v3122_v32 = vrot.slane %v3120_v16, 3 }
 0x144   : > { %v6130_v42 = vpop.f32.mrb[43].mxu0  ;;  %6423 = vmatprep.mubr.msk.bf16.mxu1 %vm7001_vm0, %v7000_v1 }
 0x145   : > { %v3123_v42 = vor.u32 %v3122_v32, %v3119_v30 }
 0x146   : > { %6452 = vmatmul.mubr.msk.bf16.vlgmr.msra.gmra.mrb[148].mxu0 %vm469_vm2, %v3097_v35  ;;  %v968_v41 = vpop.f32.mrb[44].mxu1 }
 0x147   : > { %6500 = vmatpush3.bf16.msra.mxu0 %v6903_v40  ;;  %6455 = vmatprep.mubr.msk.bf16.mxu0 %vm7001_vm0, %v7000_v1  ;;  %v989_v43 = vadd.f32 %v968_v41, %v7830_v25  ;;  %v6101_v51 = vpop.f32.mrb[45].mxu1  ;;  %v3106_v25 = vsel %vm1523_vm7, %v3096_v10, %v3105_v37 }
 0x148   : > { %6501 = vmatprep.subr.bf16.mxu0 %v7000_v1  ;;  %v971_v54 = vpop.f32.mrb[46].mxu1 }
 0x149   : > { %v1165_v57 = vpop.f32.mrb[44].mxu0  ;;  %v7965_v59 = vadd.f32 %v1157_v58, %v989_v43  ;;  %v990_v61 = vadd.f32 %v971_v54, %v7837_v8  ;;  %v6102_v55 = vpop.f32.mrb[47].mxu1  ;;  %v2938_v8 = vrot.slane %v7920_v50, 2 }
 0x14a   : > { %v6133_v63 = vpop.f32.mrb[45].mxu0 }
 0x14b   : > { %v1168_v0 = vpop.f32.mrb[46].mxu0  ;;  %6502 = vmatpush3.bf16.msra.mxu0 %v6906_v48  ;;  %v7975_v20 = vadd.f32 %v1160_v14, %v990_v61  ;;  %6424 = vmatmul.mubr.msk.bf16.vlgmr.msra.gmra.mrb[152].mxu1 %vm469_vm2, %v2937_v56  ;;  %v2939_v23 = vsel %vm1195_vm5, %v2936_v47, %v2938_v8  ;;  %v8006_v14 = vld [vmem:[%s7285_s10 + $0x30] ss:$0 sps:$4 sm:$0x77]  }
 0x14c   : > { %v6134_v11 = vpop.f32.mrb[47].mxu0  ;;  %6503 = vmatprep.subr.bf16.mxu0 %v7000_v1  ;;  %6472 = vmatpush3.bf16.msra.mxu1 %v6902_v53  ;;  %v3126_v9 = vshrl.u32 %v8006_v14, 16  ;;  %v3129_v47 = vshll.u32 %v8006_v14, 16 }
 0x14d   : > { %6427 = vmatprep.mubr.msk.bf16.mxu1 %vm7001_vm0, %v7000_v1  ;;  %6473 = vmatprep.subr.bf16.mxu1 %v7000_v1 }
 0x14e   : > { %6456 = vmatmul.mubr.msk.bf16.gmra.mrb[152].mxu0 %vm469_vm2, %v3106_v25  ;;  %v976_v13 = vpop.f32.mrb[48].mxu1  ;;  %v3128_v61 = vrot.slane %v3126_v9, 2  ;;  %v3270_v9 = vrot.slane %v7899_v44, 3 }
 0x14f   : > { %6459 = vmatprep.mubr.msk.bf16.mxu0 %vm7001_vm0, %v7000_v1  ;;  %6504 = vmatpush3.bf16.msra.mxu0 %v6909_v27  ;;  %v991_v18 = vadd.f32 %v976_v13, %v7862_v12  ;;  %v6105_v21 = vpop.f32.mrb[49].mxu1 }
 0x150   : > { %6505 = vmatprep.subr.bf16.mxu0 %v7000_v1  ;;  %v979_v10 = vpop.f32.mrb[50].mxu1  ;;  %6474 = vmatpush3.bf16.msra.mxu1 %v6905_v52  ;;  %v6912_v52 = vld [vmem:[%s7285_s10 + $0x30] ss:$0 sps:$4 sm:$0x33]  }
 0x151   : > { %v1461_v4 = vpop.f32.mrb[48].mxu0  ;;  %v8000_v6 = vadd.f32 %v1165_v57, %v991_v18  ;;  %v992_v31 = vadd.f32 %v979_v10, %v7867_v17  ;;  %v6106_v33 = vpop.f32.mrb[51].mxu1  ;;  %6475 = vmatprep.subr.bf16.mxu1 %v7000_v1  ;;  %v2940_v17 = vrot.slane %v7942_v39, 2  ;;  %v3124_v57 = vsel %vm1523_vm7, %v3114_v46, %v3123_v42 }
 0x152   : > { %v6173_v58 = vpop.f32.mrb[49].mxu0  ;;  %v2944_v10 = vrot.slane %v6912_v52, 2 }
 0x153   : > { %v1464_v12 = vpop.f32.mrb[50].mxu0  ;;  %6506 = vmatpush3.bf16.msra.mxu0 %v6914_v62  ;;  %v8008_v35 = vadd.f32 %v1168_v0, %v992_v31  ;;  %6428 = vmatmul.mubr.msk.bf16.gmra.mrb[156].mxu1 %vm469_vm2, %v2939_v23  ;;  %v2941_v38 = vsel %vm1195_vm5, %v2938_v8, %v2940_v17  ;;  %v3256_v23 = vld [vmem:[%s7285_s10 + $0x8] sm:$0x8] }
 0x154   : > { %v6174_v40 = vpop.f32.mrb[51].mxu0  ;;  %6555 = vmatprep.subr.bf16.mxu0 %v7000_v1  ;;  %6431 = vmatprep.mubr.msk.bf16.mxu1 %vm7001_vm0, %v7000_v1 }
 0x155   : > { %6476 = vmatpush3.bf16.msra.mxu1 %v6908_v24 }
 0x156   : > { %6460 = vmatmul.mubr.msk.bf16.gmra.mrb[156].mxu0 %vm469_vm2, %v3115_v29  ;;  %6477 = vmatprep.subr.bf16.mxu1 %v7000_v1  ;;  %v1280_v22 = vpop.f32.mrb[52].mxu1 }
 0x157   : > { %6463 = vmatprep.mubr.msk.bf16.mxu0 %vm7001_vm0, %v7000_v1  ;;  %v1319_v41 = vadd.f32 %v1280_v22, %v7890_v36  ;;  %v6145_v37 = vpop.f32.mrb[53].mxu1  ;;  %v3131_v36 = vrot.slane %v3129_v47, 3  ;;  %v6918_v22 = vld [vmem:[%s8740_s3 + $0x280] sm:$0xff]   ;;  %v6921_v47 = vld [vmem:[%s8740_s3 + $0x288] sm:$0xff]  }
 0x158   : > { %v1283_v48 = vpop.f32.mrb[54].mxu1 }
 0x159   : > { %v1469_v49 = vpop.f32.mrb[52].mxu0  ;;  %6478 = vmatpush3.bf16.msra.mxu1 %v6911_v19  ;;  %v8026_v43 = vadd.f32 %v1461_v4, %v1319_v41  ;;  %v1320_v51 = vadd.f32 %v1283_v48, %v7901_v45  ;;  %v6146_v54 = vpop.f32.mrb[55].mxu1  ;;  %v2942_v45 = vrot.slane %v7973_v7, 2  ;;  %v3132_v25 = vor.u32 %v3131_v36, %v3128_v61 }
 0x15a   : > { %v6177_v56 = vpop.f32.mrb[53].mxu0  ;;  %6527 = vmatprep.subr.bf16.mxu1 %v7000_v1 }
 0x15b   : > { %v1472_v53 = vpop.f32.mrb[54].mxu0  ;;  %v8031_v55 = vadd.f32 %v1464_v12, %v1320_v51  ;;  %6432 = vmatmul.mubr.msk.bf16.gmra.mrb[160].mxu1 %vm469_vm2, %v2941_v38  ;;  %v2943_v11 = vsel %vm1195_vm5, %v2940_v17, %v2942_v45  ;;  %v3133_v18 = vsel %vm1523_vm7, %v3123_v42, %v3132_v25  ;;  %v2945_v33 = vsel %vm1195_vm5, %v2942_v45, %v2944_v10  ;;  %v6916_v17 = vld [vmem:[%s7676_s9] sm:$0xff]   ;;  %v6920_v45 = vld [vmem:[%s8740_s3 + $0x268] sm:$0xff]   ;;  %v6928_v25 = vld [vmem:[%s8740_s3 + $0x298] sm:$0xff]  }
 0x15c   : > { %v6178_v63 = vpop.f32.mrb[55].mxu0  ;;  %6435 = vmatprep.mubr.msk.bf16.mxu1 %vm7001_vm0, %v7000_v1  ;;  %v5538_v12 = vcombine.low %v3256_v23, %v7886_v28  ;;  %v6917_v38 = vld [vmem:[%s8740_s3 + $0x260] sm:$0xff]   ;;  %v3274_v10 = vrot.slane %v7942_v39, 3 }
 0x15e   : > { %6464 = vmatmul.mubr.msk.bf16.gmra.mrb[160].mxu0 %vm469_vm2, %v3124_v57  ;;  %v1288_v0 = vpop.f32.mrb[56].mxu1  ;;  %v3269_v28 = vrot.slane %v5538_v12, 3  ;;  %v6919_v57 = vld [vmem:[%s7676_s9 + $0x8] sm:$0xff]  }
 0x15f   : > { %6467 = vmatprep.mubr.msk.bf16.mxu0 %vm7001_vm0, %v7000_v1  ;;  %v1321_v60 = vadd.f32 %v1288_v0, %v7915_v2  ;;  %v6149_v3 = vpop.f32.mrb[57].mxu1 }
 0x160   : > { %v1291_v27 = vpop.f32.mrb[58].mxu1  ;;  %v3271_v44 = vsel %vm1712_vm6, %v3269_v28, %v3270_v9 }
 0x161   : > { %v1477_v8 = vpop.f32.mrb[56].mxu0  ;;  %v8043_v13 = vadd.f32 %v1469_v49, %v1321_v60  ;;  %v1322_v46 = vadd.f32 %v1291_v27, %v7922_v5  ;;  %v6150_v15 = vpop.f32.mrb[59].mxu1 }
 0x162   : > { %v6181_v16 = vpop.f32.mrb[57].mxu0 }
 0x163   : > { %v1480_v62 = vpop.f32.mrb[58].mxu0  ;;  %v8047_v21 = vadd.f32 %v1472_v53, %v1322_v46  ;;  %6436 = vmatmul.mubr.msk.bf16.gmra.mrb[164].mxu1 %vm469_vm2, %v2943_v11 }
 0x164   : > { %v6182_v2 = vpop.f32.mrb[59].mxu0  ;;  %6439 = vmatprep.mubr.msk.bf16.mxu1 %vm7001_vm0, %v7000_v1 }
 0x166   : > { %6468 = vmatmul.mubr.msk.bf16.gmra.mrb[164].mxu0 %vm469_vm2, %v3133_v18  ;;  %v1296_v4 = vpop.f32.mrb[60].mxu1 }
 0x167   : > { %6507 = vmatprep.mubr.msk.bf16.mxu0 %vm7001_vm0, %v7000_v1  ;;  %v1323_v5 = vadd.f32 %v1296_v4, %v7934_v26  ;;  %v6153_v24 = vpop.f32.mrb[61].mxu1 }
 0x168   : > { %v1299_v31 = vpop.f32.mrb[62].mxu1 }
 0x169   : > { %v1485_v58 = vpop.f32.mrb[60].mxu0  ;;  %v8059_v29 = vadd.f32 %v1477_v8, %v1323_v5  ;;  %v1324_v30 = vadd.f32 %v1299_v31, %v7944_v34  ;;  %v6154_v32 = vpop.f32.mrb[63].mxu1  ;;  %v6923_v8 = vld [vmem:[%s8740_s3 + $0x270] sm:$0xff]  }
 0x16a   : > { %v6185_v40 = vpop.f32.mrb[61].mxu0  ;;  %v6925_v32 = vld [vmem:[%s7676_s9 + $0x18] sm:$0xff]  }
 0x16b   : > { %v1488_v19 = vpop.f32.mrb[62].mxu0  ;;  %v8066_v26 = vadd.f32 %v1480_v62, %v1324_v30  ;;  %6440 = vmatmul.mubr.msk.bf16.gmra.mrb[168].mxu1 %vm469_vm2, %v2945_v33  ;;  %v6922_v62 = vld [vmem:[%s7676_s9 + $0x10] sm:$0xff]  }
 0x16c   : > { %v6186_v42 = vpop.f32.mrb[63].mxu0  ;;  %6479 = vmatprep.mubr.msk.bf16.mxu1 %vm7001_vm0, %v7000_v1 }
 0x16e   : > { %6508 = vmatmul.mubr.msk.bf16.vlgmr.msra.gmra.mrb[168].mxu0 %vm469_vm2, %v6916_v17  ;;  %v1304_v34 = vpop.f32.mrb[64].mxu1 }
 0x16f   : > { %6556 = vmatpush3.bf16.msra.mxu0 %v6918_v22  ;;  %6511 = vmatprep.mubr.msk.bf16.mxu0 %vm7001_vm0, %v7000_v1  ;;  %v1325_v41 = vadd.f32 %v1304_v34, %v7965_v59  ;;  %v6157_v37 = vpop.f32.mrb[65].mxu1  ;;  %v6924_v59 = vld [vmem:[%s8740_s3 + $0x290] sm:$0xff]   ;;  %v3569_v22 = vld [vmem:[%s7676_s9 + $0x4] sm:$0xf]  ;;  %v3782_v34 = vld [vmem:[%s7676_s9] sm:$0xe] }
 0x170   : > { %6557 = vmatprep.subr.bf16.mxu0 %v7000_v1  ;;  %v1307_v48 = vpop.f32.mrb[66].mxu1 }
 0x171   : > { %v1493_v49 = vpop.f32.mrb[64].mxu0  ;;  %v8084_v51 = vadd.f32 %v1485_v58, %v1325_v41  ;;  %v1326_v54 = vadd.f32 %v1307_v48, %v7975_v20  ;;  %v6158_v56 = vpop.f32.mrb[67].mxu1  ;;  %v3272_v20 = vrot.slane %v7920_v50, 3 }
 0x172   : > { %v6189_v53 = vpop.f32.mrb[65].mxu0 }
 0x173   : > { %v1496_v61 = vpop.f32.mrb[66].mxu0  ;;  %6558 = vmatpush3.bf16.msra.mxu0 %v6921_v47  ;;  %v8091_v36 = vadd.f32 %v1488_v19, %v1326_v54  ;;  %6480 = vmatmul.mubr.msk.bf16.vlgmr.msra.gmra.mrb[172].mxu1 %vm469_vm2, %v3271_v44  ;;  %v3273_v27 = vsel %vm1712_vm6, %v3270_v9, %v3272_v20  ;;  %v3275_v39 = vsel %vm1712_vm6, %v3272_v20, %v3274_v10  ;;  %v3276_v19 = vrot.slane %v7973_v7, 3  ;;  %v6927_v54 = vld [vmem:[%s7676_s9 + $0x20] sm:$0xff]   ;;  %v8159_v53 = vld [vmem:[%s7676_s9 + $0x8] sm:$0xff]  }
 0x174   : > { %v6190_v63 = vpop.f32.mrb[67].mxu0  ;;  %6559 = vmatprep.subr.bf16.mxu0 %v7000_v1  ;;  %6528 = vmatpush3.bf16.msra.mxu1 %v6917_v38 }
 0x175   : > { %6483 = vmatprep.mubr.msk.bf16.mxu1 %vm7001_vm0, %v7000_v1  ;;  %6529 = vmatprep.subr.bf16.mxu1 %v7000_v1  ;;  %v3277_v41 = vsel %vm1712_vm6, %v3274_v10, %v3276_v19 }
 0x176   : > { %6512 = vmatmul.mubr.msk.bf16.gmra.mrb[172].mxu0 %vm469_vm2, %v6919_v57  ;;  %v1312_v0 = vpop.f32.mrb[68].mxu1  ;;  %v5601_v57 = vcombine.low %v3782_v34, %v3569_v22  ;;  %v6939_v34 = vld [vmem:[%s8740_s3 + $0x2d0] sm:$0xff]  }
 0x177   : > { %6515 = vmatprep.mubr.msk.bf16.mxu0 %vm7001_vm0, %v7000_v1  ;;  %6560 = vmatpush3.bf16.msra.mxu0 %v6924_v59  ;;  %v1327_v50 = vadd.f32 %v1312_v0, %v8000_v6  ;;  %v6161_v60 = vpop.f32.mrb[69].mxu1  ;;  %v3278_v59 = vrot.slane %v8006_v14, 3 }
 0x178   : > { %6561 = vmatprep.subr.bf16.mxu0 %v7000_v1  ;;  %v1315_v3 = vpop.f32.mrb[70].mxu1  ;;  %6530 = vmatpush3.bf16.msra.mxu1 %v6920_v45  ;;  %v3795_v20 = vrot.slane %v5601_v57, 1  ;;  %v3796_v45 = vrot.slane %v8159_v53, 1 }
 0x179   : > { %v1797_v11 = vpop.f32.mrb[68].mxu0  ;;  %v8114_v52 = vadd.f32 %v1493_v49, %v1327_v50  ;;  %v1328_v46 = vadd.f32 %v1315_v3, %v8008_v35  ;;  %v6162_v15 = vpop.f32.mrb[71].mxu1  ;;  %6531 = vmatprep.subr.bf16.mxu1 %v7000_v1  ;;  %v6926_v35 = vld [vmem:[%s8740_s3 + $0x278] sm:$0xff]   ;;  %v3279_v60 = vsel %vm1712_vm6, %v3276_v19, %v3278_v59 }
 0x17a   : > { %v6229_v16 = vpop.f32.mrb[69].mxu0 }
 0x17b   : > { %v1800_v6 = vpop.f32.mrb[70].mxu0  ;;  %6562 = vmatpush3.bf16.msra.mxu0 %v6928_v25  ;;  %v8119_v18 = vadd.f32 %v1496_v61, %v1328_v46  ;;  %6484 = vmatmul.mubr.msk.bf16.gmra.mrb[176].mxu1 %vm469_vm2, %v3273_v27 }
 0x17c   : > { %v6230_v2 = vpop.f32.mrb[71].mxu0  ;;  %6611 = vmatprep.subr.bf16.mxu0 %v7000_v1  ;;  %6487 = vmatprep.mubr.msk.bf16.mxu1 %vm7001_vm0, %v7000_v1 }
 0x17d   : > { %6532 = vmatpush3.bf16.msra.mxu1 %v6923_v8  ;;  %v8182_v2 = vld [vmem:[%s7676_s9 + $0x10] sm:$0xff]  }
 0x17e   : > { %6516 = vmatmul.mubr.msk.bf16.gmra.mrb[176].mxu0 %vm469_vm2, %v6922_v62  ;;  %6533 = vmatprep.subr.bf16.mxu1 %v7000_v1  ;;  %v1650_v23 = vpop.f32.mrb[72].mxu1  ;;  %v3636_v59 = vshrl.u32 %v8182_v2, 16 }
 0x17f   : > { %6519 = vmatprep.mubr.msk.bf16.mxu0 %vm7001_vm0, %v7000_v1  ;;  %v1689_v4 = vadd.f32 %v1650_v23, %v8026_v43  ;;  %v6201_v5 = vpop.f32.mrb[73].mxu1 }
 0x180   : > { %v1653_v24 = vpop.f32.mrb[74].mxu1  ;;  %v3798_v5 = vrot.slane %v8182_v2, 1 }
 0x181   : > { %v1805_v31 = vpop.f32.mrb[72].mxu0  ;;  %6534 = vmatpush3.bf16.msra.mxu1 %v6926_v35  ;;  %v8135_v33 = vadd.f32 %v1797_v11, %v1689_v4  ;;  %v1690_v58 = vadd.f32 %v1653_v24, %v8031_v55  ;;  %v6202_v12 = vpop.f32.mrb[75].mxu1  ;;  %v3568_v55 = vld [vmem:[%s7676_s9] sm:$0xf]  ;;  %v3624_v11 = vshll.u32 %v8159_v53, 16  ;;  %v6936_v24 = vld [vmem:[%s8740_s3 + $0x2c8] sm:$0xff]  }
 0x182   : > { %v6233_v30 = vpop.f32.mrb[73].mxu0  ;;  %6583 = vmatprep.subr.bf16.mxu1 %v7000_v1  ;;  %v5578_v48 = vcombine.low %v3568_v55, %v3569_v22 }
 0x183   : > { %v1808_v40 = vpop.f32.mrb[74].mxu0  ;;  %v8140_v43 = vadd.f32 %v1800_v6, %v1690_v58  ;;  %6488 = vmatmul.mubr.msk.bf16.gmra.mrb[180].mxu1 %vm469_vm2, %v3275_v39  ;;  %v3797_v6 = vsel %vm678_vm3, %v3795_v20, %v3796_v45  ;;  %v3626_v23 = vrot.slane %v3624_v11, 1  ;;  %v6932_v30 = vld [vmem:[%s8740_s3 + $0x2a0] sm:$0xff]   ;;  %v6941_v11 = vld [vmem:[%s8740_s3 + $0x2b8] sm:$0xff]  }
 0x184   : > { %v6234_v17 = vpop.f32.mrb[75].mxu0  ;;  %6491 = vmatprep.mubr.msk.bf16.mxu1 %vm7001_vm0, %v7000_v1  ;;  %v3619_v63 = vshll.u32 %v5578_v48, 16  ;;  %v3617_v27 = vshrl.u32 %v5578_v48, 16  ;;  %v6935_v48 = vld [vmem:[%s8740_s3 + $0x2a8] sm:$0xff]  }
 0x185   : > { %v3632_v17 = vshll.u32 %v8182_v2, 16 }
 0x186   : > { %6520 = vmatmul.mubr.msk.bf16.gmra.mrb[180].mxu0 %vm469_vm2, %v6925_v32  ;;  %v1658_v42 = vpop.f32.mrb[76].mxu1  ;;  %v3621_v14 = vrot.slane %v3619_v63, 1 }
 0x187   : > { %6523 = vmatprep.mubr.msk.bf16.mxu0 %vm7001_vm0, %v7000_v1  ;;  %v1691_v28 = vadd.f32 %v1658_v42, %v8043_v13  ;;  %v6205_v9 = vpop.f32.mrb[77].mxu1 }
 0x188   : > { %v1661_v47 = vpop.f32.mrb[78].mxu1  ;;  %v8209_v9 = vld [vmem:[%s7676_s9 + $0x18] sm:$0xff]  }
 0x189   : > { %v1813_v37 = vpop.f32.mrb[76].mxu0  ;;  %v8154_v7 = vadd.f32 %v1805_v31, %v1691_v28  ;;  %v1692_v44 = vadd.f32 %v1661_v47, %v8047_v21  ;;  %v6206_v38 = vpop.f32.mrb[79].mxu1  ;;  %v3799_v28 = vsel %vm678_vm3, %v3796_v45, %v3798_v5  ;;  %v3640_v63 = vshll.u32 %v8209_v9, 16 }
 0x18a   : > { %v6237_v49 = vpop.f32.mrb[77].mxu0  ;;  %v3800_v38 = vrot.slane %v8209_v9, 1 }
 0x18b   : > { %v1816_v56 = vpop.f32.mrb[78].mxu0  ;;  %v8161_v61 = vadd.f32 %v1808_v40, %v1692_v44  ;;  %6492 = vmatmul.mubr.msk.bf16.gmra.mrb[184].mxu1 %vm469_vm2, %v3277_v41  ;;  %v3628_v40 = vshrl.u32 %v8159_v53, 16  ;;  %v6943_v49 = vld [vmem:[%s8740_s3 + $0x2d8] sm:$0xff]  }
 0x18c   : > { %v6238_v13 = vpop.f32.mrb[79].mxu0  ;;  %6495 = vmatprep.mubr.msk.bf16.mxu1 %vm7001_vm0, %v7000_v1 }
 0x18e   : > { %6524 = vmatmul.mubr.msk.bf16.gmra.mrb[184].mxu0 %vm469_vm2, %v6927_v54  ;;  %v1666_v21 = vpop.f32.mrb[80].mxu1 }
 0x18f   : > { %6563 = vmatprep.mubr.msk.bf16.mxu0 %vm7001_vm0, %v7000_v1  ;;  %v1693_v0 = vadd.f32 %v1666_v21, %v8059_v29  ;;  %v6209_v25 = vpop.f32.mrb[81].mxu1  ;;  %v6933_v29 = vld [vmem:[%s8740_s3 + $0x2c0] sm:$0xff]   ;;  %v6938_v21 = vld [vmem:[%s8740_s3 + $0x2b0] sm:$0xff]  }
 0x190   : > { %v1669_v50 = vpop.f32.mrb[82].mxu1 }
 0x191   : > { %v1821_v3 = vpop.f32.mrb[80].mxu0  ;;  %v8174_v8 = vadd.f32 %v1813_v37, %v1693_v0  ;;  %v1694_v46 = vadd.f32 %v1669_v50, %v8066_v26  ;;  %v6210_v15 = vpop.f32.mrb[83].mxu1  ;;  %v3622_v26 = vor.u32 %v3621_v14, %v3617_v27  ;;  %v3634_v37 = vrot.slane %v3632_v17, 1 }
 0x192   : > { %v6241_v16 = vpop.f32.mrb[81].mxu0  ;;  %v3801_v50 = vsel %vm678_vm3, %v3798_v5, %v3800_v38  ;;  %v3642_v14 = vrot.slane %v3640_v63, 1 }
 0x193   : > { %v1824_v62 = vpop.f32.mrb[82].mxu0  ;;  %v8184_v10 = vadd.f32 %v1816_v56, %v1694_v46  ;;  %6496 = vmatmul.mubr.msk.bf16.gmra.mrb[188].mxu1 %vm469_vm2, %v3279_v60  ;;  %v3627_v12 = vsel %vm400_vm1, %v3622_v26, %v3626_v23  ;;  %v8245_v60 = vld [vmem:[%s7676_s9 + $0x20] sm:$0xff]  }
 0x194   : > { %v6242_v35 = vpop.f32.mrb[83].mxu0  ;;  %6535 = vmatprep.mubr.msk.bf16.mxu1 %vm7001_vm0, %v7000_v1  ;;  %v3802_v15 = vrot.slane %v8245_v60, 1 }
 0x196   : > { %6564 = vmatmul.mubr.msk.bf16.vlgmr.msra.gmra.mrb[188].mxu0 %vm469_vm2, %v3797_v6  ;;  %v1674_v4 = vpop.f32.mrb[84].mxu1  ;;  %v3928_v6 = vld [vmem:[%s7676_s9 + $0x4] sm:$0xe] }
 0x197   : > { %6612 = vmatpush3.bf16.msra.mxu0 %v6933_v29  ;;  %6567 = vmatprep.mubr.msk.bf16.mxu0 %vm7001_vm0, %v7000_v1  ;;  %v1695_v39 = vadd.f32 %v1674_v4, %v8084_v51  ;;  %v6213_v31 = vpop.f32.mrb[85].mxu1  ;;  %v8264_v29 = vld [vmem:[%s7676_s9 + $0x8] sm:$0xf]  ;;  %v3648_v4 = vshll.u32 %v8245_v60, 16 }
 0x198   : > { %6613 = vmatprep.subr.bf16.mxu0 %v7000_v1  ;;  %v1677_v58 = vpop.f32.mrb[86].mxu1  ;;  %v6942_v31 = vld [vmem:[%s7676_s9 + $0x28] ss:$0 sps:$4 sm:$0x11]  }
 0x199   : > { %v1829_v32 = vpop.f32.mrb[84].mxu0  ;;  %v8204_v19 = vadd.f32 %v1821_v3, %v1695_v39  ;;  %v1696_v51 = vadd.f32 %v1677_v58, %v8091_v36  ;;  %v6214_v55 = vpop.f32.mrb[87].mxu1  ;;  %v3630_v36 = vor.u32 %v3628_v40, %v3626_v23  ;;  %v3644_v23 = vshrl.u32 %v8209_v9, 16 }
 0x19a   : > { %v6245_v22 = vpop.f32.mrb[85].mxu0  ;;  %v3804_v55 = vrot.slane %v6942_v31, 1 }
 0x19b   : > { %v1832_v42 = vpop.f32.mrb[86].mxu0  ;;  %6614 = vmatpush3.bf16.msra.mxu0 %v6936_v24  ;;  %v8214_v47 = vadd.f32 %v1824_v62, %v1696_v51  ;;  %6536 = vmatmul.mubr.msk.bf16.vlgmr.msra.gmra.mrb[192].mxu1 %vm469_vm2, %v3627_v12  ;;  %v3635_v57 = vsel %vm400_vm1, %v3630_v36, %v3634_v37  ;;  %v3803_v12 = vsel %vm678_vm3, %v3800_v38, %v3802_v15  ;;  %v3650_v51 = vrot.slane %v3648_v4, 1 }
 0x19c   : > { %v6246_v41 = vpop.f32.mrb[87].mxu0  ;;  %6615 = vmatprep.subr.bf16.mxu0 %v7000_v1  ;;  %6584 = vmatpush3.bf16.msra.mxu1 %v6932_v30  ;;  %v8276_v30 = vcombine.low %v3928_v6, %v8264_v29  ;;  %v3652_v38 = vshrl.u32 %v8245_v60, 16 }
 0x19d   : > { %6539 = vmatprep.mubr.msk.bf16.mxu1 %vm7001_vm0, %v7000_v1  ;;  %6585 = vmatprep.subr.bf16.mxu1 %v7000_v1 }
 0x19e   : > { %6568 = vmatmul.mubr.msk.bf16.gmra.mrb[192].mxu0 %vm469_vm2, %v3799_v28  ;;  %v1682_v44 = vpop.f32.mrb[88].mxu1  ;;  %v4126_v28 = vshll.u32 %v8276_v30, 16 }
 0x19f   : > { %6571 = vmatprep.mubr.msk.bf16.mxu0 %vm7001_vm0, %v7000_v1  ;;  %6616 = vmatpush3.bf16.msra.mxu0 %v6939_v34  ;;  %v1697_v54 = vadd.f32 %v1682_v44, %v8114_v52  ;;  %v6217_v56 = vpop.f32.mrb[89].mxu1 }
 0x1a0   : > { %6617 = vmatprep.subr.bf16.mxu0 %v7000_v1  ;;  %v1685_v53 = vpop.f32.mrb[90].mxu1  ;;  %6586 = vmatpush3.bf16.msra.mxu1 %v6935_v48 }
 0x1a1   : > { %v2177_v13 = vpop.f32.mrb[88].mxu0  ;;  %v8239_v20 = vadd.f32 %v1829_v32, %v1697_v54  ;;  %v1698_v52 = vadd.f32 %v1685_v53, %v8119_v18  ;;  %v6218_v45 = vpop.f32.mrb[91].mxu1  ;;  %6587 = vmatprep.subr.bf16.mxu1 %v7000_v1  ;;  %v3638_v18 = vor.u32 %v3636_v59, %v3634_v37  ;;  %v8279_v32 = vld [vmem:[%s7676_s9 + $0xc] sm:$0xff]  }
 0x1a2   : > { %v6285_v0 = vpop.f32.mrb[89].mxu0  ;;  %v4131_v9 = vshrl.u32 %v8279_v32, 16  ;;  %v4134_v34 = vshll.u32 %v8279_v32, 16  ;;  %v8301_v45 = vld [vmem:[%s7676_s9 + $0x14] sm:$0xff]  }
 0x1a3   : > { %v2180_v25 = vpop.f32.mrb[90].mxu0  ;;  %6618 = vmatpush3.bf16.msra.mxu0 %v6943_v49  ;;  %v8247_v3 = vadd.f32 %v1832_v42, %v1698_v52  ;;  %6540 = vmatmul.mubr.msk.bf16.gmra.mrb[196].mxu1 %vm469_vm2, %v3635_v57  ;;  %v3643_v35 = vsel %vm400_vm1, %v3638_v18, %v3642_v14  ;;  %v4123_v42 = vshrl.u32 %v8276_v30, 16  ;;  %v3656_v49 = vshll.u32 %v6942_v31, 16  ;;  %v8323_v31 = vld [vmem:[%s7676_s9 + $0x1c] sm:$0xff]  }
 0x1a4   : > { %v6286_v27 = vpop.f32.mrb[91].mxu0  ;;  %6667 = vmatprep.subr.bf16.mxu0 %v7000_v1  ;;  %6543 = vmatprep.mubr.msk.bf16.mxu1 %vm7001_vm0, %v7000_v1  ;;  %v4136_v52 = vrot.slane %v4134_v34, 2 }
 0x1a5   : > { %6588 = vmatpush3.bf16.msra.mxu1 %v6938_v21  ;;  %v4125_v63 = vrot.slane %v4123_v42, 1  ;;  %v4133_v21 = vrot.slane %v4131_v9, 1  ;;  %v4152_v42 = vshll.u32 %v8323_v31, 16 }
 0x1a6   : > { %6572 = vmatmul.mubr.msk.bf16.gmra.mrb[196].mxu0 %vm469_vm2, %v3801_v50  ;;  %6589 = vmatprep.subr.bf16.mxu1 %v7000_v1  ;;  %v1963_v46 = vpop.f32.mrb[92].mxu1  ;;  %v3658_v50 = vrot.slane %v3656_v49, 1 }
 0x1a7   : > { %6575 = vmatprep.mubr.msk.bf16.mxu0 %vm7001_vm0, %v7000_v1  ;;  %v2002_v16 = vadd.f32 %v1963_v46, %v8135_v33  ;;  %v6257_v62 = vpop.f32.mrb[93].mxu1  ;;  %v4137_v18 = vor.u32 %v4136_v52, %v4133_v21 }
 0x1a8   : > { %v1966_v2 = vpop.f32.mrb[94].mxu1 }
 0x1a9   : > { %v2185_v26 = vpop.f32.mrb[92].mxu0  ;;  %6590 = vmatpush3.bf16.msra.mxu1 %v6941_v11  ;;  %v8269_v5 = vadd.f32 %v2177_v13, %v2002_v16  ;;  %v2003_v24 = vadd.f32 %v1966_v2, %v8140_v43  ;;  %v6258_v39 = vpop.f32.mrb[95].mxu1  ;;  %v3646_v43 = vor.u32 %v3644_v23, %v3642_v14  ;;  %v3805_v13 = vsel %vm678_vm3, %v3802_v15, %v3804_v55  ;;  %v6950_v55 = vld [vmem:[%s8740_s3 + $0x308] sm:$0xff]  }
 0x1aa   : > { %v6289_v33 = vpop.f32.mrb[93].mxu0  ;;  %6639 = vmatprep.subr.bf16.mxu1 %v7000_v1  ;;  %v4140_v14 = vshrl.u32 %v8301_v45, 16  ;;  %v4143_v11 = vshll.u32 %v8301_v45, 16  ;;  %v6947_v39 = vld [vmem:[%s8740_s3 + $0x300] sm:$0xff]  }
 0x1ab   : > { %v2188_v58 = vpop.f32.mrb[94].mxu0  ;;  %v8281_v40 = vadd.f32 %v2180_v25, %v2003_v24  ;;  %6544 = vmatmul.mubr.msk.bf16.gmra.mrb[200].mxu1 %vm469_vm2, %v3643_v35  ;;  %v3651_v48 = vsel %vm400_vm1, %v3646_v43, %v3650_v51 }
 0x1ac   : > { %v6290_v17 = vpop.f32.mrb[95].mxu0  ;;  %6547 = vmatprep.mubr.msk.bf16.mxu1 %vm7001_vm0, %v7000_v1  ;;  %v4142_v33 = vrot.slane %v4140_v14, 1 }
 0x1ad   : > { %v3977_v17 = vrot.slane %v8279_v32, 1 }
 0x1ae   : > { %6576 = vmatmul.mubr.msk.bf16.gmra.mrb[200].mxu0 %vm469_vm2, %v3803_v12  ;;  %v1971_v22 = vpop.f32.mrb[96].mxu1 }
 0x1af   : > { %6579 = vmatprep.mubr.msk.bf16.mxu0 %vm7001_vm0, %v7000_v1  ;;  %v2004_v41 = vadd.f32 %v1971_v22, %v8154_v7  ;;  %v6261_v36 = vpop.f32.mrb[97].mxu1  ;;  %v4128_v7 = vrot.slane %v4126_v28, 2  ;;  %v4149_v22 = vshrl.u32 %v8323_v31, 16 }
 0x1b0   : > { %v1974_v37 = vpop.f32.mrb[98].mxu1 }
 0x1b1   : > { %v2193_v44 = vpop.f32.mrb[96].mxu0  ;;  %v8296_v54 = vadd.f32 %v2185_v26, %v2004_v41  ;;  %v2005_v56 = vadd.f32 %v1974_v37, %v8161_v61  ;;  %v6262_v53 = vpop.f32.mrb[99].mxu1  ;;  %v3654_v61 = vor.u32 %v3652_v38, %v3650_v51  ;;  %v4129_v27 = vor.u32 %v4128_v7, %v4125_v63  ;;  %v6946_v41 = vld [vmem:[%s8740_s3 + $0x2e0] sm:$0xff]   ;;  %v6949_v7 = vld [vmem:[%s8740_s3 + $0x2e8] sm:$0xff]  }
 0x1b2   : > { %v6293_v57 = vpop.f32.mrb[97].mxu0  ;;  %v4154_v53 = vrot.slane %v4152_v42, 2 }
 0x1b3   : > { %v2196_v59 = vpop.f32.mrb[98].mxu0  ;;  %v8303_v0 = vadd.f32 %v2188_v58, %v2005_v56  ;;  %6548 = vmatmul.mubr.msk.bf16.gmra.mrb[204].mxu1 %vm469_vm2, %v3651_v48  ;;  %v3659_v62 = vsel %vm400_vm1, %v3654_v61, %v3658_v50  ;;  %v4138_v24 = vsel %vm1006_vm4, %v4129_v27, %v4137_v18  ;;  %v4151_v56 = vrot.slane %v4149_v22, 1  ;;  %v6953_v57 = vld [vmem:[%s8740_s3 + $0x310] sm:$0xff]   ;;  %v6958_v50 = vld [vmem:[%s8740_s3 + $0x318] sm:$0xff]  }
 0x1b4   : > { %v6294_v25 = vpop.f32.mrb[99].mxu0  ;;  %6551 = vmatprep.mubr.msk.bf16.mxu1 %vm7001_vm0, %v7000_v1 }
 0x1b5   : > { %v4155_v52 = vor.u32 %v4154_v53, %v4151_v56 }
 0x1b6   : > { %6580 = vmatmul.mubr.msk.bf16.gmra.mrb[204].mxu0 %vm469_vm2, %v3805_v13  ;;  %v1979_v60 = vpop.f32.mrb[100].mxu1  ;;  %v8354_v13 = vld [vmem:[%s7676_s9 + $0x24] sm:$0xff]  }
 0x1b7   : > { %6619 = vmatprep.mubr.msk.bf16.mxu0 %vm7001_vm0, %v7000_v1  ;;  %v2006_v46 = vadd.f32 %v1979_v60, %v8174_v8  ;;  %v6265_v15 = vpop.f32.mrb[101].mxu1  ;;  %v4145_v8 = vrot.slane %v4143_v11, 2  ;;  %v4158_v25 = vshrl.u32 %v8354_v13, 16  ;;  %v4161_v61 = vshll.u32 %v8354_v13, 16 }
 0x1b8   : > { %v1982_v16 = vpop.f32.mrb[102].mxu1 }
 0x1b9   : > { %v2201_v6 = vpop.f32.mrb[100].mxu0  ;;  %v8315_v2 = vadd.f32 %v2193_v44, %v2006_v46  ;;  %v2007_v35 = vadd.f32 %v1982_v16, %v8184_v10  ;;  %v6266_v26 = vpop.f32.mrb[103].mxu1  ;;  %v3976_v10 = vrot.slane %v8276_v30, 1  ;;  %v4146_v51 = vor.u32 %v4145_v8, %v4142_v33  ;;  %v6952_v46 = vld [vmem:[%s8740_s3 + $0x2f0] sm:$0xff]   ;;  %v6955_v33 = vld [vmem:[%s8740_s3 + $0x2f8] sm:$0xff]  }
 0x1ba   : > { %v6297_v23 = vpop.f32.mrb[101].mxu0  ;;  %v4160_v26 = vrot.slane %v4158_v25, 1 }
 0x1bb   : > { %v2204_v4 = vpop.f32.mrb[102].mxu0  ;;  %v8325_v58 = vadd.f32 %v2196_v59, %v2007_v35  ;;  %6552 = vmatmul.mubr.msk.bf16.gmra.mrb[208].mxu1 %vm469_vm2, %v3659_v62  ;;  %v3978_v34 = vsel %vm678_vm3, %v3976_v10, %v3977_v17  ;;  %v4156_v35 = vsel %vm1006_vm4, %v4146_v51, %v4155_v52  ;;  %v4163_v23 = vrot.slane %v4161_v61, 2 }
 0x1bc   : > { %v6298_v12 = vpop.f32.mrb[103].mxu0  ;;  %6591 = vmatprep.mubr.msk.bf16.mxu1 %vm7001_vm0, %v7000_v1 }
 0x1bd   : > { %v4164_v12 = vor.u32 %v4163_v23, %v4160_v26 }
 0x1be   : > { %6620 = vmatmul.mubr.msk.bf16.vlgmr.msra.gmra.mrb[208].mxu0 %vm469_vm2, %v4138_v24  ;;  %v1987_v43 = vpop.f32.mrb[104].mxu1 }
 0x1bf   : > { %6668 = vmatpush3.bf16.msra.mxu0 %v6947_v39  ;;  %6623 = vmatprep.mubr.msk.bf16.mxu0 %vm7001_vm0, %v7000_v1  ;;  %v2008_v30 = vadd.f32 %v1987_v43, %v8204_v19  ;;  %v6269_v28 = vpop.f32.mrb[105].mxu1  ;;  %v4147_v19 = vsel %vm1006_vm4, %v4137_v18, %v4146_v51 }
 0x1c0   : > { %6669 = vmatprep.subr.bf16.mxu0 %v7000_v1  ;;  %v1990_v9 = vpop.f32.mrb[106].mxu1 }
 0x1c1   : > { %v2209_v36 = vpop.f32.mrb[104].mxu0  ;;  %v8346_v37 = vadd.f32 %v2201_v6, %v2008_v30  ;;  %v2009_v48 = vadd.f32 %v1990_v9, %v8214_v47  ;;  %v6270_v44 = vpop.f32.mrb[107].mxu1  ;;  %v3979_v47 = vrot.slane %v8301_v45, 1 }
 0x1c2   : > { %v6301_v38 = vpop.f32.mrb[105].mxu0 }
 0x1c3   : > { %v2212_v49 = vpop.f32.mrb[106].mxu0  ;;  %6670 = vmatpush3.bf16.msra.mxu0 %v6950_v55  ;;  %v8356_v59 = vadd.f32 %v2204_v4, %v2009_v48  ;;  %6592 = vmatmul.mubr.msk.bf16.vlgmr.msra.gmra.mrb[212].mxu1 %vm469_vm2, %v3978_v34  ;;  %v3980_v14 = vsel %vm678_vm3, %v3977_v17, %v3979_v47  ;;  %v8387_v4 = vld [vmem:[%s7676_s9 + $0x2c] ss:$0 sps:$4 sm:$0x33]  }
 0x1c4   : > { %v6302_v63 = vpop.f32.mrb[107].mxu0  ;;  %6671 = vmatprep.subr.bf16.mxu0 %v7000_v1  ;;  %6640 = vmatpush3.bf16.msra.mxu1 %v6946_v41  ;;  %v4167_v10 = vshrl.u32 %v8387_v4, 16  ;;  %v4170_v17 = vshll.u32 %v8387_v4, 16 }
 0x1c5   : > { %6595 = vmatprep.mubr.msk.bf16.mxu1 %vm7001_vm0, %v7000_v1  ;;  %6641 = vmatprep.subr.bf16.mxu1 %v7000_v1  ;;  %v8424_v63 = vld [vmem:[%s7676_s9 + $0xc] sm:$0xf] }
 0x1c6   : > { %6624 = vmatmul.mubr.msk.bf16.gmra.mrb[212].mxu0 %vm469_vm2, %v4147_v19  ;;  %v1995_v21 = vpop.f32.mrb[108].mxu1  ;;  %v4172_v48 = vrot.slane %v4170_v17, 2 }
 0x1c7   : > { %6627 = vmatprep.mubr.msk.bf16.mxu0 %vm7001_vm0, %v7000_v1  ;;  %6672 = vmatpush3.bf16.msra.mxu0 %v6953_v57  ;;  %v2010_v60 = vadd.f32 %v1995_v21, %v8239_v20  ;;  %v6273_v27 = vpop.f32.mrb[109].mxu1  ;;  %v4443_v57 = vld [vmem:[%s7676_s9 + $0x8] sm:$0xc] }
 0x1c8   : > { %6673 = vmatprep.subr.bf16.mxu0 %v7000_v1  ;;  %v1998_v18 = vpop.f32.mrb[110].mxu1  ;;  %6642 = vmatpush3.bf16.msra.mxu1 %v6949_v7 }
 0x1c9   : > { %v2504_v11 = vpop.f32.mrb[108].mxu0  ;;  %v8381_v15 = vadd.f32 %v2209_v36, %v2010_v60  ;;  %v2011_v16 = vadd.f32 %v1998_v18, %v8247_v3  ;;  %v6274_v62 = vpop.f32.mrb[111].mxu1  ;;  %6643 = vmatprep.subr.bf16.mxu1 %v7000_v1  ;;  %v3981_v3 = vrot.slane %v8323_v31, 1  ;;  %v4165_v36 = vsel %vm1006_vm4, %v4155_v52, %v4164_v12  ;;  %v6956_v52 = vld [vmem:[%s7676_s9 + $0x2c] ss:$0 sps:$4 sm:$0x11]  }
 0x1ca   : > { %v6341_v6 = vpop.f32.mrb[109].mxu0 }
 0x1cb   : > { %v2507_v20 = vpop.f32.mrb[110].mxu0  ;;  %6674 = vmatpush3.bf16.msra.mxu0 %v6958_v50  ;;  %v8389_v24 = vadd.f32 %v2212_v49, %v2011_v16  ;;  %6596 = vmatmul.mubr.msk.bf16.gmra.mrb[216].mxu1 %vm469_vm2, %v3980_v14  ;;  %v3982_v22 = vsel %vm678_vm3, %v3979_v47, %v3981_v3  ;;  %v8436_v14 = vld [vmem:[%s7676_s9 + $0x10] sm:$0xff]   ;;  %v3985_v16 = vrot.slane %v6956_v52, 1  ;;  %v6965_v52 = vld [vmem:[%s8740_s3 + $0x328] sm:$0xff]  }
 0x1cc   : > { %v6342_v39 = vpop.f32.mrb[111].mxu0  ;;  %6723 = vmatprep.subr.bf16.mxu0 %v7000_v1  ;;  %6599 = vmatprep.mubr.msk.bf16.mxu1 %vm7001_vm0, %v7000_v1 }
 0x1cd   : > { %6644 = vmatpush3.bf16.msra.mxu1 %v6952_v46 }
 0x1ce   : > { %6628 = vmatmul.mubr.msk.bf16.gmra.mrb[216].mxu0 %vm469_vm2, %v4156_v35  ;;  %6645 = vmatprep.subr.bf16.mxu1 %v7000_v1  ;;  %v2323_v8 = vpop.f32.mrb[112].mxu1 }
 0x1cf   : > { %6631 = vmatprep.mubr.msk.bf16.mxu0 %vm7001_vm0, %v7000_v1  ;;  %v2362_v43 = vadd.f32 %v2323_v8, %v8269_v5  ;;  %v6313_v51 = vpop.f32.mrb[113].mxu1  ;;  %v4169_v5 = vrot.slane %v4167_v10, 1 }
 0x1d0   : > { %v2326_v55 = vpop.f32.mrb[114].mxu1 }
 0x1d1   : > { %v2512_v42 = vpop.f32.mrb[112].mxu0  ;;  %6646 = vmatpush3.bf16.msra.mxu1 %v6955_v33  ;;  %v8407_v30 = vadd.f32 %v2504_v11, %v2362_v43  ;;  %v2363_v28 = vadd.f32 %v2326_v55, %v8281_v40  ;;  %v6314_v9 = vpop.f32.mrb[115].mxu1  ;;  %v3983_v40 = vrot.slane %v8354_v13, 1  ;;  %v4173_v19 = vor.u32 %v4172_v48, %v4169_v5  ;;  %v8460_v55 = vld [vmem:[%s7676_s9 + $0x18] sm:$0xff]   ;;  %v6962_v48 = vld [vmem:[%s8740_s3 + $0x320] sm:$0xff]  }
 0x1d2   : > { %v6345_v34 = vpop.f32.mrb[113].mxu0  ;;  %6695 = vmatprep.subr.bf16.mxu1 %v7000_v1  ;;  %v4494_v9 = vrot.slane %v8460_v55, 2 }
 0x1d3   : > { %v2515_v41 = vpop.f32.mrb[114].mxu0  ;;  %v8412_v44 = vadd.f32 %v2507_v20, %v2363_v28  ;;  %6600 = vmatmul.mubr.msk.bf16.gmra.mrb[220].mxu1 %vm469_vm2, %v3982_v22  ;;  %v3984_v7 = vsel %vm678_vm3, %v3981_v3, %v3983_v40  ;;  %v4174_v18 = vsel %vm1006_vm4, %v4164_v12, %v4173_v19  ;;  %v4492_v20 = vrot.slane %v8436_v14, 2  ;;  %v6966_v34 = vld [vmem:[%s8740_s3 + $0x348] sm:$0xff]  }
 0x1d4   : > { %v6346_v38 = vpop.f32.mrb[115].mxu0  ;;  %6603 = vmatprep.mubr.msk.bf16.mxu1 %vm7001_vm0, %v7000_v1  ;;  %v3986_v39 = vsel %vm678_vm3, %v3983_v40, %v3985_v16 }
 0x1d6   : > { %6632 = vmatmul.mubr.msk.bf16.gmra.mrb[220].mxu0 %vm469_vm2, %v4165_v36  ;;  %v2331_v49 = vpop.f32.mrb[116].mxu1 }
 0x1d7   : > { %6635 = vmatprep.mubr.msk.bf16.mxu0 %vm7001_vm0, %v7000_v1  ;;  %v2364_v56 = vadd.f32 %v2331_v49, %v8296_v54  ;;  %v6317_v53 = vpop.f32.mrb[117].mxu1  ;;  %v8433_v54 = vcombine.low %v4443_v57, %v8424_v63  ;;  %v8486_v57 = vld [vmem:[%s7676_s9 + $0x20] sm:$0xff]  }
 0x1d8   : > { %v2334_v47 = vpop.f32.mrb[118].mxu1 }
 0x1d9   : > { %v2520_v21 = vpop.f32.mrb[116].mxu0  ;;  %v8428_v25 = vadd.f32 %v2512_v42, %v2364_v56  ;;  %v2365_v61 = vadd.f32 %v2334_v47, %v8303_v0  ;;  %v6318_v50 = vpop.f32.mrb[119].mxu1  ;;  %v4297_v0 = vld [vmem:[%s7676_s9 + $0x4] sm:$0xc]  ;;  %v4491_v6 = vrot.slane %v8433_v54, 2  ;;  %v4311_v42 = vrot.slane %v8279_v32, 2 }
 0x1da   : > { %v6349_v60 = vpop.f32.mrb[117].mxu0  ;;  %v5660_v33 = vcombine.low %v4297_v0, %v8264_v29  ;;  %v6969_v47 = vld [vmem:[%s8740_s3 + $0x350] sm:$0xff]   ;;  %v4496_v50 = vrot.slane %v8486_v57, 2 }
 0x1db   : > { %v2523_v27 = vpop.f32.mrb[118].mxu0  ;;  %v8438_v11 = vadd.f32 %v2515_v41, %v2365_v61  ;;  %6604 = vmatmul.mubr.msk.bf16.gmra.mrb[224].mxu1 %vm469_vm2, %v3984_v7  ;;  %v4493_v51 = vsel %vm1195_vm5, %v4491_v6, %v4492_v20  ;;  %v6973_v60 = vld [vmem:[%s8740_s3 + $0x358] sm:$0xff]   ;;  %v6968_v0 = vld [vmem:[%s8740_s3 + $0x330] sm:$0xff]  }
 0x1dc   : > { %v6350_v46 = vpop.f32.mrb[119].mxu0  ;;  %6607 = vmatprep.mubr.msk.bf16.mxu1 %vm7001_vm0, %v7000_v1 }
 0x1de   : > { %6636 = vmatmul.mubr.msk.bf16.gmra.mrb[224].mxu0 %vm469_vm2, %v4174_v18  ;;  %v2339_v62 = vpop.f32.mrb[120].mxu1 }
 0x1df   : > { %6675 = vmatprep.mubr.msk.bf16.mxu0 %vm7001_vm0, %v7000_v1  ;;  %v2366_v35 = vadd.f32 %v2339_v62, %v8315_v2  ;;  %v6321_v26 = vpop.f32.mrb[121].mxu1  ;;  %v6963_v2 = vld [vmem:[%s8740_s3 + $0x340] sm:$0xff]  }
 0x1e0   : > { %v2342_v23 = vpop.f32.mrb[122].mxu1  ;;  %v4497_v26 = vsel %vm1195_vm5, %v4494_v9, %v4496_v50 }
 0x1e1   : > { %v2528_v3 = vpop.f32.mrb[120].mxu0  ;;  %v8452_v8 = vadd.f32 %v2520_v21, %v2366_v35  ;;  %v2367_v12 = vadd.f32 %v2342_v23, %v8325_v58  ;;  %v6322_v10 = vpop.f32.mrb[123].mxu1  ;;  %v4310_v58 = vrot.slane %v5660_v33, 2  ;;  %v8521_v23 = vld [vmem:[%s7676_s9 + $0x28] sm:$0xff]   ;;  %v6971_v33 = vld [vmem:[%s8740_s3 + $0x338] sm:$0xff]  }
 0x1e2   : > { %v6353_v17 = vpop.f32.mrb[121].mxu0  ;;  %v4498_v10 = vrot.slane %v8521_v23, 2 }
 0x1e3   : > { %v2531_v43 = vpop.f32.mrb[122].mxu0  ;;  %v8462_v22 = vadd.f32 %v2523_v27, %v2367_v12  ;;  %6608 = vmatmul.mubr.msk.bf16.gmra.mrb[228].mxu1 %vm469_vm2, %v3986_v39  ;;  %v4312_v5 = vsel %vm1195_vm5, %v4310_v58, %v4311_v42 }
 0x1e4   : > { %v6354_v29 = vpop.f32.mrb[123].mxu0  ;;  %6647 = vmatprep.mubr.msk.bf16.mxu1 %vm7001_vm0, %v7000_v1 }
 0x1e6   : > { %6676 = vmatmul.mubr.msk.bf16.vlgmr.msra.gmra.mrb[228].mxu0 %vm469_vm2, %v4493_v51  ;;  %v2347_v28 = vpop.f32.mrb[124].mxu1 }
 0x1e7   : > { %6724 = vmatpush3.bf16.msra.mxu0 %v6963_v2  ;;  %6679 = vmatprep.mubr.msk.bf16.mxu0 %vm7001_vm0, %v7000_v1  ;;  %v2368_v41 = vadd.f32 %v2347_v28, %v8346_v37  ;;  %v6325_v36 = vpop.f32.mrb[125].mxu1  ;;  %v4495_v37 = vsel %vm1195_vm5, %v4492_v20, %v4494_v9 }
 0x1e8   : > { %6725 = vmatprep.subr.bf16.mxu0 %v7000_v1  ;;  %v2350_v32 = vpop.f32.mrb[126].mxu1 }
 0x1e9   : > { %v2536_v38 = vpop.f32.mrb[124].mxu0  ;;  %v8481_v40 = vadd.f32 %v2528_v3, %v2368_v41  ;;  %v2369_v49 = vadd.f32 %v2350_v32, %v8356_v59  ;;  %v6326_v19 = vpop.f32.mrb[127].mxu1  ;;  %v4313_v59 = vrot.slane %v8301_v45, 2  ;;  %v6972_v41 = vld [vmem:[%s7676_s9 + $0x30] ss:$0 sps:$4 sm:$0x33]  }
 0x1ea   : > { %v6357_v56 = vpop.f32.mrb[125].mxu0  ;;  %v4317_v32 = vrot.slane %v8354_v13, 2 }
 0x1eb   : > { %v2539_v53 = vpop.f32.mrb[126].mxu0  ;;  %6726 = vmatpush3.bf16.msra.mxu0 %v6966_v34  ;;  %v8491_v7 = vadd.f32 %v2531_v43, %v2369_v49  ;;  %6648 = vmatmul.mubr.msk.bf16.vlgmr.msra.gmra.mrb[232].mxu1 %vm469_vm2, %v4312_v5  ;;  %v4314_v46 = vsel %vm1195_vm5, %v4311_v42, %v4313_v59  ;;  %v4499_v34 = vsel %vm1195_vm5, %v4496_v50, %v4498_v10  ;;  %v4500_v5 = vrot.slane %v6972_v41, 2  ;;  %v4812_v49 = vld [vmem:[%s7676_s9 + $0x8] sm:$0x8] }
 0x1ec   : > { %v6358_v21 = vpop.f32.mrb[127].mxu0  ;;  %6727 = vmatprep.subr.bf16.mxu0 %v7000_v1  ;;  %6696 = vmatpush3.bf16.msra.mxu1 %v6962_v48 }
 0x1ed   : > { %6651 = vmatprep.mubr.msk.bf16.mxu1 %vm7001_vm0, %v7000_v1  ;;  %6697 = vmatprep.subr.bf16.mxu1 %v7000_v1 }
 0x1ee   : > { %6680 = vmatmul.mubr.msk.bf16.gmra.mrb[232].mxu0 %vm469_vm2, %v4495_v37  ;;  %v2355_v61 = vpop.f32.mrb[128].mxu1 }
 0x1ef   : > { %6683 = vmatprep.mubr.msk.bf16.mxu0 %vm7001_vm0, %v7000_v1  ;;  %6728 = vmatpush3.bf16.msra.mxu0 %v6969_v47  ;;  %v2370_v45 = vadd.f32 %v2355_v61, %v8381_v15  ;;  %v6329_v27 = vpop.f32.mrb[129].mxu1  ;;  %v5719_v61 = vcombine.low %v4812_v49, %v8424_v63 }
 0x1f0   : > { %6729 = vmatprep.subr.bf16.mxu0 %v7000_v1  ;;  %v2358_v18 = vpop.f32.mrb[130].mxu1  ;;  %6698 = vmatpush3.bf16.msra.mxu1 %v6965_v52  ;;  %v4501_v52 = vsel %vm1195_vm5, %v4498_v10, %v4500_v5  ;;  %v4646_v27 = vshrl.u32 %v8436_v14, 16 }
 0x1f1   : > { %v2838_v16 = vpop.f32.mrb[128].mxu0  ;;  %v8515_v62 = vadd.f32 %v2536_v38, %v2370_v45  ;;  %v2371_v6 = vadd.f32 %v2358_v18, %v8389_v24  ;;  %v6330_v20 = vpop.f32.mrb[131].mxu1  ;;  %6699 = vmatprep.subr.bf16.mxu1 %v7000_v1  ;;  %v4315_v24 = vrot.slane %v8323_v31, 2  ;;  %v4638_v45 = vshrl.u32 %v8433_v54, 16 }
 0x1f2   : > { %v6397_v35 = vpop.f32.mrb[129].mxu0  ;;  %v4649_v18 = vshll.u32 %v8436_v14, 16 }
 0x1f3   : > { %v2841_v15 = vpop.f32.mrb[130].mxu0  ;;  %6730 = vmatpush3.bf16.msra.mxu0 %v6973_v60  ;;  %v8523_v39 = vadd.f32 %v2539_v53, %v2371_v6  ;;  %6652 = vmatmul.mubr.msk.bf16.gmra.mrb[236].mxu1 %vm469_vm2, %v4314_v46  ;;  %v4316_v51 = vsel %vm1195_vm5, %v4313_v59, %v4315_v24  ;;  %v4318_v56 = vsel %vm1195_vm5, %v4315_v24, %v4317_v32  ;;  %v4319_v60 = vrot.slane %v8387_v4, 2 }
 0x1f4   : > { %v6398_v3 = vpop.f32.mrb[131].mxu0  ;;  %6655 = vmatprep.mubr.msk.bf16.mxu1 %vm7001_vm0, %v7000_v1  ;;  %6700 = vmatpush3.bf16.msra.mxu1 %v6968_v0  ;;  %v4825_v46 = vrot.slane %v5719_v61, 3  ;;  %v4826_v4 = vrot.slane %v8436_v14, 3  ;;  %v4640_v35 = vrot.slane %v4638_v45, 2 }
 0x1f5   : > { %6701 = vmatprep.subr.bf16.mxu1 %v7000_v1  ;;  %v4320_v6 = vsel %vm1195_vm5, %v4317_v32, %v4319_v60  ;;  %v4651_v3 = vrot.slane %v4649_v18, 3 }
 0x1f6   : > { %6684 = vmatmul.mubr.msk.bf16.gmra.mrb[236].mxu0 %vm469_vm2, %v4497_v26  ;;  %v2692_v12 = vpop.f32.mrb[132].mxu1  ;;  %v4648_v26 = vrot.slane %v4646_v27, 2  ;;  %v4827_v14 = vsel %vm1712_vm6, %v4825_v46, %v4826_v4 }
 0x1f7   : > { %6687 = vmatprep.mubr.msk.bf16.mxu0 %vm7001_vm0, %v7000_v1  ;;  %v2731_v17 = vadd.f32 %v2692_v12, %v8407_v30  ;;  %v6369_v43 = vpop.f32.mrb[133].mxu1 }
 0x1f8   : > { %v2695_v31 = vpop.f32.mrb[134].mxu1  ;;  %6702 = vmatpush3.bf16.msra.mxu1 %v6971_v33 }
 0x1f9   : > { %v2846_v2 = vpop.f32.mrb[132].mxu0  ;;  %v8539_v29 = vadd.f32 %v2838_v16, %v2731_v17  ;;  %v2732_v58 = vadd.f32 %v2695_v31, %v8412_v44  ;;  %v6370_v42 = vpop.f32.mrb[135].mxu1 }
 0x1fa   : > { %v6401_v28 = vpop.f32.mrb[133].mxu0  ;;  %v4828_v42 = vrot.slane %v8460_v55, 3 }
 0x1fb   : > { %v2849_v9 = vpop.f32.mrb[134].mxu0  ;;  %v8544_v36 = vadd.f32 %v2841_v15, %v2732_v58  ;;  %6656 = vmatmul.mubr.msk.bf16.gmra.mrb[240].mxu1 %vm469_vm2, %v4316_v51  ;;  %v4652_v51 = vor.u32 %v4651_v3, %v4648_v26  ;;  %v4658_v58 = vshll.u32 %v8460_v55, 16 }
 0x1fc   : > { %v6402_v30 = vpop.f32.mrb[135].mxu0  ;;  %6659 = vmatprep.mubr.msk.bf16.mxu1 %vm7001_vm0, %v7000_v1 }
 0x1fe   : > { %6688 = vmatmul.mubr.msk.bf16.gmra.mrb[240].mxu0 %vm469_vm2, %v4499_v34  ;;  %v2700_v44 = vpop.f32.mrb[136].mxu1 }
 0x1ff   : > { %6691 = vmatprep.mubr.msk.bf16.mxu0 %vm7001_vm0, %v7000_v1  ;;  %v2733_v48 = vadd.f32 %v2700_v44, %v8428_v25  ;;  %v6373_v38 = vpop.f32.mrb[137].mxu1  ;;  %v4660_v44 = vrot.slane %v4658_v58, 3 }
 0x200   : > { %v2703_v19 = vpop.f32.mrb[138].mxu1 }
 0x201   : > { %v2854_v53 = vpop.f32.mrb[136].mxu0  ;;  %v8556_v37 = vadd.f32 %v2846_v2, %v2733_v48  ;;  %v2734_v47 = vadd.f32 %v2703_v19, %v8438_v11  ;;  %v6374_v13 = vpop.f32.mrb[139].mxu1  ;;  %v4641_v11 = vshll.u32 %v8433_v54, 16  ;;  %v4655_v2 = vshrl.u32 %v8460_v55, 16 }
 0x202   : > { %v6405_v21 = vpop.f32.mrb[137].mxu0  ;;  %v4667_v13 = vshll.u32 %v8486_v57, 16 }
 0x203   : > { %v2857_v59 = vpop.f32.mrb[138].mxu0  ;;  %v8561_v50 = vadd.f32 %v2849_v9, %v2734_v47  ;;  %6660 = vmatmul.mubr.msk.bf16.gmra.mrb[244].mxu1 %vm469_vm2, %v4318_v56  ;;  %v4643_v15 = vrot.slane %v4641_v11, 3  ;;  %v4657_v32 = vrot.slane %v4655_v2, 2  ;;  %v4829_v56 = vsel %vm1712_vm6, %v4826_v4, %v4828_v42 }
 0x204   : > { %v6406_v25 = vpop.f32.mrb[139].mxu0  ;;  %6663 = vmatprep.mubr.msk.bf16.mxu1 %vm7001_vm0, %v7000_v1  ;;  %v4664_v47 = vshrl.u32 %v8486_v57, 16  ;;  %v4830_v21 = vrot.slane %v8486_v57, 3  ;;  %v4669_v11 = vrot.slane %v4667_v13, 3 }
 0x205   : > { %v4644_v31 = vor.u32 %v4643_v15, %v4640_v35 }
 0x206   : > { %6692 = vmatmul.mubr.msk.bf16.gmra.mrb[244].mxu0 %vm469_vm2, %v4501_v52  ;;  %v2708_v63 = vpop.f32.mrb[140].mxu1  ;;  %v4666_v45 = vrot.slane %v4664_v47, 2  ;;  %v4831_v57 = vsel %vm1712_vm6, %v4828_v42, %v4830_v21 }
 0x207   : > { %6731 = vmatprep.mubr.msk.bf16.mxu0 %vm7001_vm0, %v7000_v1  ;;  %v2735_v16 = vadd.f32 %v2708_v63, %v8452_v8  ;;  %v6377_v0 = vpop.f32.mrb[141].mxu1  ;;  %v4653_v41 = vsel %vm1523_vm7, %v4644_v31, %v4652_v51 }
 0x208   : > { %v2711_v20 = vpop.f32.mrb[142].mxu1  ;;  %v4673_v0 = vshrl.u32 %v8521_v23, 16 }
 0x209   : > { %v2862_v54 = vpop.f32.mrb[140].mxu0  ;;  %v8577_v24 = vadd.f32 %v2854_v53, %v2735_v16  ;;  %v2736_v33 = vadd.f32 %v2711_v20, %v8462_v22  ;;  %v6378_v12 = vpop.f32.mrb[143].mxu1  ;;  %v4676_v20 = vshll.u32 %v8521_v23, 16 }
 0x20a   : > { %v6409_v10 = vpop.f32.mrb[141].mxu0  ;;  %v4675_v26 = vrot.slane %v4673_v0, 2 }
 0x20b   : > { %v2865_v17 = vpop.f32.mrb[142].mxu0  ;;  %v8581_v43 = vadd.f32 %v2857_v59, %v2736_v33  ;;  %6664 = vmatmul.mubr.msk.bf16.gmra.mrb[248].mxu1 %vm469_vm2, %v4320_v6  ;;  %v4670_v6 = vor.u32 %v4669_v11, %v4666_v45  ;;  %v4678_v10 = vrot.slane %v4676_v20, 3 }
 0x20c   : > { %v6410_v8 = vpop.f32.mrb[143].mxu0  ;;  %6703 = vmatprep.mubr.msk.bf16.mxu1 %vm7001_vm0, %v7000_v1 }
 0x20e   : > { %6732 = vmatmul.mubr.msk.bf16.vlgmr.msra.gmra.mrb[248].mxu0 %vm469_vm2, %v4827_v14  ;;  %v2716_v22 = vpop.f32.mrb[144].mxu1 }
 0x20f   : > { %6735 = vmatprep.mubr.msk.bf16.mxu0 %vm7001_vm0, %v7000_v1  ;;  %v2737_v28 = vadd.f32 %v2716_v22, %v8481_v40  ;;  %v6381_v9 = vpop.f32.mrb[145].mxu1  ;;  %v4661_v40 = vor.u32 %v4660_v44, %v4657_v32  ;;  %v4679_v22 = vor.u32 %v4678_v10, %v4675_v26 }
 0x210   : > { %v2719_v34 = vpop.f32.mrb[146].mxu1 }
 0x211   : > { %v2870_v30 = vpop.f32.mrb[144].mxu0  ;;  %v8594_v5 = vadd.f32 %v2862_v54, %v2737_v28  ;;  %v2738_v48 = vadd.f32 %v2719_v34, %v8491_v7  ;;  %v6382_v38 = vpop.f32.mrb[147].mxu1  ;;  %v4662_v25 = vsel %vm1523_vm7, %v4652_v51, %v4661_v40  ;;  %v4832_v54 = vrot.slane %v8521_v23, 3 }
 0x212   : > { %v6413_v49 = vpop.f32.mrb[145].mxu0  ;;  %v4671_v33 = vsel %vm1523_vm7, %v4661_v40, %v4670_v6  ;;  %v4680_v32 = vsel %vm1523_vm7, %v4670_v6, %v4679_v22 }
 0x213   : > { %v2873_v19 = vpop.f32.mrb[146].mxu0  ;;  %v8598_v53 = vadd.f32 %v2865_v17, %v2738_v48  ;;  %6704 = vmatmul.mubr.msk.bf16.vlgmr.msra.gmra.mrb[252].mxu1 %vm469_vm2, %v4653_v41  ;;  %v6975_v17 = vld [vmem:[%s7676_s9 + $0x30] ss:$0 sps:$4 sm:$0x77]   ;;  %v4833_v58 = vsel %vm1712_vm6, %v4830_v21, %v4832_v54 }
 0x214   : > { %v6414_v55 = vpop.f32.mrb[147].mxu0  ;;  %6707 = vmatprep.mubr.msk.bf16.mxu1 %vm7001_vm0, %v7000_v1  ;;  %v4682_v42 = vshrl.u32 %v6975_v17, 16  ;;  %v4685_v28 = vshll.u32 %v6975_v17, 16 }
 0x216   : > { %6736 = vmatmul.mubr.msk.bf16.gmra.mrb[252].mxu0 %vm469_vm2, %v4829_v56  ;;  %v2724_v7 = vpop.f32.mrb[148].mxu1  ;;  %v4684_v48 = vrot.slane %v4682_v42, 2  ;;  %v4687_v38 = vrot.slane %v4685_v28, 3 }
 0x217   : > { %6739 = vmatprep.mubr.msk.bf16.mxu0 %vm7001_vm0, %v7000_v1  ;;  %v2739_v59 = vadd.f32 %v2724_v7, %v8515_v62  ;;  %v6385_v52 = vpop.f32.mrb[149].mxu1 }
 0x218   : > { %v2727_v61 = vpop.f32.mrb[150].mxu1  ;;  %v4688_v7 = vor.u32 %v4687_v38, %v4684_v48 }
 0x219   : > { %v3207_v60 = vpop.f32.mrb[148].mxu0  ;;  %v8611_v27 = vadd.f32 %v2870_v30, %v2739_v59  ;;  %v2740_v18 = vadd.f32 %v2727_v61, %v8523_v39  ;;  %v6386_v63 = vpop.f32.mrb[151].mxu1 }
 0x21a   : > { %v6453_v46 = vpop.f32.mrb[149].mxu0  ;;  %v4689_v61 = vsel %vm1523_vm7, %v4679_v22, %v4688_v7 }
 0x21b   : > { %v3210_v4 = vpop.f32.mrb[150].mxu0  ;;  %v8615_v16 = vadd.f32 %v2873_v19, %v2740_v18  ;;  %6708 = vmatmul.mubr.msk.bf16.gmra.mrb[0].mxu1 %vm469_vm2, %v4662_v25 }
 0x21c   : > { %v6454_v62 = vpop.f32.mrb[151].mxu0  ;;  %6711 = vmatprep.mubr.msk.bf16.mxu1 %vm7001_vm0, %v7000_v1 }
 0x21e   : > { %6740 = vmatmul.mubr.msk.bf16.gmra.mrb[0].mxu0 %vm469_vm2, %v4831_v57  ;;  %v3019_v39 = vpop.f32.mrb[152].mxu1 }
 0x21f   : > { %6743 = vmatprep.mubr.msk.bf16.mxu0 %vm7001_vm0, %v7000_v1  ;;  %v3058_v35 = vadd.f32 %v3019_v39, %v8539_v29  ;;  %v6425_v15 = vpop.f32.mrb[153].mxu1 }
 0x220   : > { %v3022_v3 = vpop.f32.mrb[154].mxu1 }
 0x221   : > { %v3215_v12 = vpop.f32.mrb[152].mxu0  ;;  %v8629_v14 = vadd.f32 %v3207_v60, %v3058_v35  ;;  %v3059_v8 = vadd.f32 %v3022_v3, %v8544_v36  ;;  %v6426_v31 = vpop.f32.mrb[155].mxu1  ;;  %v4834_v36 = vrot.slane %v6975_v17, 3 }
 0x222   : > { %v6457_v51 = vpop.f32.mrb[153].mxu0 }
 0x223   : > { %v3218_v2 = vpop.f32.mrb[154].mxu0  ;;  %v8633_v23 = vadd.f32 %v3210_v4, %v3059_v8  ;;  %6712 = vmatmul.mubr.msk.bf16.gmra.mrb[4].mxu1 %vm469_vm2, %v4671_v33  ;;  %v4835_v47 = vsel %vm1712_vm6, %v4832_v54, %v4834_v36 }
 0x224   : > { %v6458_v29 = vpop.f32.mrb[155].mxu0  ;;  %6715 = vmatprep.mubr.msk.bf16.mxu1 %vm7001_vm0, %v7000_v1 }
 0x226   : > { %6744 = vmatmul.mubr.msk.bf16.gmra.mrb[4].mxu0 %vm469_vm2, %v4833_v58  ;;  %v3027_v9 = vpop.f32.mrb[156].mxu1 }
 0x227   : > { %6747 = vmatprep.mubr.msk.bf16.mxu0 %vm7001_vm0, %v7000_v1  ;;  %v3060_v34 = vadd.f32 %v3027_v9, %v8556_v37  ;;  %v6429_v41 = vpop.f32.mrb[157].mxu1 }
 0x228   : > { %v3030_v30 = vpop.f32.mrb[158].mxu1 }
 0x229   : > { %v3223_v44 = vpop.f32.mrb[156].mxu0  ;;  %v8643_v49 = vadd.f32 %v3215_v12, %v3060_v34  ;;  %v3061_v19 = vadd.f32 %v3030_v30, %v8561_v50  ;;  %v6430_v56 = vpop.f32.mrb[159].mxu1 }
 0x22a   : > { %v6461_v55 = vpop.f32.mrb[157].mxu0 }
 0x22b   : > { %v3226_v40 = vpop.f32.mrb[158].mxu0  ;;  %v3249_v13 = vadd.f32 %v3218_v2, %v3061_v19  ;;  %6716 = vmatmul.mubr.msk.bf16.gmra.mrb[8].mxu1 %vm469_vm2, %v4680_v32 }
 0x22c   : > { %v6462_v37 = vpop.f32.mrb[159].mxu0  ;;  %6719 = vmatprep.mubr.msk.bf16.mxu1 %vm7001_vm0, %v7000_v1 }
 0x22e   : > { %6748 = vmatmul.mubr.msk.bf16.gmra.mrb[8].mxu0 %vm469_vm2, %v4835_v47  ;;  %v3035_v21 = vpop.f32.mrb[160].mxu1 }
 0x22f   : > { %v3062_v59 = vadd.f32 %v3035_v21, %v8577_v24  ;;  %v6433_v52 = vpop.f32.mrb[161].mxu1 }
 0x230   : > { %v3038_v50 = vpop.f32.mrb[162].mxu1 }
 0x231   : > { %v3231_v25 = vpop.f32.mrb[160].mxu0  ;;  %v3250_v60 = vadd.f32 %v3223_v44, %v3062_v59  ;;  %v3063_v45 = vadd.f32 %v3038_v50, %v8581_v43  ;;  %v6434_v11 = vpop.f32.mrb[163].mxu1 }
 0x232   : > { %v6465_v18 = vpop.f32.mrb[161].mxu0 }
 0x233   : > { %v3234_v63 = vpop.f32.mrb[162].mxu0  ;;  %v3251_v46 = vadd.f32 %v3226_v40, %v3063_v45  ;;  %6720 = vmatmul.mubr.msk.bf16.gmra.mrb[12].mxu1 %vm469_vm2, %v4689_v61 }
 0x234   : > { %v6466_v1 = vpop.f32.mrb[163].mxu0 }
 0x236   : > { %v3043_v57 = vpop.f32.mrb[164].mxu1 }
 0x237   : > { %v3064_v4 = vadd.f32 %v3043_v57, %v8594_v5  ;;  %v6437_v62 = vpop.f32.mrb[165].mxu1 }
 0x238   : > { %v3046_v24 = vpop.f32.mrb[166].mxu1 }
 0x239   : > { %v3239_v0 = vpop.f32.mrb[164].mxu0  ;;  %v3252_v6 = vadd.f32 %v3231_v25, %v3064_v4  ;;  %v3065_v20 = vadd.f32 %v3046_v24, %v8598_v53  ;;  %v6438_v39 = vpop.f32.mrb[167].mxu1 }
 0x23a   : > { %v6469_v54 = vpop.f32.mrb[165].mxu0 }
 0x23b   : > { %v3242_v35 = vpop.f32.mrb[166].mxu0  ;;  %v3253_v43 = vadd.f32 %v3234_v63, %v3065_v20 }
 0x23c   : > { %v6470_v15 = vpop.f32.mrb[167].mxu0 }
 0x23e   : > { %v3051_v26 = vpop.f32.mrb[168].mxu1 }
 0x23f   : > { %v3066_v3 = vadd.f32 %v3051_v26, %v8611_v27  ;;  %v6441_v33 = vpop.f32.mrb[169].mxu1 }
 0x240   : > { %v3054_v12 = vpop.f32.mrb[170].mxu1 }
 0x241   : > { %v3519_v10 = vpop.f32.mrb[168].mxu0  ;;  %v3254_v17 = vadd.f32 %v3239_v0, %v3066_v3  ;;  %v3067_v5 = vadd.f32 %v3054_v12, %v8615_v16  ;;  %v6442_v8 = vpop.f32.mrb[171].mxu1 }
 0x242   : > { %v6509_v31 = vpop.f32.mrb[169].mxu0 }
 0x243   : > { %v3522_v51 = vpop.f32.mrb[170].mxu0  ;;  %v3255_v2 = vadd.f32 %v3242_v35, %v3067_v5 }
 0x244   : > { %v6510_v58 = vpop.f32.mrb[171].mxu0 }
 0x246   : > { %v3353_v53 = vpop.f32.mrb[172].mxu1 }
 0x247   : > { %v3392_v29 = vadd.f32 %v3353_v53, %v8629_v14  ;;  %v6481_v22 = vpop.f32.mrb[173].mxu1 }
 0x248   : > { %v3356_v42 = vpop.f32.mrb[174].mxu1 }
 0x249   : > { %v3527_v28 = vpop.f32.mrb[172].mxu0  ;;  %v3558_v9 = vadd.f32 %v3519_v10, %v3392_v29  ;;  %v3393_v27 = vadd.f32 %v3356_v42, %v8633_v23  ;;  %v6482_v36 = vpop.f32.mrb[175].mxu1 }
 0x24a   : > { %v6513_v34 = vpop.f32.mrb[173].mxu0 }
 0x24b   : > { %v3530_v41 = vpop.f32.mrb[174].mxu0  ;;  %v3559_v30 = vadd.f32 %v3522_v51, %v3393_v27 }
 0x24c   : > { %v6514_v32 = vpop.f32.mrb[175].mxu0 }
 0x24e   : > { %v3361_v16 = vpop.f32.mrb[176].mxu1 }
 0x24f   : > { %v3394_v44 = vadd.f32 %v3361_v16, %v8643_v49  ;;  %v6485_v48 = vpop.f32.mrb[177].mxu1 }
 0x250   : > { %v3364_v38 = vpop.f32.mrb[178].mxu1 }
 0x251   : > { %v3535_v19 = vpop.f32.mrb[176].mxu0  ;;  %v3560_v56 = vadd.f32 %v3527_v28, %v3394_v44  ;;  %v3395_v55 = vadd.f32 %v3364_v38, %v3249_v13  ;;  %v6486_v14 = vpop.f32.mrb[179].mxu1 }
 0x252   : > { %v6517_v40 = vpop.f32.mrb[177].mxu0 }
 0x253   : > { %v3538_v47 = vpop.f32.mrb[178].mxu0  ;;  %v3561_v37 = vadd.f32 %v3530_v41, %v3395_v55 }
 0x254   : > { %v6518_v7 = vpop.f32.mrb[179].mxu0 }
 0x256   : > { %v3369_v21 = vpop.f32.mrb[180].mxu1 }
 0x257   : > { %v3396_v23 = vadd.f32 %v3369_v21, %v3250_v60  ;;  %v6489_v59 = vpop.f32.mrb[181].mxu1 }
 0x258   : > { %v3372_v52 = vpop.f32.mrb[182].mxu1 }
 0x259   : > { %v3543_v50 = vpop.f32.mrb[180].mxu0  ;;  %v3562_v61 = vadd.f32 %v3535_v19, %v3396_v23  ;;  %v3397_v25 = vadd.f32 %v3372_v52, %v3251_v46  ;;  %v6490_v45 = vpop.f32.mrb[183].mxu1 }
 0x25a   : > { %v6521_v11 = vpop.f32.mrb[181].mxu0 }
 0x25b   : > { %v3546_v49 = vpop.f32.mrb[182].mxu0  ;;  %v3563_v18 = vadd.f32 %v3538_v47, %v3397_v25 }
 0x25c   : > { %v6522_v63 = vpop.f32.mrb[183].mxu0 }
 0x25e   : > { %v3377_v1 = vpop.f32.mrb[184].mxu1 }
 0x25f   : > { %v3398_v57 = vadd.f32 %v3377_v1, %v3252_v6  ;;  %v6493_v13 = vpop.f32.mrb[185].mxu1 }
 0x260   : > { %v3380_v4 = vpop.f32.mrb[186].mxu1 }
 0x261   : > { %v3551_v62 = vpop.f32.mrb[184].mxu0  ;;  %v3564_v24 = vadd.f32 %v3543_v50, %v3398_v57  ;;  %v3399_v0 = vadd.f32 %v3380_v4, %v3253_v43  ;;  %v6494_v20 = vpop.f32.mrb[187].mxu1 }
 0x262   : > { %v6525_v39 = vpop.f32.mrb[185].mxu0 }
 0x263   : > { %v3554_v60 = vpop.f32.mrb[186].mxu0  ;;  %v3565_v54 = vadd.f32 %v3546_v49, %v3399_v0 }
 0x264   : > { %v6526_v35 = vpop.f32.mrb[187].mxu0 }
 0x266   : > { %v3385_v15 = vpop.f32.mrb[188].mxu1 }
 0x267   : > { %v3400_v26 = vadd.f32 %v3385_v15, %v3254_v17  ;;  %v6497_v46 = vpop.f32.mrb[189].mxu1 }
 0x268   : > { %v3388_v3 = vpop.f32.mrb[190].mxu1 }
 0x269   : > { %v3879_v33 = vpop.f32.mrb[188].mxu0  ;;  %v3566_v12 = vadd.f32 %v3551_v62, %v3400_v26  ;;  %v3401_v10 = vadd.f32 %v3388_v3, %v3255_v2  ;;  %v6498_v5 = vpop.f32.mrb[191].mxu1 }
 0x26a   : > { %v6565_v8 = vpop.f32.mrb[189].mxu0 }
 0x26b   : > { %v3882_v6 = vpop.f32.mrb[190].mxu0  ;;  %v3567_v31 = vadd.f32 %v3554_v60, %v3401_v10 }
 0x26c   : > { %v6566_v51 = vpop.f32.mrb[191].mxu0 }
 0x26e   : > { %v3733_v58 = vpop.f32.mrb[192].mxu1 }
 0x26f   : > { %v3772_v53 = vadd.f32 %v3733_v58, %v3558_v9  ;;  %v6537_v43 = vpop.f32.mrb[193].mxu1 }
 0x270   : > { %v3736_v29 = vpop.f32.mrb[194].mxu1 }
 0x271   : > { %v3887_v22 = vpop.f32.mrb[192].mxu0  ;;  %v3918_v42 = vadd.f32 %v3879_v33, %v3772_v53  ;;  %v3773_v28 = vadd.f32 %v3736_v29, %v3559_v30  ;;  %v6538_v27 = vpop.f32.mrb[195].mxu1 }
 0x272   : > { %v6569_v36 = vpop.f32.mrb[193].mxu0 }
 0x273   : > { %v3890_v17 = vpop.f32.mrb[194].mxu0  ;;  %v3919_v34 = vadd.f32 %v3882_v6, %v3773_v28 }
 0x274   : > { %v6570_v41 = vpop.f32.mrb[195].mxu0 }
 0x276   : > { %v3741_v32 = vpop.f32.mrb[196].mxu1 }
 0x277   : > { %v3774_v16 = vadd.f32 %v3741_v32, %v3560_v56  ;;  %v6541_v2 = vpop.f32.mrb[197].mxu1 }
 0x278   : > { %v3744_v44 = vpop.f32.mrb[198].mxu1 }
 0x279   : > { %v3895_v48 = vpop.f32.mrb[196].mxu0  ;;  %v3920_v38 = vadd.f32 %v3887_v22, %v3774_v16  ;;  %v3775_v19 = vadd.f32 %v3744_v44, %v3561_v37  ;;  %v6542_v55 = vpop.f32.mrb[199].mxu1 }
 0x27a   : > { %v6573_v14 = vpop.f32.mrb[197].mxu0 }
 0x27b   : > { %v3898_v9 = vpop.f32.mrb[198].mxu0  ;;  %v3921_v40 = vadd.f32 %v3890_v17, %v3775_v19 }
 0x27c   : > { %v6574_v47 = vpop.f32.mrb[199].mxu0 }
 0x27e   : > { %v3749_v7 = vpop.f32.mrb[200].mxu1 }
 0x27f   : > { %v3776_v21 = vadd.f32 %v3749_v7, %v3562_v61  ;;  %v6545_v30 = vpop.f32.mrb[201].mxu1 }
 0x280   : > { %v3752_v23 = vpop.f32.mrb[202].mxu1 }
 0x281   : > { %v3903_v59 = vpop.f32.mrb[200].mxu0  ;;  %v3922_v52 = vadd.f32 %v3895_v48, %v3776_v21  ;;  %v3777_v50 = vadd.f32 %v3752_v23, %v3563_v18  ;;  %v6546_v25 = vpop.f32.mrb[203].mxu1 }
 0x282   : > { %v6577_v45 = vpop.f32.mrb[201].mxu0 }
 0x283   : > { %v3906_v56 = vpop.f32.mrb[202].mxu0  ;;  %v3923_v11 = vadd.f32 %v3898_v9, %v3777_v50 }
 0x284   : > { %v6578_v49 = vpop.f32.mrb[203].mxu0 }
 0x286   : > { %v3757_v63 = vpop.f32.mrb[204].mxu1 }
 0x287   : > { %v3778_v1 = vadd.f32 %v3757_v63, %v3564_v24  ;;  %v6549_v37 = vpop.f32.mrb[205].mxu1 }
 0x288   : > { %v3760_v57 = vpop.f32.mrb[206].mxu1 }
 0x289   : > { %v3911_v13 = vpop.f32.mrb[204].mxu0  ;;  %v3924_v4 = vadd.f32 %v3903_v59, %v3778_v1  ;;  %v3779_v62 = vadd.f32 %v3760_v57, %v3565_v54  ;;  %v6550_v0 = vpop.f32.mrb[207].mxu1 }
 0x28a   : > { %v6581_v20 = vpop.f32.mrb[205].mxu0 }
 0x28b   : > { %v3914_v61 = vpop.f32.mrb[206].mxu0  ;;  %v3925_v39 = vadd.f32 %v3906_v56, %v3779_v62 }
 0x28c   : > { %v6582_v60 = vpop.f32.mrb[207].mxu0 }
 0x28e   : > { %v3765_v35 = vpop.f32.mrb[208].mxu1 }
 0x28f   : > { %v3780_v15 = vadd.f32 %v3765_v35, %v3566_v12  ;;  %v6553_v18 = vpop.f32.mrb[209].mxu1 }
 0x290   : > { %v3768_v26 = vpop.f32.mrb[210].mxu1 }
 0x291   : > { %v4248_v46 = vpop.f32.mrb[208].mxu0  ;;  %v3926_v3 = vadd.f32 %v3911_v13, %v3780_v15  ;;  %v3781_v33 = vadd.f32 %v3768_v26, %v3567_v31  ;;  %v6554_v10 = vpop.f32.mrb[211].mxu1 }
 0x292   : > { %v6621_v5 = vpop.f32.mrb[209].mxu0 }
 0x293   : > { %v4251_v24 = vpop.f32.mrb[210].mxu0  ;;  %v3927_v8 = vadd.f32 %v3914_v61, %v3781_v33 }
 0x294   : > { %v6622_v6 = vpop.f32.mrb[211].mxu0 }
 0x296   : > { %v4060_v51 = vpop.f32.mrb[212].mxu1 }
 0x297   : > { %v4099_v58 = vadd.f32 %v4060_v51, %v3918_v42  ;;  %v6593_v54 = vpop.f32.mrb[213].mxu1 }
 0x298   : > { %v4063_v53 = vpop.f32.mrb[214].mxu1 }
 0x299   : > { %v4256_v43 = vpop.f32.mrb[212].mxu0  ;;  %v4287_v29 = vadd.f32 %v4248_v46, %v4099_v58  ;;  %v4100_v22 = vadd.f32 %v4063_v53, %v3919_v34  ;;  %v6594_v28 = vpop.f32.mrb[215].mxu1 }
 0x29a   : > { %v6625_v27 = vpop.f32.mrb[213].mxu0 }
 0x29b   : > { %v4259_v12 = vpop.f32.mrb[214].mxu0  ;;  %v4288_v36 = vadd.f32 %v4251_v24, %v4100_v22 }
 0x29c   : > { %v6626_v17 = vpop.f32.mrb[215].mxu0 }
 0x29e   : > { %v4068_v41 = vpop.f32.mrb[216].mxu1 }
 0x29f   : > { %v4101_v32 = vadd.f32 %v4068_v41, %v3920_v38  ;;  %v6597_v31 = vpop.f32.mrb[217].mxu1 }
 0x2a0   : > { %v4071_v16 = vpop.f32.mrb[218].mxu1 }
 0x2a1   : > { %v4264_v2 = vpop.f32.mrb[216].mxu0  ;;  %v4289_v44 = vadd.f32 %v4256_v43, %v4101_v32  ;;  %v4102_v48 = vadd.f32 %v4071_v16, %v3921_v40  ;;  %v6598_v19 = vpop.f32.mrb[219].mxu1 }
 0x2a2   : > { %v6629_v55 = vpop.f32.mrb[217].mxu0 }
 0x2a3   : > { %v4267_v42 = vpop.f32.mrb[218].mxu0  ;;  %v4290_v14 = vadd.f32 %v4259_v12, %v4102_v48 }
 0x2a4   : > { %v6630_v9 = vpop.f32.mrb[219].mxu0 }
 0x2a6   : > { %v4076_v47 = vpop.f32.mrb[220].mxu1 }
 0x2a7   : > { %v4103_v7 = vadd.f32 %v4076_v47, %v3922_v52  ;;  %v6601_v34 = vpop.f32.mrb[221].mxu1 }
 0x2a8   : > { %v4079_v21 = vpop.f32.mrb[222].mxu1 }
 0x2a9   : > { %v4272_v30 = vpop.f32.mrb[220].mxu0  ;;  %v4291_v23 = vadd.f32 %v4264_v2, %v4103_v7  ;;  %v4104_v59 = vadd.f32 %v4079_v21, %v3923_v11  ;;  %v6602_v50 = vpop.f32.mrb[223].mxu1 }
 0x2aa   : > { %v6633_v25 = vpop.f32.mrb[221].mxu0 }
 0x2ab   : > { %v4275_v38 = vpop.f32.mrb[222].mxu0  ;;  %v4292_v45 = vadd.f32 %v4267_v42, %v4104_v59 }
 0x2ac   : > { %v6634_v56 = vpop.f32.mrb[223].mxu0 }
 0x2ae   : > { %v4084_v49 = vpop.f32.mrb[224].mxu1 }
 0x2af   : > { %v4105_v63 = vadd.f32 %v4084_v49, %v3924_v4  ;;  %v6605_v40 = vpop.f32.mrb[225].mxu1 }
 0x2b0   : > { %v4087_v1 = vpop.f32.mrb[226].mxu1 }
 0x2b1   : > { %v4280_v37 = vpop.f32.mrb[224].mxu0  ;;  %v4293_v57 = vadd.f32 %v4272_v30, %v4105_v63  ;;  %v4106_v13 = vadd.f32 %v4087_v1, %v3925_v39  ;;  %v6606_v62 = vpop.f32.mrb[227].mxu1 }
 0x2b2   : > { %v6637_v0 = vpop.f32.mrb[225].mxu0 }
 0x2b3   : > { %v4283_v52 = vpop.f32.mrb[226].mxu0  ;;  %v4294_v20 = vadd.f32 %v4275_v38, %v4106_v13 }
 0x2b4   : > { %v6638_v61 = vpop.f32.mrb[227].mxu0 }
 0x2b6   : > { %v4092_v60 = vpop.f32.mrb[228].mxu1 }
 0x2b7   : > { %v4107_v35 = vadd.f32 %v4092_v60, %v3926_v3  ;;  %v6609_v11 = vpop.f32.mrb[229].mxu1 }
 0x2b8   : > { %v4095_v15 = vpop.f32.mrb[230].mxu1 }
 0x2b9   : > { %v4575_v18 = vpop.f32.mrb[228].mxu0  ;;  %v4295_v26 = vadd.f32 %v4280_v37, %v4107_v35  ;;  %v4108_v46 = vadd.f32 %v4095_v15, %v3927_v8  ;;  %v6610_v33 = vpop.f32.mrb[231].mxu1 }
 0x2ba   : > { %v6677_v10 = vpop.f32.mrb[229].mxu0 }
 0x2bb   : > { %v4578_v4 = vpop.f32.mrb[230].mxu0  ;;  %v4296_v5 = vadd.f32 %v4283_v52, %v4108_v46 }
 0x2bc   : > { %v6678_v24 = vpop.f32.mrb[231].mxu0 }
 0x2be   : > { %v4394_v6 = vpop.f32.mrb[232].mxu1 }
 0x2bf   : > { %v4433_v51 = vadd.f32 %v4394_v6, %v4287_v29  ;;  %v6649_v39 = vpop.f32.mrb[233].mxu1 }
 0x2c0   : > { %v4397_v58 = vpop.f32.mrb[234].mxu1 }
 0x2c1   : > { %v4583_v54 = vpop.f32.mrb[232].mxu0  ;;  %v4614_v53 = vadd.f32 %v4575_v18, %v4433_v51  ;;  %v4434_v43 = vadd.f32 %v4397_v58, %v4288_v36  ;;  %v6650_v22 = vpop.f32.mrb[235].mxu1 }
 0x2c2   : > { %v6681_v28 = vpop.f32.mrb[233].mxu0 }
 0x2c3   : > { %v4586_v3 = vpop.f32.mrb[234].mxu0  ;;  %v4615_v27 = vadd.f32 %v4578_v4, %v4434_v43 }
 0x2c4   : > { %v6682_v12 = vpop.f32.mrb[235].mxu0 }
 0x2c6   : > { %v4402_v17 = vpop.f32.mrb[236].mxu1 }
 0x2c7   : > { %v4435_v41 = vadd.f32 %v4402_v17, %v4289_v44  ;;  %v6653_v8 = vpop.f32.mrb[237].mxu1 }
 0x2c8   : > { %v4405_v32 = vpop.f32.mrb[238].mxu1 }
 0x2c9   : > { %v4591_v31 = vpop.f32.mrb[236].mxu0  ;;  %v8662_v16 = vadd.f32 %v4583_v54, %v4435_v41  ;;  %v4436_v2 = vadd.f32 %v4405_v32, %v4290_v14  ;;  %v6654_v48 = vpop.f32.mrb[239].mxu1 }
 0x2ca   : > { %v6685_v29 = vpop.f32.mrb[237].mxu0 }
 0x2cb   : > { %v4594_v19 = vpop.f32.mrb[238].mxu0  ;;  %v8664_v55 = vadd.f32 %v4586_v3, %v4436_v2 }
 0x2cc   : > { %v6686_v42 = vpop.f32.mrb[239].mxu0 }
 0x2ce   : > { %v4410_v36 = vpop.f32.mrb[240].mxu1 }
 0x2cf   : > { %v4437_v9 = vadd.f32 %v4410_v36, %v4291_v23  ;;  %v6657_v47 = vpop.f32.mrb[241].mxu1 }
 0x2d0   : > { %v4413_v7 = vpop.f32.mrb[242].mxu1 }
 0x2d1   : > { %v4599_v34 = vpop.f32.mrb[240].mxu0  ;;  %v8666_v21 = vadd.f32 %v4591_v31, %v4437_v9  ;;  %v4438_v44 = vadd.f32 %v4413_v7, %v4292_v45  ;;  %v6658_v30 = vpop.f32.mrb[243].mxu1 }
 0x2d2   : > { %v6689_v59 = vpop.f32.mrb[241].mxu0 }
 0x2d3   : > { %v4602_v50 = vpop.f32.mrb[242].mxu0  ;;  %v8668_v25 = vadd.f32 %v4594_v19, %v4438_v44 }
 0x2d4   : > { %v6690_v14 = vpop.f32.mrb[243].mxu0 }
 0x2d6   : > { %v4418_v38 = vpop.f32.mrb[244].mxu1 }
 0x2d7   : > { %v4439_v56 = vadd.f32 %v4418_v38, %v4293_v57  ;;  %v6661_v49 = vpop.f32.mrb[245].mxu1 }
 0x2d8   : > { %v4421_v63 = vpop.f32.mrb[246].mxu1 }
 0x2d9   : > { %v4607_v40 = vpop.f32.mrb[244].mxu0  ;;  %v8670_v1 = vadd.f32 %v4599_v34, %v4439_v56  ;;  %v4440_v23 = vadd.f32 %v4421_v63, %v4294_v20  ;;  %v6662_v37 = vpop.f32.mrb[247].mxu1 }
 0x2da   : > { %v6693_v13 = vpop.f32.mrb[245].mxu0 }
 0x2db   : > { %v4610_v62 = vpop.f32.mrb[246].mxu0  ;;  %v8672_v0 = vadd.f32 %v4602_v50, %v4440_v23 }
 0x2dc   : > { %v6694_v45 = vpop.f32.mrb[247].mxu0 }
 0x2de   : > { %v4426_v52 = vpop.f32.mrb[248].mxu1 }
 0x2df   : > { %v4441_v61 = vadd.f32 %v4426_v52, %v4295_v26  ;;  %v6665_v60 = vpop.f32.mrb[249].mxu1  ;;  %v8683_v26 = vld [vmem:[%s8741_s4] ss:$0 sm:$0xff] }
 0x2e0   : > { %v4429_v35 = vpop.f32.mrb[250].mxu1 }
 0x2e1   : > { %v4909_v11 = vpop.f32.mrb[248].mxu0  ;;  %v8674_v57 = vadd.f32 %v4607_v40, %v4441_v61  ;;  %v4442_v15 = vadd.f32 %v4429_v35, %v4296_v5  ;;  %v6666_v18 = vpop.f32.mrb[251].mxu1 }
 0x2e2   : > { %v6733_v46 = vpop.f32.mrb[249].mxu0 }
 0x2e3   : > { %v4912_v33 = vpop.f32.mrb[250].mxu0  ;;  %v8676_v20 = vadd.f32 %v4610_v62, %v4442_v15 }
 0x2e4   : > { %v6734_v10 = vpop.f32.mrb[251].mxu0 }
 0x2e6   : > { %v4763_v4 = vpop.f32.mrb[252].mxu1 }
 0x2e7   : > { %v4802_v24 = vadd.f32 %v4763_v4, %v4614_v53  ;;  %v6705_v6 = vpop.f32.mrb[253].mxu1 }
 0x2e8   : > { %v4766_v51 = vpop.f32.mrb[254].mxu1 }
 0x2e9   : > { %v4917_v39 = vpop.f32.mrb[252].mxu0  ;;  %v4948_v58 = vadd.f32 %v4909_v11, %v4802_v24  ;;  %v4803_v5 = vadd.f32 %v4766_v51, %v4615_v27  ;;  %v6706_v54 = vpop.f32.mrb[255].mxu1 }
 0x2ea   : > { %v6737_v43 = vpop.f32.mrb[253].mxu0 }
 0x2eb   : > { %v4920_v22 = vpop.f32.mrb[254].mxu0  ;;  %v4965_v28 = vadd.f32 %v8683_v26, %v4948_v58  ;;  %v4949_v3 = vadd.f32 %v4912_v33, %v4803_v5 }
 0x2ec   : > { %v6738_v12 = vpop.f32.mrb[255].mxu0 }
 0x2ed   : > { %vm4975_vm8 = vcmp.ge.f32.partialorder %v4965_v28, 0.0  ;;  %v4985_v53 = vmul.f32 0.01, %v4965_v28  ;;  %v4966_v17 = vadd.f32 %v8683_v26, %v4949_v3 }
 0x2ee   : > { %v4771_v41 = vpop.f32.mrb[0].mxu1 }
 0x2ef   : > { %v4995_v27 = vsel %vm4975_vm8, %v4965_v28, %v4985_v53  ;;  %vm4976_vm10 = vcmp.ge.f32.partialorder %v4966_v17, 0.0  ;;  %v4986_v8 = vmul.f32 0.01, %v4966_v17  ;;  %v4804_v32 = vadd.f32 %v4771_v41, %v8662_v16  ;;  %v6709_v31 = vpop.f32.mrb[1].mxu1 }
 0x2f0   : > { %v5742_v2 = vpack.c.bf16 %v4995_v27, %v4995_v27  ;;  %v4774_v48 = vpop.f32.mrb[2].mxu1 }
 0x2f1   : > { %v4925_v29 = vpop.f32.mrb[0].mxu0  ;;  %v4996_v19 = vsel %vm4976_vm10, %v4966_v17, %v4986_v8  ;;  %v4950_v42 = vadd.f32 %v4917_v39, %v4804_v32  ;;  %v4805_v36 = vadd.f32 %v4774_v48, %v8664_v55  ;;  %v6710_v9 = vpop.f32.mrb[3].mxu1 }
 0x2f2   : > { %v6741_v47 = vpop.f32.mrb[1].mxu0  ;;  %5046 = vst.msk [vmem:[%s8690_s15] sm:$0xf] %vm5045_vm9, %v5742_v2  ;;  %v5743_v7 = vpack.c.bf16 %v4996_v19, %v4996_v19 }
 0x2f3   : > { %v4928_v34 = vpop.f32.mrb[2].mxu0  ;;  %v4967_v44 = vadd.f32 %v8683_v26, %v4950_v42  ;;  %v4951_v30 = vadd.f32 %v4920_v22, %v4805_v36 }
 0x2f4   : > { %v6742_v59 = vpop.f32.mrb[3].mxu0  ;;  %5047 = vst.msk [vmem:[%s8690_s15 + $0x4] sm:$0xf] %vm5045_vm9, %v5743_v7 }
 0x2f5   : > { %vm4977_vm11 = vcmp.ge.f32.partialorder %v4967_v44, 0.0  ;;  %v4987_v16 = vmul.f32 0.01, %v4967_v44  ;;  %v4968_v50 = vadd.f32 %v8683_v26, %v4951_v30 }
 0x2f6   : > { %v4779_v14 = vpop.f32.mrb[4].mxu1 }
 0x2f7   : > { %v4997_v38 = vsel %vm4977_vm11, %v4967_v44, %v4987_v16  ;;  %vm4978_vm12 = vcmp.ge.f32.partialorder %v4968_v50, 0.0  ;;  %v4988_v55 = vmul.f32 0.01, %v4968_v50  ;;  %v4806_v56 = vadd.f32 %v4779_v14, %v8666_v21  ;;  %v6713_v49 = vpop.f32.mrb[5].mxu1 }
 0x2f8   : > { %v5744_v63 = vpack.c.bf16 %v4997_v38, %v4997_v38  ;;  %v4782_v40 = vpop.f32.mrb[6].mxu1 }
 0x2f9   : > { %v4933_v23 = vpop.f32.mrb[4].mxu0  ;;  %v4998_v37 = vsel %vm4978_vm12, %v4968_v50, %v4988_v55  ;;  %v4952_v13 = vadd.f32 %v4925_v29, %v4806_v56  ;;  %v4807_v62 = vadd.f32 %v4782_v40, %v8668_v25  ;;  %v6714_v45 = vpop.f32.mrb[7].mxu1 }
 0x2fa   : > { %v6745_v52 = vpop.f32.mrb[5].mxu0  ;;  %5048 = vst.msk [vmem:[%s8690_s15 + $0x8] sm:$0xf] %vm5045_vm9, %v5744_v63  ;;  %v5745_v61 = vpack.c.bf16 %v4998_v37, %v4998_v37 }
 0x2fb   : > { %v4936_v60 = vpop.f32.mrb[6].mxu0  ;;  %v4969_v35 = vadd.f32 %v8683_v26, %v4952_v13  ;;  %v4953_v11 = vadd.f32 %v4928_v34, %v4807_v62 }
 0x2fc   : > { %v6746_v15 = vpop.f32.mrb[7].mxu0  ;;  %5049 = vst.msk [vmem:[%s8690_s15 + $0xc] sm:$0xf] %vm5045_vm9, %v5745_v61 }
 0x2fd   : > { %vm4979_vm13 = vcmp.ge.f32.partialorder %v4969_v35, 0.0  ;;  %v4989_v21 = vmul.f32 0.01, %v4969_v35  ;;  %v4970_v18 = vadd.f32 %v8683_v26, %v4953_v11 }
 0x2fe   : > { %v4787_v46 = vpop.f32.mrb[8].mxu1 }
 0x2ff   : > { %v4999_v33 = vsel %vm4979_vm13, %v4969_v35, %v4989_v21  ;;  %vm4980_vm14 = vcmp.ge.f32.partialorder %v4970_v18, 0.0  ;;  %v4990_v25 = vmul.f32 0.01, %v4970_v18  ;;  %v4808_v10 = vadd.f32 %v4787_v46, %v8670_v1  ;;  %v6717_v4 = vpop.f32.mrb[9].mxu1 }
 0x300   : > { %v5746_v24 = vpack.c.bf16 %v4999_v33, %v4999_v33  ;;  %v4790_v6 = vpop.f32.mrb[10].mxu1 }
 0x301   : > { %v4941_v51 = vpop.f32.mrb[8].mxu0  ;;  %v5000_v39 = vsel %vm4980_vm14, %v4970_v18, %v4990_v25  ;;  %v4954_v58 = vadd.f32 %v4933_v23, %v4808_v10  ;;  %v4809_v5 = vadd.f32 %v4790_v6, %v8672_v0  ;;  %v6718_v54 = vpop.f32.mrb[11].mxu1 }
 0x302   : > { %v6749_v43 = vpop.f32.mrb[9].mxu0  ;;  %5050 = vst.msk [vmem:[%s8690_s15 + $0x10] sm:$0xf] %vm5045_vm9, %v5746_v24  ;;  %v5747_v22 = vpack.c.bf16 %v5000_v39, %v5000_v39 }
 0x303   : > { %v4944_v28 = vpop.f32.mrb[10].mxu0  ;;  %v4971_v3 = vadd.f32 %v8683_v26, %v4954_v58  ;;  %v4955_v12 = vadd.f32 %v4936_v60, %v4809_v5 }
 0x304   : > { %v6750_v53 = vpop.f32.mrb[11].mxu0  ;;  %5051 = vst.msk [vmem:[%s8690_s15 + $0x14] sm:$0xf] %vm5045_vm9, %v5747_v22 }
 0x305   : > { %vm4981_vm15 = vcmp.ge.f32.partialorder %v4971_v3, 0.0  ;;  %v4991_v1 = vmul.f32 0.01, %v4971_v3  ;;  %v4972_v17 = vadd.f32 %v8683_v26, %v4955_v12 }
 0x306   : > { %v4795_v41 = vpop.f32.mrb[12].mxu1 }
 0x307   : > { %v5001_v0 = vsel %vm4981_vm15, %v4971_v3, %v4991_v1  ;;  %vm4982_vm0 = vcmp.ge.f32.partialorder %v4972_v17, 0.0  ;;  %v4992_v27 = vmul.f32 0.01, %v4972_v17  ;;  %v4810_v8 = vadd.f32 %v4795_v41, %v8674_v57  ;;  %v6721_v32 = vpop.f32.mrb[13].mxu1 }
 0x308   : > { %v5748_v31 = vpack.c.bf16 %v5001_v0, %v5001_v0  ;;  %v4798_v2 = vpop.f32.mrb[14].mxu1 }
 0x309   : > { %v5002_v48 = vsel %vm4982_vm0, %v4972_v17, %v4992_v27  ;;  %v4956_v29 = vadd.f32 %v4941_v51, %v4810_v8  ;;  %v4811_v19 = vadd.f32 %v4798_v2, %v8676_v20  ;;  %v6722_v42 = vpop.f32.mrb[15].mxu1 }
 0x30a   : > { %5052 = vst.msk [vmem:[%s8690_s15 + $0x18] sm:$0xf] %vm5045_vm9, %v5748_v31  ;;  %v5749_v36 = vpack.c.bf16 %v5002_v48, %v5002_v48 }
 0x30b   : > { %v4973_v9 = vadd.f32 %v8683_v26, %v4956_v29  ;;  %v4957_v47 = vadd.f32 %v4944_v28, %v4811_v19 }
 0x30c   : > { %5053 = vst.msk [vmem:[%s8690_s15 + $0x1c] sm:$0xf] %vm5045_vm9, %v5749_v36 }
 0x30d   : > { %vm4983_vm1 = vcmp.ge.f32.partialorder %v4973_v9, 0.0  ;;  %v4993_v57 = vmul.f32 0.01, %v4973_v9  ;;  %v4974_v7 = vadd.f32 %v8683_v26, %v4957_v47 }
 0x30f   : > { %v5003_v34 = vsel %vm4983_vm1, %v4973_v9, %v4993_v57  ;;  %vm4984_vm2 = vcmp.ge.f32.partialorder %v4974_v7, 0.0  ;;  %v4994_v44 = vmul.f32 0.01, %v4974_v7 }
 0x310   : > { %v5750_v30 = vpack.c.bf16 %v5003_v34, %v5003_v34 }
 0x311   : > { %v5004_v59 = vsel %vm4984_vm2, %v4974_v7, %v4994_v44 }
 0x312   : > { %5054 = vst.msk [vmem:[%s8690_s15 + $0x20] sm:$0xf] %vm5045_vm9, %v5750_v30  ;;  %v5751_v20 = vpack.c.bf16 %v5004_v59, %v5004_v59 }
 0x314   : > { %5055 = vst.msk [vmem:[%s8690_s15 + $0x24] sm:$0xf] %vm5045_vm9, %v5751_v20 }
 0x315 PF: > { %s15_s20 = sadd.s32 1, %s6998_s20   ;;  %s8743_s18 = smov %s6994_s19 }
 0x316   : > { %p12_p8 = scmp.ge.s32.totalorder %s15_s20, 10   ;;  %s8744_s19 = smov %s8746_s21 }
 0x318   :  { %14 = sbr.rel (!%p12_p8) target bundleno = 2 (0x2), region = 102 }

</bundles_post_ra>
